<compile_context>
chip_gen: v7x
topology: tpu7x:2x2x1
jax: 0.10.0
libtpu: 0.0.40
codegen_flags: <defaults>
</compile_context>

<pallas_src>
import jax
import jax.numpy as jnp
from jax import lax
from jax.experimental import pallas as pl
from jax.experimental.pallas import tpu as pltpu


_POOL_OFF = [(dy, dx) for dy in range(2) for dx in range(2)]
_TAPS = [(kh, kw) for kh in range(5) for kw in range(5)]


# ----------------------------- fused Pallas kernel --------------------------

def _fused_kernel(p1_ref, loss_ref, w1_ref, b1_ref, w2_ref, b2_ref,
                  fw1_ref, fw1l_ref, fb1_ref, fw2_ref, fb2_ref, o_ref):
    tb = o_ref.shape[0]

    # ---------------- conv1 (5x5, 2->10) + 2x2 maxpool + relu ---------------
    # p1_ref rows: b*576 + d1*144 + (p*36 + i*6 + j)
    #   d1 = pool offset, p = (row parity, col parity) of the pooled position,
    #   (i, j) = coarse 6x6 position; columns = (kh*5 + kw)*2 + c.
    z1 = jnp.dot(p1_ref[...], w1_ref[...],
                 preferred_element_type=jnp.float32) + b1_ref[...]
    z1 = z1.reshape(tb, 4, 144, 10)                  # aligned split (144 % 8 == 0)
    y1 = jnp.maximum(jnp.maximum(z1[:, 0], z1[:, 1]),
                     jnp.maximum(z1[:, 2], z1[:, 3]))  # max over pool offsets
    y1 = jnp.maximum(y1, 0.0)                          # (tb, 144, 10)
    # pad 8 junk rows so every conv2 tap window is one contiguous 24-row slice
    y1 = jnp.concatenate(
        [y1, jnp.zeros((tb, 8, 10), jnp.float32)], axis=1)   # (tb, 152, 10)

    # ---------------- conv2 (5x5, 10->20) + 2x2 maxpool + relu --------------
    # patch rows r = qy*6 + qx'   (qx' in 0..5; qx' > 3 are junk, dropped later)
    offs = []
    for dy, dx in _POOL_OFF:
        taps = []
        for kh, kw in _TAPS:
            p = ((dy + kh) % 2) * 2 + ((dx + kw) % 2)
            base = p * 36 + ((dy + kh) // 2) * 6 + ((dx + kw) // 2)
            taps.append(y1[:, base:base + 24, :])            # (tb, 24, 10)
        offs.append(jnp.concatenate(taps, axis=-1))          # (tb, 24, 250)
    p2 = jnp.stack(offs, axis=0)                             # (4, tb, 24, 250)
    p2 = p2.reshape(4 * tb * 24, 250)                        # aligned merge
    z2 = jnp.dot(p2, w2_ref[...],
                 preferred_element_type=jnp.float32) + b2_ref[...]
    z2 = z2.reshape(4, tb * 24, 20)                          # aligned split
    y2 = jnp.maximum(jnp.maximum(z2[0], z2[1]),
                     jnp.maximum(z2[2], z2[3]))
    y2 = jnp.maximum(y2, 0.0)                                # (tb*24, 20)
    y2 = y2.reshape(tb, 24, 20)                              # aligned split

    # flatten (drop junk columns qx' > 3); order (qy, qx, oc) matches fw1_ref
    flat = jnp.concatenate(
        [y2[:, qy * 6 + qx, :] for qy in range(4) for qx in range(4)],
        axis=-1)                                             # (tb, 320)

    # ---------------- fc1 (322 -> 200) + relu, fc2 (200 -> 196) -------------
    h = jnp.dot(flat, fw1_ref[...], preferred_element_type=jnp.float32)
    h = h + loss_ref[...] * fw1l_ref[...] + fb1_ref[...]     # timestep folded in
    h = jnp.maximum(h, 0.0)
    o_ref[...] = jnp.dot(h, fw2_ref[...],
                         preferred_element_type=jnp.float32) + fb2_ref[...]


# ------------------------------ JAX glue -----------------------------------

def _conv1_patches(images_nchw):
    """im2col for conv1, ordered for the fused kernel.

    Returns (B*576, 50): rows = b*576 + d1*144 + (p*36 + i*6 + j) where d1 is
    the 2x2 pool offset, p = (row parity, col parity) of the pooled position
    and (i, j) the coarse 6x6 position; columns = (kh*5 + kw)*2 + c.
    """
    x = jnp.transpose(images_nchw, (0, 2, 3, 1))              # (B, 28, 28, 2)
    B = x.shape[0]
    taps = [x[:, kh:kh + 24, kw:kw + 24, :]
            for kh in range(5) for kw in range(5)]
    pat = jnp.stack(taps, axis=3).reshape(B, 24, 24, 50)      # (B,24,24,50)
    d_blocks = []
    for dy in range(2):
        for dx in range(2):
            p_blocks = []
            for a in range(2):
                for b2 in range(2):
                    sub = pat[:, 2 * a + dy:2 * a + dy + 21:4,
                              2 * b2 + dx:2 * b2 + dx + 21:4, :]   # (B,6,6,50)
                    p_blocks.append(sub.reshape(B, 36, 50))
            d_blocks.append(jnp.concatenate(p_blocks, axis=1))     # (B,144,50)
    p1 = jnp.stack(d_blocks, axis=1)                               # (B,4,144,50)
    return p1.reshape(B * 576, 50)


def box_agent_forward(params, images, timestep, loss, *, block_b=8):
    """images: (B, 2, 28, 28) NCHW f32; loss: (B, 1); timestep: traced scalar."""
    B = images.shape[0]
    tb = int(min(block_b, B))
    bp = ((B + tb - 1) // tb) * tb
    if bp != B:
        pad = bp - B
        images = jnp.concatenate(
            [images, jnp.zeros((pad,) + images.shape[1:], images.dtype)], axis=0)
        loss = jnp.concatenate(
            [loss, jnp.zeros((pad, 1), loss.dtype)], axis=0)

    p1 = _conv1_patches(images.astype(jnp.float32))           # (bp*576, 50)
    loss = loss.astype(jnp.float32)

    # fold the constant timestep column of fc1 into its bias
    fb1_eff = (params['fb1'] + jnp.asarray(timestep, jnp.float32)
               * params['fw1'][320]).reshape(1, 200)

    out = pl.pallas_call(
        _fused_kernel,
        out_shape=jax.ShapeDtypeStruct((bp, 196), jnp.float32),
        grid=(bp // tb,),
        in_specs=[
            pl.BlockSpec((tb * 576, 50), lambda i: (i, 0)),   # conv1 patches
            pl.BlockSpec((tb, 1), lambda i: (i, 0)),          # loss
            pl.BlockSpec((50, 10), lambda i: (0, 0)),         # w1m
            pl.BlockSpec((1, 10), lambda i: (0, 0)),          # b1
            pl.BlockSpec((250, 20), lambda i: (0, 0)),        # w2m
            pl.BlockSpec((1, 20), lambda i: (0, 0)),          # b2
            pl.BlockSpec((320, 200), lambda i: (0, 0)),       # fw1 (permuted)
            pl.BlockSpec((1, 200), lambda i: (0, 0)),         # fw1 loss row
            pl.BlockSpec((1, 200), lambda i: (0, 0)),         # fb1 (+timestep)
            pl.BlockSpec((200, 196), lambda i: (0, 0)),       # fw2
            pl.BlockSpec((1, 196), lambda i: (0, 0)),         # fb2
        ],
        out_specs=pl.BlockSpec((tb, 196), lambda i: (i, 0)),
        compiler_params=pltpu.CompilerParams(
            dimension_semantics=("parallel",),
            vmem_limit_bytes=32 * 1024 * 1024),
    )(p1, loss,
      params['w1m'], params['b1'].reshape(1, 10),
      params['w2m'], params['b2'].reshape(1, 20),
      params['fw1p'], params['fw1loss'], fb1_eff,
      params['fw2'], params['fb2'].reshape(1, 196))
    return out[:B]


# ----------------------------- reference (plain JAX) ------------------------

def reference_forward(params, images, timestep, loss):
    def conv(x, w, b):
        y = lax.conv_general_dilated(
            x, w, (1, 1), 'VALID',
            dimension_numbers=('NCHW', 'OIHW', 'NCHW'))
        return y + b.reshape(1, -1, 1, 1)

    def maxpool(x):
        return lax.reduce_window(x, -jnp.inf, lax.max,
                                 (1, 1, 2, 2), (1, 1, 2, 2), 'VALID')

    x = jax.nn.relu(maxpool(conv(images, params['w1'], params['b1'])))
    x = jax.nn.relu(maxpool(conv(x, params['w2'], params['b2'])))
    B = images.shape[0]
    flat = x.reshape(B, -1)
    xf = jnp.concatenate(
        [flat, jnp.ones((B, 1), jnp.float32) * timestep, loss], axis=1)
    h = jax.nn.relu(xf @ params['fw1'] + params['fb1'])
    return h @ params['fw2'] + params['fb2']


# ------------------------------- main ---------------------------------------

def init_params(key):
    ks = jax.random.split(key, 8)
    w1 = 0.1 * jax.random.normal(ks[0], (10, 2, 5, 5), jnp.float32)    # OIHW
    b1 = 0.1 * jax.random.normal(ks[1], (10,), jnp.float32)
    w2 = 0.1 * jax.random.normal(ks[2], (20, 10, 5, 5), jnp.float32)   # OIHW
    b2 = 0.1 * jax.random.normal(ks[3], (20,), jnp.float32)
    fw1 = 0.05 * jax.random.normal(ks[4], (322, 200), jnp.float32)
    fb1 = 0.05 * jax.random.normal(ks[5], (200,), jnp.float32)
    fw2 = 0.05 * jax.random.normal(ks[6], (200, 196), jnp.float32)
    fb2 = 0.05 * jax.random.normal(ks[7], (196,), jnp.float32)
    # matmul layouts for the kernel: conv weights as (kh, kw, c, oc) -> (KKC, OC)
    w1m = jnp.transpose(w1, (2, 3, 1, 0)).reshape(50, 10)
    w2m = jnp.transpose(w2, (2, 3, 1, 0)).reshape(250, 20)
    # fc1: permute first 320 rows from PyTorch flat order (oc*16 + s) to the
    # kernel's (s*20 + oc) order; split out the loss row (321).
    fw1p = fw1[:320].reshape(20, 16, 200).transpose(1, 0, 2).reshape(320, 200)
    fw1loss = fw1[321].reshape(1, 200)
    return {
        'w1': w1, 'b1': b1, 'w2': w2, 'b2': b2,
        'w1m': w1m, 'w2m': w2m,
        'fw1': fw1, 'fb1': fb1, 'fw2': fw2, 'fb2': fb2,
        'fw1p': fw1p, 'fw1loss': fw1loss,
    }


if __name__ == "__main__":
    key = jax.random.PRNGKey(0)
    params = init_params(key)

    kx, kl = jax.random.split(jax.random.PRNGKey(1))
    B = 2
    images = jax.random.normal(kx, (B, 2, 28, 28), jnp.float32)   # NCHW
    loss = jax.random.normal(kl, (B, 1), jnp.float32)
    timestep = jnp.float32(3.0)   # traced scalar: no retrace per value

    out = jax.jit(box_agent_forward)(params, images, timestep, loss)
    out = jax.block_until_ready(out)
    assert out.shape == (B, 196), out.shape

    ref = reference_forward(params, images, timestep, loss)
    assert jnp.allclose(out, ref, rtol=1e-3, atol=1e-3), \
        float(jnp.max(jnp.abs(out - ref)))

    print("KERNEL_OK")
</pallas_src>

<mosaic_0001>
module attributes {stable_mosaic.version = 11 : i64} {
  func.func @_fused_kernel(%arg0: i32, %arg1: memref<1152x50xf32, #tpu.memory_space<vmem>>, %arg2: memref<2x1xf32, #tpu.memory_space<vmem>>, %arg3: memref<50x10xf32, #tpu.memory_space<vmem>>, %arg4: memref<1x10xf32, #tpu.memory_space<vmem>>, %arg5: memref<250x20xf32, #tpu.memory_space<vmem>>, %arg6: memref<1x20xf32, #tpu.memory_space<vmem>>, %arg7: memref<320x200xf32, #tpu.memory_space<vmem>>, %arg8: memref<1x200xf32, #tpu.memory_space<vmem>>, %arg9: memref<1x200xf32, #tpu.memory_space<vmem>>, %arg10: memref<200x196xf32, #tpu.memory_space<vmem>>, %arg11: memref<1x196xf32, #tpu.memory_space<vmem>>, %arg12: memref<2x196xf32, #tpu.memory_space<vmem>>) attributes {dimension_semantics = [#tpu.dimension_semantics<parallel>], iteration_bounds = array<i64: 1>, scalar_prefetch = 0 : i64, scratch_operands = 0 : i64, tpu.core_type = #tpu.core_type<tc>, window_params = [{transform_indices = @transform_0, window_bounds = array<i64: 1152, 50>}, {transform_indices = @transform_1, window_bounds = array<i64: 2, 1>}, {pipeline_mode = #tpu.pipeline_mode<synchronous>, transform_indices = @transform_2, window_bounds = array<i64: 50, 10>}, {pipeline_mode = #tpu.pipeline_mode<synchronous>, transform_indices = @transform_3, window_bounds = array<i64: 1, 10>}, {pipeline_mode = #tpu.pipeline_mode<synchronous>, transform_indices = @transform_4, window_bounds = array<i64: 250, 20>}, {pipeline_mode = #tpu.pipeline_mode<synchronous>, transform_indices = @transform_5, window_bounds = array<i64: 1, 20>}, {pipeline_mode = #tpu.pipeline_mode<synchronous>, transform_indices = @transform_6, window_bounds = array<i64: 320, 200>}, {pipeline_mode = #tpu.pipeline_mode<synchronous>, transform_indices = @transform_7, window_bounds = array<i64: 1, 200>}, {pipeline_mode = #tpu.pipeline_mode<synchronous>, transform_indices = @transform_8, window_bounds = array<i64: 1, 200>}, {pipeline_mode = #tpu.pipeline_mode<synchronous>, transform_indices = @transform_9, window_bounds = array<i64: 200, 196>}, {pipeline_mode = #tpu.pipeline_mode<synchronous>, transform_indices = @transform_10, window_bounds = array<i64: 1, 196>}, {transform_indices = @transform_11, window_bounds = array<i64: 2, 196>}]} {
    %c0 = arith.constant 0 : index
    %c0_0 = arith.constant 0 : index
    %0 = vector.load %arg1[%c0, %c0_0] : memref<1152x50xf32, #tpu.memory_space<vmem>>, vector<1152x50xf32>
    %c0_1 = arith.constant 0 : index
    %c0_2 = arith.constant 0 : index
    %1 = vector.load %arg3[%c0_1, %c0_2] : memref<50x10xf32, #tpu.memory_space<vmem>>, vector<50x10xf32>
    %cst = arith.constant dense<0.000000e+00> : vector<1152x10xf32>
    %2 = tpu.matmul %0, %1, %cst {dimension_numbers = #tpu.dot_dimension_numbers<[1], [0], [0], [1], [0, 0, 1, 1], [], []>} : vector<1152x50xf32>, vector<50x10xf32>, vector<1152x10xf32> -> vector<1152x10xf32>
    %c0_3 = arith.constant 0 : index
    %c0_4 = arith.constant 0 : index
    %3 = vector.load %arg4[%c0_3, %c0_4] : memref<1x10xf32, #tpu.memory_space<vmem>>, vector<1x10xf32>
    %4 = vector.broadcast %3 : vector<1x10xf32> to vector<1152x10xf32>
    %5 = arith.addf %2, %4 : vector<1152x10xf32>
    %6 = vector.shape_cast %5 : vector<1152x10xf32> to vector<2x4x144x10xf32>
    %7 = vector.extract_strided_slice %6 {offsets = [0, 0, 0, 0], sizes = [2, 1, 144, 10], strides = [1, 1, 1, 1]} : vector<2x4x144x10xf32> to vector<2x1x144x10xf32>
    %8 = vector.shape_cast %7 : vector<2x1x144x10xf32> to vector<2x144x10xf32>
    %9 = vector.extract_strided_slice %6 {offsets = [0, 1, 0, 0], sizes = [2, 1, 144, 10], strides = [1, 1, 1, 1]} : vector<2x4x144x10xf32> to vector<2x1x144x10xf32>
    %10 = vector.shape_cast %9 : vector<2x1x144x10xf32> to vector<2x144x10xf32>
    %11 = arith.maximumf %8, %10 : vector<2x144x10xf32>
    %12 = vector.extract_strided_slice %6 {offsets = [0, 2, 0, 0], sizes = [2, 1, 144, 10], strides = [1, 1, 1, 1]} : vector<2x4x144x10xf32> to vector<2x1x144x10xf32>
    %13 = vector.shape_cast %12 : vector<2x1x144x10xf32> to vector<2x144x10xf32>
    %14 = vector.extract_strided_slice %6 {offsets = [0, 3, 0, 0], sizes = [2, 1, 144, 10], strides = [1, 1, 1, 1]} : vector<2x4x144x10xf32> to vector<2x1x144x10xf32>
    %15 = vector.shape_cast %14 : vector<2x1x144x10xf32> to vector<2x144x10xf32>
    %16 = arith.maximumf %13, %15 : vector<2x144x10xf32>
    %17 = arith.maximumf %11, %16 : vector<2x144x10xf32>
    %cst_5 = arith.constant 0.000000e+00 : f32
    %18 = vector.broadcast %cst_5 : f32 to vector<2x144x10xf32>
    %19 = arith.maximumf %17, %18 : vector<2x144x10xf32>
    %cst_6 = arith.constant 0.000000e+00 : f32
    %20 = vector.broadcast %cst_6 : f32 to vector<2x8x10xf32>
    %21 = tpu.concatenate %19, %20 in 1 : vector<2x144x10xf32>, vector<2x8x10xf32> -> vector<2x152x10xf32>
    %22 = vector.extract_strided_slice %21 {offsets = [0, 0, 0], sizes = [2, 24, 10], strides = [1, 1, 1]} : vector<2x152x10xf32> to vector<2x24x10xf32>
    %23 = vector.extract_strided_slice %21 {offsets = [0, 36, 0], sizes = [2, 24, 10], strides = [1, 1, 1]} : vector<2x152x10xf32> to vector<2x24x10xf32>
    %24 = vector.extract_strided_slice %21 {offsets = [0, 1, 0], sizes = [2, 24, 10], strides = [1, 1, 1]} : vector<2x152x10xf32> to vector<2x24x10xf32>
    %25 = vector.extract_strided_slice %21 {offsets = [0, 37, 0], sizes = [2, 24, 10], strides = [1, 1, 1]} : vector<2x152x10xf32> to vector<2x24x10xf32>
    %26 = vector.extract_strided_slice %21 {offsets = [0, 2, 0], sizes = [2, 24, 10], strides = [1, 1, 1]} : vector<2x152x10xf32> to vector<2x24x10xf32>
    %27 = vector.extract_strided_slice %21 {offsets = [0, 72, 0], sizes = [2, 24, 10], strides = [1, 1, 1]} : vector<2x152x10xf32> to vector<2x24x10xf32>
    %28 = vector.extract_strided_slice %21 {offsets = [0, 108, 0], sizes = [2, 24, 10], strides = [1, 1, 1]} : vector<2x152x10xf32> to vector<2x24x10xf32>
    %29 = vector.extract_strided_slice %21 {offsets = [0, 73, 0], sizes = [2, 24, 10], strides = [1, 1, 1]} : vector<2x152x10xf32> to vector<2x24x10xf32>
    %30 = vector.extract_strided_slice %21 {offsets = [0, 109, 0], sizes = [2, 24, 10], strides = [1, 1, 1]} : vector<2x152x10xf32> to vector<2x24x10xf32>
    %31 = vector.extract_strided_slice %21 {offsets = [0, 74, 0], sizes = [2, 24, 10], strides = [1, 1, 1]} : vector<2x152x10xf32> to vector<2x24x10xf32>
    %32 = vector.extract_strided_slice %21 {offsets = [0, 6, 0], sizes = [2, 24, 10], strides = [1, 1, 1]} : vector<2x152x10xf32> to vector<2x24x10xf32>
    %33 = vector.extract_strided_slice %21 {offsets = [0, 42, 0], sizes = [2, 24, 10], strides = [1, 1, 1]} : vector<2x152x10xf32> to vector<2x24x10xf32>
    %34 = vector.extract_strided_slice %21 {offsets = [0, 7, 0], sizes = [2, 24, 10], strides = [1, 1, 1]} : vector<2x152x10xf32> to vector<2x24x10xf32>
    %35 = vector.extract_strided_slice %21 {offsets = [0, 43, 0], sizes = [2, 24, 10], strides = [1, 1, 1]} : vector<2x152x10xf32> to vector<2x24x10xf32>
    %36 = vector.extract_strided_slice %21 {offsets = [0, 8, 0], sizes = [2, 24, 10], strides = [1, 1, 1]} : vector<2x152x10xf32> to vector<2x24x10xf32>
    %37 = vector.extract_strided_slice %21 {offsets = [0, 78, 0], sizes = [2, 24, 10], strides = [1, 1, 1]} : vector<2x152x10xf32> to vector<2x24x10xf32>
    %38 = vector.extract_strided_slice %21 {offsets = [0, 114, 0], sizes = [2, 24, 10], strides = [1, 1, 1]} : vector<2x152x10xf32> to vector<2x24x10xf32>
    %39 = vector.extract_strided_slice %21 {offsets = [0, 79, 0], sizes = [2, 24, 10], strides = [1, 1, 1]} : vector<2x152x10xf32> to vector<2x24x10xf32>
    %40 = vector.extract_strided_slice %21 {offsets = [0, 115, 0], sizes = [2, 24, 10], strides = [1, 1, 1]} : vector<2x152x10xf32> to vector<2x24x10xf32>
    %41 = vector.extract_strided_slice %21 {offsets = [0, 80, 0], sizes = [2, 24, 10], strides = [1, 1, 1]} : vector<2x152x10xf32> to vector<2x24x10xf32>
    %42 = vector.extract_strided_slice %21 {offsets = [0, 12, 0], sizes = [2, 24, 10], strides = [1, 1, 1]} : vector<2x152x10xf32> to vector<2x24x10xf32>
    %43 = vector.extract_strided_slice %21 {offsets = [0, 48, 0], sizes = [2, 24, 10], strides = [1, 1, 1]} : vector<2x152x10xf32> to vector<2x24x10xf32>
    %44 = vector.extract_strided_slice %21 {offsets = [0, 13, 0], sizes = [2, 24, 10], strides = [1, 1, 1]} : vector<2x152x10xf32> to vector<2x24x10xf32>
    %45 = vector.extract_strided_slice %21 {offsets = [0, 49, 0], sizes = [2, 24, 10], strides = [1, 1, 1]} : vector<2x152x10xf32> to vector<2x24x10xf32>
    %46 = vector.extract_strided_slice %21 {offsets = [0, 14, 0], sizes = [2, 24, 10], strides = [1, 1, 1]} : vector<2x152x10xf32> to vector<2x24x10xf32>
    %47 = tpu.concatenate %22, %23, %24, %25, %26, %27, %28, %29, %30, %31, %32, %33, %34, %35, %36, %37 in 2 : vector<2x24x10xf32>, vector<2x24x10xf32>, vector<2x24x10xf32>, vector<2x24x10xf32>, vector<2x24x10xf32>, vector<2x24x10xf32>, vector<2x24x10xf32>, vector<2x24x10xf32>, vector<2x24x10xf32>, vector<2x24x10xf32>, vector<2x24x10xf32>, vector<2x24x10xf32>, vector<2x24x10xf32>, vector<2x24x10xf32>, vector<2x24x10xf32>, vector<2x24x10xf32> -> vector<2x24x160xf32>
    %48 = tpu.concatenate %38, %39, %40, %41, %42, %43, %44, %45, %46 in 2 : vector<2x24x10xf32>, vector<2x24x10xf32>, vector<2x24x10xf32>, vector<2x24x10xf32>, vector<2x24x10xf32>, vector<2x24x10xf32>, vector<2x24x10xf32>, vector<2x24x10xf32>, vector<2x24x10xf32> -> vector<2x24x90xf32>
    %49 = tpu.concatenate %47, %48 in 2 : vector<2x24x160xf32>, vector<2x24x90xf32> -> vector<2x24x250xf32>
    %50 = vector.extract_strided_slice %21 {offsets = [0, 36, 0], sizes = [2, 24, 10], strides = [1, 1, 1]} : vector<2x152x10xf32> to vector<2x24x10xf32>
    %51 = vector.extract_strided_slice %21 {offsets = [0, 1, 0], sizes = [2, 24, 10], strides = [1, 1, 1]} : vector<2x152x10xf32> to vector<2x24x10xf32>
    %52 = vector.extract_strided_slice %21 {offsets = [0, 37, 0], sizes = [2, 24, 10], strides = [1, 1, 1]} : vector<2x152x10xf32> to vector<2x24x10xf32>
    %53 = vector.extract_strided_slice %21 {offsets = [0, 2, 0], sizes = [2, 24, 10], strides = [1, 1, 1]} : vector<2x152x10xf32> to vector<2x24x10xf32>
    %54 = vector.extract_strided_slice %21 {offsets = [0, 38, 0], sizes = [2, 24, 10], strides = [1, 1, 1]} : vector<2x152x10xf32> to vector<2x24x10xf32>
    %55 = vector.extract_strided_slice %21 {offsets = [0, 108, 0], sizes = [2, 24, 10], strides = [1, 1, 1]} : vector<2x152x10xf32> to vector<2x24x10xf32>
    %56 = vector.extract_strided_slice %21 {offsets = [0, 73, 0], sizes = [2, 24, 10], strides = [1, 1, 1]} : vector<2x152x10xf32> to vector<2x24x10xf32>
    %57 = vector.extract_strided_slice %21 {offsets = [0, 109, 0], sizes = [2, 24, 10], strides = [1, 1, 1]} : vector<2x152x10xf32> to vector<2x24x10xf32>
    %58 = vector.extract_strided_slice %21 {offsets = [0, 74, 0], sizes = [2, 24, 10], strides = [1, 1, 1]} : vector<2x152x10xf32> to vector<2x24x10xf32>
    %59 = vector.extract_strided_slice %21 {offsets = [0, 110, 0], sizes = [2, 24, 10], strides = [1, 1, 1]} : vector<2x152x10xf32> to vector<2x24x10xf32>
    %60 = vector.extract_strided_slice %21 {offsets = [0, 42, 0], sizes = [2, 24, 10], strides = [1, 1, 1]} : vector<2x152x10xf32> to vector<2x24x10xf32>
    %61 = vector.extract_strided_slice %21 {offsets = [0, 7, 0], sizes = [2, 24, 10], strides = [1, 1, 1]} : vector<2x152x10xf32> to vector<2x24x10xf32>
    %62 = vector.extract_strided_slice %21 {offsets = [0, 43, 0], sizes = [2, 24, 10], strides = [1, 1, 1]} : vector<2x152x10xf32> to vector<2x24x10xf32>
    %63 = vector.extract_strided_slice %21 {offsets = [0, 8, 0], sizes = [2, 24, 10], strides = [1, 1, 1]} : vector<2x152x10xf32> to vector<2x24x10xf32>
    %64 = vector.extract_strided_slice %21 {offsets = [0, 44, 0], sizes = [2, 24, 10], strides = [1, 1, 1]} : vector<2x152x10xf32> to vector<2x24x10xf32>
    %65 = vector.extract_strided_slice %21 {offsets = [0, 114, 0], sizes = [2, 24, 10], strides = [1, 1, 1]} : vector<2x152x10xf32> to vector<2x24x10xf32>
    %66 = vector.extract_strided_slice %21 {offsets = [0, 79, 0], sizes = [2, 24, 10], strides = [1, 1, 1]} : vector<2x152x10xf32> to vector<2x24x10xf32>
    %67 = vector.extract_strided_slice %21 {offsets = [0, 115, 0], sizes = [2, 24, 10], strides = [1, 1, 1]} : vector<2x152x10xf32> to vector<2x24x10xf32>
    %68 = vector.extract_strided_slice %21 {offsets = [0, 80, 0], sizes = [2, 24, 10], strides = [1, 1, 1]} : vector<2x152x10xf32> to vector<2x24x10xf32>
    %69 = vector.extract_strided_slice %21 {offsets = [0, 116, 0], sizes = [2, 24, 10], strides = [1, 1, 1]} : vector<2x152x10xf32> to vector<2x24x10xf32>
    %70 = vector.extract_strided_slice %21 {offsets = [0, 48, 0], sizes = [2, 24, 10], strides = [1, 1, 1]} : vector<2x152x10xf32> to vector<2x24x10xf32>
    %71 = vector.extract_strided_slice %21 {offsets = [0, 13, 0], sizes = [2, 24, 10], strides = [1, 1, 1]} : vector<2x152x10xf32> to vector<2x24x10xf32>
    %72 = vector.extract_strided_slice %21 {offsets = [0, 49, 0], sizes = [2, 24, 10], strides = [1, 1, 1]} : vector<2x152x10xf32> to vector<2x24x10xf32>
    %73 = vector.extract_strided_slice %21 {offsets = [0, 14, 0], sizes = [2, 24, 10], strides = [1, 1, 1]} : vector<2x152x10xf32> to vector<2x24x10xf32>
    %74 = vector.extract_strided_slice %21 {offsets = [0, 50, 0], sizes = [2, 24, 10], strides = [1, 1, 1]} : vector<2x152x10xf32> to vector<2x24x10xf32>
    %75 = tpu.concatenate %50, %51, %52, %53, %54, %55, %56, %57, %58, %59, %60, %61, %62, %63, %64, %65 in 2 : vector<2x24x10xf32>, vector<2x24x10xf32>, vector<2x24x10xf32>, vector<2x24x10xf32>, vector<2x24x10xf32>, vector<2x24x10xf32>, vector<2x24x10xf32>, vector<2x24x10xf32>, vector<2x24x10xf32>, vector<2x24x10xf32>, vector<2x24x10xf32>, vector<2x24x10xf32>, vector<2x24x10xf32>, vector<2x24x10xf32>, vector<2x24x10xf32>, vector<2x24x10xf32> -> vector<2x24x160xf32>
    %76 = tpu.concatenate %66, %67, %68, %69, %70, %71, %72, %73, %74 in 2 : vector<2x24x10xf32>, vector<2x24x10xf32>, vector<2x24x10xf32>, vector<2x24x10xf32>, vector<2x24x10xf32>, vector<2x24x10xf32>, vector<2x24x10xf32>, vector<2x24x10xf32>, vector<2x24x10xf32> -> vector<2x24x90xf32>
    %77 = tpu.concatenate %75, %76 in 2 : vector<2x24x160xf32>, vector<2x24x90xf32> -> vector<2x24x250xf32>
    %78 = vector.extract_strided_slice %21 {offsets = [0, 72, 0], sizes = [2, 24, 10], strides = [1, 1, 1]} : vector<2x152x10xf32> to vector<2x24x10xf32>
    %79 = vector.extract_strided_slice %21 {offsets = [0, 108, 0], sizes = [2, 24, 10], strides = [1, 1, 1]} : vector<2x152x10xf32> to vector<2x24x10xf32>
    %80 = vector.extract_strided_slice %21 {offsets = [0, 73, 0], sizes = [2, 24, 10], strides = [1, 1, 1]} : vector<2x152x10xf32> to vector<2x24x10xf32>
    %81 = vector.extract_strided_slice %21 {offsets = [0, 109, 0], sizes = [2, 24, 10], strides = [1, 1, 1]} : vector<2x152x10xf32> to vector<2x24x10xf32>
    %82 = vector.extract_strided_slice %21 {offsets = [0, 74, 0], sizes = [2, 24, 10], strides = [1, 1, 1]} : vector<2x152x10xf32> to vector<2x24x10xf32>
    %83 = vector.extract_strided_slice %21 {offsets = [0, 6, 0], sizes = [2, 24, 10], strides = [1, 1, 1]} : vector<2x152x10xf32> to vector<2x24x10xf32>
    %84 = vector.extract_strided_slice %21 {offsets = [0, 42, 0], sizes = [2, 24, 10], strides = [1, 1, 1]} : vector<2x152x10xf32> to vector<2x24x10xf32>
    %85 = vector.extract_strided_slice %21 {offsets = [0, 7, 0], sizes = [2, 24, 10], strides = [1, 1, 1]} : vector<2x152x10xf32> to vector<2x24x10xf32>
    %86 = vector.extract_strided_slice %21 {offsets = [0, 43, 0], sizes = [2, 24, 10], strides = [1, 1, 1]} : vector<2x152x10xf32> to vector<2x24x10xf32>
    %87 = vector.extract_strided_slice %21 {offsets = [0, 8, 0], sizes = [2, 24, 10], strides = [1, 1, 1]} : vector<2x152x10xf32> to vector<2x24x10xf32>
    %88 = vector.extract_strided_slice %21 {offsets = [0, 78, 0], sizes = [2, 24, 10], strides = [1, 1, 1]} : vector<2x152x10xf32> to vector<2x24x10xf32>
    %89 = vector.extract_strided_slice %21 {offsets = [0, 114, 0], sizes = [2, 24, 10], strides = [1, 1, 1]} : vector<2x152x10xf32> to vector<2x24x10xf32>
    %90 = vector.extract_strided_slice %21 {offsets = [0, 79, 0], sizes = [2, 24, 10], strides = [1, 1, 1]} : vector<2x152x10xf32> to vector<2x24x10xf32>
    %91 = vector.extract_strided_slice %21 {offsets = [0, 115, 0], sizes = [2, 24, 10], strides = [1, 1, 1]} : vector<2x152x10xf32> to vector<2x24x10xf32>
    %92 = vector.extract_strided_slice %21 {offsets = [0, 80, 0], sizes = [2, 24, 10], strides = [1, 1, 1]} : vector<2x152x10xf32> to vector<2x24x10xf32>
    %93 = vector.extract_strided_slice %21 {offsets = [0, 12, 0], sizes = [2, 24, 10], strides = [1, 1, 1]} : vector<2x152x10xf32> to vector<2x24x10xf32>
    %94 = vector.extract_strided_slice %21 {offsets = [0, 48, 0], sizes = [2, 24, 10], strides = [1, 1, 1]} : vector<2x152x10xf32> to vector<2x24x10xf32>
    %95 = vector.extract_strided_slice %21 {offsets = [0, 13, 0], sizes = [2, 24, 10], strides = [1, 1, 1]} : vector<2x152x10xf32> to vector<2x24x10xf32>
    %96 = vector.extract_strided_slice %21 {offsets = [0, 49, 0], sizes = [2, 24, 10], strides = [1, 1, 1]} : vector<2x152x10xf32> to vector<2x24x10xf32>
    %97 = vector.extract_strided_slice %21 {offsets = [0, 14, 0], sizes = [2, 24, 10], strides = [1, 1, 1]} : vector<2x152x10xf32> to vector<2x24x10xf32>
    %98 = vector.extract_strided_slice %21 {offsets = [0, 84, 0], sizes = [2, 24, 10], strides = [1, 1, 1]} : vector<2x152x10xf32> to vector<2x24x10xf32>
    %99 = vector.extract_strided_slice %21 {offsets = [0, 120, 0], sizes = [2, 24, 10], strides = [1, 1, 1]} : vector<2x152x10xf32> to vector<2x24x10xf32>
    %100 = vector.extract_strided_slice %21 {offsets = [0, 85, 0], sizes = [2, 24, 10], strides = [1, 1, 1]} : vector<2x152x10xf32> to vector<2x24x10xf32>
    %101 = vector.extract_strided_slice %21 {offsets = [0, 121, 0], sizes = [2, 24, 10], strides = [1, 1, 1]} : vector<2x152x10xf32> to vector<2x24x10xf32>
    %102 = vector.extract_strided_slice %21 {offsets = [0, 86, 0], sizes = [2, 24, 10], strides = [1, 1, 1]} : vector<2x152x10xf32> to vector<2x24x10xf32>
    %103 = tpu.concatenate %78, %79, %80, %81, %82, %83, %84, %85, %86, %87, %88, %89, %90, %91, %92, %93 in 2 : vector<2x24x10xf32>, vector<2x24x10xf32>, vector<2x24x10xf32>, vector<2x24x10xf32>, vector<2x24x10xf32>, vector<2x24x10xf32>, vector<2x24x10xf32>, vector<2x24x10xf32>, vector<2x24x10xf32>, vector<2x24x10xf32>, vector<2x24x10xf32>, vector<2x24x10xf32>, vector<2x24x10xf32>, vector<2x24x10xf32>, vector<2x24x10xf32>, vector<2x24x10xf32> -> vector<2x24x160xf32>
    %104 = tpu.concatenate %94, %95, %96, %97, %98, %99, %100, %101, %102 in 2 : vector<2x24x10xf32>, vector<2x24x10xf32>, vector<2x24x10xf32>, vector<2x24x10xf32>, vector<2x24x10xf32>, vector<2x24x10xf32>, vector<2x24x10xf32>, vector<2x24x10xf32>, vector<2x24x10xf32> -> vector<2x24x90xf32>
    %105 = tpu.concatenate %103, %104 in 2 : vector<2x24x160xf32>, vector<2x24x90xf32> -> vector<2x24x250xf32>
    %106 = vector.extract_strided_slice %21 {offsets = [0, 108, 0], sizes = [2, 24, 10], strides = [1, 1, 1]} : vector<2x152x10xf32> to vector<2x24x10xf32>
    %107 = vector.extract_strided_slice %21 {offsets = [0, 73, 0], sizes = [2, 24, 10], strides = [1, 1, 1]} : vector<2x152x10xf32> to vector<2x24x10xf32>
    %108 = vector.extract_strided_slice %21 {offsets = [0, 109, 0], sizes = [2, 24, 10], strides = [1, 1, 1]} : vector<2x152x10xf32> to vector<2x24x10xf32>
    %109 = vector.extract_strided_slice %21 {offsets = [0, 74, 0], sizes = [2, 24, 10], strides = [1, 1, 1]} : vector<2x152x10xf32> to vector<2x24x10xf32>
    %110 = vector.extract_strided_slice %21 {offsets = [0, 110, 0], sizes = [2, 24, 10], strides = [1, 1, 1]} : vector<2x152x10xf32> to vector<2x24x10xf32>
    %111 = vector.extract_strided_slice %21 {offsets = [0, 42, 0], sizes = [2, 24, 10], strides = [1, 1, 1]} : vector<2x152x10xf32> to vector<2x24x10xf32>
    %112 = vector.extract_strided_slice %21 {offsets = [0, 7, 0], sizes = [2, 24, 10], strides = [1, 1, 1]} : vector<2x152x10xf32> to vector<2x24x10xf32>
    %113 = vector.extract_strided_slice %21 {offsets = [0, 43, 0], sizes = [2, 24, 10], strides = [1, 1, 1]} : vector<2x152x10xf32> to vector<2x24x10xf32>
    %114 = vector.extract_strided_slice %21 {offsets = [0, 8, 0], sizes = [2, 24, 10], strides = [1, 1, 1]} : vector<2x152x10xf32> to vector<2x24x10xf32>
    %115 = vector.extract_strided_slice %21 {offsets = [0, 44, 0], sizes = [2, 24, 10], strides = [1, 1, 1]} : vector<2x152x10xf32> to vector<2x24x10xf32>
    %116 = vector.extract_strided_slice %21 {offsets = [0, 114, 0], sizes = [2, 24, 10], strides = [1, 1, 1]} : vector<2x152x10xf32> to vector<2x24x10xf32>
    %117 = vector.extract_strided_slice %21 {offsets = [0, 79, 0], sizes = [2, 24, 10], strides = [1, 1, 1]} : vector<2x152x10xf32> to vector<2x24x10xf32>
    %118 = vector.extract_strided_slice %21 {offsets = [0, 115, 0], sizes = [2, 24, 10], strides = [1, 1, 1]} : vector<2x152x10xf32> to vector<2x24x10xf32>
    %119 = vector.extract_strided_slice %21 {offsets = [0, 80, 0], sizes = [2, 24, 10], strides = [1, 1, 1]} : vector<2x152x10xf32> to vector<2x24x10xf32>
    %120 = vector.extract_strided_slice %21 {offsets = [0, 116, 0], sizes = [2, 24, 10], strides = [1, 1, 1]} : vector<2x152x10xf32> to vector<2x24x10xf32>
    %121 = vector.extract_strided_slice %21 {offsets = [0, 48, 0], sizes = [2, 24, 10], strides = [1, 1, 1]} : vector<2x152x10xf32> to vector<2x24x10xf32>
    %122 = vector.extract_strided_slice %21 {offsets = [0, 13, 0], sizes = [2, 24, 10], strides = [1, 1, 1]} : vector<2x152x10xf32> to vector<2x24x10xf32>
    %123 = vector.extract_strided_slice %21 {offsets = [0, 49, 0], sizes = [2, 24, 10], strides = [1, 1, 1]} : vector<2x152x10xf32> to vector<2x24x10xf32>
    %124 = vector.extract_strided_slice %21 {offsets = [0, 14, 0], sizes = [2, 24, 10], strides = [1, 1, 1]} : vector<2x152x10xf32> to vector<2x24x10xf32>
    %125 = vector.extract_strided_slice %21 {offsets = [0, 50, 0], sizes = [2, 24, 10], strides = [1, 1, 1]} : vector<2x152x10xf32> to vector<2x24x10xf32>
    %126 = vector.extract_strided_slice %21 {offsets = [0, 120, 0], sizes = [2, 24, 10], strides = [1, 1, 1]} : vector<2x152x10xf32> to vector<2x24x10xf32>
    %127 = vector.extract_strided_slice %21 {offsets = [0, 85, 0], sizes = [2, 24, 10], strides = [1, 1, 1]} : vector<2x152x10xf32> to vector<2x24x10xf32>
    %128 = vector.extract_strided_slice %21 {offsets = [0, 121, 0], sizes = [2, 24, 10], strides = [1, 1, 1]} : vector<2x152x10xf32> to vector<2x24x10xf32>
    %129 = vector.extract_strided_slice %21 {offsets = [0, 86, 0], sizes = [2, 24, 10], strides = [1, 1, 1]} : vector<2x152x10xf32> to vector<2x24x10xf32>
    %130 = vector.extract_strided_slice %21 {offsets = [0, 122, 0], sizes = [2, 24, 10], strides = [1, 1, 1]} : vector<2x152x10xf32> to vector<2x24x10xf32>
    %131 = tpu.concatenate %106, %107, %108, %109, %110, %111, %112, %113, %114, %115, %116, %117, %118, %119, %120, %121 in 2 : vector<2x24x10xf32>, vector<2x24x10xf32>, vector<2x24x10xf32>, vector<2x24x10xf32>, vector<2x24x10xf32>, vector<2x24x10xf32>, vector<2x24x10xf32>, vector<2x24x10xf32>, vector<2x24x10xf32>, vector<2x24x10xf32>, vector<2x24x10xf32>, vector<2x24x10xf32>, vector<2x24x10xf32>, vector<2x24x10xf32>, vector<2x24x10xf32>, vector<2x24x10xf32> -> vector<2x24x160xf32>
    %132 = tpu.concatenate %122, %123, %124, %125, %126, %127, %128, %129, %130 in 2 : vector<2x24x10xf32>, vector<2x24x10xf32>, vector<2x24x10xf32>, vector<2x24x10xf32>, vector<2x24x10xf32>, vector<2x24x10xf32>, vector<2x24x10xf32>, vector<2x24x10xf32>, vector<2x24x10xf32> -> vector<2x24x90xf32>
    %133 = tpu.concatenate %131, %132 in 2 : vector<2x24x160xf32>, vector<2x24x90xf32> -> vector<2x24x250xf32>
    %134 = vector.shape_cast %49 : vector<2x24x250xf32> to vector<1x2x24x250xf32>
    %135 = vector.shape_cast %77 : vector<2x24x250xf32> to vector<1x2x24x250xf32>
    %136 = vector.shape_cast %105 : vector<2x24x250xf32> to vector<1x2x24x250xf32>
    %137 = vector.shape_cast %133 : vector<2x24x250xf32> to vector<1x2x24x250xf32>
    %138 = tpu.concatenate %134, %135, %136, %137 in 0 : vector<1x2x24x250xf32>, vector<1x2x24x250xf32>, vector<1x2x24x250xf32>, vector<1x2x24x250xf32> -> vector<4x2x24x250xf32>
    %139 = vector.shape_cast %138 : vector<4x2x24x250xf32> to vector<192x250xf32>
    %c0_7 = arith.constant 0 : index
    %c0_8 = arith.constant 0 : index
    %140 = vector.load %arg5[%c0_7, %c0_8] : memref<250x20xf32, #tpu.memory_space<vmem>>, vector<250x20xf32>
    %cst_9 = arith.constant dense<0.000000e+00> : vector<192x20xf32>
    %141 = tpu.matmul %139, %140, %cst_9 {dimension_numbers = #tpu.dot_dimension_numbers<[1], [0], [0], [1], [0, 0, 1, 1], [], []>} : vector<192x250xf32>, vector<250x20xf32>, vector<192x20xf32> -> vector<192x20xf32>
    %c0_10 = arith.constant 0 : index
    %c0_11 = arith.constant 0 : index
    %142 = vector.load %arg6[%c0_10, %c0_11] : memref<1x20xf32, #tpu.memory_space<vmem>>, vector<1x20xf32>
    %143 = vector.broadcast %142 : vector<1x20xf32> to vector<192x20xf32>
    %144 = arith.addf %141, %143 : vector<192x20xf32>
    %145 = vector.shape_cast %144 : vector<192x20xf32> to vector<4x48x20xf32>
    %146 = vector.extract_strided_slice %145 {offsets = [0, 0, 0], sizes = [1, 48, 20], strides = [1, 1, 1]} : vector<4x48x20xf32> to vector<1x48x20xf32>
    %147 = vector.shape_cast %146 : vector<1x48x20xf32> to vector<48x20xf32>
    %148 = vector.extract_strided_slice %145 {offsets = [1, 0, 0], sizes = [1, 48, 20], strides = [1, 1, 1]} : vector<4x48x20xf32> to vector<1x48x20xf32>
    %149 = vector.shape_cast %148 : vector<1x48x20xf32> to vector<48x20xf32>
    %150 = arith.maximumf %147, %149 : vector<48x20xf32>
    %151 = vector.extract_strided_slice %145 {offsets = [2, 0, 0], sizes = [1, 48, 20], strides = [1, 1, 1]} : vector<4x48x20xf32> to vector<1x48x20xf32>
    %152 = vector.shape_cast %151 : vector<1x48x20xf32> to vector<48x20xf32>
    %153 = vector.extract_strided_slice %145 {offsets = [3, 0, 0], sizes = [1, 48, 20], strides = [1, 1, 1]} : vector<4x48x20xf32> to vector<1x48x20xf32>
    %154 = vector.shape_cast %153 : vector<1x48x20xf32> to vector<48x20xf32>
    %155 = arith.maximumf %152, %154 : vector<48x20xf32>
    %156 = arith.maximumf %150, %155 : vector<48x20xf32>
    %cst_12 = arith.constant 0.000000e+00 : f32
    %157 = vector.broadcast %cst_12 : f32 to vector<48x20xf32>
    %158 = arith.maximumf %156, %157 : vector<48x20xf32>
    %159 = vector.shape_cast %158 : vector<48x20xf32> to vector<2x24x20xf32>
    %160 = vector.extract_strided_slice %159 {offsets = [0, 0, 0], sizes = [2, 1, 20], strides = [1, 1, 1]} : vector<2x24x20xf32> to vector<2x1x20xf32>
    %161 = vector.shape_cast %160 : vector<2x1x20xf32> to vector<2x20xf32>
    %162 = vector.extract_strided_slice %159 {offsets = [0, 1, 0], sizes = [2, 1, 20], strides = [1, 1, 1]} : vector<2x24x20xf32> to vector<2x1x20xf32>
    %163 = vector.shape_cast %162 : vector<2x1x20xf32> to vector<2x20xf32>
    %164 = vector.extract_strided_slice %159 {offsets = [0, 2, 0], sizes = [2, 1, 20], strides = [1, 1, 1]} : vector<2x24x20xf32> to vector<2x1x20xf32>
    %165 = vector.shape_cast %164 : vector<2x1x20xf32> to vector<2x20xf32>
    %166 = vector.extract_strided_slice %159 {offsets = [0, 3, 0], sizes = [2, 1, 20], strides = [1, 1, 1]} : vector<2x24x20xf32> to vector<2x1x20xf32>
    %167 = vector.shape_cast %166 : vector<2x1x20xf32> to vector<2x20xf32>
    %168 = vector.extract_strided_slice %159 {offsets = [0, 6, 0], sizes = [2, 1, 20], strides = [1, 1, 1]} : vector<2x24x20xf32> to vector<2x1x20xf32>
    %169 = vector.shape_cast %168 : vector<2x1x20xf32> to vector<2x20xf32>
    %170 = vector.extract_strided_slice %159 {offsets = [0, 7, 0], sizes = [2, 1, 20], strides = [1, 1, 1]} : vector<2x24x20xf32> to vector<2x1x20xf32>
    %171 = vector.shape_cast %170 : vector<2x1x20xf32> to vector<2x20xf32>
    %172 = vector.extract_strided_slice %159 {offsets = [0, 8, 0], sizes = [2, 1, 20], strides = [1, 1, 1]} : vector<2x24x20xf32> to vector<2x1x20xf32>
    %173 = vector.shape_cast %172 : vector<2x1x20xf32> to vector<2x20xf32>
    %174 = vector.extract_strided_slice %159 {offsets = [0, 9, 0], sizes = [2, 1, 20], strides = [1, 1, 1]} : vector<2x24x20xf32> to vector<2x1x20xf32>
    %175 = vector.shape_cast %174 : vector<2x1x20xf32> to vector<2x20xf32>
    %176 = vector.extract_strided_slice %159 {offsets = [0, 12, 0], sizes = [2, 1, 20], strides = [1, 1, 1]} : vector<2x24x20xf32> to vector<2x1x20xf32>
    %177 = vector.shape_cast %176 : vector<2x1x20xf32> to vector<2x20xf32>
    %178 = vector.extract_strided_slice %159 {offsets = [0, 13, 0], sizes = [2, 1, 20], strides = [1, 1, 1]} : vector<2x24x20xf32> to vector<2x1x20xf32>
    %179 = vector.shape_cast %178 : vector<2x1x20xf32> to vector<2x20xf32>
    %180 = vector.extract_strided_slice %159 {offsets = [0, 14, 0], sizes = [2, 1, 20], strides = [1, 1, 1]} : vector<2x24x20xf32> to vector<2x1x20xf32>
    %181 = vector.shape_cast %180 : vector<2x1x20xf32> to vector<2x20xf32>
    %182 = vector.extract_strided_slice %159 {offsets = [0, 15, 0], sizes = [2, 1, 20], strides = [1, 1, 1]} : vector<2x24x20xf32> to vector<2x1x20xf32>
    %183 = vector.shape_cast %182 : vector<2x1x20xf32> to vector<2x20xf32>
    %184 = vector.extract_strided_slice %159 {offsets = [0, 18, 0], sizes = [2, 1, 20], strides = [1, 1, 1]} : vector<2x24x20xf32> to vector<2x1x20xf32>
    %185 = vector.shape_cast %184 : vector<2x1x20xf32> to vector<2x20xf32>
    %186 = vector.extract_strided_slice %159 {offsets = [0, 19, 0], sizes = [2, 1, 20], strides = [1, 1, 1]} : vector<2x24x20xf32> to vector<2x1x20xf32>
    %187 = vector.shape_cast %186 : vector<2x1x20xf32> to vector<2x20xf32>
    %188 = vector.extract_strided_slice %159 {offsets = [0, 20, 0], sizes = [2, 1, 20], strides = [1, 1, 1]} : vector<2x24x20xf32> to vector<2x1x20xf32>
    %189 = vector.shape_cast %188 : vector<2x1x20xf32> to vector<2x20xf32>
    %190 = vector.extract_strided_slice %159 {offsets = [0, 21, 0], sizes = [2, 1, 20], strides = [1, 1, 1]} : vector<2x24x20xf32> to vector<2x1x20xf32>
    %191 = vector.shape_cast %190 : vector<2x1x20xf32> to vector<2x20xf32>
    %192 = tpu.concatenate %161, %163, %165, %167, %169, %171, %173, %175, %177, %179, %181, %183, %185, %187, %189, %191 in 1 : vector<2x20xf32>, vector<2x20xf32>, vector<2x20xf32>, vector<2x20xf32>, vector<2x20xf32>, vector<2x20xf32>, vector<2x20xf32>, vector<2x20xf32>, vector<2x20xf32>, vector<2x20xf32>, vector<2x20xf32>, vector<2x20xf32>, vector<2x20xf32>, vector<2x20xf32>, vector<2x20xf32>, vector<2x20xf32> -> vector<2x320xf32>
    %c0_13 = arith.constant 0 : index
    %c0_14 = arith.constant 0 : index
    %193 = vector.load %arg7[%c0_13, %c0_14] : memref<320x200xf32, #tpu.memory_space<vmem>>, vector<320x200xf32>
    %cst_15 = arith.constant dense<0.000000e+00> : vector<2x200xf32>
    %194 = tpu.matmul %192, %193, %cst_15 {dimension_numbers = #tpu.dot_dimension_numbers<[1], [0], [0], [1], [0, 0, 1, 1], [], []>} : vector<2x320xf32>, vector<320x200xf32>, vector<2x200xf32> -> vector<2x200xf32>
    %c0_16 = arith.constant 0 : index
    %c0_17 = arith.constant 0 : index
    %195 = vector.load %arg2[%c0_16, %c0_17] : memref<2x1xf32, #tpu.memory_space<vmem>>, vector<2x1xf32>
    %c0_18 = arith.constant 0 : index
    %c0_19 = arith.constant 0 : index
    %196 = vector.load %arg8[%c0_18, %c0_19] : memref<1x200xf32, #tpu.memory_space<vmem>>, vector<1x200xf32>
    %197 = vector.broadcast %195 : vector<2x1xf32> to vector<2x200xf32>
    %198 = vector.broadcast %196 : vector<1x200xf32> to vector<2x200xf32>
    %199 = arith.mulf %197, %198 : vector<2x200xf32>
    %200 = arith.addf %194, %199 : vector<2x200xf32>
    %c0_20 = arith.constant 0 : index
    %c0_21 = arith.constant 0 : index
    %201 = vector.load %arg9[%c0_20, %c0_21] : memref<1x200xf32, #tpu.memory_space<vmem>>, vector<1x200xf32>
    %202 = vector.broadcast %201 : vector<1x200xf32> to vector<2x200xf32>
    %203 = arith.addf %200, %202 : vector<2x200xf32>
    %cst_22 = arith.constant 0.000000e+00 : f32
    %204 = vector.broadcast %cst_22 : f32 to vector<2x200xf32>
    %205 = arith.maximumf %203, %204 : vector<2x200xf32>
    %c0_23 = arith.constant 0 : index
    %c0_24 = arith.constant 0 : index
    %206 = vector.load %arg10[%c0_23, %c0_24] : memref<200x196xf32, #tpu.memory_space<vmem>>, vector<200x196xf32>
    %cst_25 = arith.constant dense<0.000000e+00> : vector<2x196xf32>
    %207 = tpu.matmul %205, %206, %cst_25 {dimension_numbers = #tpu.dot_dimension_numbers<[1], [0], [0], [1], [0, 0, 1, 1], [], []>} : vector<2x200xf32>, vector<200x196xf32>, vector<2x196xf32> -> vector<2x196xf32>
    %c0_26 = arith.constant 0 : index
    %c0_27 = arith.constant 0 : index
    %208 = vector.load %arg11[%c0_26, %c0_27] : memref<1x196xf32, #tpu.memory_space<vmem>>, vector<1x196xf32>
    %209 = vector.broadcast %208 : vector<1x196xf32> to vector<2x196xf32>
    %210 = arith.addf %207, %209 : vector<2x196xf32>
    %c0_28 = arith.constant 0 : index
    %c0_29 = arith.constant 0 : index
    %211 = vector.load %arg12[%c0_28, %c0_29] : memref<2x196xf32, #tpu.memory_space<vmem>>, vector<2x196xf32>
    tpu.vector_store %arg12[%c0_28, %c0_29], %210 {strides = array<i32>} : memref<2x196xf32, #tpu.memory_space<vmem>>, vector<2x196xf32>,
    return
  }
  func.func @transform_0(%arg0: i32) -> (i32, i32) {
    %c0_i32 = arith.constant 0 : i32
    %c0_i32_0 = arith.constant 0 : i32
    return %arg0, %c0_i32 : i32, i32
  }
  func.func @transform_1(%arg0: i32) -> (i32, i32) {
    %c0_i32 = arith.constant 0 : i32
    %c0_i32_0 = arith.constant 0 : i32
    return %arg0, %c0_i32 : i32, i32
  }
  func.func @transform_2(%arg0: i32) -> (i32, i32) {
    %c0_i32 = arith.constant 0 : i32
    %c0_i32_0 = arith.constant 0 : i32
    %c0_i32_1 = arith.constant 0 : i32
    return %c0_i32, %c0_i32_0 : i32, i32
  }
  func.func @transform_3(%arg0: i32) -> (i32, i32) {
    %c0_i32 = arith.constant 0 : i32
    %c0_i32_0 = arith.constant 0 : i32
    %c0_i32_1 = arith.constant 0 : i32
    return %c0_i32, %c0_i32_0 : i32, i32
  }
  func.func @transform_4(%arg0: i32) -> (i32, i32) {
    %c0_i32 = arith.constant 0 : i32
    %c0_i32_0 = arith.constant 0 : i32
    %c0_i32_1 = arith.constant 0 : i32
    return %c0_i32, %c0_i32_0 : i32, i32
  }
  func.func @transform_5(%arg0: i32) -> (i32, i32) {
    %c0_i32 = arith.constant 0 : i32
    %c0_i32_0 = arith.constant 0 : i32
    %c0_i32_1 = arith.constant 0 : i32
    return %c0_i32, %c0_i32_0 : i32, i32
  }
  func.func @transform_6(%arg0: i32) -> (i32, i32) {
    %c0_i32 = arith.constant 0 : i32
    %c0_i32_0 = arith.constant 0 : i32
    %c0_i32_1 = arith.constant 0 : i32
    return %c0_i32, %c0_i32_0 : i32, i32
  }
  func.func @transform_7(%arg0: i32) -> (i32, i32) {
    %c0_i32 = arith.constant 0 : i32
    %c0_i32_0 = arith.constant 0 : i32
    %c0_i32_1 = arith.constant 0 : i32
    return %c0_i32, %c0_i32_0 : i32, i32
  }
  func.func @transform_8(%arg0: i32) -> (i32, i32) {
    %c0_i32 = arith.constant 0 : i32
    %c0_i32_0 = arith.constant 0 : i32
    %c0_i32_1 = arith.constant 0 : i32
    return %c0_i32, %c0_i32_0 : i32, i32
  }
  func.func @transform_9(%arg0: i32) -> (i32, i32) {
    %c0_i32 = arith.constant 0 : i32
    %c0_i32_0 = arith.constant 0 : i32
    %c0_i32_1 = arith.constant 0 : i32
    return %c0_i32, %c0_i32_0 : i32, i32
  }
  func.func @transform_10(%arg0: i32) -> (i32, i32) {
    %c0_i32 = arith.constant 0 : i32
    %c0_i32_0 = arith.constant 0 : i32
    %c0_i32_1 = arith.constant 0 : i32
    return %c0_i32, %c0_i32_0 : i32, i32
  }
  func.func @transform_11(%arg0: i32) -> (i32, i32) {
    %c0_i32 = arith.constant 0 : i32
    %c0_i32_0 = arith.constant 0 : i32
    return %arg0, %c0_i32 : i32, i32
  }
}

</mosaic_0001>

<bundles_post_ra>
// kernel: box_agent_forward.1
= control target key start
LH: loop header
LB: loop body
LE: loop exit
PB: predicated region body
PF: predicated region fallthrough
CT: control target
= control target key end

     0   :  { %vm13553_vm0 = vcmask 408576   ;;  %vm13531_vm1 = vcmask 1041408   ;;  %s13219_s0 = inlined_call_operand.vmem [shape: f32[1152,50], index: 0, kind: input, shape index: {}]   ;;  %s13220_s1 = inlined_call_operand.vmem [shape: f32[2,1], index: 1, kind: input, shape index: {}]   ;;  %s13221_s2 = inlined_call_operand.vmem [shape: f32[50,10], index: 2, kind: input, shape index: {}]   ;;  %s13222_s3 = inlined_call_operand.vmem [shape: f32[1,10], index: 3, kind: input, shape index: {}]   ;;  %s13223_s4 = inlined_call_operand.vmem [shape: f32[250,20], index: 4, kind: input, shape index: {}]   ;;  %s13224_s5 = inlined_call_operand.vmem [shape: f32[1,20], index: 5, kind: input, shape index: {}]   ;;  %s13225_s6 = inlined_call_operand.vmem [shape: f32[320,200], index: 6, kind: input, shape index: {}]   ;;  %s13226_s7 = inlined_call_operand.vmem [shape: f32[1,200], index: 7, kind: input, shape index: {}]   ;;  %s13227_s8 = inlined_call_operand.vmem [shape: f32[1,200], index: 8, kind: input, shape index: {}]   ;;  %s13228_s9 = inlined_call_operand.vmem [shape: f32[200,196], index: 9, kind: input, shape index: {}]   ;;  %s13229_s10 = inlined_call_operand.vmem [shape: f32[1,196], index: 10, kind: input, shape index: {}]   ;;  %s13230_s11 = inlined_call_operand.hbm [shape: f32[2,196], index: 11, kind: output, shape index: {}]  }
   0x1   :  { %v183_v0 = vld [vmem:[%s13221_s2] sm:$0xff]  ;;  %v184_v1 = vld [vmem:[%s13221_s2 + $0x8] sm:$0xff]  ;;  %v185_v2 = vld [vmem:[%s13221_s2 + $0x10] sm:$0xff] }
   0x2   :  { %v6064_v3 = vpack.c.bf16 %v184_v1, %v183_v0  ;;  %v186_v4 = vld [vmem:[%s13221_s2 + $0x18] sm:$0xff]  ;;  %v187_v6 = vld [vmem:[%s13221_s2 + $0x20] sm:$0xff]  ;;  %v188_v7 = vld [vmem:[%s13221_s2 + $0x28] sm:$0xff] }
   0x3   :  { %v6068_v5 = vpack.c.bf16 %v186_v4, %v185_v2  ;;  %v39_v8 = vld [vmem:[%s13219_s0] sm:$0xff]  ;;  %v6072_v9 = vpack.c.bf16 %v188_v7, %v187_v6  ;;  %v189_v10 = vld [vmem:[%s13221_s2 + $0x30] sm:$0x3]  ;;  %v40_v11 = vld [vmem:[%s13219_s0 + $0x8] sm:$0xff] }
   0x4   :  { %6065 = vmatprep.subr.bf16.mxu0 %v6064_v3  ;;  %5848 = vmatprep.mubr.msk.f32.mxu0 %vm13553_vm0, %v39_v8  ;;  %v41_v12 = vld [vmem:[%s13219_s0 + $0x10] sm:$0xff]  ;;  %v42_v13 = vld [vmem:[%s13219_s0 + $0x18] sm:$0xff]  ;;  %v43_v14 = vld [vmem:[%s13219_s0 + $0x20] sm:$0xff] }
   0x5   :  { %6067 = vmatpush3.bf16.msra.mxu0 %v6064_v3  ;;  %v44_v15 = vld [vmem:[%s13219_s0 + $0x28] sm:$0xff]  ;;  %v45_v16 = vld [vmem:[%s13219_s0 + $0x30] sm:$0xff]  ;;  %v46_v17 = vld [vmem:[%s13219_s0 + $0x38] sm:$0xff] }
   0x6   :  { %6069 = vmatprep.subr.bf16.mxu0 %v6068_v5 }
   0x9   :  { %6071 = vmatpush3.bf16.msra.mxu0 %v6068_v5 }
   0xa   :  { %6073 = vmatprep.subr.bf16.mxu0 %v6072_v9 }
   0xd   :  { %6075 = vmatpush3.bf16.msra.mxu0 %v6072_v9 }
   0xe   :  { %5846 = vmatprep.subr.msk.mxu0 %vm13531_vm1, %v189_v10 }
  0x11   :  { %5847 = vmatpush3.msk.msra.mxu0 %vm13531_vm1, %v189_v10 }
  0x12   :  { %5849 = vmatmul.mubr.msk.f32.vlgmr.msra.gmra.mrb[0].mxu0 %vm13553_vm0, %v40_v11 }
  0x13   :  { %5851 = vmatprep.mubr.msk.f32.mxu0 %vm13553_vm0, %v41_v12 }
  0x16   :  { %5852 = vmatmul.mubr.msk.f32.gmra.mrb[2].mxu0 %vm13553_vm0, %v42_v13 }
  0x17   :  { %5854 = vmatprep.mubr.msk.f32.mxu0 %vm13553_vm0, %v43_v14 }
  0x1a   :  { %5855 = vmatmul.mubr.msk.f32.gmra.mrb[4].mxu0 %vm13553_vm0, %v44_v15 }
  0x1b   :  { %5857 = vmatprep.mubr.msk.f32.mxu0 %vm13553_vm0, %v45_v16 }
  0x1c   :  { %16 = vsyncpa [#allocation3], 0  ;;  %v47_v18 = vld [vmem:[%s13219_s0 + $0x40] sm:$0xff]  ;;  %v48_v19 = vld [vmem:[%s13219_s0 + $0x48] sm:$0xff]  ;;  %vm13485_vm2 = vcmask 1040384   ;;  %s6808_s21 = smov 50  }
  0x1d   :  { %v49_v20 = vld [vmem:[%s13219_s0 + $0x50] sm:$0xff]  ;;  %v50_v21 = vld [vmem:[%s13219_s0 + $0x58] sm:$0xff]  ;;  %v51_v22 = vld [vmem:[%s13219_s0 + $0x60] sm:$0xff]  ;;  %vm13652_vm3 = vcmask 1046528   ;;  %s6809_s22 = smov 120   ;;  %vm13532_vm4 = vcmask 1044480  }
  0x1e   :  { %5858 = vmatmul.mubr.msk.f32.gmra.mrb[6].mxu0 %vm13553_vm0, %v46_v17  ;;  %v52_v23 = vld [vmem:[%s13219_s0 + $0x68] sm:$0xff]  ;;  %v53_v24 = vld [vmem:[%s13219_s0 + $0x70] sm:$0xff]  ;;  %v54_v25 = vld [vmem:[%s13219_s0 + $0x78] sm:$0xff]  ;;  %vm13530_vm5 = vcmask 1045504   ;;  %s6810_s23 = smov 70   ;;  %s6811_s24 = smov 20  }
  0x1f   :  { %5860 = vmatprep.mubr.msk.f32.mxu0 %vm13553_vm0, %v47_v18  ;;  %v55_v26 = vld [vmem:[%s13219_s0 + $0x80] sm:$0xff]  ;;  %v56_v27 = vld [vmem:[%s13219_s0 + $0x88] sm:$0xff]  ;;  %v57_v28 = vld [vmem:[%s13219_s0 + $0x90] sm:$0xff]  ;;  %s6812_s25 = smov 40   ;;  %s6813_s26 = smov 100   ;;  %vm1571_vm6 = vcmask 1043456  }
  0x20   :  { %v58_v29 = vld [vmem:[%s13219_s0 + $0x98] sm:$0xff]  ;;  %v59_v30 = vld [vmem:[%s13219_s0 + $0xa0] sm:$0xff]  ;;  %v60_v31 = vld [vmem:[%s13219_s0 + $0xa8] sm:$0xff]  ;;  %s6814_s27 = smov 60   ;;  %s6815_s28 = smov 80   ;;  %vm1645_vm7 = vcmask 1042432  }
  0x21   :  { %v61_v32 = vld [vmem:[%s13219_s0 + $0xb0] sm:$0xff]  ;;  %v62_v33 = vld [vmem:[%s13219_s0 + $0xb8] sm:$0xff]  ;;  %v63_v34 = vld [vmem:[%s13219_s0 + $0xc0] sm:$0xff]  ;;  %s6816_s29 = smov 10   ;;  %s6817_s30 = smov 30   ;;  %vm2055_vm8 = vcmask 80896  }
  0x22   :  { %5861 = vmatmul.mubr.msk.f32.gmra.mrb[8].mxu0 %vm13553_vm0, %v48_v19  ;;  %v64_v35 = vld [vmem:[%s13219_s0 + $0xc8] sm:$0xff]  ;;  %v65_v36 = vld [vmem:[%s13219_s0 + $0xd0] sm:$0xff]  ;;  %v66_v37 = vld [vmem:[%s13219_s0 + $0xd8] sm:$0xff]  ;;  %s6818_s12 = smov 110   ;;  %s6819_s13 = smov 2   ;;  %vm2062_vm9 = vcmask 162816  }
  0x23   :  { %5863 = vmatprep.mubr.msk.f32.mxu0 %vm13553_vm0, %v49_v20  ;;  %v67_v38 = vld [vmem:[%s13219_s0 + $0xe0] sm:$0xff]  ;;  %v68_v39 = vld [vmem:[%s13219_s0 + $0xe8] sm:$0xff]  ;;  %v69_v40 = vld [vmem:[%s13219_s0 + $0xf0] sm:$0xff]  ;;  %s6821_s16 = smov 22   ;;  %vm2069_vm10 = vcmask 244736   ;;  %vm13547_vm11 = vcmask 326656  }
  0x24   :  { %v70_v41 = vld [vmem:[%s13219_s0 + $0xf8] sm:$0xff]  ;;  %v71_v42 = vld [vmem:[%s13219_s0 + $0x100] sm:$0xff]  ;;  %v72_v43 = vld [vmem:[%s13219_s0 + $0x108] sm:$0xff]  ;;  %vm13557_vm12 = vcmask 490496   ;;  %vm13556_vm13 = vcmask 572416   ;;  %vm2103_vm14 = vcmask 654336  }
  0x25   :  { %v73_v44 = vld [vmem:[%s13219_s0 + $0x110] sm:$0xff]  ;;  %v74_v45 = vld [vmem:[%s13219_s0 + $0x118] sm:$0xff]  ;;  %v75_v46 = vld [vmem:[%s13219_s0 + $0x120] sm:$0xff]  ;;  %s6824_s2 = smov 32   ;;  %vm6825_vm15 = vmmov 1   ;;  %s6826_s17 = smov 52  }
  0x26   :  { %5864 = vmatmul.mubr.msk.f32.gmra.mrb[10].mxu0 %vm13553_vm0, %v50_v21  ;;  %v76_v47 = vld [vmem:[%s13219_s0 + $0x128] sm:$0xff]  ;;  %v77_v48 = vld [vmem:[%s13219_s0 + $0x130] sm:$0xff]  ;;  %v78_v49 = vld [vmem:[%s13219_s0 + $0x138] sm:$0xff]  ;;  %s6829_s20 = smov 92  }
  0x27   :  { %5866 = vmatprep.mubr.msk.f32.mxu0 %vm13553_vm0, %v51_v22  ;;  %v79_v50 = vld [vmem:[%s13219_s0 + $0x140] sm:$0xff]  ;;  %v80_v51 = vld [vmem:[%s13219_s0 + $0x148] sm:$0xff]  ;;  %v81_v52 = vld [vmem:[%s13219_s0 + $0x150] sm:$0xff] }
  0x28   :  { %v82_v53 = vld [vmem:[%s13219_s0 + $0x158] sm:$0xff]  ;;  %v83_v54 = vld [vmem:[%s13219_s0 + $0x160] sm:$0xff]  ;;  %v84_v55 = vld [vmem:[%s13219_s0 + $0x168] sm:$0xff] }
  0x29   :  { %v85_v56 = vld [vmem:[%s13219_s0 + $0x170] sm:$0xff]  ;;  %v86_v57 = vld [vmem:[%s13219_s0 + $0x178] sm:$0xff]  ;;  %v87_v58 = vld [vmem:[%s13219_s0 + $0x180] sm:$0xff] }
  0x2a   :  { %5867 = vmatmul.mubr.msk.f32.gmra.mrb[12].mxu0 %vm13553_vm0, %v52_v23  ;;  %v88_v59 = vld [vmem:[%s13219_s0 + $0x188] sm:$0xff]  ;;  %v89_v60 = vld [vmem:[%s13219_s0 + $0x190] sm:$0xff]  ;;  %v90_v61 = vld [vmem:[%s13219_s0 + $0x198] sm:$0xff] }
  0x2b   :  { %5869 = vmatprep.mubr.msk.f32.mxu0 %vm13553_vm0, %v53_v24  ;;  %v91_v62 = vld [vmem:[%s13219_s0 + $0x1a0] sm:$0xff]  ;;  %v92_v63 = vld [vmem:[%s13219_s0 + $0x1a8] sm:$0xff]  ;;  %v93_v0 = vld [vmem:[%s13219_s0 + $0x1b0] sm:$0xff] }
  0x2c   :  { %v94_v1 = vld [vmem:[%s13219_s0 + $0x1b8] sm:$0xff]  ;;  %v95_v2 = vld [vmem:[%s13219_s0 + $0x1c0] sm:$0xff]  ;;  %v96_v3 = vld [vmem:[%s13219_s0 + $0x1c8] sm:$0xff] }
  0x2d   :  { %v97_v4 = vld [vmem:[%s13219_s0 + $0x1d0] sm:$0xff]  ;;  %v98_v5 = vld [vmem:[%s13219_s0 + $0x1d8] sm:$0xff]  ;;  %v99_v6 = vld [vmem:[%s13219_s0 + $0x1e0] sm:$0xff] }
  0x2e   :  { %5870 = vmatmul.mubr.msk.f32.gmra.mrb[14].mxu0 %vm13553_vm0, %v54_v25  ;;  %v100_v7 = vld [vmem:[%s13219_s0 + $0x1e8] sm:$0xff]  ;;  %v101_v8 = vld [vmem:[%s13219_s0 + $0x1f0] sm:$0xff]  ;;  %v102_v9 = vld [vmem:[%s13219_s0 + $0x1f8] sm:$0xff] }
  0x2f   :  { %5872 = vmatprep.mubr.msk.f32.mxu0 %vm13553_vm0, %v55_v26  ;;  %v103_v10 = vld [vmem:[%s13219_s0 + $0x200] sm:$0xff]  ;;  %v104_v11 = vld [vmem:[%s13219_s0 + $0x208] sm:$0xff]  ;;  %v105_v12 = vld [vmem:[%s13219_s0 + $0x210] sm:$0xff] }
  0x30   :  { %v106_v13 = vld [vmem:[%s13219_s0 + $0x218] sm:$0xff]  ;;  %v107_v14 = vld [vmem:[%s13219_s0 + $0x220] sm:$0xff]  ;;  %v108_v15 = vld [vmem:[%s13219_s0 + $0x228] sm:$0xff] }
  0x31   :  { %v109_v16 = vld [vmem:[%s13219_s0 + $0x230] sm:$0xff]  ;;  %v110_v17 = vld [vmem:[%s13219_s0 + $0x238] sm:$0xff]  ;;  %v111_v18 = vld [vmem:[%s13219_s0 + $0x240] sm:$0xff] }
  0x32   :  { %5873 = vmatmul.mubr.msk.f32.gmra.mrb[16].mxu0 %vm13553_vm0, %v56_v27  ;;  %v112_v19 = vld [vmem:[%s13219_s0 + $0x248] sm:$0xff]  ;;  %v113_v20 = vld [vmem:[%s13219_s0 + $0x250] sm:$0xff]  ;;  %v114_v21 = vld [vmem:[%s13219_s0 + $0x258] sm:$0xff] }
  0x33   :  { %5875 = vmatprep.mubr.msk.f32.mxu0 %vm13553_vm0, %v57_v28  ;;  %v115_v22 = vld [vmem:[%s13219_s0 + $0x260] sm:$0xff]  ;;  %v116_v23 = vld [vmem:[%s13219_s0 + $0x268] sm:$0xff]  ;;  %v117_v24 = vld [vmem:[%s13219_s0 + $0x270] sm:$0xff] }
  0x34   :  { %v118_v25 = vld [vmem:[%s13219_s0 + $0x278] sm:$0xff]  ;;  %v119_v26 = vld [vmem:[%s13219_s0 + $0x280] sm:$0xff]  ;;  %v120_v27 = vld [vmem:[%s13219_s0 + $0x288] sm:$0xff] }
  0x35   :  { %v121_v28 = vld [vmem:[%s13219_s0 + $0x290] sm:$0xff] }
  0x36   :  { %5876 = vmatmul.mubr.msk.f32.gmra.mrb[18].mxu0 %vm13553_vm0, %v58_v29  ;;  %v122_v29 = vld [vmem:[%s13219_s0 + $0x298] sm:$0xff] }
  0x37   :  { %5878 = vmatprep.mubr.msk.f32.mxu0 %vm13553_vm0, %v59_v30  ;;  %v123_v30 = vld [vmem:[%s13219_s0 + $0x2a0] sm:$0xff] }
  0x3a   :  { %5879 = vmatmul.mubr.msk.f32.gmra.mrb[20].mxu0 %vm13553_vm0, %v60_v31  ;;  %v124_v31 = vld [vmem:[%s13219_s0 + $0x2a8] sm:$0xff] }
  0x3b   :  { %5881 = vmatprep.mubr.msk.f32.mxu0 %vm13553_vm0, %v61_v32  ;;  %v125_v32 = vld [vmem:[%s13219_s0 + $0x2b0] sm:$0xff] }
  0x3e   :  { %5882 = vmatmul.mubr.msk.f32.gmra.mrb[22].mxu0 %vm13553_vm0, %v62_v33  ;;  %v126_v33 = vld [vmem:[%s13219_s0 + $0x2b8] sm:$0xff] }
  0x3f   :  { %5884 = vmatprep.mubr.msk.f32.mxu0 %vm13553_vm0, %v63_v34  ;;  %v127_v34 = vld [vmem:[%s13219_s0 + $0x2c0] sm:$0xff] }
  0x42   :  { %5885 = vmatmul.mubr.msk.f32.gmra.mrb[24].mxu0 %vm13553_vm0, %v64_v35  ;;  %v128_v35 = vld [vmem:[%s13219_s0 + $0x2c8] sm:$0xff] }
  0x43   :  { %5887 = vmatprep.mubr.msk.f32.mxu0 %vm13553_vm0, %v65_v36  ;;  %v129_v36 = vld [vmem:[%s13219_s0 + $0x2d0] sm:$0xff] }
  0x46   :  { %5888 = vmatmul.mubr.msk.f32.gmra.mrb[26].mxu0 %vm13553_vm0, %v66_v37  ;;  %v130_v37 = vld [vmem:[%s13219_s0 + $0x2d8] sm:$0xff] }
  0x47   :  { %5890 = vmatprep.mubr.msk.f32.mxu0 %vm13553_vm0, %v67_v38  ;;  %v131_v38 = vld [vmem:[%s13219_s0 + $0x2e0] sm:$0xff] }
  0x4a   :  { %5891 = vmatmul.mubr.msk.f32.gmra.mrb[28].mxu0 %vm13553_vm0, %v68_v39  ;;  %v132_v39 = vld [vmem:[%s13219_s0 + $0x2e8] sm:$0xff] }
  0x4b   :  { %5893 = vmatprep.mubr.msk.f32.mxu0 %vm13553_vm0, %v69_v40  ;;  %v133_v40 = vld [vmem:[%s13219_s0 + $0x2f0] sm:$0xff] }
  0x4e   :  { %5894 = vmatmul.mubr.msk.f32.gmra.mrb[30].mxu0 %vm13553_vm0, %v70_v41  ;;  %v134_v41 = vld [vmem:[%s13219_s0 + $0x2f8] sm:$0xff] }
  0x4f   :  { %5896 = vmatprep.mubr.msk.f32.mxu0 %vm13553_vm0, %v71_v42  ;;  %v135_v42 = vld [vmem:[%s13219_s0 + $0x300] sm:$0xff] }
  0x52   :  { %5897 = vmatmul.mubr.msk.f32.gmra.mrb[32].mxu0 %vm13553_vm0, %v72_v43  ;;  %v136_v43 = vld [vmem:[%s13219_s0 + $0x308] sm:$0xff] }
  0x53   :  { %5899 = vmatprep.mubr.msk.f32.mxu0 %vm13553_vm0, %v73_v44  ;;  %v137_v44 = vld [vmem:[%s13219_s0 + $0x310] sm:$0xff] }
  0x56   :  { %5900 = vmatmul.mubr.msk.f32.gmra.mrb[34].mxu0 %vm13553_vm0, %v74_v45  ;;  %v138_v45 = vld [vmem:[%s13219_s0 + $0x318] sm:$0xff] }
  0x57   :  { %5902 = vmatprep.mubr.msk.f32.mxu0 %vm13553_vm0, %v75_v46  ;;  %v139_v46 = vld [vmem:[%s13219_s0 + $0x320] sm:$0xff] }
  0x5a   :  { %5903 = vmatmul.mubr.msk.f32.gmra.mrb[36].mxu0 %vm13553_vm0, %v76_v47  ;;  %v140_v47 = vld [vmem:[%s13219_s0 + $0x328] sm:$0xff] }
  0x5b   :  { %5905 = vmatprep.mubr.msk.f32.mxu0 %vm13553_vm0, %v77_v48  ;;  %v141_v48 = vld [vmem:[%s13219_s0 + $0x330] sm:$0xff] }
  0x5e   :  { %5906 = vmatmul.mubr.msk.f32.gmra.mrb[38].mxu0 %vm13553_vm0, %v78_v49  ;;  %v142_v49 = vld [vmem:[%s13219_s0 + $0x338] sm:$0xff] }
  0x5f   :  { %5908 = vmatprep.mubr.msk.f32.mxu0 %vm13553_vm0, %v79_v50  ;;  %v143_v50 = vld [vmem:[%s13219_s0 + $0x340] sm:$0xff] }
  0x62   :  { %5909 = vmatmul.mubr.msk.f32.gmra.mrb[40].mxu0 %vm13553_vm0, %v80_v51  ;;  %v144_v51 = vld [vmem:[%s13219_s0 + $0x348] sm:$0xff] }
  0x63   :  { %5911 = vmatprep.mubr.msk.f32.mxu0 %vm13553_vm0, %v81_v52  ;;  %v145_v52 = vld [vmem:[%s13219_s0 + $0x350] sm:$0xff] }
  0x66   :  { %5912 = vmatmul.mubr.msk.f32.gmra.mrb[42].mxu0 %vm13553_vm0, %v82_v53  ;;  %v146_v53 = vld [vmem:[%s13219_s0 + $0x358] sm:$0xff] }
  0x67   :  { %5914 = vmatprep.mubr.msk.f32.mxu0 %vm13553_vm0, %v83_v54  ;;  %v147_v54 = vld [vmem:[%s13219_s0 + $0x360] sm:$0xff] }
  0x6a   :  { %5915 = vmatmul.mubr.msk.f32.gmra.mrb[44].mxu0 %vm13553_vm0, %v84_v55 }
  0x6b   :  { %5917 = vmatprep.mubr.msk.f32.mxu0 %vm13553_vm0, %v85_v56 }
  0x6e   :  { %5918 = vmatmul.mubr.msk.f32.gmra.mrb[46].mxu0 %vm13553_vm0, %v86_v57  ;;  %v148_v57 = vld [vmem:[%s13219_s0 + $0x368] sm:$0xff] }
  0x6f   :  { %5920 = vmatprep.mubr.msk.f32.mxu0 %vm13553_vm0, %v87_v58  ;;  %v149_v58 = vld [vmem:[%s13219_s0 + $0x370] sm:$0xff] }
  0x72   :  { %5921 = vmatmul.mubr.msk.f32.gmra.mrb[48].mxu0 %vm13553_vm0, %v88_v59 }
  0x73   :  { %5923 = vmatprep.mubr.msk.f32.mxu0 %vm13553_vm0, %v89_v60 }
  0x76   :  { %5924 = vmatmul.mubr.msk.f32.gmra.mrb[50].mxu0 %vm13553_vm0, %v90_v61  ;;  %v150_v61 = vld [vmem:[%s13219_s0 + $0x378] sm:$0xff] }
  0x77   :  { %5926 = vmatprep.mubr.msk.f32.mxu0 %vm13553_vm0, %v91_v62  ;;  %v151_v62 = vld [vmem:[%s13219_s0 + $0x380] sm:$0xff] }
  0x7a   :  { %5927 = vmatmul.mubr.msk.f32.gmra.mrb[52].mxu0 %vm13553_vm0, %v92_v63 }
  0x7b   :  { %5929 = vmatprep.mubr.msk.f32.mxu0 %vm13553_vm0, %v93_v0 }
  0x7e   :  { %5930 = vmatmul.mubr.msk.f32.gmra.mrb[54].mxu0 %vm13553_vm0, %v94_v1  ;;  %v152_v1 = vld [vmem:[%s13219_s0 + $0x388] sm:$0xff] }
  0x7f   :  { %5932 = vmatprep.mubr.msk.f32.mxu0 %vm13553_vm0, %v95_v2  ;;  %v153_v2 = vld [vmem:[%s13219_s0 + $0x390] sm:$0xff] }
  0x82   :  { %5933 = vmatmul.mubr.msk.f32.gmra.mrb[56].mxu0 %vm13553_vm0, %v96_v3 }
  0x83   :  { %5935 = vmatprep.mubr.msk.f32.mxu0 %vm13553_vm0, %v97_v4 }
  0x86   :  { %5936 = vmatmul.mubr.msk.f32.gmra.mrb[58].mxu0 %vm13553_vm0, %v98_v5  ;;  %v154_v5 = vld [vmem:[%s13219_s0 + $0x398] sm:$0xff] }
  0x87   :  { %5938 = vmatprep.mubr.msk.f32.mxu0 %vm13553_vm0, %v99_v6  ;;  %v155_v6 = vld [vmem:[%s13219_s0 + $0x3a0] sm:$0xff] }
  0x8a   :  { %5939 = vmatmul.mubr.msk.f32.gmra.mrb[60].mxu0 %vm13553_vm0, %v100_v7 }
  0x8b   :  { %5941 = vmatprep.mubr.msk.f32.mxu0 %vm13553_vm0, %v101_v8 }
  0x8e   :  { %5942 = vmatmul.mubr.msk.f32.gmra.mrb[62].mxu0 %vm13553_vm0, %v102_v9  ;;  %v156_v9 = vld [vmem:[%s13219_s0 + $0x3a8] sm:$0xff] }
  0x8f   :  { %5944 = vmatprep.mubr.msk.f32.mxu0 %vm13553_vm0, %v103_v10  ;;  %v157_v10 = vld [vmem:[%s13219_s0 + $0x3b0] sm:$0xff] }
  0x92   :  { %5945 = vmatmul.mubr.msk.f32.gmra.mrb[64].mxu0 %vm13553_vm0, %v104_v11 }
  0x93   :  { %5947 = vmatprep.mubr.msk.f32.mxu0 %vm13553_vm0, %v105_v12 }
  0x96   :  { %5948 = vmatmul.mubr.msk.f32.gmra.mrb[66].mxu0 %vm13553_vm0, %v106_v13  ;;  %v158_v13 = vld [vmem:[%s13219_s0 + $0x3b8] sm:$0xff] }
  0x97   :  { %5950 = vmatprep.mubr.msk.f32.mxu0 %vm13553_vm0, %v107_v14  ;;  %v159_v14 = vld [vmem:[%s13219_s0 + $0x3c0] sm:$0xff] }
  0x9a   :  { %5951 = vmatmul.mubr.msk.f32.gmra.mrb[68].mxu0 %vm13553_vm0, %v108_v15 }
  0x9b   :  { %5953 = vmatprep.mubr.msk.f32.mxu0 %vm13553_vm0, %v109_v16 }
  0x9e   :  { %5954 = vmatmul.mubr.msk.f32.gmra.mrb[70].mxu0 %vm13553_vm0, %v110_v17  ;;  %v160_v17 = vld [vmem:[%s13219_s0 + $0x3c8] sm:$0xff] }
  0x9f   :  { %5956 = vmatprep.mubr.msk.f32.mxu0 %vm13553_vm0, %v111_v18  ;;  %v161_v18 = vld [vmem:[%s13219_s0 + $0x3d0] sm:$0xff] }
  0xa2   :  { %5957 = vmatmul.mubr.msk.f32.gmra.mrb[72].mxu0 %vm13553_vm0, %v112_v19 }
  0xa3   :  { %5959 = vmatprep.mubr.msk.f32.mxu0 %vm13553_vm0, %v113_v20 }
  0xa6   :  { %5960 = vmatmul.mubr.msk.f32.gmra.mrb[74].mxu0 %vm13553_vm0, %v114_v21  ;;  %v162_v21 = vld [vmem:[%s13219_s0 + $0x3d8] sm:$0xff] }
  0xa7   :  { %5962 = vmatprep.mubr.msk.f32.mxu0 %vm13553_vm0, %v115_v22  ;;  %v163_v22 = vld [vmem:[%s13219_s0 + $0x3e0] sm:$0xff] }
  0xaa   :  { %5963 = vmatmul.mubr.msk.f32.gmra.mrb[76].mxu0 %vm13553_vm0, %v116_v23 }
  0xab   :  { %5965 = vmatprep.mubr.msk.f32.mxu0 %vm13553_vm0, %v117_v24 }
  0xae   :  { %5966 = vmatmul.mubr.msk.f32.gmra.mrb[78].mxu0 %vm13553_vm0, %v118_v25  ;;  %v7451_v25 = vld [vmem:[%s13222_s3] ss:$0 sm:$0xff] }
  0xaf   :  { %5968 = vmatprep.mubr.msk.f32.mxu0 %vm13553_vm0, %v119_v26  ;;  %v164_v26 = vld [vmem:[%s13219_s0 + $0x3e8] sm:$0xff] }
  0xb2   :  { %5969 = vmatmul.mubr.msk.f32.gmra.mrb[80].mxu0 %vm13553_vm0, %v120_v27  ;;  %v165_v27 = vld [vmem:[%s13219_s0 + $0x3f0] sm:$0xff] }
  0xb3   :  { %5971 = vmatprep.mubr.msk.f32.mxu0 %vm13553_vm0, %v121_v28 }
  0xb6   :  { %5972 = vmatmul.mubr.msk.f32.gmra.mrb[82].mxu0 %vm13553_vm0, %v122_v29 }
  0xb7   :  { %5974 = vmatprep.mubr.msk.f32.mxu0 %vm13553_vm0, %v123_v30 }
  0xba   :  { %5975 = vmatmul.mubr.msk.f32.gmra.mrb[84].mxu0 %vm13553_vm0, %v124_v31 }
  0xbb   :  { %5977 = vmatprep.mubr.msk.f32.mxu0 %vm13553_vm0, %v125_v32 }
  0xbe   :  { %5978 = vmatmul.mubr.msk.f32.gmra.mrb[86].mxu0 %vm13553_vm0, %v126_v33 }
  0xbf   :  { %5980 = vmatprep.mubr.msk.f32.mxu0 %vm13553_vm0, %v127_v34  ;;  %v166_v34 = vld [vmem:[%s13219_s0 + $0x3f8] sm:$0xff] }
  0xc2   :  { %5981 = vmatmul.mubr.msk.f32.gmra.mrb[88].mxu0 %vm13553_vm0, %v128_v35 }
  0xc3   :  { %5983 = vmatprep.mubr.msk.f32.mxu0 %vm13553_vm0, %v129_v36  ;;  %v167_v36 = vld [vmem:[%s13219_s0 + $0x400] sm:$0xff] }
  0xc6   :  { %5984 = vmatmul.mubr.msk.f32.gmra.mrb[90].mxu0 %vm13553_vm0, %v130_v37 }
  0xc7   :  { %5986 = vmatprep.mubr.msk.f32.mxu0 %vm13553_vm0, %v131_v38 }
  0xca   :  { %5987 = vmatmul.mubr.msk.f32.gmra.mrb[92].mxu0 %vm13553_vm0, %v132_v39 }
  0xcb   :  { %5989 = vmatprep.mubr.msk.f32.mxu0 %vm13553_vm0, %v133_v40 }
  0xce   :  { %5990 = vmatmul.mubr.msk.f32.gmra.mrb[94].mxu0 %vm13553_vm0, %v134_v41 }
  0xcf   :  { %5992 = vmatprep.mubr.msk.f32.mxu0 %vm13553_vm0, %v135_v42 }
  0xd2   :  { %5993 = vmatmul.mubr.msk.f32.gmra.mrb[96].mxu0 %vm13553_vm0, %v136_v43 }
  0xd3   :  { %5995 = vmatprep.mubr.msk.f32.mxu0 %vm13553_vm0, %v137_v44  ;;  %v168_v44 = vld [vmem:[%s13219_s0 + $0x408] sm:$0xff] }
  0xd6   :  { %5996 = vmatmul.mubr.msk.f32.gmra.mrb[98].mxu0 %vm13553_vm0, %v138_v45 }
  0xd7   :  { %5998 = vmatprep.mubr.msk.f32.mxu0 %vm13553_vm0, %v139_v46  ;;  %v169_v46 = vld [vmem:[%s13219_s0 + $0x410] sm:$0xff] }
  0xda   :  { %5999 = vmatmul.mubr.msk.f32.gmra.mrb[100].mxu0 %vm13553_vm0, %v140_v47 }
  0xdb   :  { %6001 = vmatprep.mubr.msk.f32.mxu0 %vm13553_vm0, %v141_v48 }
  0xde   :  { %6002 = vmatmul.mubr.msk.f32.gmra.mrb[102].mxu0 %vm13553_vm0, %v142_v49 }
  0xdf   :  { %6004 = vmatprep.mubr.msk.f32.mxu0 %vm13553_vm0, %v143_v50 }
  0xe2   :  { %6005 = vmatmul.mubr.msk.f32.gmra.mrb[104].mxu0 %vm13553_vm0, %v144_v51 }
  0xe3   :  { %6007 = vmatprep.mubr.msk.f32.mxu0 %vm13553_vm0, %v145_v52 }
  0xe5   :  { %v5850_v55 = vpop.f32.mrb[0].mxu0 }
  0xe6   :  { %v700_v56 = vpop.f32.mrb[1].mxu0  ;;  %6008 = vmatmul.mubr.msk.f32.gmra.mrb[106].mxu0 %vm13553_vm0, %v146_v53  ;;  %v7461_v29 = vadd.f32 %v5850_v55, %v7451_v25 }
  0xe7   :  { %6010 = vmatprep.mubr.msk.f32.mxu0 %vm13553_vm0, %v147_v54  ;;  %v7468_v32 = vadd.f32 %v7451_v25, %v700_v56  ;;  %v170_v54 = vld [vmem:[%s13219_s0 + $0x418] sm:$0xff]  ;;  %v171_v56 = vld [vmem:[%s13219_s0 + $0x420] sm:$0xff] }
  0xe9   :  { %v5853_v59 = vpop.f32.mrb[2].mxu0 }
  0xea   :  { %v7361_v60 = vpop.f32.mrb[3].mxu0  ;;  %6011 = vmatmul.mubr.msk.f32.gmra.mrb[108].mxu0 %vm13553_vm0, %v148_v57  ;;  %v7485_v39 = vadd.f32 %v5853_v59, %v7451_v25 }
  0xeb   :  { %6013 = vmatprep.mubr.msk.f32.mxu0 %vm13553_vm0, %v149_v58  ;;  %v7493_v42 = vadd.f32 %v7451_v25, %v7361_v60 }
  0xed   :  { %v7371_v63 = vpop.f32.mrb[4].mxu0 }
  0xee   :  { %v7373_v0 = vpop.f32.mrb[5].mxu0  ;;  %6014 = vmatmul.mubr.msk.f32.gmra.mrb[110].mxu0 %vm13553_vm0, %v150_v61  ;;  %v7511_v49 = vadd.f32 %v7371_v63, %v7451_v25 }
  0xef   :  { %6016 = vmatprep.mubr.msk.f32.mxu0 %vm13553_vm0, %v151_v62  ;;  %v7519_v52 = vadd.f32 %v7451_v25, %v7373_v0  ;;  %v172_v0 = vld [vmem:[%s13219_s0 + $0x428] sm:$0xff] }
  0xf1   :  { %v7383_v3 = vpop.f32.mrb[6].mxu0 }
  0xf2   :  { %v7385_v4 = vpop.f32.mrb[7].mxu0  ;;  %6017 = vmatmul.mubr.msk.f32.gmra.mrb[112].mxu0 %vm13553_vm0, %v152_v1  ;;  %v7537_v59 = vadd.f32 %v7383_v3, %v7451_v25 }
  0xf3   :  { %6019 = vmatprep.mubr.msk.f32.mxu0 %vm13553_vm0, %v153_v2  ;;  %v7545_v62 = vadd.f32 %v7451_v25, %v7385_v4  ;;  %v173_v2 = vld [vmem:[%s13219_s0 + $0x430] sm:$0xff] }
  0xf5   :  { %v7395_v7 = vpop.f32.mrb[8].mxu0 }
  0xf6   :  { %v7397_v8 = vpop.f32.mrb[9].mxu0  ;;  %6020 = vmatmul.mubr.msk.f32.gmra.mrb[114].mxu0 %vm13553_vm0, %v154_v5  ;;  %v7563_v5 = vadd.f32 %v7395_v7, %v7451_v25  ;;  %v174_v7 = vld [vmem:[%s13219_s0 + $0x438] sm:$0xff] }
  0xf7   :  { %6022 = vmatprep.mubr.msk.f32.mxu0 %vm13553_vm0, %v155_v6 }
  0xf9   :  { %v7407_v11 = vpop.f32.mrb[10].mxu0 }
  0xfa   :  { %v7409_v12 = vpop.f32.mrb[11].mxu0  ;;  %6023 = vmatmul.mubr.msk.f32.gmra.mrb[116].mxu0 %vm13553_vm0, %v156_v9 }
  0xfb   :  { %6025 = vmatprep.mubr.msk.f32.mxu0 %vm13553_vm0, %v157_v10  ;;  %v7571_v10 = vadd.f32 %v7451_v25, %v7397_v8 }
  0xfd   :  { %v7419_v15 = vpop.f32.mrb[12].mxu0 }
  0xfe   :  { %v7421_v16 = vpop.f32.mrb[13].mxu0  ;;  %6026 = vmatmul.mubr.msk.f32.gmra.mrb[118].mxu0 %vm13553_vm0, %v158_v13 }
  0xff   :  { %6028 = vmatprep.mubr.msk.f32.mxu0 %vm13553_vm0, %v159_v14 }
 0x101   :  { %v7431_v19 = vpop.f32.mrb[14].mxu0 }
 0x102   :  { %v7433_v20 = vpop.f32.mrb[15].mxu0  ;;  %6029 = vmatmul.mubr.msk.f32.gmra.mrb[120].mxu0 %vm13553_vm0, %v160_v17  ;;  %v175_v17 = vld [vmem:[%s13219_s0 + $0x440] sm:$0xff] }
 0x103   :  { %6031 = vmatprep.mubr.msk.f32.mxu0 %vm13553_vm0, %v161_v18 }
 0x105   :  { %v7443_v23 = vpop.f32.mrb[16].mxu0 }
 0x106   :  { %v7445_v24 = vpop.f32.mrb[17].mxu0  ;;  %6032 = vmatmul.mubr.msk.f32.gmra.mrb[122].mxu0 %vm13553_vm0, %v162_v21  ;;  %v7589_v21 = vadd.f32 %v7407_v11, %v7451_v25  ;;  %v176_v11 = vld [vmem:[%s13219_s0 + $0x448] sm:$0xff] }
 0x107   :  { %6034 = vmatprep.mubr.msk.f32.mxu0 %vm13553_vm0, %v163_v22 }
 0x109   :  { %v5877_v28 = vpop.f32.mrb[18].mxu0 }
 0x10a   :  { %v7464_v30 = vadd.f32 %v5877_v28, %v7451_v25  ;;  %v790_v31 = vpop.f32.mrb[19].mxu0  ;;  %6035 = vmatmul.mubr.msk.f32.gmra.mrb[124].mxu0 %vm13553_vm0, %v164_v26 }
 0x10b   :  { %v7471_v33 = vadd.f32 %v7451_v25, %v790_v31  ;;  %6037 = vmatprep.mubr.msk.f32.mxu0 %vm13553_vm0, %v165_v27  ;;  %v7597_v27 = vadd.f32 %v7451_v25, %v7409_v12 }
 0x10d   :  { %v5880_v38 = vpop.f32.mrb[20].mxu0 }
 0x10e   :  { %v7488_v40 = vadd.f32 %v5880_v38, %v7451_v25  ;;  %v800_v41 = vpop.f32.mrb[21].mxu0  ;;  %6038 = vmatmul.mubr.msk.f32.gmra.mrb[126].mxu0 %vm13553_vm0, %v166_v34  ;;  %v177_v34 = vld [vmem:[%s13219_s0 + $0x450] sm:$0xff]  ;;  %v7615_v38 = vadd.f32 %v7419_v15, %v7451_v25  ;;  %v178_v15 = vld [vmem:[%s13219_s0 + $0x458] sm:$0xff] }
 0x10f   :  { %v7496_v43 = vadd.f32 %v7451_v25, %v800_v41  ;;  %6040 = vmatprep.mubr.msk.f32.mxu0 %vm13553_vm0, %v167_v36 }
 0x111   :  { %v5883_v48 = vpop.f32.mrb[22].mxu0 }
 0x112   :  { %v7514_v50 = vadd.f32 %v5883_v48, %v7451_v25  ;;  %v810_v51 = vpop.f32.mrb[23].mxu0  ;;  %6041 = vmatmul.mubr.msk.f32.gmra.mrb[128].mxu0 %vm13553_vm0, %v168_v44 }
 0x113   :  { %v7522_v53 = vadd.f32 %v7451_v25, %v810_v51  ;;  %6043 = vmatprep.mubr.msk.f32.mxu0 %vm13553_vm0, %v169_v46  ;;  %v7623_v46 = vadd.f32 %v7451_v25, %v7421_v16 }
 0x115   :  { %v5886_v58 = vpop.f32.mrb[24].mxu0 }
 0x116   :  { %v7540_v60 = vadd.f32 %v5886_v58, %v7451_v25  ;;  %v820_v61 = vpop.f32.mrb[25].mxu0  ;;  %6044 = vmatmul.mubr.msk.f32.gmra.mrb[130].mxu0 %vm13553_vm0, %v170_v54  ;;  %v179_v54 = vld [vmem:[%s13219_s0 + $0x460] sm:$0xff]  ;;  %v7641_v58 = vadd.f32 %v7431_v19, %v7451_v25  ;;  %v180_v19 = vld [vmem:[%s13219_s0 + $0x468] sm:$0xff] }
 0x117   :  { %v7548_v63 = vadd.f32 %v7451_v25, %v820_v61  ;;  %6046 = vmatprep.mubr.msk.f32.mxu0 %vm13553_vm0, %v171_v56 }
 0x119   :  { %v5889_v4 = vpop.f32.mrb[26].mxu0 }
 0x11a   :  { %v7566_v6 = vadd.f32 %v5889_v4, %v7451_v25  ;;  %v830_v9 = vpop.f32.mrb[27].mxu0  ;;  %6047 = vmatmul.mubr.msk.f32.gmra.mrb[132].mxu0 %vm13553_vm0, %v172_v0 }
 0x11b   :  { %v7574_v13 = vadd.f32 %v7451_v25, %v830_v9  ;;  %6049 = vmatprep.mubr.msk.f32.mxu0 %vm13553_vm0, %v173_v2  ;;  %v7649_v2 = vadd.f32 %v7451_v25, %v7433_v20 }
 0x11d   :  { %v5892_v18 = vpop.f32.mrb[28].mxu0 }
 0x11e   :  { %v7592_v22 = vadd.f32 %v5892_v18, %v7451_v25  ;;  %v840_v26 = vpop.f32.mrb[29].mxu0  ;;  %6050 = vmatmul.mubr.msk.f32.gmra.mrb[134].mxu0 %vm13553_vm0, %v174_v7  ;;  %v181_v7 = vld [vmem:[%s13219_s0 + $0x470] sm:$0xff]  ;;  %v7667_v18 = vadd.f32 %v7443_v23, %v7451_v25  ;;  %v182_v23 = vld [vmem:[%s13219_s0 + $0x478] sm:$0xff]  ;;  %s6807_s0 = smov 12  }
 0x11f   :  { %v7600_v28 = vadd.f32 %v7451_v25, %v840_v26  ;;  %6052 = vmatprep.mubr.msk.f32.mxu0 %vm13553_vm0, %v175_v17 }
 0x120   :  { %13654 = vst [vmem:[#allocation6_spill] sm:$0xff] %v7667_v18 }
 0x121   :  { %v5895_v36 = vpop.f32.mrb[30].mxu0 }
 0x122   :  { %v7618_v41 = vadd.f32 %v5895_v36, %v7451_v25  ;;  %v850_v44 = vpop.f32.mrb[31].mxu0  ;;  %6053 = vmatmul.mubr.msk.f32.gmra.mrb[136].mxu0 %vm13553_vm0, %v176_v11 }
 0x123   :  { %v7626_v48 = vadd.f32 %v7451_v25, %v850_v44  ;;  %6055 = vmatprep.mubr.msk.f32.mxu0 %vm13553_vm0, %v177_v34  ;;  %v7675_v34 = vadd.f32 %v7451_v25, %v7445_v24 }
 0x125   :  { %v5898_v56 = vpop.f32.mrb[32].mxu0  ;;  %13656 = vst [vmem:[#allocation8_spill] sm:$0xff] %v7675_v34  ;;  %v13658_v34 = vmax.f32 %v7461_v29, %v7464_v30 }
 0x126   :  { %v7644_v61 = vadd.f32 %v5898_v56, %v7451_v25  ;;  %v860_v0 = vpop.f32.mrb[33].mxu0  ;;  %6056 = vmatmul.mubr.msk.f32.gmra.mrb[138].mxu0 %vm13553_vm0, %v178_v15 }
 0x127   :  { %v7652_v4 = vadd.f32 %v7451_v25, %v860_v0  ;;  %6058 = vmatprep.mubr.msk.f32.mxu0 %vm13553_vm0, %v179_v54 }
 0x129   :  { %13653 = vst [vmem:[#allocation5_spill] sm:$0xff] %v7652_v4  ;;  %v5901_v17 = vpop.f32.mrb[34].mxu0 }
 0x12a   :  { %v7670_v26 = vadd.f32 %v5901_v17, %v7451_v25  ;;  %v870_v11 = vpop.f32.mrb[35].mxu0  ;;  %6059 = vmatmul.mubr.msk.f32.gmra.mrb[140].mxu0 %vm13553_vm0, %v180_v19 }
 0x12b   :  { %v7678_v36 = vadd.f32 %v7451_v25, %v870_v11  ;;  %6061 = vmatprep.mubr.msk.f32.mxu0 %vm13553_vm0, %v181_v7 }
 0x12c   :  { %13655 = vst [vmem:[#allocation7_spill] sm:$0xff] %v7670_v26 }
 0x12d   :  { %13657 = vst [vmem:[#allocation9_spill] sm:$0xff] %v7678_v36  ;;  %v5904_v54 = vpop.f32.mrb[36].mxu0 }
 0x12e   :  { %v880_v56 = vpop.f32.mrb[37].mxu0  ;;  %6062 = vmatmul.mubr.msk.f32.gmra.mrb[142].mxu0 %vm13553_vm0, %v182_v23  ;;  %v886_v3 = vadd.f32 %v5904_v54, %v7451_v25 }
 0x12f   :  { %v881_v55 = vadd.f32 %v7451_v25, %v880_v56 }
 0x131   :  { %v5907_v24 = vpop.f32.mrb[38].mxu0 }
 0x132   :  { %v890_v0 = vpop.f32.mrb[39].mxu0  ;;  %v896_v36 = vadd.f32 %v5907_v24, %v7451_v25 }
 0x133   :  { %v891_v54 = vadd.f32 %v7451_v25, %v890_v0 }
 0x135   :  { %v5910_v19 = vpop.f32.mrb[40].mxu0 }
 0x136   :  { %v900_v17 = vpop.f32.mrb[41].mxu0 }
 0x139   :  { %v5913_v11 = vpop.f32.mrb[42].mxu0 }
 0x13a   :  { %v910_v7 = vpop.f32.mrb[43].mxu0 }
 0x13d   :  { %v5916_v20 = vpop.f32.mrb[44].mxu0 }
 0x13e   :  { %v7689_v9 = vpop.f32.mrb[45].mxu0 }
 0x141   :  { %v7691_v16 = vpop.f32.mrb[46].mxu0 }
 0x142   :  { %v7693_v51 = vpop.f32.mrb[47].mxu0 }
 0x145   :  { %v7695_v44 = vpop.f32.mrb[48].mxu0 }
 0x146   :  { %v7697_v15 = vpop.f32.mrb[49].mxu0 }
 0x149   :  { %v7699_v12 = vpop.f32.mrb[50].mxu0 }
 0x14a   :  { %v7701_v23 = vpop.f32.mrb[51].mxu0 }
 0x14d   :  { %v7703_v31 = vpop.f32.mrb[52].mxu0 }
 0x14e   :  { %v7705_v8 = vpop.f32.mrb[53].mxu0 }
 0x151   :  { %v5931_v14 = vpop.f32.mrb[54].mxu0 }
 0x152   :  { %v976_v1 = vadd.f32 %v5931_v14, %v7451_v25  ;;  %v970_v57 = vpop.f32.mrb[55].mxu0  ;;  %v13659_v14 = vmax.f32 %v7468_v32, %v7471_v33 }
 0x153   :  { %v971_v47 = vadd.f32 %v7451_v25, %v970_v57 }
 0x154   :  { %v1456_v45 = vmax.f32 %v886_v3, %v976_v1 }
 0x155   :  { %v1455_v37 = vmax.f32 %v881_v55, %v971_v47  ;;  %v5934_v35 = vpop.f32.mrb[56].mxu0  ;;  %v906_v55 = vadd.f32 %v5910_v19, %v7451_v25 }
 0x156   :  { %v1492_v26 = vmax.f32 %v13658_v34, %v1456_v45  ;;  %v986_v18 = vadd.f32 %v5934_v35, %v7451_v25  ;;  %v980_v4 = vpop.f32.mrb[57].mxu0  ;;  %v13662_v35 = vmax.f32 %v7485_v39, %v7488_v40 }
 0x157   :  { %v1491_v56 = vmax.f32 %v13659_v14, %v1455_v37  ;;  %v981_v57 = vadd.f32 %v7451_v25, %v980_v4  ;;  %v901_v4 = vadd.f32 %v7451_v25, %v900_v17 }
 0x158   :  { %v7721_v1 = vmax.f32 %v1492_v26, 0.0  ;;  %v1458_v47 = vmax.f32 %v896_v36, %v986_v18  ;;  %v13663_v18 = vmax.f32 %v7493_v42, %v7496_v43  ;;  %v916_v42 = vadd.f32 %v5913_v11, %v7451_v25 }
 0x159   :  { %v7724_v3 = vmax.f32 %v1491_v56, 0.0  ;;  %v1457_v29 = vmax.f32 %v891_v54, %v981_v57  ;;  %v5937_v30 = vpop.f32.mrb[58].mxu0  ;;  %v13667_v54 = vmax.f32 %v7511_v49, %v7514_v50  ;;  %v13668_v11 = vmax.f32 %v7519_v52, %v7522_v53 }
 0x15a   :  { %13660 = vst [vmem:[#allocation10_spill] sm:$0xff] %v7721_v1  ;;  %v1494_v45 = vmax.f32 %v13662_v35, %v1458_v47  ;;  %v996_v34 = vadd.f32 %v5937_v30, %v7451_v25  ;;  %2005 = vrot.lane.b32.xlu1 %v7721_v1, %s6807_s0  ;;  %v990_v32 = vpop.f32.mrb[59].mxu0  ;;  %v7733_v33 = vrot.slane %v7721_v1, 6  ;;  %v7736_v37 = vrot.slane %v7721_v1, 7 }
 0x15b   :  { %13661 = vst [vmem:[#allocation11_spill] sm:$0xff] %v7724_v3  ;;  %v1493_v39 = vmax.f32 %v13663_v18, %v1457_v29  ;;  %v991_v40 = vadd.f32 %v7451_v25, %v990_v32  ;;  %v1940_v26 = vrot.slane %v7724_v3, 7  ;;  %v911_v47 = vadd.f32 %v7451_v25, %v910_v7 }
 0x15c   :  { %v1460_v36 = vmax.f32 %v906_v55, %v996_v34  ;;  %3200 = vrot.lane.b32.xlu0 %v7733_v33, %s6808_s21  ;;  %v7753_v43 = vmax.f32 %v1494_v45, 0.0  ;;  %v926_v55 = vadd.f32 %v5916_v20, %v7451_v25  ;;  %v921_v50 = vadd.f32 %v7451_v25, %v7689_v9 }
 0x15d   :  { %v7746_v24 = vmax.f32 %v1493_v39, 0.0  ;;  %v1459_v0 = vmax.f32 %v901_v4, %v991_v40  ;;  %v5940_v19 = vpop.f32.mrb[60].mxu0  ;;  %v7750_v17 = vsel %vm13485_vm2, %v1940_v26, %v7736_v37  ;;  %v936_v30 = vadd.f32 %v7691_v16, %v7451_v25 }
 0x15e   :  { %13665 = vst [vmem:[#allocation13_spill] sm:$0xff] %v7750_v17  ;;  %13666 = vst [vmem:[#allocation14_spill] sm:$0xff] %v7753_v43  ;;  %v7758_v14 = vmax.f32 %v13667_v54, %v1460_v36  ;;  %v1006_v56 = vadd.f32 %v5940_v19, %v7451_v25  ;;  %v1000_v57 = vpop.f32.mrb[61].mxu0  ;;  %1954 = vrot.lane.b32.xlu1 %v7750_v17, %s6809_s22  ;;  %v931_v35 = vadd.f32 %v7451_v25, %v7693_v51 }
 0x15f   :  { %13664 = vst [vmem:[#allocation12_spill] sm:$0xff] %v7746_v24  ;;  %v7768_v29 = vmax.f32 %v13668_v11, %v1459_v0  ;;  %v1001_v49 = vadd.f32 %v7451_v25, %v1000_v57  ;;  %v7781_v52 = vadd.f32 %v7695_v44, %v7451_v25  ;;  %v7785_v53 = vadd.f32 %v7451_v25, %v7697_v15 }
 0x160   :  { %v1462_v7 = vmax.f32 %v916_v42, %v1006_v56  ;;  %3254 = vrot.lane.b32.xlu0 %v7736_v37, %s6810_s23  ;;  %v1616_v16 = vrot.slane %v7746_v24, 1  ;;  %v13669_v51 = vmax.f32 %v7537_v59, %v7540_v60  ;;  %v13238_v44 = vrot.slane %v7721_v1, 1 }
 0x161   :  { %v1461_v9 = vmax.f32 %v911_v47, %v1001_v49  ;;  %v5943_v20 = vpop.f32.mrb[62].mxu0  ;;  %v1618_v15 = vrot.slane %v7753_v43, 1  ;;  %v13670_v4 = vmax.f32 %v7545_v62, %v7548_v63  ;;  %v13239_v59 = vrot.slane %v7721_v1, 2 }
 0x162   :  { %v7791_v45 = vmax.f32 %v13669_v51, %v1462_v7  ;;  %v1016_v34 = vadd.f32 %v5943_v20, %v7451_v25  ;;  %v1010_v32 = vpop.f32.mrb[63].mxu0  ;;  %2009 = vrot.lane.b32.xlu1 %v7753_v43, %s6807_s0  ;;  %v13236_v60 = vrot.slane %v7724_v3, 6  ;;  %v1682_v26 = vrot.slane %v7746_v24, 2 }
 0x163   :  { %v7801_v18 = vmax.f32 %v13670_v4, %v1461_v9  ;;  %v1011_v39 = vadd.f32 %v7451_v25, %v1010_v32  ;;  %v1684_v36 = vrot.slane %v7753_v43, 2  ;;  %v2311_v0 = vrot.slane %v7721_v1, 3 }
 0x164   :  { %v1464_v40 = vmax.f32 %v926_v55, %v1016_v34  ;;  %2007 = vrot.lane.b32.xlu0 %v7746_v24, %s6807_s0  ;;  %v1617_v63 = vsel %vm13652_vm3, %v13238_v44, %v1616_v16  ;;  %v1876_v42 = vrot.slane %v7746_v24, 6  ;;  %v2312_v54 = vrot.slane %v7746_v24, 3 }
 0x165   :  { %v1463_v19 = vmax.f32 %v921_v50, %v1011_v39  ;;  %v5946_v62 = vpop.f32.mrb[64].mxu0  ;;  %v13671_v56 = vmax.f32 %v7563_v5, %v7566_v6  ;;  %v1619_v11 = vsel %vm13652_vm3, %v1616_v16, %v1618_v15  ;;  %v7827_v49 = vrot.slane %v7753_v43, 3 }
 0x166   :  { %v1026_v47 = vadd.f32 %v5946_v62, %v7451_v25  ;;  %v1020_v55 = vpop.f32.mrb[65].mxu0  ;;  %1629 = vrot.lane.b32.xlu1 %v1617_v63, %s6811_s24  ;;  %v13673_v50 = vmax.f32 %v7571_v10, %v7574_v13  ;;  %v7836_v6 = vsel %vm13532_vm4, %v2311_v0, %v2312_v54  ;;  %v2826_v9 = vrot.slane %v7724_v3, 3 }
 0x167   :  { %v7819_v57 = vmax.f32 %v13671_v56, %v1464_v40  ;;  %13672 = vst [vmem:[#allocation15_spill] sm:$0xff] %v7827_v49  ;;  %v1021_v5 = vadd.f32 %v7451_v25, %v1020_v55  ;;  %13674 = vst [vmem:[#allocation16_spill] sm:$0xff] %v7836_v6  ;;  %v1685_v16 = vsel %vm13530_vm5, %v1682_v26, %v1684_v36  ;;  %v8161_v17 = vmax.f32 %v7791_v45, 0.0 }
 0x168   :  { %v7832_v7 = vmax.f32 %v13673_v50, %v1463_v19  ;;  %v1466_v20 = vmax.f32 %v936_v30, %v1026_v47  ;;  %1631 = vrot.lane.b32.xlu0 %v1619_v11, %s6811_s24  ;;  %v7847_v10 = vsel %vm13531_vm1, %v13236_v60, %v7733_v33  ;;  %v7851_v13 = vsel %vm13532_vm4, %v2312_v54, %v7827_v49 }
 0x169   :  { %13675 = vst [vmem:[#allocation17_spill] sm:$0xff] %v7847_v10  ;;  %13676 = vst [vmem:[#allocation18_spill] sm:$0xff] %v7851_v13  ;;  %v1465_v51 = vmax.f32 %v931_v35, %v1021_v5  ;;  %v5949_v34 = vpop.f32.mrb[66].mxu0  ;;  %v7857_v30 = vsel %vm13531_vm1, %v7733_v33, %v1876_v42  ;;  %v7862_v4 = vsel %vm13532_vm4, %v2826_v9, %v2311_v0  ;;  %v1943_v54 = vrot.slane %v7746_v24, 7 }
 0x16a   :  { %13677 = vst [vmem:[#allocation19_spill] sm:$0xff] %v7862_v4  ;;  %v13678_v39 = vmax.f32 %v7589_v21, %v7592_v22  ;;  %v1036_v35 = vadd.f32 %v5949_v34, %v7451_v25  ;;  %v1030_v19 = vpop.f32.mrb[67].mxu0  ;;  %1697 = vrot.lane.b32.xlu1 %v1685_v16, %s6812_s25  ;;  %v13679_v0 = vmax.f32 %v7597_v27, %v7600_v28  ;;  %v13242_v28 = vrot.slane %v7753_v43, 7 }
 0x16b   :  { %v1031_v21 = vadd.f32 %v7451_v25, %v1030_v19  ;;  %v1683_v22 = vsel %vm13530_vm5, %v13239_v59, %v1682_v26  ;;  %v6286_v47 = vpack.i.bf16 %v7857_v30, %v7847_v10  ;;  %v956_v11 = vadd.f32 %v7699_v12, %v7451_v25  ;;  %v13684_v19 = vld [vmem:[#allocation5_spill] sm:$0xff]  ;;  %13708 = vst [vmem:[#allocation31_spill] sm:$0xff] %v8161_v17 }
 0x16c   :  { %v7867_v40 = vmax.f32 %v13678_v39, %v1466_v20  ;;  %v7878_v63 = vmax.f32 %v13679_v0, %v1465_v51  ;;  %v1468_v56 = vmax.f32 %v7781_v52, %v1036_v35  ;;  %1695 = vrot.lane.b32.xlu0 %v1683_v22, %s6812_s25  ;;  %v13680_v26 = vmax.f32 %v7615_v38, %v7618_v41 }
 0x16d   :  { %v1467_v55 = vmax.f32 %v7785_v53, %v1031_v21  ;;  %v5952_v27 = vpop.f32.mrb[68].mxu0  ;;  %v951_v53 = vadd.f32 %v7451_v25, %v7701_v23  ;;  %v13681_v9 = vmax.f32 %v7623_v46, %v7626_v48  ;;  %v1944_v38 = vsel %vm13485_vm2, %v7736_v37, %v1943_v54 }
 0x16e   :  { %v7896_v50 = vmax.f32 %v13680_v26, %v1468_v56  ;;  %v1046_v52 = vadd.f32 %v5952_v27, %v7451_v25  ;;  %v1040_v5 = vpop.f32.mrb[69].mxu0  ;;  %6287 = vrot.lane.b32.xlu1 %v6286_v47, %s6813_s26  ;;  %v1946_v34 = vsel %vm13485_vm2, %v1943_v54, %v13242_v28  ;;  %v966_v23 = vadd.f32 %v7703_v31, %v7451_v25  ;;  %v13687_v56 = vld [vmem:[#allocation6_spill] sm:$0xff]  ;;  %v13692_v26 = vld [vmem:[#allocation9_spill] sm:$0xff] }
 0x16f   :  { %v7905_v20 = vmax.f32 %v13681_v9, %v1467_v55  ;;  %v1041_v12 = vadd.f32 %v7451_v25, %v1040_v5  ;;  %v961_v46 = vadd.f32 %v7451_v25, %v7705_v8  ;;  %v13683_v48 = vmax.f32 %v7641_v58, %v7644_v61 }
 0x170   :  { %v1470_v41 = vmax.f32 %v956_v11, %v1046_v52  ;;  %1956 = vrot.lane.b32.xlu0 %v1944_v38, %s6809_s22  ;;  %v13685_v0 = vmax.f32 %v7649_v2, %v13684_v19  ;;  %v2388_v22 = vrot.slane %v7746_v24, 4  ;;  %v7933_v8 = vrot.slane %v7753_v43, 4  ;;  %v13688_v2 = vld [vmem:[#allocation7_spill] sm:$0xff]  ;;  %v13691_v11 = vld [vmem:[#allocation8_spill] sm:$0xff] }
 0x171   :  { %13682 = vst [vmem:[#allocation20_spill] sm:$0xff] %v7905_v20  ;;  %v1469_v16 = vmax.f32 %v951_v53, %v1041_v12  ;;  %v5955_v51 = vpop.f32.mrb[70].mxu0  ;;  %v13689_v47 = vmax.f32 %v13687_v56, %v13688_v2  ;;  %v13693_v52 = vmax.f32 %v13691_v11, %v13692_v26  ;;  %v7958_v9 = vrot.slane %v7721_v1, 4 }
 0x172   :  { %v7921_v39 = vmax.f32 %v13683_v48, %v1470_v41  ;;  %v1056_v37 = vadd.f32 %v5955_v51, %v7451_v25  ;;  %v1050_v35 = vpop.f32.mrb[71].mxu0  ;;  %1958 = vrot.lane.b32.xlu1 %v1946_v34, %s6809_s22  ;;  %13686 = vst [vmem:[#allocation5_spill] sm:$0xff] %v7933_v8  ;;  %v7955_v53 = vsel %vm1571_vm6, %v2388_v22, %v7933_v8  ;;  %v1878_v12 = vrot.slane %v7753_v43, 6 }
 0x173   :  { %v7928_v21 = vmax.f32 %v13685_v0, %v1469_v16  ;;  %v1051_v31 = vadd.f32 %v7451_v25, %v1050_v35  ;;  %13694 = vst [vmem:[#allocation7_spill] sm:$0xff] %v7955_v53  ;;  %13695 = vst [vmem:[#allocation8_spill] sm:$0xff] %v7958_v9  ;;  %v7965_v41 = vsel %vm1571_vm6, %v7958_v9, %v2388_v22  ;;  %v7985_v48 = vmax.f32 %v7768_v29, 0.0 }
 0x174   :  { %v1472_v58 = vmax.f32 %v966_v23, %v1056_v37  ;;  %2327 = vrot.lane.b32.xlu0 %v7851_v13, %s6814_s27  ;;  %13696 = vst [vmem:[#allocation9_spill] sm:$0xff] %v7965_v41  ;;  %v7978_v23 = vsel %vm13531_vm1, %v1876_v42, %v1878_v12  ;;  %v2537_v35 = vrot.slane %v7746_v24, 5  ;;  %v13237_v29 = vrot.slane %v7721_v1, 5 }
 0x175   :  { %v1471_v61 = vmax.f32 %v961_v46, %v1051_v31  ;;  %v7937_v54 = vpop.f32.mrb[72].mxu0  ;;  %13697 = vst [vmem:[#allocation21_spill] sm:$0xff] %v7978_v23  ;;  %13698 = vst [vmem:[#allocation22_spill] sm:$0xff] %v7985_v48  ;;  %v7997_v42 = vrot.slane %v7985_v48, 2  ;;  %v8003_v31 = vmax.f32 %v7819_v57, 0.0  ;;  %v8006_v22 = vmax.f32 %v7878_v63, 0.0 }
 0x176   :  { %v7942_v55 = vmax.f32 %v13689_v47, %v1472_v58  ;;  %2325 = vrot.lane.b32.xlu1 %v7836_v6, %s6814_s27  ;;  %v7946_v27 = vpop.f32.mrb[73].mxu0  ;;  %v2316_v57 = vrot.slane %v7985_v48, 3  ;;  %v2539_v56 = vrot.slane %v7753_v43, 5  ;;  %v8032_v11 = vrot.slane %v7985_v48, 4 }
 0x177   :  { %v7951_v5 = vmax.f32 %v13693_v52, %v1471_v61  ;;  %13699 = vst [vmem:[#allocation23_spill] sm:$0xff] %v8003_v31  ;;  %13700 = vst [vmem:[#allocation24_spill] sm:$0xff] %v8006_v22  ;;  %v13241_v61 = vrot.slane %v8003_v31, 2  ;;  %v8081_v44 = vadd.f32 %v7937_v54, %v7451_v25  ;;  %v2262_v59 = vsel %vm13530_vm5, %v1684_v36, %v7997_v42 }
 0x178   :  { %13690 = vst [vmem:[#allocation6_spill] sm:$0xff] %v7942_v55  ;;  %2401 = vrot.lane.b32.xlu0 %v7955_v53, %s6815_s28  ;;  %v2317_v60 = vsel %vm13532_vm4, %v7827_v49, %v2316_v57  ;;  %v8210_v9 = vmax.f32 %v7921_v39, 0.0 }
 0x179   :  { %v7967_v16 = vpop.f32.mrb[74].mxu0 }
 0x17a   :  { %2399 = vrot.lane.b32.xlu1 %v7965_v41, %s6815_s28  ;;  %v7971_v51 = vpop.f32.mrb[75].mxu0  ;;  %13713 = vst [vmem:[#allocation35_spill] sm:$0xff] %v8210_v9 }
 0x17c   :  { %3204 = vrot.lane.b32.xlu0 %v7978_v23, %s6808_s21 }
 0x17d   :  { %v7982_v46 = vpop.f32.mrb[76].mxu0 }
 0x17e   :  { %3202 = vrot.lane.b32.xlu1 %v7857_v30, %s6808_s21  ;;  %v7989_v37 = vpop.f32.mrb[77].mxu0 }
 0x180   :  { %3258 = vrot.lane.b32.xlu0 %v1946_v34, %s6810_s23  ;;  %v8011_v34 = vmax.f32 %v7867_v40, 0.0  ;;  %v1842_v40 = vrot.slane %v8006_v22, 2 }
 0x181   :  { %v7993_v19 = vpop.f32.mrb[78].mxu0 }
 0x182   :  { %3256 = vrot.lane.b32.xlu1 %v1944_v38, %s6810_s23  ;;  %v7999_v0 = vpop.f32.mrb[79].mxu0  ;;  %13701 = vst [vmem:[#allocation25_spill] sm:$0xff] %v8011_v34  ;;  %v2538_v38 = vsel %vm1645_vm7, %v13237_v29, %v2537_v35  ;;  %v13240_v47 = vrot.slane %v8011_v34, 2  ;;  %v1843_v52 = vsel %vm13530_vm5, %v13241_v61, %v1842_v40  ;;  %v8090_v61 = vadd.f32 %v7451_v25, %v7946_v27 }
 0x183   :  { %v8106_v27 = vmax.f32 %v7758_v14, 0.0  ;;  %v8143_v14 = vadd.f32 %v7982_v46, %v7451_v25  ;;  %v8191_v4 = vadd.f32 %v7451_v25, %v7999_v0 }
 0x184   :  { %2267 = vrot.lane.b32.xlu0 %v7997_v42, %s6812_s25 }
 0x185   :  { %v8016_v58 = vpop.f32.mrb[80].mxu0  ;;  %13705 = vst [vmem:[#allocation29_spill] sm:$0xff] %v8106_v27  ;;  %v13709_v46 = vrot.slane %v8106_v27, 2 }
 0x186   :  { %2552 = vrot.lane.b32.xlu1 %v2538_v38, %s6816_s29  ;;  %v8020_v63 = vpop.f32.mrb[81].mxu0  ;;  %v1845_v38 = vsel %vm13530_vm5, %v1842_v40, %v13240_v47  ;;  %v3196_v47 = vrot.slane %v7985_v48, 6 }
 0x187   :  { %v8044_v33 = vpack.i.bf16 %v1845_v38, %v1843_v52  ;;  %v13243_v52 = vrot.slane %v7985_v48, 5 }
 0x188   :  { %2331 = vrot.lane.b32.xlu0 %v2316_v57, %s6814_s27  ;;  %v2572_v57 = vrot.slane %v7985_v48, 1 }
 0x189   :  { %v8026_v2 = vpop.f32.mrb[82].mxu0  ;;  %13702 = vst [vmem:[#allocation26_spill] sm:$0xff] %v8044_v33 }
 0x18a   :  { %2614 = vrot.lane.b32.xlu1 %v7857_v30, %s6817_s30  ;;  %v8034_v26 = vpop.f32.mrb[83].mxu0  ;;  %v2540_v30 = vsel %vm1645_vm7, %v2537_v35, %v2539_v56  ;;  %v8064_v35 = vsel %vm1571_vm6, %v7933_v8, %v8032_v11  ;;  %v4316_v36 = vsel %vm13652_vm3, %v1618_v15, %v2572_v57  ;;  %v3250_v15 = vrot.slane %v7985_v48, 7 }
 0x18b   :  { %13703 = vst [vmem:[#allocation27_spill] sm:$0xff] %v8064_v35  ;;  %v13707_v8 = vrot.slane %v7753_v43, 7  ;;  %v2573_v43 = vrot.slane %v8106_v27, 1  ;;  %v8264_v41 = vadd.f32 %v8026_v2, %v7451_v25 }
 0x18c   :  { %2405 = vrot.lane.b32.xlu0 %v8032_v11, %s6815_s28 }
 0x18d   :  { %v8047_v32 = vpop.f32.mrb[84].mxu0  ;;  %v3251_v13 = vsel %vm13485_vm2, %v13707_v8, %v3250_v15 }
 0x18e   :  { %2554 = vrot.lane.b32.xlu1 %v2540_v30, %s6816_s29  ;;  %v8050_v62 = vpop.f32.mrb[85].mxu0  ;;  %v3718_v30 = vsel %vm1645_vm7, %v2539_v56, %v13243_v52  ;;  %v8093_v56 = vmax.f32 %v7801_v18, 0.0  ;;  %v8111_v18 = vadd.f32 %v7967_v16, %v7451_v25 }
 0x190   :  { %2329 = vrot.lane.b32.xlu0 %v2317_v60, %s6814_s27  ;;  %13704 = vst [vmem:[#allocation28_spill] sm:$0xff] %v8093_v56  ;;  %v8127_v16 = vrot.slane %v8093_v56, 3  ;;  %v8156_v49 = vrot.slane %v8093_v56, 1  ;;  %v8253_v39 = vrot.slane %v8093_v56, 7 }
 0x191   :  { %v8055_v29 = vpop.f32.mrb[86].mxu0 }
 0x192   :  { %2616 = vrot.lane.b32.xlu1 %v7978_v23, %s6817_s30  ;;  %v8059_v40 = vpop.f32.mrb[87].mxu0  ;;  %13718 = vst [vmem:[#allocation40_spill] sm:$0xff] %v8253_v39  ;;  %v2798_v23 = vrot.slane %v8106_v27, 6 }
 0x194   :  { %2403 = vrot.lane.b32.xlu0 %v8064_v35, %s6815_s28 }
 0x195   :  { %v8070_v60 = vpop.f32.mrb[88].mxu0 }
 0x196   :  { %4320 = vrot.lane.b32.xlu1 %v2572_v57, %s6811_s24  ;;  %v8073_v38 = vpop.f32.mrb[89].mxu0 }
 0x198   :  { %3720 = vrot.lane.b32.xlu0 %v3718_v30, %s6816_s29 }
 0x199   :  { %v5985_v28 = vpop.f32.mrb[90].mxu0 }
 0x19a   :  { %2265 = vrot.lane.b32.xlu1 %v2262_v59, %s6812_s25  ;;  %v8097_v54 = vadd.f32 %v5985_v28, %v7451_v25  ;;  %v1150_v30 = vpop.f32.mrb[91].mxu0  ;;  %v3197_v28 = vsel %vm13531_vm1, %v1878_v12, %v3196_v47  ;;  %v8133_v12 = vrot.slane %v8093_v56, 4 }
 0x19b   :  { %v8103_v52 = vadd.f32 %v7451_v25, %v1150_v30  ;;  %v8121_v30 = vadd.f32 %v7451_v25, %v7971_v51  ;;  %v1573_v51 = vrot.slane %v8106_v27, 4 }
 0x19c   :  { %4318 = vrot.lane.b32.xlu0 %v4316_v36, %s6811_s24  ;;  %13706 = vst [vmem:[#allocation30_spill] sm:$0xff] %v8133_v12 }
 0x19d   :  { %v5988_v36 = vpop.f32.mrb[92].mxu0  ;;  %v1574_v45 = vsel %vm1571_vm6, %v8032_v11, %v1573_v51  ;;  %v8242_v11 = vmax.f32 %v7896_v50, 0.0  ;;  %v8260_v50 = vrot.slane %v8161_v17, 2 }
 0x19e   :  { %3206 = vrot.lane.b32.xlu1 %v3197_v28, %s6808_s21  ;;  %v8130_v59 = vadd.f32 %v5988_v36, %v7451_v25  ;;  %v1160_v35 = vpop.f32.mrb[93].mxu0 }
 0x19f   :  { %v8136_v47 = vadd.f32 %v7451_v25, %v1160_v35  ;;  %v8153_v35 = vadd.f32 %v7451_v25, %v7989_v37  ;;  %v1576_v37 = vsel %vm1571_vm6, %v1573_v51, %v8133_v12  ;;  %13716 = vst [vmem:[#allocation38_spill] sm:$0xff] %v8242_v11  ;;  %13719 = vst [vmem:[#allocation41_spill] sm:$0xff] %v8260_v50  ;;  %v2760_v24 = vrot.slane %v8242_v11, 2 }
 0x1a0   :  { %3282 = vrot.lane.b32.xlu0 %v8127_v16, %s6815_s28  ;;  %v6291_v6 = vpack.i.bf16 %v1576_v37, %v1574_v45  ;;  %v8223_v37 = vrot.slane %v8093_v56, 6  ;;  %v8227_v45 = vadd.f32 %v8016_v58, %v7451_v25 }
 0x1a1   :  { %v5991_v53 = vpop.f32.mrb[94].mxu0 }
 0x1a2   :  { %3260 = vrot.lane.b32.xlu1 %v3251_v13, %s6810_s23  ;;  %v8165_v36 = vadd.f32 %v5991_v53, %v7451_v25  ;;  %v1170_v8 = vpop.f32.mrb[95].mxu0  ;;  %v8179_v13 = vadd.f32 %v7993_v19, %v7451_v25  ;;  %v8196_v19 = vsel %vm13652_vm3, %v2572_v57, %v2573_v43  ;;  %v8200_v53 = vsel %vm13652_vm3, %v2573_v43, %v8156_v49 }
 0x1a3   :  { %v8170_v15 = vadd.f32 %v7451_v25, %v1170_v8  ;;  %v8187_v8 = vsel %vm13530_vm5, %v7997_v42, %v13709_v46  ;;  %13711 = vst [vmem:[#allocation33_spill] sm:$0xff] %v8196_v19  ;;  %13712 = vst [vmem:[#allocation34_spill] sm:$0xff] %v8200_v53  ;;  %v13263_v42 = vrot.slane %v8161_v17, 4  ;;  %v8213_v57 = vmax.f32 %v7928_v21, 0.0 }
 0x1a4   :  { %4298 = vrot.lane.b32.xlu0 %v8133_v12, %s6816_s29  ;;  %13710 = vst [vmem:[#allocation32_spill] sm:$0xff] %v8187_v8  ;;  %v8232_v21 = vrot.slane %v8093_v56, 5  ;;  %v13721_v53 = vrot.slane %v8161_v17, 5 }
 0x1a5   :  { %v5994_v51 = vpop.f32.mrb[96].mxu0  ;;  %13714 = vst [vmem:[#allocation36_spill] sm:$0xff] %v8213_v57  ;;  %v8250_v58 = vsel %vm1571_vm6, %v8133_v12, %v13263_v42  ;;  %v2761_v42 = vrot.slane %v8213_v57, 2  ;;  %v2763_v12 = vrot.slane %v8210_v9, 2  ;;  %v2799_v57 = vsel %vm13531_vm1, %v2798_v23, %v8223_v37 }
 0x1a6   :  { %3740 = vrot.lane.b32.xlu1 %v3197_v28, %s6817_s30  ;;  %v8205_v46 = vadd.f32 %v5994_v51, %v7451_v25  ;;  %v1180_v0 = vpop.f32.mrb[97].mxu0  ;;  %v8219_v28 = vmax.f32 %v7951_v5, 0.0  ;;  %v8237_v5 = vadd.f32 %v7451_v25, %v8020_v63  ;;  %13717 = vst [vmem:[#allocation39_spill] sm:$0xff] %v8250_v58  ;;  %v1908_v51 = vrot.slane %v8093_v56, 2 }
 0x1a7   :  { %v8216_v43 = vadd.f32 %v7451_v25, %v1180_v0  ;;  %v1652_v2 = vsel %vm1645_vm7, %v8232_v21, %v13721_v53  ;;  %v2762_v55 = vsel %vm13530_vm5, %v2760_v24, %v2761_v42  ;;  %v8346_v20 = vpack.i.bf16 %v2799_v57, %v2798_v23 }
 0x1a8   :  { %13715 = vst [vmem:[#allocation37_spill] sm:$0xff] %v8219_v28  ;;  %6292 = vrot.lane.b32.xlu0 %v6291_v6, %s6816_s29  ;;  %v8276_v56 = vrot.slane %v8219_v28, 2  ;;  %v8306_v1 = vsel %vm13530_vm5, %v1908_v51, %v8260_v50 }
 0x1a9   :  { %v5997_v0 = vpop.f32.mrb[98].mxu0  ;;  %13725 = vst [vmem:[#allocation45_spill] sm:$0xff] %v8306_v1  ;;  %13730 = vst [vmem:[#allocation50_spill] sm:$0xff] %v8346_v20  ;;  %v13742_v20 = vrot.slane %v7985_v48, 5 }
 0x1aa   :  { %2287 = vrot.lane.b32.xlu1 %v8223_v37, %s6808_s21  ;;  %v8256_v63 = vadd.f32 %v5997_v0, %v7451_v25  ;;  %v1190_v6 = vpop.f32.mrb[99].mxu0  ;;  %13720 = vst [vmem:[#allocation42_spill] sm:$0xff] %v8276_v56  ;;  %v8297_v53 = vsel %vm13530_vm5, %v2763_v12, %v8276_v56 }
 0x1ab   :  { %v8267_v19 = vadd.f32 %v7451_v25, %v1190_v6  ;;  %v8284_v6 = vadd.f32 %v7451_v25, %v8034_v26  ;;  %13722 = vst [vmem:[#allocation43_spill] sm:$0xff] %v8297_v53  ;;  %v13723_v26 = vrot.slane %v8106_v27, 2  ;;  %v8363_v23 = vpack.i.bf16 %v8276_v56, %v8297_v53 }
 0x1ac   :  { %1590 = vrot.lane.b32.xlu0 %v8250_v58, %s6816_s29 }
 0x1ad   :  { %v6000_v0 = vpop.f32.mrb[100].mxu0  ;;  %v8302_v58 = vsel %vm13530_vm5, %v13723_v26, %v1908_v51  ;;  %v8320_v26 = vsel %vm13530_vm5, %v2761_v42, %v2763_v12  ;;  %13733 = vst [vmem:[#allocation53_spill] sm:$0xff] %v8363_v23 }
 0x1ae   :  { %2363 = vrot.lane.b32.xlu1 %v8253_v39, %s6810_s23  ;;  %v8291_v8 = vadd.f32 %v6000_v0, %v7451_v25  ;;  %v1200_v10 = vpop.f32.mrb[101].mxu0  ;;  %13724 = vst [vmem:[#allocation44_spill] sm:$0xff] %v8302_v58  ;;  %v8310_v0 = vadd.f32 %v8047_v32, %v7451_v25  ;;  %13726 = vst [vmem:[#allocation46_spill] sm:$0xff] %v8320_v26  ;;  %v8326_v32 = vadd.f32 %v7451_v25, %v8050_v62 }
 0x1af   :  { %v8313_v3 = vadd.f32 %v7451_v25, %v1200_v10  ;;  %v6301_v24 = vpack.i.bf16 %v8306_v1, %v8302_v58  ;;  %v8344_v10 = vpack.i.bf16 %v8320_v26, %v2762_v55  ;;  %v8357_v62 = vadd.f32 %v7451_v25, %v8059_v40 }
 0x1b0   :  { %1664 = vrot.lane.b32.xlu0 %v1652_v2, %s6817_s30  ;;  %13727 = vst [vmem:[#allocation47_spill] sm:$0xff] %v8326_v32  ;;  %v8351_v2 = vadd.f32 %v8055_v29, %v7451_v25  ;;  %v1647_v55 = vrot.slane %v8106_v27, 5 }
 0x1b1   :  { %v6003_v9 = vpop.f32.mrb[102].mxu0  ;;  %13729 = vst [vmem:[#allocation49_spill] sm:$0xff] %v8344_v10  ;;  %13732 = vst [vmem:[#allocation52_spill] sm:$0xff] %v8357_v62  ;;  %v13316_v62 = vrot.slane %v8003_v31, 3 }
 0x1b2   :  { %3172 = vrot.lane.b32.xlu1 %v8156_v49, %s6812_s25  ;;  %v8337_v12 = vadd.f32 %v6003_v9, %v7451_v25  ;;  %v1210_v42 = vpop.f32.mrb[103].mxu0  ;;  %13731 = vst [vmem:[#allocation51_spill] sm:$0xff] %v8351_v2  ;;  %v1650_v9 = vsel %vm1645_vm7, %v1647_v55, %v8232_v21  ;;  %v1648_v10 = vsel %vm1645_vm7, %v13742_v20, %v1647_v55  ;;  %v1973_v55 = vrot.slane %v8106_v27, 3 }
 0x1b3   :  { %v8341_v28 = vadd.f32 %v7451_v25, %v1210_v42 }
 0x1b4   :  { %6302 = vrot.lane.b32.xlu0 %v6301_v24, %s6818_s12  ;;  %v13735_v24 = vrot.slane %v8161_v17, 3 }
 0x1b5   :  { %13728 = vst [vmem:[#allocation48_spill] sm:$0xff] %v8341_v28  ;;  %v6006_v42 = vpop.f32.mrb[104].mxu0 }
 0x1b6   :  { %3226 = vrot.lane.b32.xlu1 %v1908_v51, %s6814_s27  ;;  %v8367_v29 = vadd.f32 %v6006_v42, %v7451_v25  ;;  %v1220_v57 = vpop.f32.mrb[105].mxu0  ;;  %v1977_v40 = vsel %vm13532_vm4, %v8127_v16, %v13735_v24  ;;  %v8381_v51 = vadd.f32 %v8070_v60, %v7451_v25  ;;  %v8387_v24 = vadd.f32 %v7451_v25, %v8073_v38 }
 0x1b7   :  { %v8376_v26 = vadd.f32 %v7451_v25, %v1220_v57  ;;  %v13740_v42 = vrot.slane %v8161_v17, 6  ;;  %v2350_v57 = vrot.slane %v8161_v17, 7 }
 0x1b8   :  { %13734 = vst [vmem:[#allocation54_spill] sm:$0xff] %v8367_v29  ;;  %1989 = vrot.lane.b32.xlu0 %v1977_v40, %s6819_s13  ;;  %13737 = vst [vmem:[#allocation56_spill] sm:$0xff] %v8381_v51 }
 0x1b9   :  { %13736 = vst [vmem:[#allocation55_spill] sm:$0xff] %v8376_v26  ;;  %13738 = vst [vmem:[#allocation57_spill] sm:$0xff] %v8387_v24  ;;  %v6009_v53 = vpop.f32.mrb[106].mxu0  ;;  %v8402_v38 = vsel %vm13531_vm1, %v8223_v37, %v13740_v42 }
 0x1ba   :  { %4336 = vrot.lane.b32.xlu1 %v8232_v21, %s6817_s30  ;;  %v8396_v60 = vadd.f32 %v6009_v53, %v7451_v25  ;;  %v1230_v23 = vpop.f32.mrb[107].mxu0  ;;  %13741 = vst [vmem:[#allocation59_spill] sm:$0xff] %v8402_v38  ;;  %v6296_v21 = vpack.i.bf16 %v1650_v9, %v1648_v10  ;;  %v8428_v10 = vrot.slane %v8161_v17, 1  ;;  %v8434_v9 = vsel %vm13532_vm4, %v1973_v55, %v8127_v16 }
 0x1bb   :  { %v8409_v58 = vadd.f32 %v7451_v25, %v1230_v23  ;;  %v8424_v25 = vsel %vm13485_vm2, %v8253_v39, %v2350_v57  ;;  %13746 = vst [vmem:[#allocation63_spill] sm:$0xff] %v8434_v9  ;;  %v8446_v53 = vmax.f32 %v7832_v7, 0.0 }
 0x1bc   :  { %13739 = vst [vmem:[#allocation58_spill] sm:$0xff] %v8396_v60  ;;  %2289 = vrot.lane.b32.xlu0 %v8402_v38, %s6808_s21  ;;  %13744 = vst [vmem:[#allocation61_spill] sm:$0xff] %v8424_v25  ;;  %v2578_v37 = vsel %vm13652_vm3, %v8156_v49, %v8428_v10 }
 0x1bd   :  { %13743 = vst [vmem:[#allocation60_spill] sm:$0xff] %v8409_v58  ;;  %v8417_v42 = vpop.f32.mrb[108].mxu0  ;;  %13745 = vst [vmem:[#allocation62_spill] sm:$0xff] %v8428_v10  ;;  %v2280_v55 = vrot.slane %v8446_v53, 6  ;;  %v3168_v38 = vrot.slane %v8446_v53, 1  ;;  %v1912_v58 = vrot.slane %v8446_v53, 2 }
 0x1be   :  { %6297 = vrot.lane.b32.xlu1 %v6296_v21, %s6817_s30  ;;  %v8420_v20 = vpop.f32.mrb[109].mxu0  ;;  %13747 = vst [vmem:[#allocation64_spill] sm:$0xff] %v8446_v53 }
 0x1bf   :  { %v3169_v28 = vsel %vm13652_vm3, %v8428_v10, %v3168_v38 }
 0x1c0   :  { %2365 = vrot.lane.b32.xlu0 %v8424_v25, %s6810_s23 }
 0x1c1   :  { %v8436_v23 = vpop.f32.mrb[110].mxu0 }
 0x1c2   :  { %1987 = vrot.lane.b32.xlu1 %v8434_v9, %s6819_s13  ;;  %v8440_v21 = vpop.f32.mrb[111].mxu0 }
 0x1c4   :  { %3174 = vrot.lane.b32.xlu0 %v2578_v37, %s6812_s25 }
 0x1c5   :  { %v8449_v48 = vpop.f32.mrb[112].mxu0 }
 0x1c6   :  { %3284 = vrot.lane.b32.xlu1 %v1977_v40, %s6815_s28  ;;  %v8452_v16 = vpop.f32.mrb[113].mxu0  ;;  %v1978_v40 = vrot.slane %v8446_v53, 3 }
 0x1c8   :  { %3228 = vrot.lane.b32.xlu0 %v8306_v1, %s6814_s27 }
 0x1c9   :  { %v8457_v9 = vpop.f32.mrb[114].mxu0 }
 0x1ca   :  { %2293 = vrot.lane.b32.xlu1 %v2280_v55, %s6808_s21  ;;  %v8460_v49 = vpop.f32.mrb[115].mxu0 }
 0x1cc   :  { %v8462_v7 = vpop.permute.xlu1 %2005  ;;  %2590 = vrot.lane.b32.xlu0 %v2578_v37, %s6811_s24 }
 0x1cd   :  { %13748 = vst [vmem:[#allocation65_spill] sm:$0xff] %v8462_v7  ;;  %v8467_v25 = vpop.f32.mrb[116].mxu0  ;;  %v13751_v7 = vrot.slane %v8161_v17, 3 }
 0x1ce   :  { %v8469_v39 = vpop.permute.xlu0 %3200  ;;  %3178 = vrot.lane.b32.xlu1 %v3168_v38, %s6812_s25  ;;  %v8472_v27 = vpop.f32.mrb[117].mxu0 }
 0x1cf   :  { %13749 = vst [vmem:[#allocation66_spill] sm:$0xff] %v8469_v39  ;;  %v1979_v37 = vsel %vm13532_vm4, %v13751_v7, %v1978_v40  ;;  %v2352_v7 = vrot.slane %v8446_v53, 7 }
 0x1d0   :  { %1721 = vrot.lane.b32.xlu0 %v8011_v34, %s6808_s21  ;;  %v8476_v1 = vpop.permute.xlu1 %1954 }
 0x1d1   :  { %13750 = vst [vmem:[#allocation67_spill] sm:$0xff] %v8476_v1  ;;  %v8481_v56 = vpop.f32.mrb[118].mxu0  ;;  %v13754_v1 = vrot.slane %v8161_v17, 6 }
 0x1d2   :  { %v8483_v11 = vpop.permute.xlu0 %3254  ;;  %1991 = vrot.lane.b32.xlu1 %v1979_v37, %s6819_s13  ;;  %v8486_v39 = vpop.f32.mrb[119].mxu0 }
 0x1d3   :  { %13752 = vst [vmem:[#allocation68_spill] sm:$0xff] %v8483_v11  ;;  %v8495_v60 = vsel %vm13531_vm1, %v13754_v1, %v2280_v55  ;;  %v8514_v55 = vsel %vm13485_vm2, %v2350_v57, %v2352_v7 }
 0x1d4   :  { %3286 = vrot.lane.b32.xlu0 %v1979_v37, %s6815_s28  ;;  %v8490_v24 = vpop.permute.xlu1 %2009  ;;  %13755 = vst [vmem:[#allocation70_spill] sm:$0xff] %v8495_v60  ;;  %v13757_v37 = vrot.slane %v8003_v31, 2  ;;  %13759 = vst [vmem:[#allocation73_spill] sm:$0xff] %v8514_v55 }
 0x1d5   :  { %13753 = vst [vmem:[#allocation69_spill] sm:$0xff] %v8490_v24  ;;  %v8498_v51 = vpop.f32.mrb[120].mxu0 }
 0x1d6   :  { %v8500_v11 = vpop.permute.xlu0 %2007  ;;  %2291 = vrot.lane.b32.xlu1 %v8495_v60, %s6808_s21  ;;  %v8504_v26 = vpop.f32.mrb[121].mxu0  ;;  %v3224_v24 = vsel %vm13530_vm5, %v1912_v58, %v13757_v37 }
 0x1d7   :  { %13756 = vst [vmem:[#allocation71_spill] sm:$0xff] %v8500_v11  ;;  %v13317_v11 = vrot.slane %v8003_v31, 7 }
 0x1d8   :  { %3232 = vrot.lane.b32.xlu0 %v3224_v24, %s6814_s27  ;;  %v8511_v1 = vpop.permute.xlu1 %1629  ;;  %v3279_v24 = vsel %vm13532_vm4, %v1978_v40, %v13316_v62 }
 0x1d9   :  { %13758 = vst [vmem:[#allocation72_spill] sm:$0xff] %v8511_v1  ;;  %v8516_v29 = vpop.f32.mrb[122].mxu0  ;;  %v2355_v57 = vsel %vm13485_vm2, %v2352_v7, %v13317_v11 }
 0x1da   :  { %v8519_v60 = vpop.permute.xlu0 %1631  ;;  %2367 = vrot.lane.b32.xlu1 %v8514_v55, %s6810_s23  ;;  %v8523_v2 = vpop.f32.mrb[123].mxu0 }
 0x1db   :  { %13760 = vst [vmem:[#allocation74_spill] sm:$0xff] %v8519_v60 }
 0x1dc   :  { %3288 = vrot.lane.b32.xlu0 %v3279_v24, %s6815_s28  ;;  %v8529_v37 = vpop.permute.xlu1 %1697  ;;  %v8547_v24 = vld [vmem:[%s13222_s3] ss:$0 sm:$0xff]  ;;  %s6820_s3 = smov 90  }
 0x1dd   :  { %13761 = vst [vmem:[#allocation75_spill] sm:$0xff] %v8529_v37  ;;  %v8534_v1 = vpop.f32.mrb[124].mxu0  ;;  %v1246_v7 = vadd.f32 %v8547_v24, %v8417_v42 }
 0x1de   :  { %13762 = vst [vmem:[#allocation76_spill] sm:$0xff] %v8534_v1  ;;  %v8536_v60 = vpop.permute.xlu0 %1695  ;;  %2369 = vrot.lane.b32.xlu1 %v2355_v57, %s6810_s23  ;;  %v8539_v55 = vpop.f32.mrb[125].mxu0  ;;  %v1241_v57 = vadd.f32 %v8547_v24, %v8420_v20  ;;  %v13325_v1 = vrot.slane %v8446_v53, 5 }
 0x1df   :  { %13763 = vst [vmem:[#allocation77_spill] sm:$0xff] %v8536_v60  ;;  %13764 = vst [vmem:[#allocation78_spill] sm:$0xff] %v8539_v55  ;;  %v13767_v55 = vrot.slane %v8003_v31, 1 }
 0x1e0   :  { %3728 = vrot.lane.b32.xlu0 %v3169_v28, %s6811_s24  ;;  %v8552_v62 = vpop.permute.xlu1 %6287 }
 0x1e1   :  { %13765 = vst [vmem:[#allocation79_spill] sm:$0xff] %v8552_v62  ;;  %v6039_v11 = vpop.f32.mrb[126].mxu0  ;;  %v3726_v42 = vsel %vm13652_vm3, %v3168_v38, %v13767_v55  ;;  %v1256_v62 = vadd.f32 %v8547_v24, %v8436_v23  ;;  %v8577_v38 = vrot.slane %v8446_v53, 4  ;;  %v13770_v23 = vmax.f32 %v8081_v44, %v8097_v54 }
 0x1e2   :  { %v1336_v10 = vadd.f32 %v8547_v24, %v6039_v11  ;;  %v1330_v37 = vpop.f32.mrb[127].mxu0  ;;  %v8557_v40 = vpop.permute.xlu0 %1956  ;;  %3176 = vrot.lane.b32.xlu1 %v3169_v28, %s6812_s25  ;;  %v13773_v54 = vrot.slane %v8161_v17, 5 }
 0x1e3   :  { %13766 = vst [vmem:[#allocation80_spill] sm:$0xff] %v8557_v40  ;;  %v1331_v60 = vadd.f32 %v8547_v24, %v1330_v37  ;;  %v1251_v40 = vadd.f32 %v8547_v24, %v8440_v21  ;;  %v8574_v37 = vsel %vm13530_vm5, %v8260_v50, %v1912_v58  ;;  %13769 = vst [vmem:[#allocation82_spill] sm:$0xff] %v8577_v38  ;;  %v8590_v58 = vrot.slane %v8006_v22, 1 }
 0x1e4   :  { %v1474_v20 = vmax.f32 %v1246_v7, %v1336_v10  ;;  %3730 = vrot.lane.b32.xlu0 %v3726_v42, %s6811_s24  ;;  %v8568_v11 = vpop.permute.xlu1 %1958  ;;  %v13772_v7 = vmax.f32 %v8090_v61, %v8103_v52  ;;  %v4331_v42 = vsel %vm1645_vm7, %v13773_v54, %v13325_v1  ;;  %v1261_v61 = vadd.f32 %v8547_v24, %v8452_v16 }
 0x1e5   :  { %13768 = vst [vmem:[#allocation81_spill] sm:$0xff] %v8568_v11  ;;  %v1473_v28 = vmax.f32 %v1241_v57, %v1331_v60  ;;  %v6042_v32 = vpop.f32.mrb[128].mxu0  ;;  %v4294_v54 = vrot.slane %v8003_v31, 4  ;;  %v13779_v16 = vmax.f32 %v8121_v30, %v8136_v47  ;;  %v1271_v30 = vadd.f32 %v8547_v24, %v8460_v49 }
 0x1e6   :  { %v8582_v10 = vmax.f32 %v13770_v23, %v1474_v20  ;;  %v8584_v55 = vpop.permute.xlu0 %2327  ;;  %3230 = vrot.lane.b32.xlu1 %v8574_v37, %s6814_s27  ;;  %v1346_v60 = vadd.f32 %v8547_v24, %v6042_v32  ;;  %v1340_v21 = vpop.f32.mrb[129].mxu0  ;;  %v13329_v20 = vrot.slane %v8011_v34, 1  ;;  %v1266_v32 = vadd.f32 %v8547_v24, %v8449_v48 }
 0x1e7   :  { %13771 = vst [vmem:[#allocation83_spill] sm:$0xff] %v8584_v55  ;;  %v8595_v57 = vmax.f32 %v13772_v7, %v1473_v28  ;;  %v1341_v44 = vadd.f32 %v8547_v24, %v1340_v21  ;;  %v13775_v21 = vrot.slane %v8161_v17, 4  ;;  %v13777_v48 = vmax.f32 %v8111_v18, %v8130_v59 }
 0x1e8   :  { %v1476_v23 = vmax.f32 %v1256_v62, %v1346_v60  ;;  %4338 = vrot.lane.b32.xlu0 %v4331_v42, %s6817_s30  ;;  %v8607_v50 = vpop.permute.xlu1 %2325  ;;  %v8636_v18 = vsel %vm13652_vm3, %v8590_v58, %v13329_v20  ;;  %v1276_v59 = vadd.f32 %v8547_v24, %v8457_v9  ;;  %v13782_v9 = vmax.f32 %v8143_v14, %v8165_v36  ;;  %v13809_v20 = vld [vmem:[#allocation78_spill] sm:$0xff] }
 0x1e9   :  { %13774 = vst [vmem:[#allocation84_spill] sm:$0xff] %v8607_v50  ;;  %v1475_v52 = vmax.f32 %v1251_v40, %v1341_v44  ;;  %v6045_v28 = vpop.f32.mrb[130].mxu0  ;;  %v8615_v7 = vsel %vm1571_vm6, %v13775_v21, %v8577_v38  ;;  %v4295_v21 = vsel %vm1571_vm6, %v8577_v38, %v4294_v54  ;;  %v13784_v49 = vmax.f32 %v8153_v35, %v8170_v15 }
 0x1ea   :  { %13776 = vst [vmem:[#allocation85_spill] sm:$0xff] %v8615_v7  ;;  %v1512_v62 = vmax.f32 %v13777_v48, %v1476_v23  ;;  %v1356_v60 = vadd.f32 %v8547_v24, %v6045_v28  ;;  %v1350_v42 = vpop.f32.mrb[131].mxu0  ;;  %v8622_v1 = vpop.permute.xlu0 %2401  ;;  %4300 = vrot.lane.b32.xlu1 %v8615_v7, %s6816_s29  ;;  %v8649_v48 = vrot.slane %v8003_v31, 5  ;;  %v13326_v14 = vrot.slane %v8011_v34, 6  ;;  %v13826_v7 = vld [vmem:[#allocation60_spill] sm:$0xff] }
 0x1eb   :  { %13778 = vst [vmem:[#allocation86_spill] sm:$0xff] %v8622_v1  ;;  %v8629_v40 = vmax.f32 %v13779_v16, %v1475_v52  ;;  %v1351_v44 = vadd.f32 %v8547_v24, %v1350_v42  ;;  %v1286_v36 = vadd.f32 %v8547_v24, %v8467_v25  ;;  %v1281_v35 = vadd.f32 %v8547_v24, %v8472_v27 }
 0x1ec   :  { %v1478_v23 = vmax.f32 %v1266_v32, %v1356_v60  ;;  %1793 = vrot.lane.b32.xlu0 %v8636_v18, %s6810_s23  ;;  %v8642_v28 = vpop.permute.xlu1 %2399  ;;  %13781 = vst [vmem:[#allocation88_spill] sm:$0xff] %v8649_v48  ;;  %v13787_v25 = vmax.f32 %v8179_v13, %v8205_v46  ;;  %v13330_v27 = vrot.slane %v8006_v22, 5  ;;  %v13328_v46 = vrot.slane %v8011_v34, 5 }
 0x1ed   :  { %13780 = vst [vmem:[#allocation87_spill] sm:$0xff] %v8642_v28  ;;  %v1477_v47 = vmax.f32 %v1261_v61, %v1351_v44  ;;  %v6048_v52 = vpop.f32.mrb[132].mxu0  ;;  %v8667_v44 = vrot.slane %v8006_v22, 6 }
 0x1ee   :  { %v8654_v32 = vmax.f32 %v13782_v9, %v1478_v23  ;;  %v1366_v60 = vadd.f32 %v8547_v24, %v6048_v52  ;;  %v1360_v42 = vpop.f32.mrb[133].mxu0  ;;  %v8657_v16 = vpop.permute.xlu0 %3204  ;;  %4302 = vrot.lane.b32.xlu1 %v4295_v21, %s6816_s29  ;;  %v13786_v21 = vrot.slane %v8446_v53, 5 }
 0x1ef   :  { %13783 = vst [vmem:[#allocation89_spill] sm:$0xff] %v8657_v16  ;;  %v8663_v61 = vmax.f32 %v13784_v49, %v1477_v47  ;;  %v1361_v54 = vadd.f32 %v8547_v24, %v1360_v42  ;;  %v8702_v13 = vsel %vm13531_vm1, %v8667_v44, %v13326_v14 }
 0x1f0   :  { %v1480_v23 = vmax.f32 %v1276_v59, %v1366_v60  ;;  %6307 = vrot.lane.b32.xlu0 %v8044_v33, %s6820_s3  ;;  %v8674_v52 = vpop.permute.xlu1 %3202  ;;  %v4332_v9 = vsel %vm1645_vm7, %v13786_v21, %v8649_v48  ;;  %13790 = vst [vmem:[#allocation92_spill] sm:$0xff] %v8702_v13 }
 0x1f1   :  { %13785 = vst [vmem:[#allocation90_spill] sm:$0xff] %v8674_v52  ;;  %v1479_v15 = vmax.f32 %v1271_v30, %v1361_v54  ;;  %v6051_v47 = vpop.f32.mrb[134].mxu0  ;;  %v13789_v30 = vmax.f32 %v8191_v4, %v8216_v43  ;;  %v1291_v43 = vadd.f32 %v8547_v24, %v8486_v39  ;;  %v13795_v39 = vmax.f32 %v8237_v5, %v8267_v19 }
 0x1f2   :  { %v8685_v59 = vmax.f32 %v13787_v25, %v1480_v23  ;;  %v1376_v60 = vadd.f32 %v8547_v24, %v6051_v47  ;;  %v8688_v42 = vpop.permute.xlu0 %3258  ;;  %4340 = vrot.lane.b32.xlu1 %v4332_v9, %s6817_s30  ;;  %v1370_v49 = vpop.f32.mrb[135].mxu0  ;;  %v1296_v23 = vadd.f32 %v8547_v24, %v8481_v56  ;;  %v13794_v56 = vmax.f32 %v8227_v45, %v8256_v63 }
 0x1f3   :  { %13788 = vst [vmem:[#allocation91_spill] sm:$0xff] %v8688_v42  ;;  %v8695_v54 = vmax.f32 %v13789_v30, %v1479_v15  ;;  %v1371_v21 = vadd.f32 %v8547_v24, %v1370_v49  ;;  %v8713_v15 = vmax.f32 %v1512_v62, 0.0  ;;  %v8716_v49 = vmax.f32 %v8582_v10, 0.0 }
 0x1f4   :  { %v1482_v47 = vmax.f32 %v1286_v36, %v1376_v60  ;;  %2039 = vrot.lane.b32.xlu0 %v8702_v13, %s6821_s16  ;;  %v8709_v4 = vpop.permute.xlu1 %3256  ;;  %v8739_v45 = vsel %vm1645_vm7, %v13330_v27, %v13328_v46  ;;  %v1306_v63 = vadd.f32 %v8547_v24, %v8498_v51  ;;  %v13799_v51 = vmax.f32 %v8264_v41, %v8291_v8  ;;  %v13812_v27 = vld [vmem:[#allocation54_spill] sm:$0xff] }
 0x1f5   :  { %13791 = vst [vmem:[#allocation93_spill] sm:$0xff] %v8709_v4  ;;  %13792 = vst [vmem:[#allocation94_spill] sm:$0xff] %v8713_v15  ;;  %v1481_v9 = vmax.f32 %v1281_v35, %v1371_v21  ;;  %v6054_v25 = vpop.f32.mrb[136].mxu0  ;;  %v8744_v35 = vmax.f32 %v8595_v57, 0.0  ;;  %v13327_v5 = vrot.slane %v8716_v49, 3  ;;  %v1316_v41 = vadd.f32 %v8547_v24, %v8516_v29  ;;  %v13856_v4 = vld [vmem:[#allocation36_spill] sm:$0xff] }
 0x1f6   :  { %13793 = vst [vmem:[#allocation95_spill] sm:$0xff] %v8716_v49  ;;  %v8721_v36 = vmax.f32 %v13794_v56, %v1482_v47  ;;  %v1386_v60 = vadd.f32 %v8547_v24, %v6054_v25  ;;  %v1380_v30 = vpop.f32.mrb[137].mxu0  ;;  %v8724_v14 = vpop.permute.xlu0 %2267  ;;  %1719 = vrot.lane.b32.xlu1 %v8006_v22, %s6808_s21  ;;  %v1301_v47 = vadd.f32 %v8547_v24, %v8504_v26  ;;  %v8754_v56 = vrot.slane %v8713_v15, 3 }
 0x1f7   :  { %v8731_v62 = vmax.f32 %v13795_v39, %v1481_v9  ;;  %v1381_v10 = vadd.f32 %v8547_v24, %v1380_v30  ;;  %13796 = vst [vmem:[#allocation96_spill] sm:$0xff] %v8744_v35  ;;  %v2828_v26 = vrot.slane %v8744_v35, 3  ;;  %v13803_v29 = vmax.f32 %v8310_v0, %v8337_v12 }
 0x1f8   :  { %v1484_v21 = vmax.f32 %v1296_v23, %v1386_v60  ;;  %2175 = vrot.lane.b32.xlu0 %v8739_v45, %s6816_s29  ;;  %v8748_v19 = vpop.permute.xlu1 %2552  ;;  %13798 = vst [vmem:[#allocation98_spill] sm:$0xff] %v8754_v56  ;;  %v3747_v12 = vrot.slane %v8011_v34, 4 }
 0x1f9   :  { %13797 = vst [vmem:[#allocation97_spill] sm:$0xff] %v8748_v19  ;;  %v1483_v9 = vmax.f32 %v1291_v43, %v1381_v10  ;;  %v6057_v25 = vpop.f32.mrb[138].mxu0  ;;  %v13800_v43 = vmax.f32 %v8284_v6, %v8313_v3  ;;  %v1311_v3 = vadd.f32 %v8547_v24, %v8523_v2  ;;  %v13332_v2 = vrot.slane %v8003_v31, 6 }
 0x1fa   :  { %v8759_v57 = vmax.f32 %v13799_v51, %v1484_v21  ;;  %v8761_v23 = vpop.permute.xlu0 %2331  ;;  %2237 = vrot.lane.b32.xlu1 %v8667_v44, %s6817_s30  ;;  %v1396_v60 = vadd.f32 %v8547_v24, %v6057_v25  ;;  %v1390_v30 = vpop.f32.mrb[139].mxu0  ;;  %v8782_v25 = vsel %vm13532_vm4, %v2828_v26, %v13327_v5  ;;  %v13805_v26 = vld [vmem:[#allocation48_spill] sm:$0xff] }
 0x1fb   :  { %v8770_v39 = vmax.f32 %v13800_v43, %v1483_v9  ;;  %v1391_v10 = vadd.f32 %v8547_v24, %v1390_v30  ;;  %13802 = vst [vmem:[#allocation100_spill] sm:$0xff] %v8782_v25 }
 0x1fc   :  { %v1486_v8 = vmax.f32 %v1306_v63, %v1396_v60  ;;  %2239 = vrot.lane.b32.xlu0 %v8702_v13, %s6817_s30  ;;  %v8777_v21 = vpop.permute.xlu1 %2614 }
 0x1fd   :  { %13801 = vst [vmem:[#allocation99_spill] sm:$0xff] %v8777_v21  ;;  %v1485_v6 = vmax.f32 %v1301_v47, %v1391_v10  ;;  %v6060_v9 = vpop.f32.mrb[140].mxu0  ;;  %v13804_v47 = vld [vmem:[#allocation47_spill] sm:$0xff]  ;;  %v13842_v21 = vrot.slane %v8011_v34, 5 }
 0x1fe   :  { %v8791_v63 = vmax.f32 %v13803_v29, %v1486_v8  ;;  %v1406_v60 = vadd.f32 %v8547_v24, %v6060_v9  ;;  %v1400_v30 = vpop.f32.mrb[141].mxu0  ;;  %v8794_v43 = vpop.permute.xlu0 %2405  ;;  %3116 = vrot.lane.b32.xlu1 %v8590_v58, %s6811_s24  ;;  %v13806_v10 = vmax.f32 %v13804_v47, %v13805_v26  ;;  %v13807_v8 = vld [vmem:[#allocation76_spill] sm:$0xff]  ;;  %v1321_v47 = vadd.f32 %v8547_v24, %v13809_v20 }
 0x1ff   :  { %v1401_v51 = vadd.f32 %v8547_v24, %v1400_v30  ;;  %v1326_v9 = vadd.f32 %v8547_v24, %v13807_v8  ;;  %v8819_v30 = vsel %vm13531_vm1, %v13332_v2, %v8667_v44  ;;  %v13817_v44 = vrot.slane %v8006_v22, 4 }
 0x200   :  { %v8802_v5 = vmax.f32 %v13806_v10, %v1485_v6  ;;  %v1488_v29 = vmax.f32 %v1316_v41, %v1406_v60  ;;  %3118 = vrot.lane.b32.xlu0 %v8636_v18, %s6811_s24  ;;  %v8811_v46 = vpop.permute.xlu1 %2554  ;;  %13810 = vst [vmem:[#allocation48_spill] sm:$0xff] %v8819_v30  ;;  %v13811_v10 = vld [vmem:[#allocation51_spill] sm:$0xff] }
 0x201   :  { %13808 = vst [vmem:[#allocation47_spill] sm:$0xff] %v8811_v46  ;;  %v1487_v6 = vmax.f32 %v1311_v3, %v1401_v51  ;;  %v6063_v26 = vpop.f32.mrb[142].mxu0  ;;  %v13813_v8 = vmax.f32 %v13811_v10, %v13812_v27  ;;  %v13814_v3 = vld [vmem:[#allocation52_spill] sm:$0xff]  ;;  %v13815_v51 = vld [vmem:[#allocation55_spill] sm:$0xff]  ;;  %v8839_v2 = vsel %vm1571_vm6, %v13817_v44, %v3747_v12  ;;  %v13825_v44 = vld [vmem:[#allocation57_spill] sm:$0xff] }
 0x202   :  { %v8826_v60 = vpop.permute.xlu0 %2329  ;;  %2037 = vrot.lane.b32.xlu1 %v8819_v30, %s6821_s16  ;;  %v1416_v20 = vadd.f32 %v8547_v24, %v6063_v26  ;;  %v1410_v18 = vpop.f32.mrb[143].mxu0  ;;  %v13816_v0 = vmax.f32 %v13814_v3, %v13815_v51  ;;  %13818 = vst [vmem:[#allocation76_spill] sm:$0xff] %v8839_v2  ;;  %v13820_v26 = vrot.slane %v8006_v22, 5  ;;  %v13822_v3 = vld [vmem:[#allocation56_spill] sm:$0xff]  ;;  %v9035_v11 = vmax.f32 %v8802_v5, 0.0 }
 0x203   :  { %v8824_v41 = vmax.f32 %v13813_v8, %v1488_v29  ;;  %v1411_v27 = vadd.f32 %v8547_v24, %v1410_v18  ;;  %v13823_v24 = vld [vmem:[#allocation58_spill] sm:$0xff] }
 0x204   :  { %v8834_v38 = vmax.f32 %v13816_v0, %v1487_v6  ;;  %3758 = vrot.lane.b32.xlu0 %v8839_v2, %s6812_s25  ;;  %v8844_v29 = vpop.permute.xlu1 %2616  ;;  %v1490_v10 = vmax.f32 %v1326_v9, %v1416_v20  ;;  %v8850_v8 = vsel %vm1645_vm7, %v8649_v48, %v13820_v26  ;;  %v13824_v18 = vmax.f32 %v13822_v3, %v13823_v24  ;;  %v13828_v2 = vld [vmem:[#allocation38_spill] sm:$0xff] }
 0x205   :  { %13819 = vst [vmem:[#allocation78_spill] sm:$0xff] %v8844_v29  ;;  %13821 = vst [vmem:[#allocation51_spill] sm:$0xff] %v8850_v8  ;;  %v1489_v0 = vmax.f32 %v1321_v47, %v1411_v27  ;;  %v13827_v9 = vmax.f32 %v13825_v44, %v13826_v7  ;;  %v13830_v47 = vld [vmem:[#allocation20_spill] sm:$0xff]  ;;  %v1809_v17 = vrot.slane %v13828_v2, 5  ;;  %v9020_v30 = vmax.f32 %v8824_v41, 0.0 }
 0x206   :  { %v8852_v6 = vpop.permute.xlu0 %2403  ;;  %2173 = vrot.lane.b32.xlu1 %v8850_v8, %s6816_s29  ;;  %v8859_v51 = vmax.f32 %v13824_v18, %v1490_v10  ;;  %v8871_v27 = vmax.f32 %v13830_v47, 0.0  ;;  %v9023_v8 = vmax.f32 %v8834_v38, 0.0  ;;  %13872 = vst [vmem:[#allocation128_spill] sm:$0xff] %v9035_v11 }
 0x207   :  { %v8864_v20 = vmax.f32 %v13827_v9, %v1489_v0  ;;  %13868 = vst [vmem:[#allocation124_spill] sm:$0xff] %v9020_v30 }
 0x208   :  { %2660 = vrot.lane.b32.xlu0 %v13828_v2, %s6808_s21  ;;  %v8868_v26 = vpop.permute.xlu1 %4320  ;;  %13831 = vst [vmem:[#allocation52_spill] sm:$0xff] %v8871_v27  ;;  %v1782_v7 = vrot.slane %v8871_v27, 1  ;;  %v2164_v3 = vrot.slane %v8871_v27, 5  ;;  %v2028_v44 = vrot.slane %v8871_v27, 6  ;;  %13869 = vst [vmem:[#allocation125_spill] sm:$0xff] %v9023_v8  ;;  %v1846_v5 = vrot.slane %v8871_v27, 2 }
 0x209   :  { %13829 = vst [vmem:[#allocation54_spill] sm:$0xff] %v8868_v26  ;;  %v13838_v26 = vrot.slane %v8011_v34, 6 }
 0x20a   :  { %v8873_v29 = vpop.permute.xlu0 %3720  ;;  %2688 = vrot.lane.b32.xlu1 %v8739_v45, %s6814_s27  ;;  %v13835_v45 = vrot.slane %v8011_v34, 1 }
 0x20b   :  { %13832 = vst [vmem:[#allocation55_spill] sm:$0xff] %v8873_v29 }
 0x20c   :  { %4378 = vrot.lane.b32.xlu0 %v8871_v27, %s6808_s21  ;;  %v8879_v10 = vpop.permute.xlu1 %2265  ;;  %v1783_v18 = vsel %vm13652_vm3, %v13835_v45, %v1782_v7 }
 0x20e   :  { %v8882_v0 = vpop.permute.xlu0 %4318  ;;  %2740 = vrot.lane.b32.xlu1 %v8702_v13, %s6815_s28  ;;  %v2165_v13 = vsel %vm1645_vm7, %v13842_v21, %v2164_v3 }
 0x20f   :  { %13833 = vst [vmem:[#allocation56_spill] sm:$0xff] %v8882_v0  ;;  %v8903_v0 = vsel %vm13531_vm1, %v13838_v26, %v2028_v44  ;;  %v8919_v26 = vrot.slane %v8871_v27, 4  ;;  %v2768_v27 = vrot.slane %v9023_v8, 2 }
 0x210   :  { %2179 = vrot.lane.b32.xlu0 %v2164_v3, %s6816_s29  ;;  %v8888_v24 = vpop.permute.xlu1 %3206  ;;  %13839 = vst [vmem:[#allocation20_spill] sm:$0xff] %v8903_v0 }
 0x211   :  { %13834 = vst [vmem:[#allocation58_spill] sm:$0xff] %v8888_v24  ;;  %13844 = vst [vmem:[#allocation104_spill] sm:$0xff] %v8919_v26  ;;  %v8931_v21 = vsel %vm1571_vm6, %v3747_v12, %v8919_v26 }
 0x212   :  { %v8894_v9 = vpop.permute.xlu0 %3282  ;;  %1795 = vrot.lane.b32.xlu1 %v1783_v18, %s6810_s23  ;;  %13847 = vst [vmem:[#allocation106_spill] sm:$0xff] %v8931_v21 }
 0x213   :  { %13836 = vst [vmem:[#allocation57_spill] sm:$0xff] %v8894_v9  ;;  %v3806_v9 = vrot.slane %v13828_v2, 6 }
 0x214   :  { %2243 = vrot.lane.b32.xlu0 %v2028_v44, %s6817_s30  ;;  %v8898_v47 = vpop.permute.xlu1 %3260 }
 0x215   :  { %13837 = vst [vmem:[#allocation60_spill] sm:$0xff] %v8898_v47 }
 0x216   :  { %v8905_v29 = vpop.permute.xlu0 %4298  ;;  %2041 = vrot.lane.b32.xlu1 %v8903_v0, %s6821_s16 }
 0x217   :  { %13840 = vst [vmem:[#allocation101_spill] sm:$0xff] %v8905_v29  ;;  %v13845_v29 = vld [vmem:[#allocation35_spill] sm:$0xff] }
 0x218   :  { %3122 = vrot.lane.b32.xlu0 %v1782_v7, %s6811_s24  ;;  %v8910_v45 = vpop.permute.xlu1 %3740 }
 0x219   :  { %13841 = vst [vmem:[#allocation102_spill] sm:$0xff] %v8910_v45  ;;  %v1743_v45 = vrot.slane %v13828_v2, 4 }
 0x21a   :  { %v8915_v33 = vpop.permute.xlu0 %6292  ;;  %2177 = vrot.lane.b32.xlu1 %v2165_v13, %s6816_s29 }
 0x21b   :  { %13843 = vst [vmem:[#allocation103_spill] sm:$0xff] %v8915_v33  ;;  %v3751_v47 = vsel %vm1571_vm6, %v8919_v26, %v1743_v45  ;;  %v8961_v26 = vrot.slane %v13828_v2, 1  ;;  %v1744_v2 = vrot.slane %v13856_v4, 4  ;;  %v9104_v33 = vmax.f32 %v8859_v51, 0.0 }
 0x21c   :  { %2664 = vrot.lane.b32.xlu0 %v13845_v29, %s6808_s21  ;;  %v8923_v46 = vpop.permute.xlu1 %2287 }
 0x21d   :  { %13853 = vst [vmem:[#allocation112_spill] sm:$0xff] %v8961_v26  ;;  %13888 = vst [vmem:[#allocation138_spill] sm:$0xff] %v9104_v33 }
 0x21e   :  { %v8925_v19 = vpop.permute.xlu0 %1590  ;;  %2241 = vrot.lane.b32.xlu1 %v8903_v0, %s6817_s30 }
 0x21f   :  { %13846 = vst [vmem:[#allocation105_spill] sm:$0xff] %v8925_v19 }
 0x220   :  { %3760 = vrot.lane.b32.xlu0 %v8931_v21, %s6812_s25  ;;  %v8936_v25 = vpop.permute.xlu1 %2363  ;;  %v3782_v21 = vsel %vm1645_vm7, %v2164_v3, %v1809_v17  ;;  %v8967_v3 = vrot.slane %v13845_v29, 3 }
 0x222   :  { %v8938_v53 = vpop.permute.xlu0 %1664  ;;  %3120 = vrot.lane.b32.xlu1 %v1783_v18, %s6811_s24  ;;  %13855 = vst [vmem:[#allocation114_spill] sm:$0xff] %v8967_v3 }
 0x223   :  { %13848 = vst [vmem:[#allocation107_spill] sm:$0xff] %v8938_v53 }
 0x224   :  { %3762 = vrot.lane.b32.xlu0 %v3751_v47, %s6812_s25  ;;  %v8945_v12 = vpop.permute.xlu1 %3172  ;;  %v3807_v47 = vsel %vm13531_vm1, %v2028_v44, %v3806_v9  ;;  %v8978_v44 = vmax.f32 %v8695_v54, 0.0  ;;  %v4405_v9 = vsel %vm13652_vm3, %v1782_v7, %v8961_v26  ;;  %v13863_v7 = vld [vmem:[#allocation6_spill] sm:$0xff] }
 0x225   :  { %13849 = vst [vmem:[#allocation108_spill] sm:$0xff] %v8945_v12  ;;  %v9000_v12 = vmax.f32 %v13863_v7, 0.0 }
 0x226   :  { %v8947_v24 = vpop.permute.xlu0 %6302  ;;  %2690 = vrot.lane.b32.xlu1 %v2165_v13, %s6814_s27  ;;  %13858 = vst [vmem:[#allocation116_spill] sm:$0xff] %v8978_v44  ;;  %v9016_v22 = vrot.slane %v8978_v44, 2 }
 0x227   :  { %13850 = vst [vmem:[#allocation109_spill] sm:$0xff] %v8947_v24  ;;  %13864 = vst [vmem:[#allocation6_spill] sm:$0xff] %v9000_v12 }
 0x228   :  { %3784 = vrot.lane.b32.xlu0 %v3782_v21, %s6814_s27  ;;  %v8953_v18 = vpop.permute.xlu1 %3226  ;;  %v8970_v21 = vrot.slane %v13845_v29, 5 }
 0x229   :  { %13851 = vst [vmem:[#allocation110_spill] sm:$0xff] %v8953_v18  ;;  %v1810_v18 = vrot.slane %v13856_v4, 5 }
 0x22a   :  { %v8955_v42 = vpop.permute.xlu0 %1989  ;;  %2742 = vrot.lane.b32.xlu1 %v8903_v0, %s6815_s28  ;;  %v8990_v0 = vmax.f32 %v8770_v39, 0.0  ;;  %v9010_v39 = vmax.f32 %v8663_v61, 0.0 }
 0x22b   :  { %13852 = vst [vmem:[#allocation111_spill] sm:$0xff] %v8955_v42  ;;  %v8993_v52 = vsel %vm1645_vm7, %v1809_v17, %v1810_v18  ;;  %v8997_v54 = vsel %vm1645_vm7, %v1810_v18, %v8970_v21  ;;  %v9013_v17 = vmax.f32 %v8721_v36, 0.0  ;;  %v9032_v36 = vsel %vm1571_vm6, %v1743_v45, %v1744_v2 }
 0x22c   :  { %3810 = vrot.lane.b32.xlu0 %v3807_v47, %s6815_s28  ;;  %v8964_v13 = vpop.permute.xlu1 %4336  ;;  %13861 = vst [vmem:[#allocation119_spill] sm:$0xff] %v8990_v0  ;;  %13862 = vst [vmem:[#allocation120_spill] sm:$0xff] %v8993_v52  ;;  %v6316_v61 = vpack.i.bf16 %v8997_v54, %v8993_v52  ;;  %v9038_v41 = vrot.slane %v9010_v39, 2  ;;  %v9042_v24 = vrot.slane %v8990_v0, 1  ;;  %v9045_v42 = vmax.f32 %v8759_v57, 0.0 }
 0x22d   :  { %13854 = vst [vmem:[#allocation113_spill] sm:$0xff] %v8964_v13  ;;  %v8987_v13 = vmax.f32 %v8654_v32, 0.0  ;;  %v9007_v32 = vrot.slane %v13845_v29, 4  ;;  %13866 = vst [vmem:[#allocation122_spill] sm:$0xff] %v9010_v39  ;;  %v3520_v52 = vrot.slane %v9000_v12, 2  ;;  %v1849_v57 = vrot.slane %v8990_v0, 2 }
 0x22e   :  { %v8973_v16 = vpop.permute.xlu0 %2289  ;;  %4354 = vrot.lane.b32.xlu1 %v8967_v3, %s6812_s25  ;;  %13867 = vst [vmem:[#allocation123_spill] sm:$0xff] %v9013_v17  ;;  %13871 = vst [vmem:[#allocation127_spill] sm:$0xff] %v9032_v36  ;;  %v13879_v53 = vrot.slane %v9013_v17, 1 }
 0x22f   :  { %13857 = vst [vmem:[#allocation115_spill] sm:$0xff] %v8973_v16  ;;  %13860 = vst [vmem:[#allocation118_spill] sm:$0xff] %v8987_v13  ;;  %v1914_v7 = vrot.slane %v8987_v13, 2  ;;  %v1747_v45 = vsel %vm1571_vm6, %v1744_v2, %v9007_v32 }
 0x230   :  { %4407 = vrot.lane.b32.xlu0 %v4405_v9, %s6810_s23  ;;  %v8983_v47 = vpop.permute.xlu1 %6297  ;;  %13873 = vst [vmem:[#allocation129_spill] sm:$0xff] %v9042_v24  ;;  %13874 = vst [vmem:[#allocation130_spill] sm:$0xff] %v9045_v42 }
 0x231   :  { %13859 = vst [vmem:[#allocation117_spill] sm:$0xff] %v8983_v47  ;;  %v9056_v38 = vsel %vm13530_vm5, %v1914_v7, %v9016_v22  ;;  %v2770_v47 = vrot.slane %v9020_v30, 2  ;;  %v9091_v30 = vmax.f32 %v8864_v20, 0.0  ;;  %v9110_v20 = vrot.slane %v8978_v44, 6 }
 0x232   :  { %v9002_v9 = vpop.permute.xlu0 %2365  ;;  %4422 = vrot.lane.b32.xlu1 %v8970_v21, %s6815_s28  ;;  %13876 = vst [vmem:[#allocation132_spill] sm:$0xff] %v9056_v38 }
 0x233   :  { %13865 = vst [vmem:[#allocation121_spill] sm:$0xff] %v9002_v9  ;;  %13883 = vst [vmem:[#allocation137_spill] sm:$0xff] %v9091_v30 }
 0x234   :  { %4387 = vrot.lane.b32.xlu0 %v9007_v32, %s6814_s27  ;;  %v9027_v48 = vpop.permute.xlu1 %1987 }
 0x235   :  { %13870 = vst [vmem:[#allocation126_spill] sm:$0xff] %v9027_v48  ;;  %v1786_v48 = vsel %vm13652_vm3, %v13879_v53, %v9042_v24  ;;  %v13886_v24 = vld [vmem:[#allocation42_spill] sm:$0xff] }
 0x236   :  { %v9047_v26 = vpop.permute.xlu0 %3174  ;;  %3092 = vrot.lane.b32.xlu1 %v1744_v2, %s6816_s29  ;;  %v6311_v2 = vpack.i.bf16 %v1747_v45, %v9032_v36  ;;  %v9101_v36 = vsel %vm13530_vm5, %v13886_v24, %v3520_v52  ;;  %v13897_v24 = vrot.slane %v13845_v29, 1 }
 0x237   :  { %13875 = vst [vmem:[#allocation131_spill] sm:$0xff] %v9047_v26  ;;  %v9062_v26 = vsel %vm13530_vm5, %v9038_v41, %v1914_v7  ;;  %v1851_v7 = vrot.slane %v9045_v42, 2  ;;  %13887 = vst [vmem:[#allocation42_spill] sm:$0xff] %v9101_v36  ;;  %v3088_v36 = vrot.slane %v9000_v12, 4 }
 0x238   :  { %13877 = vst [vmem:[#allocation133_spill] sm:$0xff] %v9062_v26  ;;  %6317 = vrot.lane.b32.xlu0 %v6316_v61, %s6815_s28  ;;  %v9065_v19 = vpop.permute.xlu1 %3284  ;;  %v1853_v61 = vrot.slane %v9035_v11, 2  ;;  %v13882_v26 = vrot.slane %v8003_v31, 1  ;;  %v13884_v11 = vrot.slane %v8011_v34, 2  ;;  %v2800_v34 = vrot.slane %v8987_v13, 6 }
 0x239   :  { %13878 = vst [vmem:[#allocation134_spill] sm:$0xff] %v9065_v19  ;;  %v9079_v19 = vmax.f32 %v8791_v63, 0.0 }
 0x23a   :  { %v9081_v0 = vpop.permute.xlu0 %3228  ;;  %3144 = vrot.lane.b32.xlu1 %v1810_v18, %s6817_s30  ;;  %v1779_v53 = vsel %vm13652_vm3, %v13882_v26, %v8590_v58  ;;  %v1847_v63 = vsel %vm13530_vm5, %v13884_v11, %v1846_v5  ;;  %v9113_v11 = vsel %vm13530_vm5, %v2768_v27, %v2770_v47  ;;  %v1854_v52 = vsel %vm13530_vm5, %v1851_v7, %v1853_v61 }
 0x23b   :  { %13880 = vst [vmem:[#allocation135_spill] sm:$0xff] %v9079_v19  ;;  %13881 = vst [vmem:[#allocation136_spill] sm:$0xff] %v9081_v0  ;;  %v13885_v0 = vrot.slane %v9013_v17, 2  ;;  %v9115_v26 = vpack.i.bf16 %v1786_v48, %v1779_v53  ;;  %v2767_v51 = vrot.slane %v9079_v19, 2  ;;  %v2772_v48 = vrot.slane %v9091_v30, 2 }
 0x23c   :  { %3094 = vrot.lane.b32.xlu0 %v1747_v45, %s6816_s29  ;;  %v9107_v58 = vpop.permute.xlu1 %2293  ;;  %13889 = vst [vmem:[#allocation139_spill] sm:$0xff] %v9113_v11  ;;  %v9125_v45 = vrot.slane %v9079_v19, 1  ;;  %v1952_v19 = vrot.slane %v8713_v15, 7 }
 0x23d   :  { %v1850_v18 = vsel %vm13530_vm5, %v13885_v0, %v1849_v57  ;;  %13890 = vst [vmem:[#allocation140_spill] sm:$0xff] %v9115_v26  ;;  %v1852_v0 = vsel %vm13530_vm5, %v1849_v57, %v1851_v7  ;;  %v9132_v57 = vrot.slane %v9091_v30, 1  ;;  %v9163_v7 = vsel %vm13530_vm5, %v2770_v47, %v2772_v48 }
 0x23e   :  { %v9121_v5 = vpop.permute.xlu0 %2590  ;;  %6312 = vrot.lane.b32.xlu1 %v6311_v2, %s6814_s27  ;;  %13892 = vst [vmem:[#allocation142_spill] sm:$0xff] %v9125_v45  ;;  %v9129_v53 = vpack.i.bf16 %v1850_v18, %v1847_v63  ;;  %v9140_v2 = vpack.i.bf16 %v1854_v52, %v1852_v0  ;;  %v2769_v18 = vsel %vm13530_vm5, %v2767_v51, %v2768_v27  ;;  %13903 = vst [vmem:[#allocation150_spill] sm:$0xff] %v9163_v7  ;;  %v13392_v47 = vmov 0.0  }
 0x23f   :  { %13891 = vst [vmem:[#allocation141_spill] sm:$0xff] %v9121_v5  ;;  %13894 = vst [vmem:[#allocation144_spill] sm:$0xff] %v9132_v57  ;;  %v13898_v5 = vrot.slane %v13856_v4, 1  ;;  %v2801_v52 = vsel %vm13531_vm1, %v2800_v34, %v9110_v20  ;;  %v3577_v27 = vrot.slane %v9000_v12, 3 }
 0x240   :  { %13893 = vst [vmem:[#allocation143_spill] sm:$0xff] %v9129_v53  ;;  %3146 = vrot.lane.b32.xlu0 %v8997_v54, %s6817_s30  ;;  %v9138_v61 = vpop.permute.xlu1 %3178  ;;  %13896 = vst [vmem:[#allocation146_spill] sm:$0xff] %v9140_v2  ;;  %v13901_v54 = vrot.slane %v9023_v8, 1 }
 0x241   :  { %13895 = vst [vmem:[#allocation145_spill] sm:$0xff] %v9138_v61  ;;  %v9147_v63 = vsel %vm13652_vm3, %v13898_v5, %v13897_v24  ;;  %v3522_v24 = vrot.slane %v9104_v33, 2  ;;  %v9180_v61 = vrot.slane %v13392_v47, 4  ;;  %v13424_v33 = vrot.slane %v8713_v15, 6 }
 0x242   :  { %13899 = vst [vmem:[#allocation147_spill] sm:$0xff] %v9147_v63  ;;  %v9150_v30 = vpop.permute.xlu0 %1721  ;;  %2213 = vrot.lane.b32.xlu1 %v9147_v63, %s6811_s24  ;;  %v9158_v0 = vsel %vm13652_vm3, %v9125_v45, %v13901_v54  ;;  %v9176_v54 = vpack.i.bf16 %v9113_v11, %v2769_v18  ;;  %v13910_v63 = vld [vmem:[#allocation37_spill] sm:$0xff]  ;;  %v9192_v18 = vpack.i.bf16 %v2772_v48, %v9163_v7 }
 0x243   :  { %13900 = vst [vmem:[#allocation148_spill] sm:$0xff] %v9150_v30  ;;  %13902 = vst [vmem:[#allocation149_spill] sm:$0xff] %v9158_v0  ;;  %v9173_v5 = vsel %vm13530_vm5, %v2772_v48, %v3522_v24  ;;  %v9184_v0 = vpack.i.bf16 %v2801_v52, %v2800_v34  ;;  %v2204_v24 = vrot.slane %v9000_v12, 1  ;;  %v4385_v47 = vsel %vm1571_vm6, %v3088_v36, %v9180_v61 }
 0x244   :  { %3776 = vrot.lane.b32.xlu0 %v9000_v12, %s6808_s21  ;;  %v9170_v51 = vpop.permute.xlu1 %1991  ;;  %13905 = vst [vmem:[#allocation152_spill] sm:$0xff] %v9173_v5  ;;  %13906 = vst [vmem:[#allocation153_spill] sm:$0xff] %v9176_v54  ;;  %v1814_v34 = vrot.slane %v13910_v63, 5  ;;  %v13914_v5 = vmov 0.0   ;;  %v9211_v7 = vrot.slane %v13910_v63, 1 }
 0x245   :  { %13904 = vst [vmem:[#allocation151_spill] sm:$0xff] %v9170_v51  ;;  %13907 = vst [vmem:[#allocation154_spill] sm:$0xff] %v9180_v61 }
 0x246   :  { %13908 = vst [vmem:[#allocation155_spill] sm:$0xff] %v9184_v0  ;;  %v9186_v45 = vpop.permute.xlu0 %3286  ;;  %2666 = vrot.lane.b32.xlu1 %v13910_v63, %s6808_s21  ;;  %13911 = vst [vmem:[#allocation157_spill] sm:$0xff] %v9192_v18  ;;  %v9205_v0 = vrot.slane %v13914_v5, 1  ;;  %v1815_v18 = vsel %vm1645_vm7, %v8970_v21, %v1814_v34 }
 0x247   :  { %13909 = vst [vmem:[#allocation156_spill] sm:$0xff] %v9186_v45  ;;  %13917 = vst [vmem:[#allocation162_spill] sm:$0xff] %v9211_v7  ;;  %v2205_v45 = vsel %vm13652_vm3, %v9211_v7, %v2204_v24 }
 0x248   :  { %2219 = vrot.lane.b32.xlu0 %v2204_v24, %s6811_s24  ;;  %v9195_v11 = vpop.permute.xlu1 %2291  ;;  %13915 = vst [vmem:[#allocation160_spill] sm:$0xff] %v9205_v0 }
 0x249   :  { %13912 = vst [vmem:[#allocation158_spill] sm:$0xff] %v9195_v11 }
 0x24a   :  { %v9200_v52 = vpop.permute.xlu0 %3232  ;;  %4391 = vrot.lane.b32.xlu1 %v4385_v47, %s6814_s27  ;;  %v3792_v47 = vsel %vm13652_vm3, %v2204_v24, %v9205_v0 }
 0x24b   :  { %13913 = vst [vmem:[#allocation159_spill] sm:$0xff] %v9200_v52  ;;  %v1748_v52 = vrot.slane %v13910_v63, 4 }
 0x24c   :  { %4360 = vrot.lane.b32.xlu0 %v3577_v27, %s6812_s25  ;;  %v9208_v48 = vpop.permute.xlu1 %2367 }
 0x24d   :  { %13916 = vst [vmem:[#allocation161_spill] sm:$0xff] %v9208_v48  ;;  %v1749_v21 = vsel %vm1571_vm6, %v9007_v32, %v1748_v52 }
 0x24e   :  { %v9215_v54 = vpop.permute.xlu0 %3288  ;;  %1827 = vrot.lane.b32.xlu1 %v1815_v18, %s6815_s28 }
 0x24f   :  { %13918 = vst [vmem:[#allocation163_spill] sm:$0xff] %v9215_v54 }
 0x250   :  { %3796 = vrot.lane.b32.xlu0 %v3792_v47, %s6810_s23  ;;  %v9222_v61 = vpop.permute.xlu1 %2369  ;;  %v13922_v47 = vrot.slane %v13845_v29, 1 }
 0x252   :  { %v9226_v51 = vpop.permute.xlu0 %3728  ;;  %2217 = vrot.lane.b32.xlu1 %v2205_v45, %s6811_s24  ;;  %v2203_v24 = vsel %vm13652_vm3, %v13922_v47, %v9211_v7  ;;  %v3575_v47 = vrot.slane %v13910_v63, 3 }
 0x253   :  { %13919 = vst [vmem:[#allocation164_spill] sm:$0xff] %v9226_v51 }
 0x254   :  { %1761 = vrot.lane.b32.xlu0 %v1749_v21, %s6814_s27  ;;  %v9232_v54 = vpop.permute.xlu1 %3176 }
 0x255   :  { %13920 = vst [vmem:[#allocation165_spill] sm:$0xff] %v9232_v54 }
 0x256   :  { %v9234_v30 = vpop.permute.xlu0 %3730  ;;  %3096 = vrot.lane.b32.xlu1 %v1749_v21, %s6816_s29  ;;  %v13404_v21 = vrot.slane %v9000_v12, 5 }
 0x257   :  { %13921 = vst [vmem:[#allocation166_spill] sm:$0xff] %v9234_v30  ;;  %v3089_v30 = vsel %vm1571_vm6, %v1748_v52, %v3088_v36  ;;  %v9267_v36 = vsel %vm13532_vm4, %v8967_v3, %v3575_v47 }
 0x258   :  { %2215 = vrot.lane.b32.xlu0 %v2203_v24, %s6811_s24  ;;  %v9242_v51 = vpop.permute.xlu1 %3230  ;;  %13929 = vst [vmem:[#allocation173_spill] sm:$0xff] %v9267_v36 }
 0x259   :  { %13923 = vst [vmem:[#allocation167_spill] sm:$0xff] %v9242_v51 }
 0x25a   :  { %v9244_v5 = vpop.permute.xlu0 %4338  ;;  %3148 = vrot.lane.b32.xlu1 %v1815_v18, %s6817_s30  ;;  %v3141_v18 = vsel %vm1645_vm7, %v1814_v34, %v13404_v21  ;;  %v13410_v34 = vrot.slane %v8716_v49, 2 }
 0x25b   :  { %13924 = vst [vmem:[#allocation168_spill] sm:$0xff] %v9244_v5  ;;  %v13933_v5 = vld [vmem:[#allocation11_spill] sm:$0xff] }
 0x25c   :  { %2716 = vrot.lane.b32.xlu0 %v2203_v24, %s6810_s23  ;;  %v9248_v32 = vpop.permute.xlu1 %4300 }
 0x25d   :  { %13925 = vst [vmem:[#allocation169_spill] sm:$0xff] %v9248_v32  ;;  %v1679_v32 = vrot.slane %v13933_v5, 2 }
 0x25e   :  { %v9252_v54 = vpop.permute.xlu0 %1793  ;;  %3098 = vrot.lane.b32.xlu1 %v3089_v30, %s6816_s29 }
 0x25f   :  { %13926 = vst [vmem:[#allocation170_spill] sm:$0xff] %v9252_v54 }
 0x260   :  { %3794 = vrot.lane.b32.xlu0 %v2205_v45, %s6810_s23  ;;  %v9257_v7 = vpop.permute.xlu1 %4302  ;;  %v9274_v45 = vsel %vm13532_vm4, %v3575_v47, %v3577_v27 }
 0x261   :  { %13927 = vst [vmem:[#allocation171_spill] sm:$0xff] %v9257_v7  ;;  %13931 = vst [vmem:[#allocation175_spill] sm:$0xff] %v9274_v45  ;;  %v1686_v7 = vrot.slane %v8744_v35, 2 }
 0x262   :  { %v9262_v24 = vpop.permute.xlu0 %6307  ;;  %3150 = vrot.lane.b32.xlu1 %v3141_v18, %s6817_s30 }
 0x263   :  { %13928 = vst [vmem:[#allocation172_spill] sm:$0xff] %v9262_v24  ;;  %v1688_v27 = vsel %vm13530_vm5, %v1686_v7, %v13410_v34  ;;  %v1881_v7 = vrot.slane %v8716_v49, 6  ;;  %v1620_v34 = vrot.slane %v8744_v35, 1 }
 0x264   :  { %4356 = vrot.lane.b32.xlu0 %v9267_v36, %s6812_s25  ;;  %v9271_v52 = vpop.permute.xlu1 %4340 }
 0x265   :  { %13930 = vst [vmem:[#allocation174_spill] sm:$0xff] %v9271_v52  ;;  %v13935_v52 = vld [vmem:[#allocation10_spill] sm:$0xff] }
 0x266   :  { %v9278_v21 = vpop.permute.xlu0 %2039  ;;  %4358 = vrot.lane.b32.xlu1 %v9274_v45, %s6812_s25  ;;  %v13936_v36 = vrot.slane %v13935_v52, 2 }
 0x267   :  { %13932 = vst [vmem:[#allocation176_spill] sm:$0xff] %v9278_v21  ;;  %v9300_v21 = vmax.f32 %v8629_v40, 0.0 }
 0x268   :  { %4424 = vrot.lane.b32.xlu0 %v3141_v18, %s6815_s28  ;;  %v9284_v3 = vpop.permute.xlu1 %1719  ;;  %v1681_v51 = vsel %vm13530_vm5, %v1679_v32, %v13936_v36  ;;  %v1613_v36 = vrot.slane %v13933_v5, 1 }
 0x269   :  { %13934 = vst [vmem:[#allocation177_spill] sm:$0xff] %v9284_v3  ;;  %v6326_v18 = vpack.i.bf16 %v1688_v27, %v1681_v51  ;;  %13937 = vst [vmem:[#allocation178_spill] sm:$0xff] %v9300_v21  ;;  %v1623_v51 = vrot.slane %v9300_v21, 1  ;;  %v1948_v27 = vrot.slane %v8716_v49, 7  ;;  %v1883_v0 = vrot.slane %v9300_v21, 6 }
 0x26a   :  { %v9289_v47 = vpop.permute.xlu0 %2175  ;;  %4389 = vrot.lane.b32.xlu1 %v3089_v30, %s6814_s27  ;;  %v1621_v30 = vrot.slane %v8716_v49, 1  ;;  %v1689_v54 = vrot.slane %v9300_v21, 2 }
 0x26c   :  { %2011 = vrot.lane.b32.xlu0 %v8716_v49, %s6807_s0  ;;  %v9297_v45 = vpop.permute.xlu1 %2237  ;;  %v1624_v57 = vsel %vm13652_vm3, %v1621_v30, %v1623_v51 }
 0x26e   :  { %v9302_v24 = vpop.permute.xlu0 %2239  ;;  %6327 = vrot.lane.b32.xlu1 %v6326_v18, %s6812_s25  ;;  %v1622_v18 = vsel %vm13652_vm3, %v1620_v34, %v1621_v30 }
 0x270   :  { %3208 = vrot.lane.b32.xlu0 %v1881_v7, %s6808_s21  ;;  %v9309_v32 = vpop.permute.xlu1 %3116 }
 0x271   :  { %13938 = vst [vmem:[#allocation179_spill] sm:$0xff] %v9309_v32  ;;  %v13941_v32 = vrot.slane %v13935_v52, 1 }
 0x272   :  { %v9313_v40 = vpop.permute.xlu0 %3118  ;;  %2013 = vrot.lane.b32.xlu1 %v9300_v21, %s6807_s0 }
 0x273   :  { %13939 = vst [vmem:[#allocation180_spill] sm:$0xff] %v9313_v40  ;;  %v1615_v5 = vsel %vm13652_vm3, %v1613_v36, %v13941_v32  ;;  %v13421_v40 = vrot.slane %v8713_v15, 2  ;;  %v1884_v36 = vsel %vm13531_vm1, %v1881_v7, %v1883_v0 }
 0x274   :  { %3262 = vrot.lane.b32.xlu0 %v1948_v27, %s6810_s23  ;;  %v9321_v3 = vpop.permute.xlu1 %2037  ;;  %v6321_v34 = vpack.i.bf16 %v1622_v18, %v1615_v5 }
 0x275   :  { %13940 = vst [vmem:[#allocation181_spill] sm:$0xff] %v9321_v3  ;;  %v13943_v3 = vrot.slane %v8744_v35, 6  ;;  %v1692_v30 = vsel %vm13530_vm5, %v1689_v54, %v13421_v40  ;;  %v1950_v40 = vrot.slane %v9300_v21, 7 }
 0x276   :  { %v9330_v2 = vpop.permute.xlu0 %3758  ;;  %1635 = vrot.lane.b32.xlu1 %v1624_v57, %s6811_s24  ;;  %v9349_v57 = vsel %vm13531_vm1, %v1883_v0, %v13424_v33 }
 0x277   :  { %13942 = vst [vmem:[#allocation182_spill] sm:$0xff] %v9330_v2  ;;  %v9337_v52 = vsel %vm13531_vm1, %v13943_v3, %v1881_v7  ;;  %v13946_v3 = vld [vmem:[#allocation21_spill] sm:$0xff]  ;;  %v6336_v7 = vpack.i.bf16 %v9349_v57, %v1884_v36 }
 0x278   :  { %13944 = vst [vmem:[#allocation183_spill] sm:$0xff] %v9337_v52  ;;  %v9339_v32 = vpop.permute.xlu1 %2173  ;;  %6322 = vrot.lane.b32.xlu0 %v6321_v34, %s6811_s24  ;;  %v6331_v18 = vpack.i.bf16 %v9337_v52, %v13946_v3  ;;  %v1947_v34 = vrot.slane %v8744_v35, 7  ;;  %v1951_v3 = vsel %vm13485_vm2, %v1948_v27, %v1950_v40 }
 0x27a   :  { %v9351_v5 = vpop.permute.xlu0 %2660  ;;  %1703 = vrot.lane.b32.xlu1 %v1692_v30, %s6812_s25  ;;  %v9366_v0 = vsel %vm13485_vm2, %v1947_v34, %v1948_v27  ;;  %v13952_v34 = vrot.slane %v8716_v49, 3  ;;  %v9388_v27 = vrot.slane %v8716_v49, 4 }
 0x27b   :  { %13945 = vst [vmem:[#allocation184_spill] sm:$0xff] %v9351_v5  ;;  %13949 = vst [vmem:[#allocation186_spill] sm:$0xff] %v9366_v0 }
 0x27c   :  { %v9357_v2 = vpop.permute.xlu1 %2688  ;;  %6332 = vrot.lane.b32.xlu0 %v6331_v18, %s6813_s26  ;;  %v2319_v18 = vrot.slane %v9300_v21, 3  ;;  %13954 = vst [vmem:[#allocation190_spill] sm:$0xff] %v9388_v27 }
 0x27d   :  { %13947 = vst [vmem:[#allocation21_spill] sm:$0xff] %v9357_v2 }
 0x27e   :  { %v9362_v8 = vpop.permute.xlu0 %4378  ;;  %6337 = vrot.lane.b32.xlu1 %v6336_v7, %s6813_s26  ;;  %v9385_v7 = vsel %vm13532_vm4, %v13952_v34, %v2319_v18 }
 0x27f   :  { %13948 = vst [vmem:[#allocation185_spill] sm:$0xff] %v9362_v8  ;;  %v13437_v8 = vrot.slane %v8713_v15, 1  ;;  %13953 = vst [vmem:[#allocation189_spill] sm:$0xff] %v9385_v7 }
 0x280   :  { %v9368_v30 = vpop.permute.xlu1 %2740  ;;  %1960 = vrot.lane.b32.xlu0 %v9366_v0, %s6809_s22 }
 0x281   :  { %13950 = vst [vmem:[#allocation187_spill] sm:$0xff] %v9368_v30  ;;  %v2394_v30 = vrot.slane %v9300_v21, 4  ;;  %v1626_v2 = vsel %vm13652_vm3, %v1623_v51, %v13437_v8  ;;  %v1953_v8 = vsel %vm13485_vm2, %v1950_v40, %v1952_v19 }
 0x282   :  { %v9374_v33 = vpop.permute.xlu0 %2179  ;;  %1962 = vrot.lane.b32.xlu1 %v1951_v3, %s6809_s22 }
 0x283   :  { %v9403_v34 = vsel %vm1571_vm6, %v9388_v27, %v2394_v30 }
 0x284   :  { %v9378_v5 = vpop.permute.xlu1 %1795  ;;  %2015 = vrot.lane.b32.xlu0 %v8713_v15, %s6807_s0  ;;  %13956 = vst [vmem:[#allocation192_spill] sm:$0xff] %v9403_v34 }
 0x285   :  { %13951 = vst [vmem:[#allocation188_spill] sm:$0xff] %v9378_v5  ;;  %v13958_v5 = vrot.slane %v8716_v49, 2 }
 0x286   :  { %v9391_v0 = vpop.permute.xlu0 %2243  ;;  %2333 = vrot.lane.b32.xlu1 %v9385_v7, %s6814_s27 }
 0x287   :  { %v1690_v7 = vsel %vm13530_vm5, %v13958_v5, %v1689_v54  ;;  %v2544_v54 = vrot.slane %v9300_v21, 5 }
 0x288   :  { %v9398_v52 = vpop.permute.xlu1 %2041  ;;  %1637 = vrot.lane.b32.xlu0 %v1626_v2, %s6811_s24 }
 0x289   :  { %13955 = vst [vmem:[#allocation191_spill] sm:$0xff] %v9398_v52 }
 0x28a   :  { %v9405_v35 = vpop.permute.xlu0 %3122  ;;  %2407 = vrot.lane.b32.xlu1 %v9403_v34, %s6815_s28  ;;  %v13446_v34 = vrot.slane %v8716_v49, 5 }
 0x28b   :  { %13957 = vst [vmem:[#allocation193_spill] sm:$0xff] %v9405_v35  ;;  %v9440_v35 = vrot.slane %v8713_v15, 4 }
 0x28c   :  { %v9413_v51 = vpop.permute.xlu1 %2177  ;;  %1701 = vrot.lane.b32.xlu0 %v1690_v7, %s6812_s25  ;;  %v9430_v7 = vsel %vm13532_vm4, %v2319_v18, %v8754_v56  ;;  %v2545_v40 = vsel %vm1645_vm7, %v13446_v34, %v2544_v54 }
 0x28d   :  { %13962 = vst [vmem:[#allocation197_spill] sm:$0xff] %v9430_v7  ;;  %13964 = vst [vmem:[#allocation199_spill] sm:$0xff] %v9440_v35 }
 0x28e   :  { %v9416_v2 = vpop.permute.xlu0 %2664  ;;  %3210 = vrot.lane.b32.xlu1 %v1884_v36, %s6808_s21 }
 0x28f   :  { %13959 = vst [vmem:[#allocation194_spill] sm:$0xff] %v9416_v2 }
 0x290   :  { %v9420_v27 = vpop.permute.xlu1 %2241  ;;  %1964 = vrot.lane.b32.xlu0 %v1953_v8, %s6809_s22 }
 0x291   :  { %13960 = vst [vmem:[#allocation195_spill] sm:$0xff] %v9420_v27 }
 0x292   :  { %v9425_v5 = vpop.permute.xlu0 %3760  ;;  %3264 = vrot.lane.b32.xlu1 %v1951_v3, %s6810_s23  ;;  %v9447_v3 = vsel %vm1571_vm6, %v2394_v30, %v9440_v35 }
 0x293   :  { %13961 = vst [vmem:[#allocation196_spill] sm:$0xff] %v9425_v5  ;;  %13966 = vst [vmem:[#allocation201_spill] sm:$0xff] %v9447_v3  ;;  %v13449_v5 = vrot.slane %v8713_v15, 5 }
 0x294   :  { %v9432_v2 = vpop.permute.xlu1 %3120  ;;  %2335 = vrot.lane.b32.xlu0 %v9430_v7, %s6814_s27 }
 0x295   :  { %13963 = vst [vmem:[#allocation198_spill] sm:$0xff] %v9432_v2  ;;  %v2547_v30 = vsel %vm1645_vm7, %v2544_v54, %v13449_v5  ;;  %v3252_v5 = vrot.slane %v9010_v39, 7  ;;  %v9530_v2 = vmax.f32 %v8685_v59, 0.0 }
 0x296   :  { %v9442_v21 = vpop.permute.xlu0 %3762  ;;  %2560 = vrot.lane.b32.xlu1 %v2545_v40, %s6816_s29 }
 0x297   :  { %13965 = vst [vmem:[#allocation200_spill] sm:$0xff] %v9442_v21  ;;  %13984 = vst [vmem:[#allocation217_spill] sm:$0xff] %v9530_v2 }
 0x298   :  { %v9449_v18 = vpop.permute.xlu1 %2690  ;;  %2409 = vrot.lane.b32.xlu0 %v9447_v3, %s6815_s28 }
 0x299   :  { %13967 = vst [vmem:[#allocation202_spill] sm:$0xff] %v9449_v18 }
 0x29a   :  { %v9454_v7 = vpop.permute.xlu0 %3784  ;;  %2622 = vrot.lane.b32.xlu1 %v1884_v36, %s6817_s30  ;;  %v13972_v36 = vrot.slane %v8713_v15, 2 }
 0x29b   :  { %13968 = vst [vmem:[#allocation203_spill] sm:$0xff] %v9454_v7 }
 0x29c   :  { %v9457_v34 = vpop.permute.xlu1 %2742  ;;  %3212 = vrot.lane.b32.xlu0 %v9349_v57, %s6808_s21  ;;  %v2264_v7 = vsel %vm13530_vm5, %v13972_v36, %v9038_v41 }
 0x29d   :  { %13969 = vst [vmem:[#allocation204_spill] sm:$0xff] %v9457_v34  ;;  %v3198_v34 = vrot.slane %v9010_v39, 6 }
 0x29e   :  { %v9464_v40 = vpop.permute.xlu0 %3810  ;;  %2562 = vrot.lane.b32.xlu1 %v2547_v30, %s6816_s29  ;;  %v13975_v30 = vrot.slane %v8713_v15, 6 }
 0x29f   :  { %13970 = vst [vmem:[#allocation205_spill] sm:$0xff] %v9464_v40  ;;  %v9520_v40 = vrot.slane %v8978_v44, 7 }
 0x2a0   :  { %v9467_v21 = vpop.permute.xlu1 %4354  ;;  %3266 = vrot.lane.b32.xlu0 %v1953_v8, %s6810_s23  ;;  %v3199_v8 = vsel %vm13531_vm1, %v13975_v30, %v3198_v34 }
 0x2a1   :  { %13971 = vst [vmem:[#allocation206_spill] sm:$0xff] %v9467_v21  ;;  %13982 = vst [vmem:[#allocation215_spill] sm:$0xff] %v9520_v40 }
 0x2a2   :  { %v9475_v18 = vpop.permute.xlu0 %4407  ;;  %2269 = vrot.lane.b32.xlu1 %v2264_v7, %s6812_s25  ;;  %v3253_v7 = vsel %vm13485_vm2, %v1952_v19, %v3252_v5  ;;  %v1580_v19 = vrot.slane %v8987_v13, 4 }
 0x2a3   :  { %13973 = vst [vmem:[#allocation207_spill] sm:$0xff] %v9475_v18 }
 0x2a4   :  { %v9478_v54 = vpop.permute.xlu1 %4422  ;;  %2624 = vrot.lane.b32.xlu0 %v9349_v57, %s6817_s30  ;;  %v2323_v57 = vrot.slane %v9010_v39, 3 }
 0x2a5   :  { %13974 = vst [vmem:[#allocation208_spill] sm:$0xff] %v9478_v54  ;;  %v1579_v54 = vrot.slane %v9010_v39, 4 }
 0x2a6   :  { %v9486_v21 = vpop.permute.xlu0 %4387  ;;  %3214 = vrot.lane.b32.xlu1 %v3199_v8, %s6808_s21 }
 0x2a7   :  { %13976 = vst [vmem:[#allocation209_spill] sm:$0xff] %v9486_v21  ;;  %v1581_v3 = vsel %vm1571_vm6, %v1579_v54, %v1580_v19 }
 0x2a8   :  { %v9489_v36 = vpop.permute.xlu1 %3092  ;;  %2271 = vrot.lane.b32.xlu0 %v9038_v41, %s6812_s25  ;;  %v9510_v41 = vrot.slane %v8978_v44, 4 }
 0x2a9   :  { %13977 = vst [vmem:[#allocation210_spill] sm:$0xff] %v9489_v36  ;;  %v1654_v36 = vrot.slane %v8987_v13, 5 }
 0x2aa   :  { %v9494_v18 = vpop.permute.xlu0 %6317  ;;  %3268 = vrot.lane.b32.xlu1 %v3253_v7, %s6810_s23  ;;  %13980 = vst [vmem:[#allocation213_spill] sm:$0xff] %v9510_v41  ;;  %v2324_v7 = vsel %vm13532_vm4, %v8754_v56, %v2323_v57  ;;  %v1583_v49 = vsel %vm1571_vm6, %v1580_v19, %v9510_v41  ;;  %v4652_v56 = vld [vmem:[%s13223_s4] sm:$0xff]  ;;  %v4653_v19 = vld [vmem:[%s13223_s4 + $0x8] sm:$0xff] }
 0x2ab   :  { %v6341_v59 = vpack.i.bf16 %v1583_v49, %v1581_v3  ;;  %v13987_v3 = vrot.slane %v8713_v15, 5 }
 0x2ac   :  { %v9498_v34 = vpop.permute.xlu1 %3144  ;;  %2339 = vrot.lane.b32.xlu0 %v2323_v57, %s6814_s27  ;;  %v9534_v57 = vsel %vm1571_vm6, %v9440_v35, %v1579_v54 }
 0x2ad   :  { %13978 = vst [vmem:[#allocation211_spill] sm:$0xff] %v9498_v34  ;;  %13985 = vst [vmem:[#allocation218_spill] sm:$0xff] %v9534_v57 }
 0x2ae   :  { %v9501_v30 = vpop.permute.xlu0 %3094  ;;  %3742 = vrot.lane.b32.xlu1 %v3199_v8, %s6817_s30 }
 0x2af   :  { %13979 = vst [vmem:[#allocation212_spill] sm:$0xff] %v9501_v30  ;;  %v9551_v30 = vrot.slane %v8978_v44, 5 }
 0x2b0   :  { %v9505_v21 = vpop.permute.xlu1 %6312  ;;  %2413 = vrot.lane.b32.xlu0 %v1579_v54, %s6815_s28  ;;  %v6077_v54 = vpack.c.bf16 %v4653_v19, %v4652_v56 }
 0x2b2   :  { %v9512_v5 = vpop.permute.xlu0 %3146  ;;  %2295 = vrot.lane.b32.xlu1 %v9110_v20, %s6808_s21 }
 0x2b3   :  { %13981 = vst [vmem:[#allocation214_spill] sm:$0xff] %v9512_v5  ;;  %v13463_v5 = vmov 0.0|0.0  }
 0x2b4   :  { %v2214_v8 = vpop.permute.xlu1 %2213  ;;  %2337 = vrot.lane.b32.xlu0 %v2324_v7, %s6814_s27  ;;  %v1653_v7 = vrot.slane %v9010_v39, 5  ;;  %6076 = vmatprep.subr.bf16.mxu1 %v13463_v5  ;;  %v4654_v39 = vld [vmem:[%s13223_s4 + $0x10] sm:$0xff] }
 0x2b5   :  { %6078 = vmatpush1.bf16.msra.mxu1 %v6077_v54  ;;  %v4657_v54 = vld [vmem:[%s13223_s4 + $0x28] sm:$0xff] }
 0x2b6   :  { %v9525_v34 = vpop.permute.xlu0 %3776  ;;  %2371 = vrot.lane.b32.xlu1 %v9520_v40, %s6810_s23  ;;  %v3719_v19 = vsel %vm1645_vm7, %v13987_v3, %v1653_v7  ;;  %6079 = vmatprep.subr.bf16.mxu1 %v13463_v5 }
 0x2b7   :  { %13983 = vst [vmem:[#allocation216_spill] sm:$0xff] %v9525_v34 }
 0x2b8   :  { %v9543_v34 = vpop.permute.xlu1 %2666  ;;  %2411 = vrot.lane.b32.xlu0 %v9534_v57, %s6815_s28  ;;  %v4655_v57 = vld [vmem:[%s13223_s4 + $0x18] sm:$0xff] }
 0x2b9   :  { %13986 = vst [vmem:[#allocation219_spill] sm:$0xff] %v9543_v34  ;;  %v6080_v56 = vpack.c.bf16 %v4655_v57, %v4654_v39  ;;  %v13989_v34 = vrot.slane %v9530_v2, 4  ;;  %v1657_v39 = vsel %vm1645_vm7, %v1654_v36, %v9551_v30  ;;  %v4656_v57 = vld [vmem:[%s13223_s4 + $0x20] sm:$0xff] }
 0x2ba   :  { %v2220_v49 = vpop.permute.xlu0 %2219  ;;  %6342 = vrot.lane.b32.xlu1 %v6341_v59, %s6816_s29  ;;  %v1655_v59 = vsel %vm1645_vm7, %v1653_v7, %v1654_v36  ;;  %v6083_v7 = vpack.c.bf16 %v4657_v54, %v4656_v57  ;;  %v9630_v54 = vsel %vm2055_vm8, %v13910_v63, %v9413_v51  ;;  %v4663_v51 = vld [vmem:[%s13223_s4 + $0x58] sm:$0xff]  ;;  %v9669_v63 = vrot.slane %v9530_v2, 1 }
 0x2bb   :  { %v9571_v52 = vsel %vm1571_vm6, %v9510_v41, %v13989_v34  ;;  %v9587_v34 = vrot.slane %v8978_v44, 1  ;;  %6081 = vmatpush1.bf16.msra.mxu1 %v6080_v56  ;;  %13996 = vst [vmem:[#allocation227_spill] sm:$0xff] %v9630_v54 }
 0x2bc   :  { %v9564_v35 = vpop.permute.xlu1 %4391  ;;  %3722 = vrot.lane.b32.xlu0 %v3719_v19, %s6816_s29  ;;  %13990 = vst [vmem:[#allocation221_spill] sm:$0xff] %v9571_v52  ;;  %6082 = vmatprep.subr.bf16.mxu1 %v13463_v5  ;;  %v6346_v19 = vpack.i.bf16 %v1657_v39, %v1655_v59  ;;  %v6356_v59 = vpack.i.bf16 %v9056_v38, %v8574_v37  ;;  %v9625_v37 = vrot.slane %v8978_v44, 3  ;;  %v13999_v38 = vrot.slane %v9530_v2, 5 }
 0x2bd   :  { %13988 = vst [vmem:[#allocation220_spill] sm:$0xff] %v9564_v35  ;;  %v4658_v35 = vld [vmem:[%s13223_s4 + $0x30] sm:$0xff]  ;;  %v2423_v39 = vsel %vm2055_vm8, %v13856_v4, %v9339_v32  ;;  %14000 = vst [vmem:[#allocation228_spill] sm:$0xff] %v9669_v63 }
 0x2be   :  { %v9582_v3 = vpop.permute.xlu0 %4360  ;;  %1596 = vrot.lane.b32.xlu1 %v9571_v52, %s6816_s29  ;;  %v4659_v52 = vld [vmem:[%s13223_s4 + $0x38] sm:$0xff] }
 0x2bf   :  { %13991 = vst [vmem:[#allocation222_spill] sm:$0xff] %v9582_v3  ;;  %6084 = vmatpush1.bf16.msra.mxu1 %v6083_v7  ;;  %v6086_v56 = vpack.c.bf16 %v4659_v52, %v4658_v35  ;;  %v4660_v35 = vld [vmem:[%s13223_s4 + $0x40] sm:$0xff]  ;;  %v4661_v52 = vld [vmem:[%s13223_s4 + $0x48] sm:$0xff]  ;;  %v9619_v7 = vsel %vm2062_vm9, %v2423_v39, %v2214_v8 }
 0x2c0   :  { %v9590_v36 = vpop.permute.xlu1 %1827  ;;  %3180 = vrot.lane.b32.xlu0 %v9587_v34, %s6812_s25  ;;  %6085 = vmatprep.subr.bf16.mxu1 %v13463_v5  ;;  %13994 = vst [vmem:[#allocation225_spill] sm:$0xff] %v9619_v7  ;;  %v6089_v32 = vpack.c.bf16 %v4661_v52, %v4660_v35  ;;  %v13998_v35 = vrot.slane %v9530_v2, 3  ;;  %v2424_v5 = vsel %vm2055_vm8, %v13845_v29, %v9289_v47  ;;  %v14001_v47 = vld [vmem:[#allocation77_spill] sm:$0xff] }
 0x2c1   :  { %13992 = vst [vmem:[#allocation223_spill] sm:$0xff] %v9590_v36 }
 0x2c2   :  { %v9600_v3 = vpop.permute.xlu0 %3796  ;;  %6347 = vrot.lane.b32.xlu1 %v6346_v19, %s6817_s30  ;;  %v1984_v52 = vsel %vm13532_vm4, %v9625_v37, %v13998_v35  ;;  %v1659_v35 = vsel %vm1645_vm7, %v9551_v30, %v13999_v38  ;;  %v14003_v38 = vld [vmem:[#allocation75_spill] sm:$0xff] }
 0x2c3   :  { %13993 = vst [vmem:[#allocation224_spill] sm:$0xff] %v9600_v3  ;;  %6087 = vmatpush1.bf16.msra.mxu1 %v6086_v56  ;;  %v13997_v3 = vmov 0.0|0.0   ;;  %v4662_v56 = vld [vmem:[%s13223_s4 + $0x50] sm:$0xff] }
 0x2c4   :  { %v2218_v57 = vpop.permute.xlu1 %2217  ;;  %3234 = vrot.lane.b32.xlu0 %v9016_v22, %s6814_s27  ;;  %6088 = vmatprep.subr.bf16.mxu1 %v13997_v3 }
 0x2c5   :  { %v2433_v8 = vsel %vm2062_vm9, %v9630_v54, %v2218_v57  ;;  %v2439_v57 = vsel %vm2069_vm10, %v9619_v7, %v9297_v45 }
 0x2c6   :  { %v9621_v19 = vpop.permute.xlu0 %1761  ;;  %6357 = vrot.lane.b32.xlu1 %v6356_v59, %s6818_s12  ;;  %v2426_v59 = vsel %vm2055_vm8, %v9000_v12, %v9374_v33  ;;  %v6092_v33 = vpack.c.bf16 %v4663_v51, %v4662_v56  ;;  %v2441_v45 = vsel %vm2069_vm10, %v2433_v8, %v9420_v27  ;;  %v2585_v56 = vsel %vm13652_vm3, %v9587_v34, %v9669_v63  ;;  %v4683_v27 = vld [vmem:[%s13223_s4 + $0xf8] sm:$0x3] }
 0x2c7   :  { %13995 = vst [vmem:[#allocation226_spill] sm:$0xff] %v9621_v19  ;;  %v2434_v54 = vsel %vm2062_vm9, %v2426_v59, %v2220_v49  ;;  %6090 = vmatpush1.bf16.msra.mxu1 %v6089_v32  ;;  %v2447_v49 = vsel %vm13547_vm11, %v2439_v57, %v14001_v47  ;;  %v9690_v51 = vrot.slane %v9530_v2, 2  ;;  %v6351_v57 = vpack.i.bf16 %v9013_v17, %v8003_v31 }
 0x2c8   :  { %v9636_v39 = vpop.permute.xlu1 %3096  ;;  %3290 = vrot.lane.b32.xlu0 %v9625_v37, %s6815_s28  ;;  %6091 = vmatprep.subr.bf16.mxu1 %v13997_v3 }
 0x2c9   :  { %14004 = vst [vmem:[#allocation75_spill] sm:$0xff] %v9690_v51 }
 0x2ca   :  { %v2216_v44 = vpop.permute.xlu0 %2215  ;;  %1995 = vrot.lane.b32.xlu1 %v1984_v52, %s6819_s13 }
 0x2cb   :  { %v2432_v7 = vsel %vm2062_vm9, %v2424_v5, %v2216_v44  ;;  %v2442_v44 = vsel %vm2069_vm10, %v2434_v54, %v9391_v0  ;;  %v2449_v0 = vsel %vm13547_vm11, %v2441_v45, %v8879_v10  ;;  %6093 = vmatpush1.bf16.msra.mxu1 %v6092_v33  ;;  %v4666_v33 = vld [vmem:[%s13223_s4 + $0x70] sm:$0xff] }
 0x2cc   :  { %v9676_v32 = vsel %vm2069_vm10, %v2432_v7, %v9302_v24  ;;  %v9678_v8 = vpop.permute.xlu1 %3148  ;;  %1670 = vrot.lane.b32.xlu0 %v1659_v35, %s6817_s30  ;;  %v4664_v24 = vld [vmem:[%s13223_s4 + $0x60] sm:$0xff]  ;;  %v4665_v7 = vld [vmem:[%s13223_s4 + $0x68] sm:$0xff]  ;;  %v2455_v35 = vsel %vm13553_vm0, %v2447_v49, %v8923_v46  ;;  %6094 = vmatprep.subr.bf16.mxu1 %v13997_v3  ;;  %v2450_v45 = vsel %vm13547_vm11, %v2442_v44, %v8724_v14  ;;  %v4667_v46 = vld [vmem:[%s13223_s4 + $0x78] sm:$0xff] }
 0x2cd   :  { %14002 = vst [vmem:[#allocation77_spill] sm:$0xff] %v9676_v32  ;;  %v2448_v5 = vsel %vm13547_vm11, %v9676_v32, %v14003_v38  ;;  %v1980_v32 = vrot.slane %v8987_v13, 3  ;;  %v6095_v10 = vpack.c.bf16 %v4665_v7, %v4664_v24  ;;  %v2457_v49 = vsel %vm13553_vm0, %v2449_v0, %v9195_v11  ;;  %v4682_v11 = vld [vmem:[%s13223_s4 + $0xf0] sm:$0xff] }
 0x2ce   :  { %v2456_v54 = vsel %vm13553_vm0, %v2448_v5, %v8973_v16  ;;  %v9702_v59 = vpop.permute.xlu0 %2716  ;;  %3182 = vrot.lane.b32.xlu1 %v2585_v56, %s6812_s25  ;;  %v9729_v14 = vsel %vm13530_vm5, %v9016_v22, %v9690_v51  ;;  %v2463_v44 = vsel %vm13557_vm12, %v2455_v35, %v8607_v50  ;;  %v6098_v7 = vpack.c.bf16 %v4667_v46, %v4666_v33 }
 0x2cf   :  { %14005 = vst [vmem:[#allocation229_spill] sm:$0xff] %v9702_v59  ;;  %v2464_v5 = vsel %vm13557_vm12, %v2456_v54, %v8584_v55  ;;  %14006 = vst [vmem:[#allocation230_spill] sm:$0xff] %v9729_v14  ;;  %6096 = vmatpush1.bf16.msra.mxu1 %v6095_v10  ;;  %v2458_v54 = vsel %vm13553_vm0, %v2450_v45, %v9107_v58  ;;  %v9741_v0 = vsel %vm13532_vm4, %v1980_v32, %v9625_v37  ;;  %v4668_v37 = vld [vmem:[%s13223_s4 + $0x80] sm:$0xff]  ;;  %v4669_v32 = vld [vmem:[%s13223_s4 + $0x88] sm:$0xff] }
 0x2d0   :  { %v9715_v16 = vpop.permute.xlu1 %3098  ;;  %6352 = vrot.lane.b32.xlu0 %v6351_v57, %s6808_s21  ;;  %14008 = vst [vmem:[#allocation232_spill] sm:$0xff] %v9741_v0  ;;  %v2283_v22 = vrot.slane %v9530_v2, 6  ;;  %v2472_v57 = vsel %vm13556_vm13, %v2464_v5, %v9002_v9  ;;  %6097 = vmatprep.subr.bf16.mxu1 %v13997_v3  ;;  %v2465_v35 = vsel %vm13557_vm12, %v2457_v49, %v8826_v60  ;;  %v13476_v33 = vrot.slane %v9530_v2, 7  ;;  %v4671_v49 = vld [vmem:[%s13223_s4 + $0x98] sm:$0xff] }
 0x2d1   :  { %v2471_v58 = vsel %vm13556_vm13, %v2463_v44, %v8936_v25  ;;  %v2466_v60 = vsel %vm13557_vm12, %v2458_v54, %v8761_v23  ;;  %v2480_v45 = vsel %vm2103_vm14, %v2472_v57, %v8622_v1  ;;  %v6101_v25 = vpack.c.bf16 %v4669_v32, %v4668_v37 }
 0x2d2   :  { %v9733_v24 = vpop.permute.xlu0 %3794  ;;  %3236 = vrot.lane.b32.xlu1 %v9729_v14, %s6814_s27  ;;  %v9772_v5 = vsel %vm13531_vm1, %v9110_v20, %v2283_v22  ;;  %v2473_v23 = vsel %vm13556_vm13, %v2465_v35, %v9208_v48  ;;  %v4670_v20 = vld [vmem:[%s13223_s4 + $0x90] sm:$0xff]  ;;  %v2496_v44 = vrot.slane %v2480_v45, 2  ;;  %v3753_v59 = vrot.slane %v9045_v42, 4 }
 0x2d3   :  { %14007 = vst [vmem:[#allocation231_spill] sm:$0xff] %v9733_v24  ;;  %6099 = vmatpush1.bf16.msra.mxu1 %v6098_v7  ;;  %14010 = vst [vmem:[#allocation234_spill] sm:$0xff] %v9772_v5  ;;  %v2474_v7 = vsel %vm13556_vm13, %v2466_v60, %v9222_v61  ;;  %v2481_v57 = vsel %vm2103_vm14, %v2473_v23, %v8852_v6  ;;  %v6104_v35 = vpack.c.bf16 %v4671_v49, %v4670_v20  ;;  %v4672_v6 = vld [vmem:[%s13223_s4 + $0xa0] sm:$0xff] }
 0x2d4   :  { %v9749_v55 = vpop.permute.xlu1 %3150  ;;  %1993 = vrot.lane.b32.xlu0 %v9741_v0, %s6819_s13  ;;  %6100 = vmatprep.subr.bf16.mxu1 %v13997_v3  ;;  %v2482_v61 = vsel %vm2103_vm14, %v2474_v7, %v8794_v43  ;;  %v2498_v45 = vrot.slane %v2481_v57, 2  ;;  %v4675_v7 = vld [vmem:[%s13223_s4 + $0xb8] sm:$0xff] }
 0x2d5   :  { %v2500_v20 = vrot.slane %v2482_v61, 2 }
 0x2d6   :  { %v9763_v10 = vpop.permute.xlu0 %4356  ;;  %3292 = vrot.lane.b32.xlu1 %v1984_v52, %s6815_s28  ;;  %v2479_v52 = vsel %vm2103_vm14, %v2471_v58, %v8642_v28  ;;  %v9801_v58 = vsel %vm13485_vm2, %v9520_v40, %v13476_v33 }
 0x2d7   :  { %14009 = vst [vmem:[#allocation233_spill] sm:$0xff] %v9763_v10  ;;  %6102 = vmatpush1.bf16.msra.mxu1 %v6101_v25  ;;  %14013 = vst [vmem:[#allocation237_spill] sm:$0xff] %v9801_v58  ;;  %v2495_v37 = vrot.slane %v2479_v52, 2  ;;  %v9818_v25 = vmax.f32 %v8731_v62, 0.0  ;;  %v2499_v52 = vsel %vm13530_vm5, %v2496_v44, %v2498_v45  ;;  %v4674_v62 = vld [vmem:[%s13223_s4 + $0xb0] sm:$0xff]  ;;  %v2501_v57 = vsel %vm13530_vm5, %v2498_v45, %v2500_v20  ;;  %v4677_v45 = vld [vmem:[%s13223_s4 + $0xc8] sm:$0xff] }
 0x2d8   :  { %v9778_v46 = vpop.permute.xlu1 %4358  ;;  %2297 = vrot.lane.b32.xlu0 %v9772_v5, %s6808_s21  ;;  %6103 = vmatprep.subr.bf16.mxu1 %v13997_v3 }
 0x2d9   :  { %14011 = vst [vmem:[#allocation235_spill] sm:$0xff] %v9778_v46  ;;  %v2497_v60 = vsel %vm13530_vm5, %v2495_v37, %v2496_v44  ;;  %14015 = vst [vmem:[#allocation239_spill] sm:$0xff] %v9818_v25  ;;  %v2285_v44 = vrot.slane %v9818_v25, 6  ;;  %v6110_v37 = vpack.c.bf16 %v4675_v7, %v4674_v62  ;;  %v13475_v61 = vrot.slane %v9818_v25, 2  ;;  %v4678_v7 = vld [vmem:[%s13223_s4 + $0xd0] sm:$0xff] }
 0x2da   :  { %v9792_v54 = vpop.permute.xlu0 %4424  ;;  %2598 = vrot.lane.b32.xlu1 %v2585_v56, %s6811_s24  ;;  %v4673_v56 = vld [vmem:[%s13223_s4 + $0xa8] sm:$0xff]  ;;  %v2359_v48 = vrot.slane %v9818_v25, 7  ;;  %v1985_v1 = vrot.slane %v9818_v25, 3 }
 0x2db   :  { %14012 = vst [vmem:[#allocation236_spill] sm:$0xff] %v9792_v54  ;;  %6105 = vmatpush1.bf16.msra.mxu1 %v6104_v35  ;;  %v6107_v43 = vpack.c.bf16 %v4673_v56, %v4672_v6  ;;  %v9845_v56 = vrot.slane %v9818_v25, 1  ;;  %v1920_v20 = vsel %vm13530_vm5, %v9690_v51, %v13475_v61 }
 0x2dc   :  { %v9804_v32 = vpop.permute.xlu1 %4389  ;;  %2373 = vrot.lane.b32.xlu0 %v9801_v58, %s6810_s23  ;;  %6106 = vmatprep.subr.bf16.mxu1 %v13997_v3 }
 0x2dd   :  { %14014 = vst [vmem:[#allocation238_spill] sm:$0xff] %v9804_v32 }
 0x2de   :  { %v9820_v23 = vpop.permute.xlu0 %2011  ;;  %2509 = vrot.lane.b32.xlu1 %v2497_v60, %s6824_s2  ;;  %v4676_v60 = vld [vmem:[%s13223_s4 + $0xc0] sm:$0xff] }
 0x2df   :  { %14016 = vst [vmem:[#allocation240_spill] sm:$0xff] %v9820_v23  ;;  %6108 = vmatpush1.bf16.msra.mxu1 %v6107_v43 }
 0x2e0   :  { %v9825_v49 = vpop.permute.xlu1 %6327  ;;  %2511 = vrot.lane.b32.xlu0 %v2499_v52, %s6824_s2  ;;  %6109 = vmatprep.subr.bf16.mxu1 %v13997_v3  ;;  %v6113_v52 = vpack.c.bf16 %v4677_v45, %v4676_v60  ;;  %v13480_v60 = vrot.slane %v9013_v17, 7  ;;  %v6361_v45 = vpack.i.bf16 %v1920_v20, %v9729_v14 }
 0x2e1   :  { %14017 = vst [vmem:[#allocation241_spill] sm:$0xff] %v9825_v49 }
 0x2e2   :  { %v9835_v35 = vpop.permute.xlu0 %3208  ;;  %2513 = vrot.lane.b32.xlu1 %v2501_v57, %s6824_s2  ;;  %v4679_v57 = vld [vmem:[%s13223_s4 + $0xd8] sm:$0xff] }
 0x2e3   :  { %14018 = vst [vmem:[#allocation242_spill] sm:$0xff] %v9835_v35  ;;  %6111 = vmatpush1.bf16.msra.mxu1 %v6110_v37  ;;  %v9875_v37 = vsel %vm13531_vm1, %v2283_v22, %v2285_v44  ;;  %v6116_v33 = vpack.c.bf16 %v4679_v57, %v4678_v7  ;;  %v2362_v22 = vsel %vm13485_vm2, %v2359_v48, %v13480_v60 }
 0x2e4   :  { %v9841_v6 = vpop.permute.xlu1 %2013  ;;  %2301 = vrot.lane.b32.xlu0 %v2285_v44, %s6808_s21  ;;  %6112 = vmatprep.subr.bf16.mxu1 %v13997_v3  ;;  %14022 = vst [vmem:[#allocation246_spill] sm:$0xff] %v9875_v37 }
 0x2e5   :  { %14019 = vst [vmem:[#allocation243_spill] sm:$0xff] %v9841_v6  ;;  %v9972_v6 = vrot.slane %v9013_v17, 5 }
 0x2e6   :  { %v9853_v43 = vpop.permute.xlu0 %3262  ;;  %3186 = vrot.lane.b32.xlu1 %v9845_v56, %s6812_s25 }
 0x2e7   :  { %14020 = vst [vmem:[#allocation244_spill] sm:$0xff] %v9853_v43  ;;  %6114 = vmatpush1.bf16.msra.mxu1 %v6113_v52  ;;  %v14026_v52 = vrot.slane %v9530_v2, 3  ;;  %14042 = vst [vmem:[#allocation261_spill] sm:$0xff] %v9972_v6 }
 0x2e8   :  { %v9862_v62 = vpop.permute.xlu1 %1635  ;;  %1727 = vrot.lane.b32.xlu0 %v9045_v42, %s6808_s21  ;;  %6115 = vmatprep.subr.bf16.mxu1 %v13997_v3 }
 0x2e9   :  { %14021 = vst [vmem:[#allocation245_spill] sm:$0xff] %v9862_v62  ;;  %v1986_v7 = vsel %vm13532_vm4, %v14026_v52, %v1985_v1  ;;  %v14030_v52 = vrot.slane %v9530_v2, 7 }
 0x2ea   :  { %2299 = vrot.lane.b32.xlu1 %v9875_v37, %s6808_s21  ;;  %v9881_v61 = vpop.permute.xlu0 %6322 }
 0x2eb   :  { %14023 = vst [vmem:[#allocation247_spill] sm:$0xff] %v9881_v61  ;;  %6117 = vmatpush1.bf16.msra.mxu1 %v6116_v33  ;;  %v14028_v33 = vld [vmem:[#allocation119_spill] sm:$0xff]  ;;  %v9915_v50 = vsel %vm13485_vm2, %v14030_v52, %v2359_v48  ;;  %v6122_v48 = vpack.c.bf16 %v4683_v27, %v4682_v11  ;;  %vm6123_vm2 = vmpackc.low %vm13531_vm1, %vm6825_vm15  ;;  %v3171_v52 = vsel %vm13652_vm3, %v9669_v63, %v9845_v56  ;;  %vm2145_vm15 = vcmask 97280  }
 0x2ec   :  { %v9886_v9 = vpop.permute.xlu1 %1703  ;;  %6362 = vrot.lane.b32.xlu0 %v6361_v45, %s6818_s12  ;;  %6118 = vmatprep.subr.bf16.mxu1 %v13997_v3  ;;  %v4680_v45 = vld [vmem:[%s13223_s4 + $0xe0] sm:$0xff]  ;;  %14031 = vst [vmem:[#allocation252_spill] sm:$0xff] %v9915_v50  ;;  %v2167_v10 = vrot.slane %v14028_v33, 5  ;;  %v13496_v24 = vrot.slane %v14028_v33, 4 }
 0x2ed   :  { %14024 = vst [vmem:[#allocation248_spill] sm:$0xff] %v9886_v9  ;;  %v14111_v9 = vld [vmem:[#allocation10_spill] sm:$0xff] }
 0x2ee   :  { %2377 = vrot.lane.b32.xlu1 %v2362_v22, %s6810_s23  ;;  %v9893_v44 = vpop.permute.xlu0 %6332  ;;  %v4681_v22 = vld [vmem:[%s13223_s4 + $0xe8] sm:$0xff]  ;;  %s6830_s4 = smov 44  }
 0x2ef   :  { %14025 = vst [vmem:[#allocation249_spill] sm:$0xff] %v9893_v44  ;;  %v6119_v60 = vpack.c.bf16 %v4681_v22, %v4680_v45  ;;  %v9928_v22 = vrot.slane %v14028_v33, 6 }
 0x2f0   :  { %v9899_v57 = vpop.permute.xlu1 %6337  ;;  %1997 = vrot.lane.b32.xlu0 %v1986_v7, %s6819_s13 }
 0x2f1   :  { %14027 = vst [vmem:[#allocation250_spill] sm:$0xff] %v9899_v57  ;;  %6120 = vmatpush1.bf16.msra.mxu1 %v6119_v60 }
 0x2f2   :  { %1725 = vrot.lane.b32.xlu1 %v14028_v33, %s6808_s21  ;;  %v9910_v28 = vpop.permute.xlu0 %1960  ;;  %6121 = vmatprep.subr.bf16.mxu1 %v13997_v3  ;;  %v2033_v3 = vrot.slane %v9045_v42, 6 }
 0x2f3   :  { %14029 = vst [vmem:[#allocation251_spill] sm:$0xff] %v9910_v28 }
 0x2f4   :  { %v9923_v45 = vpop.permute.xlu1 %1962  ;;  %2375 = vrot.lane.b32.xlu0 %v9915_v50, %s6810_s23  ;;  %v9959_v46 = vsel %vm13531_vm1, %v9928_v22, %v2033_v3 }
 0x2f5   :  { %14032 = vst [vmem:[#allocation253_spill] sm:$0xff] %v9923_v45  ;;  %6124 = vmatpush1.bf16.msk.msra.mxu1 %vm6123_vm2, %v6122_v48  ;;  %14038 = vst [vmem:[#allocation259_spill] sm:$0xff] %v9959_v46  ;;  %v9980_v45 = vsel %vm1645_vm7, %v9972_v6, %v2167_v10  ;;  %vm2138_vm2 = vcmask 15360  }
 0x2f6   :  { %2245 = vrot.lane.b32.xlu1 %v9928_v22, %s6817_s30  ;;  %v9934_v60 = vpop.permute.xlu0 %2015  ;;  %14044 = vst [vmem:[#allocation263_spill] sm:$0xff] %v9980_v45 }
 0x2f7   :  { %14033 = vst [vmem:[#allocation254_spill] sm:$0xff] %v9934_v60  ;;  %v14040_v60 = vrot.slane %v9013_v17, 2 }
 0x2f8   :  { %v9939_v54 = vpop.permute.xlu1 %2333  ;;  %3184 = vrot.lane.b32.xlu0 %v3171_v52, %s6812_s25 }
 0x2f9   :  { %14034 = vst [vmem:[#allocation255_spill] sm:$0xff] %v9939_v54 }
 0x2fa   :  { %6367 = vrot.lane.b32.xlu1 %v9115_v26, %s6810_s23  ;;  %v9944_v11 = vpop.permute.xlu0 %1637 }
 0x2fb   :  { %14035 = vst [vmem:[#allocation256_spill] sm:$0xff] %v9944_v11 }
 0x2fc   :  { %v9946_v27 = vpop.permute.xlu1 %2407  ;;  %3238 = vrot.lane.b32.xlu0 %v1920_v20, %s6814_s27 }
 0x2fd   :  { %14036 = vst [vmem:[#allocation257_spill] sm:$0xff] %v9946_v27  ;;  %v14100_v27 = vld [vmem:[#allocation67_spill] sm:$0xff] }
 0x2fe   :  { %6372 = vrot.lane.b32.xlu1 %v9129_v53, %s6820_s3  ;;  %v9952_v32 = vpop.permute.xlu0 %1701  ;;  %v14041_v53 = vrot.slane %v9818_v25, 2 }
 0x300   :  { %v9954_v48 = vpop.permute.xlu1 %3210  ;;  %3294 = vrot.lane.b32.xlu0 %v1986_v7, %s6815_s28  ;;  %v3225_v23 = vsel %vm13530_vm5, %v14041_v53, %v14040_v60  ;;  %v13494_v7 = vrot.slane %v9013_v17, 3  ;;  %vm13579_vm5 = vcmask 261120  }
 0x301   :  { %14037 = vst [vmem:[#allocation258_spill] sm:$0xff] %v9954_v48 }
 0x302   :  { %2045 = vrot.lane.b32.xlu1 %v9959_v46, %s6821_s16  ;;  %v9964_v20 = vpop.permute.xlu0 %1964  ;;  %v3281_v53 = vsel %vm13532_vm4, %v1985_v1, %v13494_v7  ;;  %v10006_v1 = vsel %vm1571_vm6, %v13496_v24, %v3753_v59  ;;  %vm13558_vm4 = vcmask 998400  }
 0x303   :  { %14039 = vst [vmem:[#allocation260_spill] sm:$0xff] %v9964_v20  ;;  %v1787_v20 = vrot.slane %v9045_v42, 1  ;;  %14050 = vst [vmem:[#allocation267_spill] sm:$0xff] %v10006_v1 }
 0x304   :  { %v9975_v28 = vpop.permute.xlu1 %3264  ;;  %3240 = vrot.lane.b32.xlu0 %v3225_v23, %s6814_s27  ;;  %v14047_v23 = vld [vmem:[#allocation129_spill] sm:$0xff] }
 0x305   :  { %14043 = vst [vmem:[#allocation262_spill] sm:$0xff] %v9975_v28  ;;  %v1788_v11 = vsel %vm13652_vm3, %v14047_v23, %v1787_v20 }
 0x306   :  { %2181 = vrot.lane.b32.xlu1 %v9980_v45, %s6816_s29  ;;  %v9985_v57 = vpop.permute.xlu0 %2335 }
 0x307   :  { %14045 = vst [vmem:[#allocation264_spill] sm:$0xff] %v9985_v57 }
 0x308   :  { %v9990_v60 = vpop.permute.xlu1 %2560  ;;  %3296 = vrot.lane.b32.xlu0 %v3281_v53, %s6815_s28  ;;  %v2169_v53 = vrot.slane %v9045_v42, 5  ;;  %v14079_v42 = vld [vmem:[#allocation146_spill] sm:$0xff] }
 0x309   :  { %14046 = vst [vmem:[#allocation265_spill] sm:$0xff] %v9990_v60  ;;  %v14052_v60 = vrot.slane %v9013_v17, 1 }
 0x30a   :  { %3126 = vrot.lane.b32.xlu1 %v1788_v11, %s6811_s24  ;;  %v9998_v62 = vpop.permute.xlu0 %2409 }
 0x30b   :  { %14048 = vst [vmem:[#allocation129_spill] sm:$0xff] %v9998_v62  ;;  %v3727_v26 = vsel %vm13652_vm3, %v9845_v56, %v14052_v60 }
 0x30c   :  { %v10000_v0 = vpop.permute.xlu1 %2622  ;;  %3732 = vrot.lane.b32.xlu0 %v3171_v52, %s6811_s24  ;;  %v2170_v52 = vsel %vm1645_vm7, %v2167_v10, %v2169_v53 }
 0x30d   :  { %14049 = vst [vmem:[#allocation266_spill] sm:$0xff] %v10000_v0 }
 0x30e   :  { %3764 = vrot.lane.b32.xlu1 %v10006_v1, %s6812_s25  ;;  %v10011_v7 = vpop.permute.xlu0 %3212  ;;  %v14056_v1 = vld [vmem:[#allocation128_spill] sm:$0xff] }
 0x30f   :  { %14051 = vst [vmem:[#allocation268_spill] sm:$0xff] %v10011_v7  ;;  %v10029_v37 = vrot.slane %v14056_v1, 1 }
 0x310   :  { %v10017_v0 = vpop.permute.xlu1 %2562  ;;  %3734 = vrot.lane.b32.xlu0 %v3727_v26, %s6811_s24  ;;  %v13503_v26 = vrot.slane %v9013_v17, 6 }
 0x311   :  { %14053 = vst [vmem:[#allocation269_spill] sm:$0xff] %v10017_v0  ;;  %v1790_v60 = vsel %vm13652_vm3, %v1787_v20, %v10029_v37  ;;  %v2171_v0 = vrot.slane %v14056_v1, 5  ;;  %v2035_v20 = vrot.slane %v14056_v1, 6 }
 0x312   :  { %2696 = vrot.lane.b32.xlu1 %v2170_v52, %s6814_s27  ;;  %v10022_v24 = vpop.permute.xlu0 %3266 }
 0x313   :  { %14054 = vst [vmem:[#allocation270_spill] sm:$0xff] %v10022_v24 }
 0x314   :  { %v10024_v50 = vpop.permute.xlu1 %2269  ;;  %3124 = vrot.lane.b32.xlu0 %v14047_v23, %s6811_s24 }
 0x315   :  { %14055 = vst [vmem:[#allocation271_spill] sm:$0xff] %v10024_v50  ;;  %v14124_v50 = vld [vmem:[#allocation74_spill] sm:$0xff] }
 0x316   :  { %3130 = vrot.lane.b32.xlu1 %v10029_v37, %s6811_s24  ;;  %v10033_v56 = vpop.permute.xlu0 %2624 }
 0x317   :  { %14057 = vst [vmem:[#allocation272_spill] sm:$0xff] %v10033_v56  ;;  %v10049_v56 = vsel %vm13531_vm1, %v13503_v26, %v9928_v22  ;;  %v10064_v22 = vsel %vm13531_vm1, %v2033_v3, %v2035_v20  ;;  %v10067_v26 = vrot.slane %v14056_v1, 4 }
 0x318   :  { %v10036_v10 = vpop.permute.xlu1 %3214  ;;  %1799 = vrot.lane.b32.xlu0 %v1788_v11, %s6810_s23  ;;  %14060 = vst [vmem:[#allocation275_spill] sm:$0xff] %v10049_v56  ;;  %v2172_v11 = vsel %vm1645_vm7, %v2169_v53, %v2171_v0  ;;  %14064 = vst [vmem:[#allocation279_spill] sm:$0xff] %v10064_v22 }
 0x319   :  { %14058 = vst [vmem:[#allocation273_spill] sm:$0xff] %v10036_v10  ;;  %14065 = vst [vmem:[#allocation280_spill] sm:$0xff] %v10067_v26 }
 0x31a   :  { %1801 = vrot.lane.b32.xlu1 %v1790_v60, %s6810_s23  ;;  %v10043_v23 = vpop.permute.xlu0 %2271 }
 0x31b   :  { %14059 = vst [vmem:[#allocation274_spill] sm:$0xff] %v10043_v23 }
 0x31c   :  { %v10051_v5 = vpop.permute.xlu1 %3268  ;;  %2043 = vrot.lane.b32.xlu0 %v10049_v56, %s6821_s16 }
 0x31d   :  { %14061 = vst [vmem:[#allocation276_spill] sm:$0xff] %v10051_v5 }
 0x31e   :  { %2185 = vrot.lane.b32.xlu1 %v2172_v11, %s6816_s29  ;;  %v10058_v10 = vpop.permute.xlu0 %2339 }
 0x31f   :  { %14062 = vst [vmem:[#allocation277_spill] sm:$0xff] %v10058_v10  ;;  %v14112_v10 = vld [vmem:[#allocation117_spill] sm:$0xff] }
 0x320   :  { %v10060_v58 = vpop.permute.xlu1 %3742  ;;  %2183 = vrot.lane.b32.xlu0 %v2170_v52, %s6816_s29 }
 0x321   :  { %14063 = vst [vmem:[#allocation278_spill] sm:$0xff] %v10060_v58  ;;  %v10079_v58 = vsel %vm1571_vm6, %v3753_v59, %v10067_v26 }
 0x322   :  { %2249 = vrot.lane.b32.xlu1 %v10064_v22, %s6817_s30  ;;  %v10071_v53 = vpop.permute.xlu0 %2413  ;;  %14068 = vst [vmem:[#allocation283_spill] sm:$0xff] %v10079_v58 }
 0x323   :  { %14066 = vst [vmem:[#allocation281_spill] sm:$0xff] %v10071_v53  ;;  %v14096_v53 = vld [vmem:[#allocation160_spill] sm:$0xff] }
 0x324   :  { %v10073_v5 = vpop.permute.xlu1 %2295  ;;  %2247 = vrot.lane.b32.xlu0 %v9959_v46, %s6817_s30 }
 0x325   :  { %14067 = vst [vmem:[#allocation282_spill] sm:$0xff] %v10073_v5  ;;  %v14116_v5 = vld [vmem:[#allocation11_spill] sm:$0xff] }
 0x326   :  { %3766 = vrot.lane.b32.xlu1 %v10079_v58, %s6812_s25  ;;  %v10083_v3 = vpop.permute.xlu0 %2337  ;;  %v14074_v58 = vld [vmem:[#allocation135_spill] sm:$0xff] }
 0x327   :  { %14069 = vst [vmem:[#allocation284_spill] sm:$0xff] %v10083_v3  ;;  %v1816_v7 = vrot.slane %v14074_v58, 5 }
 0x328   :  { %v10085_v52 = vpop.permute.xlu1 %2371  ;;  %2748 = vrot.lane.b32.xlu0 %v9959_v46, %s6815_s28 }
 0x329   :  { %14070 = vst [vmem:[#allocation285_spill] sm:$0xff] %v10085_v52  ;;  %v3783_v46 = vsel %vm1645_vm7, %v2171_v0, %v1816_v7 }
 0x32a   :  { %2698 = vrot.lane.b32.xlu1 %v2172_v11, %s6814_s27  ;;  %v10090_v24 = vpop.permute.xlu0 %2411 }
 0x32b   :  { %14071 = vst [vmem:[#allocation286_spill] sm:$0xff] %v10090_v24 }
 0x32c   :  { %v10092_v43 = vpop.permute.xlu1 %6342  ;;  %2187 = vrot.lane.b32.xlu0 %v2171_v0, %s6816_s29  ;;  %v1750_v0 = vrot.slane %v14074_v58, 4 }
 0x32d   :  { %14072 = vst [vmem:[#allocation287_spill] sm:$0xff] %v10092_v43  ;;  %v14077_v43 = vld [vmem:[#allocation125_spill] sm:$0xff] }
 0x32e   :  { %2750 = vrot.lane.b32.xlu1 %v10064_v22, %s6815_s28  ;;  %v10097_v59 = vpop.permute.xlu0 %3722  ;;  %v1751_v35 = vrot.slane %v14077_v43, 4 }
 0x32f   :  { %14073 = vst [vmem:[#allocation288_spill] sm:$0xff] %v10097_v59  ;;  %v14080_v59 = vld [vmem:[#allocation124_spill] sm:$0xff] }
 0x330   :  { %v10100_v28 = vpop.permute.xlu1 %1596  ;;  %2251 = vrot.lane.b32.xlu0 %v2035_v20, %s6817_s30  ;;  %v10113_v40 = vrot.slane %v14080_v59, 4 }
 0x331   :  { %14075 = vst [vmem:[#allocation289_spill] sm:$0xff] %v10100_v28 }
 0x332   :  { %3786 = vrot.lane.b32.xlu1 %v3783_v46, %s6814_s27  ;;  %v10105_v11 = vpop.permute.xlu0 %3180  ;;  %v1817_v46 = vrot.slane %v14077_v43, 5 }
 0x333   :  { %14076 = vst [vmem:[#allocation290_spill] sm:$0xff] %v10105_v11  ;;  %v10130_v11 = vsel %vm1571_vm6, %v1750_v0, %v1751_v35 }
 0x334   :  { %v10108_v48 = vpop.permute.xlu1 %6347  ;;  %6377 = vrot.lane.b32.xlu0 %v14079_v42, %s6820_s3  ;;  %14084 = vst [vmem:[#allocation295_spill] sm:$0xff] %v10130_v11 }
 0x335   :  { %14078 = vst [vmem:[#allocation291_spill] sm:$0xff] %v10108_v48  ;;  %v1754_v48 = vsel %vm1571_vm6, %v1751_v35, %v10113_v40 }
 0x336   :  { %3100 = vrot.lane.b32.xlu1 %v1751_v35, %s6816_s29  ;;  %v10116_v28 = vpop.permute.xlu0 %3234  ;;  %v6381_v14 = vpack.i.bf16 %v1754_v48, %v10130_v11  ;;  %v14088_v35 = vrot.slane %v14077_v43, 1  ;;  %v10159_v11 = vrot.slane %v14080_v59, 5 }
 0x337   :  { %14081 = vst [vmem:[#allocation292_spill] sm:$0xff] %v10116_v28 }
 0x338   :  { %v10119_v51 = vpop.permute.xlu1 %6357  ;;  %2047 = vrot.lane.b32.xlu0 %v10064_v22, %s6821_s16  ;;  %v13522_v22 = vrot.slane %v14080_v59, 1 }
 0x339   :  { %14082 = vst [vmem:[#allocation293_spill] sm:$0xff] %v10119_v51 }
 0x33a   :  { %3152 = vrot.lane.b32.xlu1 %v1817_v46, %s6817_s30  ;;  %v10127_v42 = vpop.permute.xlu0 %3290 }
 0x33b   :  { %14083 = vst [vmem:[#allocation294_spill] sm:$0xff] %v10127_v42 }
 0x33c   :  { %v10132_v28 = vpop.permute.xlu1 %1995  ;;  %3128 = vrot.lane.b32.xlu0 %v1790_v60, %s6811_s24 }
 0x33d   :  { %14085 = vst [vmem:[#allocation296_spill] sm:$0xff] %v10132_v28  ;;  %v10149_v28 = vsel %vm13652_vm3, %v14088_v35, %v13522_v22  ;;  %v14093_v22 = vld [vmem:[#allocation137_spill] sm:$0xff] }
 0x33e   :  { %6382 = vrot.lane.b32.xlu1 %v6381_v14, %s6814_s27  ;;  %v10138_v56 = vpop.permute.xlu0 %1670  ;;  %14089 = vst [vmem:[#allocation299_spill] sm:$0xff] %v10149_v28  ;;  %v3757_v14 = vsel %vm1571_vm6, %v10067_v26, %v1750_v0  ;;  %v1820_v0 = vsel %vm1645_vm7, %v1817_v46, %v10159_v11  ;;  %v1821_v62 = vrot.slane %v14093_v22, 5 }
 0x33f   :  { %14086 = vst [vmem:[#allocation297_spill] sm:$0xff] %v10138_v56  ;;  %v3808_v56 = vrot.slane %v14074_v58, 6 }
 0x340   :  { %v10140_v33 = vpop.permute.xlu1 %3182  ;;  %2672 = vrot.lane.b32.xlu0 %v14080_v59, %s6808_s21 }
 0x341   :  { %14087 = vst [vmem:[#allocation298_spill] sm:$0xff] %v10140_v33  ;;  %v14092_v33 = vld [vmem:[#allocation138_spill] sm:$0xff]  ;;  %v3809_v45 = vsel %vm13531_vm1, %v2035_v20, %v3808_v56  ;;  %vm13587_vm1 = vcmask 179200  }
 0x342   :  { %2221 = vrot.lane.b32.xlu1 %v10149_v28, %s6811_s24  ;;  %v10153_v60 = vpop.permute.xlu0 %6352  ;;  %v2211_v35 = vrot.slane %v14092_v33, 1  ;;  %v14099_v20 = vld [vmem:[#allocation126_spill] sm:$0xff]  ;;  %v13544_v54 = vrot.slane %v14092_v33, 5 }
 0x343   :  { %14090 = vst [vmem:[#allocation300_spill] sm:$0xff] %v10153_v60 }
 0x344   :  { %v10161_v42 = vpop.permute.xlu1 %3236  ;;  %3768 = vrot.lane.b32.xlu0 %v3757_v14, %s6812_s25  ;;  %v10178_v14 = vsel %vm1645_vm7, %v1816_v7, %v1817_v46  ;;  %v1822_v7 = vsel %vm1645_vm7, %v10159_v11, %v1821_v62 }
 0x345   :  { %14091 = vst [vmem:[#allocation301_spill] sm:$0xff] %v10161_v42  ;;  %v3793_v42 = vsel %vm13652_vm3, %v2211_v35, %v14096_v53  ;;  %14097 = vst [vmem:[#allocation160_spill] sm:$0xff] %v10178_v14  ;;  %v6386_v56 = vpack.i.bf16 %v1820_v0, %v10178_v14  ;;  %v14103_v53 = vld [vmem:[#allocation65_spill] sm:$0xff] }
 0x346   :  { %2674 = vrot.lane.b32.xlu1 %v14093_v22, %s6808_s21  ;;  %v10167_v28 = vpop.permute.xlu0 %1993  ;;  %v14104_v14 = vld [vmem:[#allocation181_spill] sm:$0xff] }
 0x347   :  { %14094 = vst [vmem:[#allocation302_spill] sm:$0xff] %v10167_v28 }
 0x348   :  { %v10172_v26 = vpop.permute.xlu1 %3292  ;;  %3812 = vrot.lane.b32.xlu0 %v3809_v45, %s6815_s28 }
 0x349   :  { %14095 = vst [vmem:[#allocation303_spill] sm:$0xff] %v10172_v26  ;;  %v2139_v26 = vsel %vm2138_vm2, %v14100_v27, %v14099_v20 }
 0x34a   :  { %3800 = vrot.lane.b32.xlu1 %v3793_v42, %s6810_s23  ;;  %v10182_v28 = vpop.permute.xlu0 %2297  ;;  %v2146_v46 = vsel %vm2145_vm15, %v2139_v26, %v14103_v53  ;;  %v14108_v53 = vld [vmem:[#allocation103_spill] sm:$0xff] }
 0x34b   :  { %14098 = vst [vmem:[#allocation304_spill] sm:$0xff] %v10182_v28  ;;  %v2153_v20 = vsel %vm13587_vm1, %v2146_v46, %v14104_v14  ;;  %v1755_v28 = vrot.slane %v14093_v22, 4  ;;  %v13541_v46 = vrot.slane %v14092_v33, 4 }
 0x34c   :  { %v10188_v45 = vpop.permute.xlu1 %2598  ;;  %6387 = vrot.lane.b32.xlu0 %v6386_v56, %s6815_s28  ;;  %v14105_v56 = vld [vmem:[#allocation144_spill] sm:$0xff] }
 0x34d   :  { %14101 = vst [vmem:[#allocation126_spill] sm:$0xff] %v10188_v45  ;;  %v2212_v24 = vsel %vm13652_vm3, %v14105_v56, %v2211_v35  ;;  %v10235_v3 = vsel %vm1571_vm6, %v1755_v28, %v13541_v46  ;;  %v10253_v46 = vsel %vm1645_vm7, %v1821_v62, %v13544_v54  ;;  %v14120_v62 = vrot.slane %v14080_v59, 1 }
 0x34e   :  { %1833 = vrot.lane.b32.xlu1 %v1822_v7, %s6815_s28  ;;  %v10194_v42 = vpop.permute.xlu0 %2373 }
 0x34f   :  { %14102 = vst [vmem:[#allocation67_spill] sm:$0xff] %v10194_v42 }
 0x350   :  { %v2510_v45 = vpop.permute.xlu1 %2509  ;;  %3102 = vrot.lane.b32.xlu0 %v1754_v48, %s6816_s29  ;;  %v1756_v48 = vsel %vm1571_vm6, %v10113_v40, %v1755_v28 }
 0x351   :  { %v2528_v57 = vsel %vm13579_vm5, %v2153_v20, %v2510_v45 }
 0x352   :  { %2225 = vrot.lane.b32.xlu1 %v2212_v24, %s6811_s24  ;;  %5657 = vmatprep.mubr.msk.f32.mxu1 %vm13558_vm4, %v2528_v57  ;;  %v10207_v42 = vpop.permute.xlu0 %2511  ;;  %v6295_v57 = vunpack.i.h.bf16 %v14108_v53 }
 0x354   :  { %v10209_v26 = vpop.permute.xlu1 %2513  ;;  %3154 = vrot.lane.b32.xlu0 %v1820_v0, %s6817_s30  ;;  %v2057_v52 = vsel %vm2055_vm8, %v14111_v9, %v6295_v57  ;;  %v6324_v57 = vunpack.i.l.bf16 %v9881_v61  ;;  %v14119_v61 = vld [vmem:[#allocation12_spill] sm:$0xff] }
 0x356   :  { %3104 = vrot.lane.b32.xlu1 %v1756_v48, %s6816_s29  ;;  %v10215_v14 = vpop.permute.xlu0 %2301 }
 0x357   :  { %14106 = vst [vmem:[#allocation65_spill] sm:$0xff] %v10215_v14 }
 0x358   :  { %v10217_v45 = vpop.permute.xlu1 %3186  ;;  %3778 = vrot.lane.b32.xlu0 %v14092_v33, %s6808_s21 }
 0x359   :  { %14107 = vst [vmem:[#allocation181_spill] sm:$0xff] %v10217_v45  ;;  %v6300_v45 = vunpack.i.h.bf16 %v14112_v10 }
 0x35a   :  { %3156 = vrot.lane.b32.xlu1 %v1822_v7, %s6817_s30  ;;  %v10224_v20 = vpop.permute.xlu0 %1727 }
 0x35b   :  { %14109 = vst [vmem:[#allocation103_spill] sm:$0xff] %v10224_v20  ;;  %v6294_v20 = vunpack.i.l.bf16 %v14108_v53  ;;  %v6315_v53 = vunpack.i.h.bf16 %v9505_v21 }
 0x35c   :  { %v10226_v0 = vpop.permute.xlu1 %2299  ;;  %2227 = vrot.lane.b32.xlu0 %v2211_v35, %s6811_s24  ;;  %v14114_v35 = vld [vmem:[#allocation72_spill] sm:$0xff] }
 0x35d   :  { %14110 = vst [vmem:[#allocation305_spill] sm:$0xff] %v10226_v0  ;;  %v2064_v14 = vsel %vm2062_vm9, %v2057_v52, %v14114_v35  ;;  %v2056_v35 = vsel %vm2055_vm8, %v14116_v5, %v6294_v20  ;;  %v6299_v20 = vunpack.i.l.bf16 %v14112_v10 }
 0x35e   :  { %3106 = vrot.lane.b32.xlu1 %v10235_v3, %s6816_s29  ;;  %v10240_v7 = vpop.permute.xlu0 %6362  ;;  %v2071_v28 = vsel %vm2069_vm10, %v2064_v14, %v6300_v45  ;;  %v2210_v45 = vsel %vm13652_vm3, %v14120_v62, %v14105_v56 }
 0x35f   :  { %14113 = vst [vmem:[#allocation117_spill] sm:$0xff] %v10240_v7  ;;  %v2534_v7 = vrot.slane %v14116_v5, 5  ;;  %v2078_v54 = vsel %vm13547_vm11, %v2071_v28, %v14001_v47 }
 0x360   :  { %v10246_v0 = vpop.permute.xlu1 %2377  ;;  %1767 = vrot.lane.b32.xlu0 %v1756_v48, %s6814_s27  ;;  %v14118_v48 = vld [vmem:[#allocation105_spill] sm:$0xff] }
 0x361   :  { %14115 = vst [vmem:[#allocation306_spill] sm:$0xff] %v10246_v0  ;;  %v2058_v14 = vsel %vm2055_vm8, %v14119_v61, %v14118_v48  ;;  %v2063_v0 = vsel %vm2062_vm9, %v2056_v35, %v6324_v57  ;;  %v14123_v48 = vrot.slane %v14111_v9, 5  ;;  %v14126_v57 = vld [vmem:[#allocation107_spill] sm:$0xff] }
 0x362   :  { %3158 = vrot.lane.b32.xlu1 %v10253_v46, %s6817_s30  ;;  %v10259_v52 = vpop.permute.xlu0 %1997  ;;  %v2065_v62 = vsel %vm2062_vm9, %v2058_v14, %v14124_v50  ;;  %v2070_v10 = vsel %vm2069_vm10, %v2063_v0, %v6299_v20  ;;  %v6320_v0 = vunpack.i.h.bf16 %v9494_v18 }
 0x363   :  { %14117 = vst [vmem:[#allocation11_spill] sm:$0xff] %v10259_v52  ;;  %v14122_v52 = vld [vmem:[#allocation177_spill] sm:$0xff]  ;;  %v2536_v61 = vsel %vm1645_vm7, %v2534_v7, %v14123_v48  ;;  %v10290_v28 = vsel %vm2069_vm10, %v2065_v62, %v14126_v57  ;;  %v6329_v48 = vunpack.i.l.bf16 %v9825_v49  ;;  %v14131_v57 = vld [vmem:[#allocation148_spill] sm:$0xff] }
 0x364   :  { %v10273_v23 = vpop.permute.xlu1 %1725  ;;  %2223 = vrot.lane.b32.xlu0 %v2210_v45, %s6811_s24  ;;  %v2084_v63 = vsel %vm13553_vm0, %v2078_v54, %v14122_v52  ;;  %14127 = vst [vmem:[#allocation107_spill] sm:$0xff] %v10290_v28  ;;  %v6354_v54 = vunpack.i.l.bf16 %v10153_v60  ;;  %v14128_v52 = vmov 0.0  }
 0x365   :  { %14121 = vst [vmem:[#allocation105_spill] sm:$0xff] %v10273_v23  ;;  %v2091_v47 = vsel %vm13557_vm12, %v2084_v63, %v6315_v53  ;;  %v10295_v23 = vrot.slane %v14128_v52, 5  ;;  %v6391_v63 = vpack.i.bf16 %v2536_v61, %v2534_v7  ;;  %v14129_v53 = vld [vmem:[#allocation170_spill] sm:$0xff]  ;;  %v2077_v20 = vsel %vm13547_vm11, %v2070_v10, %v6329_v48  ;;  %v14134_v48 = vld [vmem:[#allocation112_spill] sm:$0xff] }
 0x366   :  { %2724 = vrot.lane.b32.xlu1 %v2210_v45, %s6810_s23  ;;  %v10286_v35 = vpop.permute.xlu0 %2375  ;;  %v2098_v14 = vsel %vm13556_vm13, %v2091_v47, %v14129_v53  ;;  %v2079_v45 = vsel %vm13547_vm11, %v10290_v28, %v14003_v38  ;;  %v14132_v61 = vrot.slane %v9000_v12, 5  ;;  %v6314_v38 = vunpack.i.l.bf16 %v9505_v21  ;;  %v14138_v21 = vld [vmem:[#allocation32_spill] sm:$0xff] }
 0x367   :  { %14125 = vst [vmem:[#allocation74_spill] sm:$0xff] %v10286_v35  ;;  %v2085_v52 = vsel %vm13553_vm0, %v2079_v45, %v14131_v57  ;;  %vm2110_vm11 = vcmask 736256   ;;  %v14135_v45 = vld [vmem:[#allocation172_spill] sm:$0xff]  ;;  %v14136_v53 = vrot.slane %v14116_v5, 6 }
 0x368   :  { %v10298_v50 = vpop.permute.xlu1 %2245  ;;  %3798 = vrot.lane.b32.xlu0 %v2212_v24, %s6810_s23  ;;  %v2083_v24 = vsel %vm13553_vm0, %v2077_v20, %v6354_v54  ;;  %v4420_v7 = vsel %vm1645_vm7, %v14132_v61, %v10295_v23  ;;  %v2092_v47 = vsel %vm13557_vm12, %v2085_v52, %v9621_v19  ;;  %v6310_v54 = vunpack.i.h.bf16 %v14135_v45  ;;  %v14137_v61 = vld [vmem:[#allocation17_spill] sm:$0xff]  ;;  %v14139_v28 = vld [vmem:[#allocation44_spill] sm:$0xff]  ;;  %v14140_v52 = vld [vmem:[#allocation111_spill] sm:$0xff] }
 0x369   :  { %v6401_v57 = vpack.i.bf16 %v14137_v61, %v14136_v53  ;;  %v6406_v49 = vpack.i.bf16 %v14139_v28, %v14138_v21  ;;  %v14141_v19 = vld [vmem:[#allocation80_spill] sm:$0xff]  ;;  %v6309_v9 = vunpack.i.l.bf16 %v14135_v45  ;;  %vm2117_vm0 = vcmask 818176  }
 0x36a   :  { %6392 = vrot.lane.b32.xlu1 %v6391_v63, %s6816_s29  ;;  %v10309_v62 = vpop.permute.xlu0 %3184  ;;  %v2105_v63 = vsel %vm2103_vm14, %v2098_v14, %v6320_v0  ;;  %v2140_v60 = vsel %vm2138_vm2, %v14141_v19, %v14140_v52  ;;  %v2090_v14 = vsel %vm13557_vm12, %v2083_v24, %v6314_v38  ;;  %v14143_v5 = vld [vmem:[#allocation188_spill] sm:$0xff]  ;;  %v14144_v52 = vld [vmem:[#allocation79_spill] sm:$0xff]  ;;  %vm13580_vm12 = vcmask 982016  }
 0x36b   :  { %14130 = vst [vmem:[#allocation307_spill] sm:$0xff] %v10309_v62  ;;  %v6319_v62 = vunpack.i.l.bf16 %v9494_v18  ;;  %v2099_v53 = vsel %vm13556_vm13, %v2092_v47, %v14143_v5  ;;  %v6290_v61 = vunpack.i.h.bf16 %v14144_v52  ;;  %v6289_v45 = vunpack.i.l.bf16 %v14144_v52  ;;  %v14145_v18 = vld [vmem:[#allocation109_spill] sm:$0xff]  ;;  %v14147_v47 = vld [vmem:[#allocation71_spill] sm:$0xff] }
 0x36c   :  { %v10321_v10 = vpop.permute.xlu1 %6367  ;;  %4409 = vrot.lane.b32.xlu0 %v14134_v48, %s6810_s23  ;;  %v6305_v28 = vunpack.i.h.bf16 %v14145_v18 }
 0x36d   :  { %14133 = vst [vmem:[#allocation308_spill] sm:$0xff] %v10321_v10  ;;  %v6369_v20 = vunpack.i.l.bf16 %v10321_v10  ;;  %v2112_v10 = vsel %vm2110_vm11, %v2105_v63, %v6310_v54  ;;  %v2106_v54 = vsel %vm2103_vm14, %v2099_v53, %v9590_v36 }
 0x36e   :  { %4304 = vrot.lane.b32.xlu1 %v9510_v41, %s6816_s29  ;;  %v10341_v0 = vpop.permute.xlu0 %3238  ;;  %v6304_v41 = vunpack.i.l.bf16 %v14145_v18  ;;  %v10369_v18 = vrot.slane %v9818_v25, 4 }
 0x36f   :  { %14142 = vst [vmem:[#allocation112_spill] sm:$0xff] %v10341_v0  ;;  %v2097_v21 = vsel %vm13556_vm13, %v2090_v14, %v6369_v20  ;;  %v2147_v20 = vsel %vm2145_vm15, %v2140_v60, %v14147_v47  ;;  %vm13584_vm13 = vcmask 900096  }
 0x370   :  { %v2104_v24 = vsel %vm2103_vm14, %v2097_v21, %v6319_v62  ;;  %v10351_v38 = vpop.permute.xlu1 %6372  ;;  %4426 = vrot.lane.b32.xlu0 %v4420_v7, %s6815_s28  ;;  %v2119_v7 = vsel %vm2117_vm0, %v2112_v10, %v6290_v61  ;;  %14149 = vst [vmem:[#allocation111_spill] sm:$0xff] %v10369_v18  ;;  %v14154_v10 = vld [vmem:[#allocation34_spill] sm:$0xff]  ;;  %v14155_v61 = vld [vmem:[#allocation33_spill] sm:$0xff] }
 0x371   :  { %14146 = vst [vmem:[#allocation172_spill] sm:$0xff] %v10351_v38  ;;  %v6374_v14 = vunpack.i.l.bf16 %v10351_v38  ;;  %v2111_v63 = vsel %vm2110_vm11, %v2104_v24, %v6309_v9  ;;  %v14150_v9 = vld [vmem:[#allocation151_spill] sm:$0xff]  ;;  %v14151_v24 = vld [vmem:[#allocation81_spill] sm:$0xff] }
 0x372   :  { %6402 = vrot.lane.b32.xlu1 %v6401_v57, %s6817_s30  ;;  %v10362_v52 = vpop.permute.xlu0 %3294  ;;  %v2118_v62 = vsel %vm2117_vm0, %v2111_v63, %v6289_v45  ;;  %v2141_v53 = vsel %vm2138_vm2, %v14151_v24, %v14150_v9  ;;  %v14152_v57 = vld [vmem:[#allocation176_spill] sm:$0xff]  ;;  %v6334_v45 = vunpack.i.l.bf16 %v9893_v44  ;;  %v14291_v44 = vld [vmem:[#allocation59_spill] sm:$0xff] }
 0x373   :  { %14148 = vst [vmem:[#allocation32_spill] sm:$0xff] %v10362_v52  ;;  %v2113_v21 = vsel %vm2110_vm11, %v2106_v54, %v6374_v14  ;;  %v2125_v60 = vsel %vm13584_vm13, %v2118_v62, %v6304_v41  ;;  %v2154_v47 = vsel %vm13587_vm1, %v2147_v20, %v14152_v57  ;;  %v14156_v14 = vpack.i.bf16 %v14154_v10, %v14155_v61  ;;  %v14157_v10 = vld [vmem:[#allocation69_spill] sm:$0xff] }
 0x374   :  { %v10377_v63 = vpop.permute.xlu1 %2045  ;;  %v2132_v41 = vsel %vm13580_vm12, %v2125_v60, %v14100_v27  ;;  %v2529_v54 = vsel %vm13579_vm5, %v2154_v47, %v10207_v42  ;;  %v2126_v62 = vsel %vm13584_vm13, %v2119_v7, %v6305_v28  ;;  %v13560_v20 = vrot.slane %v9818_v25, 5  ;;  %v14160_v7 = vld [vmem:[#allocation191_spill] sm:$0xff] }
 0x375   :  { %14153 = vst [vmem:[#allocation80_spill] sm:$0xff] %v10377_v63  ;;  %6397 = vrot.lane.b32.xlu0 %v14156_v14, %s6811_s24  ;;  %4820 = vmatmul.mubr.f32.vlgmr.msra.gmra.mrb[0].mxu1 %v2132_v41  ;;  %v2120_v57 = vsel %vm2117_vm0, %v2113_v21, %v6334_v45  ;;  %v2148_v61 = vsel %vm2145_vm15, %v2141_v53, %v14157_v10  ;;  %v6359_v27 = vunpack.i.l.bf16 %v10119_v51  ;;  %v14158_v42 = vrot.slane %v9530_v2, 4  ;;  %v14162_v14 = vld [vmem:[#allocation122_spill] sm:$0xff] }
 0x376   :  { %6407 = vrot.lane.b32.xlu1 %v6406_v49, %s6812_s25  ;;  %v10390_v9 = vpop.permute.xlu0 %3240  ;;  %5658 = vmatprep.mubr.msk.f32.mxu1 %vm13558_vm4, %v2529_v54  ;;  %v2155_v49 = vsel %vm13587_vm1, %v2148_v61, %v14160_v7  ;;  %v2133_v21 = vsel %vm13580_vm12, %v2126_v62, %v14141_v19  ;;  %v14161_v47 = vrot.slane %v9530_v2, 5  ;;  %v10419_v41 = vrot.slane %v14162_v14, 1 }
 0x377   :  { %v10401_v28 = vsel %vm1571_vm6, %v14158_v42, %v10369_v18  ;;  %v2530_v53 = vsel %vm13579_vm5, %v2155_v49, %v10209_v26  ;;  %v2127_v54 = vsel %vm13584_vm13, %v2120_v57, %v6359_v27  ;;  %v14163_v19 = vrot.slane %v8713_v15, 1 }
 0x378   :  { %14159 = vst [vmem:[#allocation79_spill] sm:$0xff] %v10401_v28  ;;  %v10405_v60 = vpop.permute.xlu1 %2181  ;;  %v4334_v45 = vsel %vm1645_vm7, %v14161_v47, %v13560_v20  ;;  %v2134_v61 = vsel %vm13580_vm12, %v2127_v54, %v14151_v24  ;;  %v10436_v57 = vrot.slane %v14080_v59, 3  ;;  %v13559_v27 = vrot.slane %v14092_v33, 3  ;;  %v14170_v47 = vld [vmem:[#allocation88_spill] sm:$0xff] }
 0x379   :  { %4306 = vrot.lane.b32.xlu0 %v10401_v28, %s6816_s29  ;;  %4825 = vmatmul.mubr.f32.gmra.mrb[2].mxu1 %v2133_v21  ;;  %v4317_v26 = vsel %vm13652_vm3, %v14163_v19, %v10419_v41  ;;  %v3582_v7 = vrot.slane %v14093_v22, 3  ;;  %v14178_v28 = vld [vmem:[#allocation147_spill] sm:$0xff]  ;;  %vm14230_vm13 = vcmask 490496  }
 0x37a   :  { %4344 = vrot.lane.b32.xlu1 %v4334_v45, %s6817_s30  ;;  %v10423_v10 = vpop.permute.xlu0 %3296  ;;  %5659 = vmatprep.mubr.msk.f32.mxu1 %vm13558_vm4, %v2530_v53  ;;  %14164 = vst [vmem:[#allocation109_spill] sm:$0xff] %v10436_v57  ;;  %vm14167_vm4 = vcmask 1044480   ;;  %v6411_v53 = vpack.i.bf16 %v14077_v43, %v13856_v4  ;;  %v14171_v45 = vld [vmem:[#allocation51_spill] sm:$0xff] }
 0x37b   :  { %v10451_v24 = vsel %vm14167_vm4, %v3582_v7, %v13559_v27  ;;  %v6416_v54 = vpack.i.bf16 %v14171_v45, %v14170_v47 }
 0x37c   :  { %v10430_v62 = vpop.permute.xlu1 %3126  ;;  %14168 = vst [vmem:[#allocation81_spill] sm:$0xff] %v10451_v24 }
 0x37d   :  { %4322 = vrot.lane.b32.xlu0 %v4317_v26, %s6811_s24  ;;  %4830 = vmatmul.mubr.f32.gmra.mrb[4].mxu1 %v2134_v61  ;;  %v10469_v26 = vsel %vm14167_vm4, %v10436_v57, %v3582_v7  ;;  %v4296_v61 = vrot.slane %v9013_v17, 4  ;;  %vm14190_vm4 = vcmask 1040384  }
 0x37e   :  { %4362 = vrot.lane.b32.xlu1 %v10436_v57, %s6812_s25  ;;  %v10441_v42 = vpop.permute.xlu0 %3732  ;;  %14173 = vst [vmem:[#allocation33_spill] sm:$0xff] %v10469_v26 }
 0x37f   :  { %14165 = vst [vmem:[#allocation71_spill] sm:$0xff] %v10441_v42  ;;  %v4297_v7 = vsel %vm1571_vm6, %v10369_v18, %v4296_v61  ;;  %v14186_v42 = vld [vmem:[#allocation29_spill] sm:$0xff] }
 0x380   :  { %v10444_v49 = vpop.permute.xlu1 %3764  ;;  %v10520_v15 = vrot.slane %v14186_v42, 7 }
 0x381   :  { %14166 = vst [vmem:[#allocation151_spill] sm:$0xff] %v10444_v49  ;;  %4342 = vrot.lane.b32.xlu0 %v9551_v30, %s6817_s30  ;;  %v14204_v49 = vld [vmem:[#allocation180_spill] sm:$0xff] }
 0x382   :  { %4366 = vrot.lane.b32.xlu1 %v10451_v24, %s6812_s25  ;;  %v10455_v21 = vpop.permute.xlu0 %3734  ;;  %v14185_v24 = vld [vmem:[#allocation41_spill] sm:$0xff] }
 0x383   :  { %14169 = vst [vmem:[#allocation176_spill] sm:$0xff] %v10455_v21 }
 0x384   :  { %v10461_v19 = vpop.permute.xlu1 %2696 }
 0x385   :  { %14172 = vst [vmem:[#allocation34_spill] sm:$0xff] %v10461_v19  ;;  %6412 = vrot.lane.b32.xlu0 %v6411_v53, %s6808_s21  ;;  %v14175_v53 = vrot.slane %v13856_v4, 1 }
 0x386   :  { %6417 = vrot.lane.b32.xlu1 %v6416_v54, %s6814_s27  ;;  %v10465_v30 = vpop.permute.xlu0 %3124 }
 0x387   :  { %v10484_v54 = vsel %vm13652_vm3, %v14134_v48, %v14175_v53  ;;  %v14182_v53 = vld [vmem:[#allocation48_spill] sm:$0xff] }
 0x388   :  { %v10472_v27 = vpop.permute.xlu1 %3130  ;;  %14176 = vst [vmem:[#allocation191_spill] sm:$0xff] %v10484_v54  ;;  %v6421_v36 = vpack.i.bf16 %v14178_v28, %v10484_v54  ;;  %v14181_v28 = vrot.slane %v8003_v31, 6  ;;  %v14200_v54 = vrot.slane %v9818_v25, 5 }
 0x389   :  { %4364 = vrot.lane.b32.xlu0 %v10469_v26, %s6812_s25 }
 0x38a   :  { %4380 = vrot.lane.b32.xlu1 %v14056_v1, %s6808_s21  ;;  %v10478_v45 = vpop.permute.xlu0 %1799 }
 0x38b   :  { %14174 = vst [vmem:[#allocation69_spill] sm:$0xff] %v10478_v45  ;;  %v14234_v45 = vld [vmem:[#allocation167_spill] sm:$0xff] }
 0x38c   :  { %v10488_v20 = vpop.permute.xlu1 %1801 }
 0x38d   :  { %14177 = vst [vmem:[#allocation51_spill] sm:$0xff] %v10488_v20  ;;  %4308 = vrot.lane.b32.xlu0 %v4297_v7, %s6816_s29  ;;  %v10511_v7 = vpack.i.bf16 %v14182_v53, %v14181_v28 }
 0x38e   :  { %4324 = vrot.lane.b32.xlu1 %v10419_v41, %s6811_s24  ;;  %v10495_v5 = vpop.permute.xlu0 %2043 }
 0x38f   :  { %14179 = vst [vmem:[#allocation147_spill] sm:$0xff] %v10495_v5  ;;  %14183 = vst [vmem:[#allocation48_spill] sm:$0xff] %v10511_v7 }
 0x390   :  { %v10497_v21 = vpop.permute.xlu1 %2185 }
 0x391   :  { %6422 = vrot.lane.b32.xlu0 %v6421_v36, %s6810_s23  ;;  %v14184_v36 = vld [vmem:[#allocation45_spill] sm:$0xff] }
 0x392   :  { %4395 = vrot.lane.b32.xlu1 %v10235_v3, %s6814_s27  ;;  %v10502_v48 = vpop.permute.xlu0 %2183  ;;  %v6426_v3 = vpack.i.bf16 %v14185_v24, %v14184_v36  ;;  %14187 = vst [vmem:[#allocation45_spill] sm:$0xff] %v10520_v15  ;;  %v14194_v24 = vld [vmem:[#allocation9_spill] sm:$0xff] }
 0x394   :  { %v10504_v61 = vpop.permute.xlu1 %2249 }
 0x395   :  { %14180 = vst [vmem:[#allocation309_spill] sm:$0xff] %v10504_v61  ;;  %4393 = vrot.lane.b32.xlu0 %v10113_v40, %s6814_s27  ;;  %v14189_v40 = vld [vmem:[#allocation40_spill] sm:$0xff] }
 0x396   :  { %6432 = vrot.lane.b32.xlu1 %v10511_v7, %s6815_s28  ;;  %v10515_v18 = vpop.permute.xlu0 %2247  ;;  %v10528_v28 = vsel %vm14190_vm4, %v10520_v15, %v14189_v40  ;;  %v14196_v40 = vld [vmem:[#allocation8_spill] sm:$0xff]  ;;  %vm14214_vm4 = vcmask 326656  }
 0x397   :  { %14191 = vst [vmem:[#allocation40_spill] sm:$0xff] %v10528_v28  ;;  %vm14218_vm5 = vmmov %vm14214_vm4 }
 0x398   :  { %v10522_v26 = vpop.permute.xlu1 %3766  ;;  %vm14220_vm12 = vmmov %vm14214_vm4 }
 0x399   :  { %14188 = vst [vmem:[#allocation41_spill] sm:$0xff] %v10522_v26  ;;  %6427 = vrot.lane.b32.xlu0 %v6426_v3, %s6812_s25  ;;  %v14197_v26 = vld [vmem:[#allocation142_spill] sm:$0xff] }
 0x39a   :  { %2860 = vrot.lane.b32.xlu1 %v10528_v28, %s6809_s22  ;;  %v10532_v7 = vpop.permute.xlu0 %2748  ;;  %v4406_v28 = vsel %vm13652_vm3, %v10029_v37, %v14197_v26 }
 0x39b   :  { %14192 = vst [vmem:[#allocation310_spill] sm:$0xff] %v10532_v7  ;;  %v14198_v7 = vld [vmem:[#allocation212_spill] sm:$0xff] }
 0x39c   :  { %v10534_v14 = vpop.permute.xlu1 %2698 }
 0x39d   :  { %14193 = vst [vmem:[#allocation311_spill] sm:$0xff] %v10534_v14  ;;  %2858 = vrot.lane.b32.xlu0 %v10520_v15, %s6809_s22  ;;  %v14199_v15 = vld [vmem:[#allocation24_spill] sm:$0xff] }
 0x39e   :  { %2884 = vrot.lane.b32.xlu1 %v14194_v24, %s6819_s13  ;;  %v10540_v36 = vpop.permute.xlu0 %2187  ;;  %v3307_v19 = vsel %vm2055_vm8, %v14199_v15, %v14198_v7 }
 0x39f   :  { %v3315_v7 = vsel %vm2062_vm9, %v3307_v19, %v14204_v49  ;;  %v14211_v49 = vld [vmem:[#allocation211_spill] sm:$0xff] }
 0x3a0   :  { %v10542_v3 = vpop.permute.xlu1 %2750 }
 0x3a1   :  { %14195 = vst [vmem:[#allocation312_spill] sm:$0xff] %v10542_v3  ;;  %2882 = vrot.lane.b32.xlu0 %v14196_v40, %s6819_s13  ;;  %v4335_v3 = vsel %vm1645_vm7, %v14200_v54, %v9972_v6  ;;  %v14202_v40 = vld [vmem:[#allocation210_spill] sm:$0xff] }
 0x3a2   :  { %4411 = vrot.lane.b32.xlu1 %v4406_v28, %s6810_s23  ;;  %v10550_v14 = vpop.permute.xlu0 %2251  ;;  %v3306_v37 = vsel %vm2055_vm8, %v8003_v31, %v14202_v40  ;;  %v14203_v28 = vld [vmem:[#allocation25_spill] sm:$0xff]  ;;  %v14206_v54 = vld [vmem:[#allocation214_spill] sm:$0xff] }
 0x3a3   :  { %v3308_v57 = vsel %vm2055_vm8, %v14203_v28, %v9636_v39  ;;  %v14209_v40 = vld [vmem:[#allocation198_spill] sm:$0xff]  ;;  %v14210_v39 = vld [vmem:[#allocation49_spill] sm:$0xff] }
 0x3a4   :  { %v10559_v47 = vpop.permute.xlu1 %3786  ;;  %v3316_v24 = vsel %vm2062_vm9, %v3308_v57, %v14209_v40  ;;  %v14215_v57 = vrot.slane %v14092_v33, 3  ;;  %v14217_v40 = vld [vmem:[#allocation108_spill] sm:$0xff] }
 0x3a5   :  { %14201 = vst [vmem:[#allocation142_spill] sm:$0xff] %v10559_v47  ;;  %4346 = vrot.lane.b32.xlu0 %v4335_v3, %s6817_s30  ;;  %v10576_v47 = vsel %vm2069_vm10, %v3315_v7, %v14206_v54  ;;  %v14208_v3 = vld [vmem:[#allocation179_spill] sm:$0xff]  ;;  %v14222_v7 = vld [vmem:[#allocation90_spill] sm:$0xff] }
 0x3a6   :  { %2906 = vrot.lane.b32.xlu1 %v14186_v42, %s6807_s0  ;;  %v10572_v5 = vpop.permute.xlu0 %6377  ;;  %14207 = vst [vmem:[#allocation210_spill] sm:$0xff] %v10576_v47  ;;  %v3314_v63 = vsel %vm2062_vm9, %v3306_v37, %v14208_v3  ;;  %v10590_v42 = vsel %vm2069_vm10, %v3316_v24, %v9678_v8  ;;  %v14213_v54 = vld [vmem:[#allocation131_spill] sm:$0xff] }
 0x3a7   :  { %14205 = vst [vmem:[#allocation212_spill] sm:$0xff] %v10572_v5  ;;  %v3322_v19 = vsel %vm2069_vm10, %v3314_v63, %v14211_v49  ;;  %14212 = vst [vmem:[#allocation25_spill] sm:$0xff] %v10590_v42  ;;  %v3331_v37 = vsel %vm14214_vm4, %v10576_v47, %v14213_v54  ;;  %v14219_v63 = vld [vmem:[#allocation165_spill] sm:$0xff]  ;;  %v14221_v49 = vld [vmem:[#allocation28_spill] sm:$0xff]  ;;  %vm14223_vm4 = vcmask 408576   ;;  %v14224_v47 = vrot.slane %v8987_v13, 1 }
 0x3a8   :  { %v10582_v20 = vpop.permute.xlu1 %3100  ;;  %v3332_v8 = vsel %vm14220_vm12, %v10590_v42, %v14219_v63  ;;  %v3339_v54 = vsel %vm14223_vm4, %v3331_v37, %v14222_v7  ;;  %v14227_v42 = vld [vmem:[#allocation89_spill] sm:$0xff]  ;;  %vm14228_vm12 = vmmov %vm14223_vm4  ;;  %v14229_v5 = vld [vmem:[#allocation136_spill] sm:$0xff] }
 0x3a9   :  { %6437 = vrot.lane.b32.xlu0 %v14210_v39, %s6820_s3  ;;  %v3330_v39 = vsel %vm14218_vm5, %v3322_v19, %v14217_v40  ;;  %v14225_v40 = vld [vmem:[#allocation66_spill] sm:$0xff]  ;;  %vm14226_vm5 = vmmov %vm14223_vm4  ;;  %v3347_v51 = vsel %vm14230_vm13, %v3339_v54, %v14229_v5 }
 0x3aa   :  { %4368 = vrot.lane.b32.xlu1 %v14215_v57, %s6812_s25  ;;  %v10599_v3 = vpop.permute.xlu0 %2047  ;;  %v2581_v57 = vsel %vm13652_vm3, %v10419_v41, %v14224_v47  ;;  %v3338_v63 = vsel %vm14226_vm5, %v3330_v39, %v14225_v40  ;;  %v14231_v41 = vld [vmem:[#allocation62_spill] sm:$0xff]  ;;  %vm14233_vm4 = vmmov %vm14230_vm13  ;;  %vm14238_vm5 = vcmask 572416  }
 0x3ab   :  { %14216 = vst [vmem:[#allocation180_spill] sm:$0xff] %v10599_v3  ;;  %v3340_v3 = vsel %vm14228_vm12, %v3332_v8, %v14227_v42  ;;  %v6441_v47 = vpack.i.bf16 %v2581_v57, %v14231_v41  ;;  %v14232_v7 = vld [vmem:[#allocation110_spill] sm:$0xff]  ;;  %vm14235_vm1 = vmmov %vm14233_vm4  ;;  %v14237_v8 = vld [vmem:[#allocation93_spill] sm:$0xff]  ;;  %vm14251_vm12 = vcmask 1041408  }
 0x3ac   :  { %v10606_v24 = vpop.permute.xlu1 %3152  ;;  %v3348_v38 = vsel %vm14235_vm1, %v3340_v3, %v14234_v45  ;;  %v3355_v54 = vsel %vm14238_vm5, %v3347_v51, %v14237_v8  ;;  %vm14241_vm13 = vmmov %vm14238_vm5  ;;  %v14242_v3 = vld [vmem:[#allocation91_spill] sm:$0xff]  ;;  %v14246_v51 = vld [vmem:[#allocation134_spill] sm:$0xff] }
 0x3ad   :  { %2908 = vrot.lane.b32.xlu0 %v14221_v49, %s6807_s0  ;;  %vm14243_vm1 = vmmov %vm14238_vm5  ;;  %v3363_v42 = vsel %vm2103_vm14, %v3355_v54, %v14246_v51  ;;  %v14248_v57 = vld [vmem:[#allocation57_spill] sm:$0xff] }
 0x3ae   :  { %4430 = vrot.lane.b32.xlu1 %v10253_v46, %s6815_s28  ;;  %v10618_v19 = vpop.permute.xlu0 %3128  ;;  %v3346_v46 = vsel %vm14233_vm4, %v3338_v63, %v14232_v7  ;;  %v14240_v7 = vld [vmem:[#allocation68_spill] sm:$0xff]  ;;  %v3356_v41 = vsel %vm14243_vm1, %v3348_v38, %v14242_v3  ;;  %v14250_v38 = vrot.slane %v13845_v29, 6  ;;  %v3379_v5 = vrot.slane %v3363_v42, 3 }
 0x3af   :  { %v3354_v63 = vsel %vm14241_vm13, %v3346_v46, %v14240_v7  ;;  %v14249_v46 = vld [vmem:[#allocation156_spill] sm:$0xff]  ;;  %vm14258_vm4 = vcmask 1044480   ;;  %vm14274_vm13 = vcmask 326656   ;;  %vm14278_vm1 = vcmask 408576  }
 0x3b0   :  { %v10626_v37 = vpop.permute.xlu1 %6382  ;;  %v3362_v8 = vsel %vm2103_vm14, %v3354_v63, %v14248_v57  ;;  %v10664_v7 = vsel %vm2103_vm14, %v3356_v41, %v14249_v46  ;;  %v14255_v63 = vld [vmem:[#allocation16_spill] sm:$0xff]  ;;  %v14256_v41 = vld [vmem:[#allocation19_spill] sm:$0xff]  ;;  %vm14260_vm5 = vmmov %vm14258_vm4 }
 0x3b1   :  { %4428 = vrot.lane.b32.xlu0 %v10159_v11, %s6815_s28  ;;  %v10643_v11 = vrot.slane %v13856_v4, 6  ;;  %v3378_v51 = vrot.slane %v3362_v8, 3  ;;  %v14257_v46 = vpack.i.bf16 %v14255_v63, %v14256_v41 }
 0x3b2   :  { %6442 = vrot.lane.b32.xlu1 %v6441_v47, %s6811_s24  ;;  %v10636_v39 = vpop.permute.xlu0 %2672  ;;  %v14244_v47 = vld [vmem:[#allocation50_spill] sm:$0xff] }
 0x3b3   :  { %14236 = vst [vmem:[#allocation214_spill] sm:$0xff] %v10636_v39  ;;  %14239 = vst [vmem:[#allocation179_spill] sm:$0xff] %v10643_v11  ;;  %v10670_v3 = vsel %vm14251_vm12, %v10643_v11, %v14250_v38  ;;  %v14269_v39 = vld [vmem:[#allocation193_spill] sm:$0xff] }
 0x3b4   :  { %v2222_v40 = vpop.permute.xlu1 %2221  ;;  %14252 = vst [vmem:[#allocation131_spill] sm:$0xff] %v10670_v3  ;;  %vm14281_vm12 = vmmov %vm14274_vm13 }
 0x3b5   :  { %2668 = vrot.lane.b32.xlu0 %v14074_v58, %s6808_s21 }
 0x3b6   :  { %6447 = vrot.lane.b32.xlu1 %v14244_v47, %s6813_s26  ;;  %v10652_v45 = vpop.permute.xlu0 %3768  ;;  %v3380_v47 = vsel %vm14258_vm4, %v3378_v51, %v3379_v5  ;;  %v14265_v51 = vld [vmem:[#allocation52_spill] sm:$0xff]  ;;  %vm14283_vm4 = vmmov %vm14281_vm12 }
 0x3b7   :  { %14245 = vst [vmem:[#allocation198_spill] sm:$0xff] %v10652_v45  ;;  %v13592_v45 = vrot.slane %v10664_v7, 3 }
 0x3b8   :  { %v10656_v58 = vpop.permute.xlu1 %2674 }
 0x3b9   :  { %14247 = vst [vmem:[#allocation211_spill] sm:$0xff] %v10656_v58  ;;  %2944 = vrot.lane.b32.xlu0 %v10643_v11, %s6821_s16  ;;  %v3382_v38 = vsel %vm14260_vm5, %v3379_v5, %v13592_v45  ;;  %v3309_v11 = vsel %vm2055_vm8, %v14265_v51, %v9715_v16  ;;  %v14266_v45 = vld [vmem:[#allocation61_spill] sm:$0xff]  ;;  %v2427_v16 = vsel %vm2055_vm8, %v14077_v43, %v10405_v60  ;;  %vm14286_vm5 = vcmask 490496  }
 0x3ba   :  { %2946 = vrot.lane.b32.xlu1 %v10670_v3, %s6821_s16  ;;  %v10674_v54 = vpop.permute.xlu0 %3812 }
 0x3bb   :  { %14253 = vst [vmem:[#allocation108_spill] sm:$0xff] %v10674_v54  ;;  %v14262_v54 = vld [vmem:[#allocation154_spill] sm:$0xff] }
 0x3bc   :  { %v10677_v57 = vpop.permute.xlu1 %3800 }
 0x3bd   :  { %14254 = vst [vmem:[#allocation165_spill] sm:$0xff] %v10677_v57  ;;  %6452 = vrot.lane.b32.xlu0 %v14257_v46, %s6818_s12  ;;  %v14263_v57 = vrot.slane %v14092_v33, 4  ;;  %v14264_v46 = vld [vmem:[#allocation96_spill] sm:$0xff] }
 0x3be   :  { %3392 = vrot.lane.b32.xlu1 %v3380_v47, %s6824_s2  ;;  %v10685_v42 = vpop.permute.xlu0 %6387  ;;  %v2541_v3 = vrot.slane %v14264_v46, 5 }
 0x3bf   :  { %14259 = vst [vmem:[#allocation66_spill] sm:$0xff] %v10685_v42  ;;  %v4386_v63 = vsel %vm1571_vm6, %v14263_v57, %v14262_v54  ;;  %v3317_v54 = vsel %vm2062_vm9, %v3309_v11, %v14269_v39  ;;  %v14270_v57 = vld [vmem:[#allocation7_spill] sm:$0xff]  ;;  %v10730_v11 = vsel %vm2062_vm9, %v2427_v16, %v2222_v40  ;;  %v14276_v40 = vld [vmem:[#allocation53_spill] sm:$0xff]  ;;  %v14292_v42 = vld [vmem:[#allocation70_spill] sm:$0xff] }
 0x3c0   :  { %v10690_v8 = vpop.permute.xlu1 %1833  ;;  %14272 = vst [vmem:[#allocation68_spill] sm:$0xff] %v10730_v11 }
 0x3c1   :  { %14261 = vst [vmem:[#allocation62_spill] sm:$0xff] %v10690_v8  ;;  %3394 = vrot.lane.b32.xlu0 %v3382_v38, %s6824_s2  ;;  %v14267_v38 = vld [vmem:[#allocation95_spill] sm:$0xff]  ;;  %v3325_v8 = vsel %vm2069_vm10, %v3317_v54, %v9749_v55  ;;  %v14273_v54 = vld [vmem:[#allocation145_spill] sm:$0xff] }
 0x3c2   :  { %4397 = vrot.lane.b32.xlu1 %v4386_v63, %s6814_s27  ;;  %v10699_v47 = vpop.permute.xlu0 %3102  ;;  %v14268_v41 = vrot.slane %v14267_v38, 5  ;;  %v3333_v60 = vsel %vm14274_vm13, %v3325_v8, %v14273_v54  ;;  %v14279_v8 = vrot.slane %v8987_v13, 1  ;;  %vm14289_vm13 = vmmov %vm14283_vm4 }
 0x3c4   :  { %v2226_v5 = vpop.permute.xlu1 %2225  ;;  %v2543_v58 = vsel %vm1645_vm7, %v2541_v3, %v14268_v41  ;;  %v2583_v16 = vsel %vm13652_vm3, %v14279_v8, %v9587_v34  ;;  %v14285_v8 = vld [vmem:[#allocation159_spill] sm:$0xff] }
 0x3c5   :  { %2862 = vrot.lane.b32.xlu0 %v14266_v45, %s6809_s22  ;;  %v10723_v45 = vsel %vm2055_vm8, %v14093_v22, %v10497_v21  ;;  %v6456_v39 = vpack.i.bf16 %v2543_v58, %v2541_v3  ;;  %v2443_v21 = vsel %vm2069_vm10, %v10730_v11, %v10298_v50  ;;  %v14277_v3 = vld [vmem:[#allocation58_spill] sm:$0xff]  ;;  %v2430_v50 = vsel %vm2055_vm8, %v14092_v33, %v10540_v36 }
 0x3c6   :  { %2886 = vrot.lane.b32.xlu1 %v14270_v57, %s6819_s13  ;;  %v10713_v63 = vpop.permute.xlu0 %3154  ;;  %14271 = vst [vmem:[#allocation110_spill] sm:$0xff] %v10723_v45  ;;  %v2437_v55 = vsel %vm2062_vm9, %v10723_v45, %v2226_v5  ;;  %v3341_v5 = vsel %vm14278_vm1, %v3333_v60, %v14277_v3  ;;  %v2451_v54 = vsel %vm14281_vm12, %v2443_v21, %v9952_v32  ;;  %v14284_v3 = vrot.slane %v14092_v33, 5  ;;  %v14287_v21 = vld [vmem:[#allocation228_spill] sm:$0xff] }
 0x3c7   :  { %v2445_v58 = vsel %vm2069_vm10, %v2437_v55, %v10504_v61  ;;  %v14282_v61 = vld [vmem:[#allocation271_spill] sm:$0xff]  ;;  %v3349_v36 = vsel %vm14286_vm5, %v3341_v5, %v14285_v8  ;;  %v14295_v8 = vld [vmem:[#allocation305_spill] sm:$0xff]  ;;  %vm14298_vm12 = vcmask 572416  }
 0x3c8   :  { %v10725_v41 = vpop.permute.xlu1 %3104  ;;  %v2453_v45 = vsel %vm14283_vm4, %v2445_v58, %v14282_v61  ;;  %v4421_v34 = vsel %vm1645_vm7, %v14284_v3, %v10295_v23  ;;  %v14288_v61 = vld [vmem:[#allocation274_spill] sm:$0xff]  ;;  %v6471_v23 = vpack.i.bf16 %v14292_v42, %v14291_v44  ;;  %vm14294_vm7 = vmmov %vm14278_vm1  ;;  %v14301_v44 = vld [vmem:[#allocation255_spill] sm:$0xff] }
 0x3c9   :  { %4413 = vrot.lane.b32.xlu0 %v14197_v26, %s6810_s23  ;;  %v14293_v3 = vld [vmem:[#allocation282_spill] sm:$0xff]  ;;  %vm14300_vm4 = vmmov %vm14278_vm1 }
 0x3ca   :  { %6457 = vrot.lane.b32.xlu1 %v6456_v39, %s6816_s29  ;;  %v10737_v57 = vpop.permute.xlu0 %3778  ;;  %v14280_v39 = vld [vmem:[#allocation31_spill] sm:$0xff]  ;;  %v2459_v5 = vsel %vm14294_vm7, %v2451_v54, %v14293_v3  ;;  %v14302_v54 = vld [vmem:[#allocation284_spill] sm:$0xff]  ;;  %vm14305_vm7 = vcmask 1041408  }
 0x3cb   :  { %14275 = vst [vmem:[#allocation57_spill] sm:$0xff] %v10737_v57  ;;  %v2467_v42 = vsel %vm14286_vm5, %v2459_v5, %v14301_v44  ;;  %v14308_v5 = vld [vmem:[#allocation183_spill] sm:$0xff]  ;;  %v14314_v44 = vld [vmem:[#allocation162_spill] sm:$0xff] }
 0x3cc   :  { %v10744_v26 = vpop.permute.xlu1 %3156 }
 0x3cd   :  { %6462 = vrot.lane.b32.xlu0 %v14276_v40, %s6820_s3  ;;  %v6466_v40 = vpack.i.bf16 %v14287_v21, %v2583_v16  ;;  %v14299_v21 = vld [vmem:[#allocation65_spill] sm:$0xff] }
 0x3ce   :  { %2910 = vrot.lane.b32.xlu1 %v14280_v39, %s6807_s0  ;;  %v2228_v55 = vpop.permute.xlu0 %2227 }
 0x3cf   :  { %v2438_v60 = vsel %vm2062_vm9, %v2430_v50, %v2228_v55  ;;  %v14290_v50 = vld [vmem:[#allocation37_spill] sm:$0xff] }
 0x3d0   :  { %v2446_v11 = vsel %vm2069_vm10, %v2438_v60, %v10550_v14  ;;  %v10772_v57 = vpop.permute.xlu1 %3106  ;;  %v13601_v55 = vrot.slane %v14290_v50, 6  ;;  %v2461_v14 = vsel %vm14278_vm1, %v2453_v45, %v14295_v8  ;;  %vm14311_vm1 = vmmov %vm14286_vm5 }
 0x3d1   :  { %4432 = vrot.lane.b32.xlu0 %v4421_v34, %s6815_s28  ;;  %v2454_v58 = vsel %vm14289_vm13, %v2446_v11, %v14288_v61  ;;  %v14297_v34 = vld [vmem:[#allocation60_spill] sm:$0xff]  ;;  %vm14303_vm13 = vmmov %vm14286_vm5  ;;  %vm14319_vm5 = vcmask 326656  }
 0x3d2   :  { %6467 = vrot.lane.b32.xlu1 %v6466_v40, %s6811_s24  ;;  %v10786_v60 = vpop.permute.xlu0 %1767  ;;  %v3357_v16 = vsel %vm14298_vm12, %v3349_v36, %v14297_v34  ;;  %v2462_v11 = vsel %vm14300_vm4, %v2454_v58, %v14299_v21  ;;  %v2469_v45 = vsel %vm14303_vm13, %v2461_v14, %v14302_v54  ;;  %v14304_v40 = vrot.slane %v13845_v29, 6  ;;  %v14309_v14 = vld [vmem:[#allocation163_spill] sm:$0xff]  ;;  %v14310_v54 = vld [vmem:[#allocation277_spill] sm:$0xff]  ;;  %vm14317_vm4 = vmmov %vm14298_vm12 }
 0x3d3   :  { %14296 = vst [vmem:[#allocation16_spill] sm:$0xff] %v10786_v60  ;;  %v2428_v36 = vsel %vm2055_vm8, %v14080_v59, %v10502_v48  ;;  %v3365_v21 = vsel %vm2103_vm14, %v3357_v16, %v14309_v14  ;;  %v2470_v8 = vsel %vm14311_vm1, %v2462_v11, %v14310_v54  ;;  %v14316_v16 = vld [vmem:[#allocation285_spill] sm:$0xff]  ;;  %v14318_v11 = vld [vmem:[#allocation248_spill] sm:$0xff]  ;;  %vm14321_vm13 = vcmask 408576  }
 0x3d4   :  { %v10792_v61 = vpop.permute.xlu1 %3158  ;;  %v10804_v3 = vsel %vm14305_vm7, %v14304_v40, %v13601_v55  ;;  %v2475_v14 = vsel %vm14317_vm4, %v2467_v42, %v14316_v16  ;;  %vm14324_vm7 = vmmov %vm14317_vm4  ;;  %v14327_v16 = vld [vmem:[#allocation257_spill] sm:$0xff] }
 0x3d5   :  { %6472 = vrot.lane.b32.xlu0 %v6471_v23, %s6813_s26  ;;  %14306 = vst [vmem:[#allocation154_spill] sm:$0xff] %v10804_v3  ;;  %v14307_v23 = vrot.slane %v14264_v46, 6 }
 0x3d6   :  { %2948 = vrot.lane.b32.xlu1 %v10804_v3, %s6821_s16  ;;  %v2224_v58 = vpop.permute.xlu0 %2223  ;;  %v14315_v3 = vld [vmem:[#allocation149_spill] sm:$0xff] }
 0x3d7   :  { %v6476_v34 = vpack.i.bf16 %v14308_v5, %v14307_v23  ;;  %v2436_v40 = vsel %vm2062_vm9, %v2428_v36, %v2224_v58  ;;  %v6481_v29 = vpack.i.bf16 %v14315_v3, %v14314_v44  ;;  %v2477_v23 = vsel %vm14298_vm12, %v2469_v45, %v10286_v35  ;;  %v14326_v35 = vld [vmem:[#allocation286_spill] sm:$0xff]  ;;  %vm14332_vm12 = vmmov %vm14317_vm4 }
 0x3d8   :  { %v10821_v55 = vsel %vm2069_vm10, %v2436_v40, %v10515_v18  ;;  %v10823_v48 = vpop.permute.xlu1 %2724  ;;  %v3383_v58 = vrot.slane %v3365_v21, 3  ;;  %v14320_v18 = vld [vmem:[#allocation304_spill] sm:$0xff]  ;;  %v14323_v40 = vld [vmem:[#allocation306_spill] sm:$0xff]  ;;  %v2485_v42 = vsel %vm2103_vm14, %v2477_v23, %v14326_v35  ;;  %vm14334_vm4 = vcmask 1044480   ;;  %v14336_v23 = vld [vmem:[#allocation281_spill] sm:$0xff] }
 0x3d9   :  { %14312 = vst [vmem:[#allocation96_spill] sm:$0xff] %v10821_v55  ;;  %14313 = vst [vmem:[#allocation61_spill] sm:$0xff] %v10823_v48  ;;  %6477 = vrot.lane.b32.xlu0 %v6476_v34, %s6817_s30  ;;  %v2452_v36 = vsel %vm14319_vm5, %v10821_v55, %v14318_v11  ;;  %v2478_v3 = vsel %vm14324_vm7, %v2470_v8, %v14323_v40  ;;  %v14325_v48 = vld [vmem:[#allocation264_spill] sm:$0xff]  ;;  %v2483_v55 = vsel %vm2103_vm14, %v2475_v14, %v14327_v16  ;;  %v14335_v40 = vld [vmem:[#allocation129_spill] sm:$0xff]  ;;  %vm14339_vm5 = vcmask 1045504  }
 0x3da   :  { %v2460_v54 = vsel %vm14321_vm13, %v2452_v36, %v14320_v18  ;;  %6482 = vrot.lane.b32.xlu1 %v6481_v29, %s6810_s23  ;;  %v10838_v34 = vpop.permute.xlu0 %3798  ;;  %v14328_v36 = vld [vmem:[#allocation15_spill] sm:$0xff]  ;;  %v14329_v18 = vld [vmem:[#allocation18_spill] sm:$0xff]  ;;  %v14333_v8 = vrot.slane %v10664_v7, 3  ;;  %v2486_v14 = vsel %vm2103_vm14, %v2478_v3, %v14336_v23  ;;  %vm14340_vm13 = vmmov %vm14339_vm5 }
 0x3db   :  { %14322 = vst [vmem:[#allocation193_spill] sm:$0xff] %v10838_v34  ;;  %v2468_v45 = vsel %vm14311_vm1, %v2460_v54, %v14325_v48  ;;  %v14330_v29 = vpack.i.bf16 %v14328_v36, %v14329_v18  ;;  %v14331_v34 = vld [vmem:[#allocation67_spill] sm:$0xff]  ;;  %v2505_v18 = vrot.slane %v2485_v42, 2  ;;  %vm14342_vm7 = vmmov %vm14339_vm5  ;;  %v14345_v23 = vld [vmem:[#allocation133_spill] sm:$0xff]  ;;  %vm14352_vm1 = vcmask 1041408  }
 0x3dc   :  { %v10848_v21 = vpop.permute.xlu1 %6392  ;;  %v2476_v44 = vsel %vm14332_vm12, %v2468_v45, %v14331_v34  ;;  %v3384_v54 = vsel %vm14334_vm4, %v14333_v8, %v3383_v58  ;;  %v2507_v8 = vrot.slane %v2486_v14, 2  ;;  %vm14369_vm12 = vcmask 1040384  }
 0x3dd   :  { %6487 = vrot.lane.b32.xlu0 %v14330_v29, %s6818_s12  ;;  %v2484_v35 = vsel %vm2103_vm14, %v2476_v44, %v14335_v40  ;;  %v2502_v29 = vrot.slane %v2483_v55, 2  ;;  %v14343_v55 = vld [vmem:[#allocation73_spill] sm:$0xff]  ;;  %vm14372_vm4 = vcmask 326656  }
 0x3de   :  { %3396 = vrot.lane.b32.xlu1 %v3384_v54, %s6824_s2  ;;  %v10864_v48 = vpop.permute.xlu0 %4409  ;;  %v2503_v16 = vrot.slane %v2484_v35, 2  ;;  %v2508_v54 = vsel %vm14342_vm7, %v2505_v18, %v2507_v8  ;;  %v14350_v8 = vld [vmem:[#allocation5_spill] sm:$0xff] }
 0x3df   :  { %14337 = vst [vmem:[#allocation145_spill] sm:$0xff] %v10864_v48 }
 0x3e0   :  { %v10866_v36 = vpop.permute.xlu1 %4304  ;;  %v2506_v45 = vsel %vm14339_vm5, %v2503_v16, %v2505_v18  ;;  %v2504_v7 = vsel %vm14340_vm13, %v2502_v29, %v2503_v16  ;;  %v14344_v16 = vld [vmem:[#allocation132_spill] sm:$0xff]  ;;  %v2935_v29 = vrot.slane %v9000_v12, 6  ;;  %vm14376_vm5 = vmmov %vm14372_vm4  ;;  %vm14379_vm13 = vcmask 408576  }
 0x3e1   :  { %14338 = vst [vmem:[#allocation58_spill] sm:$0xff] %v10866_v36  ;;  %2517 = vrot.lane.b32.xlu0 %v2506_v45, %s6824_s2  ;;  %v14346_v14 = vpack.i.bf16 %v14344_v16, %v14345_v23  ;;  %v14347_v45 = vld [vmem:[#allocation64_spill] sm:$0xff]  ;;  %vm14384_vm7 = vmmov %vm14379_vm13 }
 0x3e2   :  { %2515 = vrot.lane.b32.xlu1 %v2504_v7, %s6824_s2  ;;  %v10872_v44 = vpop.permute.xlu0 %4426 }
 0x3e3   :  { %14341 = vst [vmem:[#allocation271_spill] sm:$0xff] %v10872_v44 }
 0x3e4   :  { %v10874_v3 = vpop.permute.xlu1 %6402 }
 0x3e5   :  { %2519 = vrot.lane.b32.xlu0 %v2508_v54, %s6824_s2  ;;  %v14351_v54 = vrot.slane %v14290_v50, 6 }
 0x3e6   :  { %2864 = vrot.lane.b32.xlu1 %v14343_v55, %s6809_s22 }
 0x3e7   :  { %v10880_v42 = vpop.permute.xlu0 %6397  ;;  %v10900_v55 = vsel %vm14352_vm1, %v14351_v54, %v2935_v29  ;;  %v14359_v54 = vld [vmem:[#allocation119_spill] sm:$0xff]  ;;  %vm14386_vm1 = vcmask 490496  }
 0x3e8   :  { %v10882_v35 = vpop.permute.xlu1 %6407  ;;  %14353 = vst [vmem:[#allocation274_spill] sm:$0xff] %v10900_v55  ;;  %v3311_v36 = vsel %vm2055_vm8, %v14359_v54, %v10699_v47  ;;  %v14471_v54 = vld [vmem:[#allocation194_spill] sm:$0xff] }
 0x3e9   :  { %6492 = vrot.lane.b32.xlu0 %v14346_v14, %s6812_s25  ;;  %v14355_v14 = vld [vmem:[#allocation263_spill] sm:$0xff] }
 0x3ea   :  { %2912 = vrot.lane.b32.xlu1 %v14347_v45, %s6807_s0  ;;  %v6496_v40 = vpack.i.bf16 %v14355_v14, %v9972_v6  ;;  %v14362_v14 = vld [vmem:[#allocation275_spill] sm:$0xff] }
 0x3eb   :  { %v10891_v18 = vpop.permute.xlu0 %4306 }
 0x3ec   :  { %14348 = vst [vmem:[#allocation159_spill] sm:$0xff] %v10891_v18  ;;  %v10893_v7 = vpop.permute.xlu1 %4344  ;;  %v14358_v18 = vld [vmem:[#allocation299_spill] sm:$0xff] }
 0x3ed   :  { %14349 = vst [vmem:[#allocation228_spill] sm:$0xff] %v10893_v7  ;;  %2888 = vrot.lane.b32.xlu0 %v14350_v8, %s6819_s13  ;;  %v6501_v29 = vpack.i.bf16 %v14105_v56, %v14358_v18  ;;  %v3319_v18 = vsel %vm2062_vm9, %v3311_v36, %v10430_v62  ;;  %v14368_v36 = vld [vmem:[#allocation215_spill] sm:$0xff] }
 0x3ee   :  { %2950 = vrot.lane.b32.xlu1 %v10900_v55, %s6821_s16  ;;  %v14448_v8 = vld [vmem:[#allocation47_spill] sm:$0xff] }
 0x3ef   :  { %v10904_v23 = vpop.permute.xlu0 %4322 }
 0x3f0   :  { %14354 = vst [vmem:[#allocation59_spill] sm:$0xff] %v10904_v23  ;;  %v10908_v34 = vpop.permute.xlu1 %4362  ;;  %v14361_v23 = vrot.slane %v9013_v17, 6 }
 0x3f1   :  { %14356 = vst [vmem:[#allocation70_spill] sm:$0xff] %v10908_v34  ;;  %6497 = vrot.lane.b32.xlu0 %v6496_v40, %s6814_s27  ;;  %v10931_v40 = vrot.slane %v8987_v13, 7 }
 0x3f2   :  { %3398 = vrot.lane.b32.xlu1 %v3383_v58, %s6824_s2  ;;  %v10924_v44 = vpack.i.bf16 %v14362_v14, %v14361_v23  ;;  %v3310_v58 = vsel %vm2055_vm8, %v9013_v17, %v10582_v20  ;;  %v14366_v23 = vld [vmem:[#allocation75_spill] sm:$0xff]  ;;  %v14473_v14 = vld [vmem:[#allocation196_spill] sm:$0xff] }
 0x3f3   :  { %v10912_v7 = vpop.permute.xlu0 %4342  ;;  %14364 = vst [vmem:[#allocation284_spill] sm:$0xff] %v10931_v40  ;;  %v3318_v20 = vsel %vm2062_vm9, %v3310_v58, %v10465_v30 }
 0x3f4   :  { %14357 = vst [vmem:[#allocation282_spill] sm:$0xff] %v10912_v7  ;;  %v10919_v12 = vpop.permute.xlu1 %4366  ;;  %14363 = vst [vmem:[#allocation65_spill] sm:$0xff] %v10924_v44  ;;  %v10943_v7 = vsel %vm2069_vm10, %v3319_v18, %v10713_v63  ;;  %v3326_v62 = vsel %vm2069_vm10, %v3318_v20, %v10606_v24  ;;  %v14373_v18 = vld [vmem:[#allocation130_spill] sm:$0xff] }
 0x3f5   :  { %14360 = vst [vmem:[#allocation60_spill] sm:$0xff] %v10919_v12  ;;  %6502 = vrot.lane.b32.xlu0 %v6501_v29, %s6810_s23  ;;  %v14365_v12 = vld [vmem:[#allocation230_spill] sm:$0xff]  ;;  %14367 = vst [vmem:[#allocation183_spill] sm:$0xff] %v10943_v7  ;;  %v3312_v30 = vsel %vm2055_vm8, %v14373_v18, %v10725_v41  ;;  %v14463_v18 = vld [vmem:[#allocation92_spill] sm:$0xff] }
 0x3f6   :  { %6512 = vrot.lane.b32.xlu1 %v10924_v44, %s6815_s28  ;;  %v6506_v34 = vpack.i.bf16 %v14366_v23, %v14365_v12  ;;  %v10955_v44 = vsel %vm14369_vm12, %v10931_v40, %v14368_v36  ;;  %v14371_v12 = vld [vmem:[#allocation298_spill] sm:$0xff]  ;;  %vm14389_vm12 = vmmov %vm14372_vm4 }
 0x3f7   :  { %v10937_v47 = vpop.permute.xlu0 %6412  ;;  %14370 = vst [vmem:[#allocation163_spill] sm:$0xff] %v10955_v44  ;;  %v3335_v63 = vsel %vm14372_vm4, %v10943_v7, %v14371_v12  ;;  %v14375_v24 = vld [vmem:[#allocation290_spill] sm:$0xff]  ;;  %v3320_v12 = vsel %vm2062_vm9, %v3312_v30, %v10618_v19  ;;  %v14381_v7 = vld [vmem:[#allocation192_spill] sm:$0xff]  ;;  %v14388_v19 = vld [vmem:[#allocation307_spill] sm:$0xff] }
 0x3f8   :  { %v10947_v29 = vpop.permute.xlu1 %6417  ;;  %v14378_v20 = vld [vmem:[#allocation258_spill] sm:$0xff]  ;;  %v10979_v41 = vsel %vm2069_vm10, %v3320_v12, %v10744_v26  ;;  %v14391_v12 = vld [vmem:[#allocation292_spill] sm:$0xff]  ;;  %vm14392_vm4 = vmmov %vm14386_vm1 }
 0x3f9   :  { %6507 = vrot.lane.b32.xlu0 %v6506_v34, %s6812_s25  ;;  %v3334_v34 = vsel %vm14376_vm5, %v3326_v62, %v14375_v24  ;;  %v3343_v36 = vsel %vm14379_vm13, %v3335_v63, %v14378_v20  ;;  %14380 = vst [vmem:[#allocation248_spill] sm:$0xff] %v10979_v41  ;;  %v14383_v62 = vld [vmem:[#allocation242_spill] sm:$0xff]  ;;  %v3336_v30 = vsel %vm14389_vm12, %v10979_v41, %v14388_v19  ;;  %vm14394_vm5 = vcmask 572416   ;;  %vm14396_vm13 = vmmov %vm14384_vm7  ;;  %v14398_v19 = vld [vmem:[#allocation153_spill] sm:$0xff] }
 0x3fa   :  { %2868 = vrot.lane.b32.xlu1 %v10955_v44, %s6809_s22  ;;  %v3342_v24 = vsel %vm14384_vm7, %v3334_v34, %v14383_v62  ;;  %v14390_v26 = vld [vmem:[#allocation190_spill] sm:$0xff]  ;;  %v14395_v62 = vld [vmem:[#allocation268_spill] sm:$0xff]  ;;  %v11011_v41 = vrot.slane %v14077_v43, 6  ;;  %vm14401_vm7 = vmmov %vm14394_vm5  ;;  %vm14407_vm12 = vcmask 1041408  }
 0x3fb   :  { %v10965_v58 = vpop.permute.xlu0 %4364  ;;  %v3350_v44 = vsel %vm14392_vm4, %v3342_v24, %v14391_v12  ;;  %v14393_v34 = vld [vmem:[#allocation262_spill] sm:$0xff]  ;;  %v2938_v24 = vrot.slane %v14080_v59, 6  ;;  %v14400_v12 = vld [vmem:[#allocation244_spill] sm:$0xff]  ;;  %vm14410_vm4 = vmmov %vm14394_vm5 }
 0x3fc   :  { %14374 = vst [vmem:[#allocation277_spill] sm:$0xff] %v10965_v58  ;;  %v10969_v23 = vpop.permute.xlu1 %4380  ;;  %14399 = vst [vmem:[#allocation281_spill] sm:$0xff] %v11011_v41  ;;  %v14406_v59 = vld [vmem:[#allocation116_spill] sm:$0xff] }
 0x3fd   :  { %14377 = vst [vmem:[#allocation285_spill] sm:$0xff] %v10969_v23  ;;  %2866 = vrot.lane.b32.xlu0 %v10931_v40, %s6809_s22  ;;  %v14385_v23 = vld [vmem:[#allocation301_spill] sm:$0xff]  ;;  %v14402_v40 = vld [vmem:[#allocation155_spill] sm:$0xff] }
 0x3fe   :  { %2892 = vrot.lane.b32.xlu1 %v14381_v7, %s6819_s13  ;;  %v3351_v63 = vsel %vm14386_vm1, %v3343_v36, %v14385_v23  ;;  %v14464_v7 = vld [vmem:[#allocation99_spill] sm:$0xff] }
 0x3ff   :  { %v10983_v58 = vpop.permute.xlu0 %4308  ;;  %v3359_v36 = vsel %vm14394_vm5, %v3351_v63, %v14393_v34  ;;  %v14404_v34 = vld [vmem:[#allocation303_spill] sm:$0xff]  ;;  %vm14411_vm5 = vcmask 1044480  }
 0x400   :  { %14382 = vst [vmem:[#allocation306_spill] sm:$0xff] %v10983_v58  ;;  %v10989_v20 = vpop.permute.xlu1 %4324 }
 0x401   :  { %14387 = vst [vmem:[#allocation286_spill] sm:$0xff] %v10989_v20  ;;  %2890 = vrot.lane.b32.xlu0 %v14390_v26, %s6819_s13  ;;  %v3344_v20 = vsel %vm14396_vm13, %v3336_v30, %v14395_v62  ;;  %v3358_v26 = vsel %vm14401_vm7, %v3350_v44, %v14400_v12  ;;  %v3367_v30 = vsel %vm2103_vm14, %v3359_v36, %v14404_v34  ;;  %vm14415_vm13 = vcmask 326656  }
 0x402   :  { %2914 = vrot.lane.b32.xlu1 %v8987_v13, %s6807_s0  ;;  %v3352_v62 = vsel %vm14386_vm1, %v3344_v20, %v10341_v0  ;;  %v11032_v44 = vsel %vm14407_vm12, %v11011_v41, %v2938_v24  ;;  %v3386_v12 = vrot.slane %v3367_v30, 3  ;;  %v3313_v36 = vsel %vm2055_vm8, %v14056_v1, %v10772_v57  ;;  %v14409_v0 = vld [vmem:[#allocation270_spill] sm:$0xff]  ;;  %vm14420_vm1 = vmmov %vm14411_vm5  ;;  %v14451_v1 = vld [vmem:[#allocation164_spill] sm:$0xff] }
 0x403   :  { %v11000_v58 = vpop.permute.xlu0 %6422  ;;  %14408 = vst [vmem:[#allocation132_spill] sm:$0xff] %v11032_v44  ;;  %vm14418_vm7 = vcmask 408576   ;;  %vm14423_vm12 = vcmask 490496  }
 0x404   :  { %v11006_v23 = vpop.permute.xlu1 %4395 }
 0x405   :  { %14397 = vst [vmem:[#allocation18_spill] sm:$0xff] %v11006_v23  ;;  %6517 = vrot.lane.b32.xlu0 %v14398_v19, %s6820_s3  ;;  %v14405_v19 = vld [vmem:[#allocation294_spill] sm:$0xff] }
 0x406   :  { %6522 = vrot.lane.b32.xlu1 %v14402_v40, %s6813_s26  ;;  %v3366_v48 = vsel %vm2103_vm14, %v3358_v26, %v14405_v19  ;;  %v3360_v26 = vsel %vm14410_vm4, %v3352_v62, %v14409_v0  ;;  %v14413_v0 = vld [vmem:[#allocation189_spill] sm:$0xff] }
 0x407   :  { %v11018_v63 = vpop.permute.xlu0 %4393  ;;  %v3385_v19 = vrot.slane %v3366_v48, 3  ;;  %v3368_v57 = vsel %vm2103_vm14, %v3360_v26, %v10362_v52  ;;  %v14412_v48 = vld [vmem:[#allocation100_spill] sm:$0xff]  ;;  %v14416_v26 = vld [vmem:[#allocation237_spill] sm:$0xff] }
 0x408   :  { %14403 = vst [vmem:[#allocation73_spill] sm:$0xff] %v11018_v63  ;;  %v11024_v23 = vpop.permute.xlu1 %6432  ;;  %v3321_v63 = vsel %vm2062_vm9, %v3313_v36, %v10472_v27  ;;  %v6526_v40 = vpack.i.bf16 %v14413_v0, %v14412_v48  ;;  %v3388_v27 = vrot.slane %v3368_v57, 3  ;;  %v14414_v36 = vld [vmem:[#allocation181_spill] sm:$0xff] }
 0x409   :  { %2916 = vrot.lane.b32.xlu0 %v14406_v59, %s6807_s0  ;;  %v3387_v30 = vsel %vm14411_vm5, %v3385_v19, %v3386_v12  ;;  %v14421_v57 = vld [vmem:[#allocation157_spill] sm:$0xff]  ;;  %vm14433_vm5 = vcmask 1041408  }
 0x40a   :  { %2954 = vrot.lane.b32.xlu1 %v11032_v44, %s6821_s16  ;;  %v3329_v44 = vsel %vm2069_vm10, %v3321_v63, %v10792_v61  ;;  %v14417_v61 = vld [vmem:[#allocation273_spill] sm:$0xff]  ;;  %v3389_v0 = vsel %vm14420_vm1, %v3386_v12, %v3388_v27 }
 0x40b   :  { %v11039_v20 = vpop.permute.xlu0 %6427 }
 0x40c   :  { %v11043_v34 = vpop.permute.xlu1 %2860 }
 0x40d   :  { %2952 = vrot.lane.b32.xlu0 %v11011_v41, %s6821_s16  ;;  %v3337_v41 = vsel %vm14415_vm13, %v3329_v44, %v14414_v36  ;;  %v14424_v36 = vld [vmem:[#allocation234_spill] sm:$0xff]  ;;  %vm14439_vm13 = vmmov %vm14420_vm1 }
 0x40e   :  { %3400 = vrot.lane.b32.xlu1 %v3387_v30, %s6824_s2  ;;  %v3345_v63 = vsel %vm14418_vm7, %v3337_v41, %v14417_v61  ;;  %v14426_v41 = vld [vmem:[#allocation201_spill] sm:$0xff]  ;;  %v14427_v61 = vld [vmem:[#allocation276_spill] sm:$0xff]  ;;  %vm14453_vm7 = vmmov %vm14433_vm5 }
 0x40f   :  { %v11055_v62 = vpop.permute.xlu0 %2858 }
 0x410   :  { %v11059_v55 = vpop.permute.xlu1 %2884 }
 0x411   :  { %6527 = vrot.lane.b32.xlu0 %v6526_v40, %s6818_s12  ;;  %v3353_v40 = vsel %vm14423_vm12, %v3345_v63, %v10390_v9  ;;  %v2940_v9 = vrot.slane %v14093_v22, 6  ;;  %vm14460_vm12 = vcmask 1040384  }
 0x412   :  { %2870 = vrot.lane.b32.xlu1 %v14416_v26, %s6809_s22  ;;  %v14425_v26 = vld [vmem:[#allocation246_spill] sm:$0xff] }
 0x413   :  { %v11066_v19 = vpop.permute.xlu0 %2882  ;;  %v6536_v52 = vpack.i.bf16 %v14425_v26, %v14424_v36  ;;  %v14435_v26 = vld [vmem:[#allocation252_spill] sm:$0xff] }
 0x414   :  { %v11070_v30 = vpop.permute.xlu1 %4411 }
 0x415   :  { %14419 = vst [vmem:[#allocation133_spill] sm:$0xff] %v11070_v30  ;;  %3402 = vrot.lane.b32.xlu0 %v3389_v0, %s6824_s2  ;;  %v3361_v0 = vsel %vm14410_vm4, %v3353_v40, %v14427_v61  ;;  %v14428_v30 = vld [vmem:[#allocation197_spill] sm:$0xff]  ;;  %v11106_v40 = vsel %vm14433_vm5, %v2938_v24, %v2940_v9  ;;  %vm14468_vm4 = vcmask 326656   ;;  %vm14472_vm5 = vcmask 408576  }
 0x416   :  { %6532 = vrot.lane.b32.xlu1 %v14421_v57, %s6820_s3  ;;  %v3369_v63 = vsel %vm2103_vm14, %v3361_v0, %v10423_v10  ;;  %14434 = vst [vmem:[#allocation215_spill] sm:$0xff] %v11106_v40  ;;  %v14438_v10 = vld [vmem:[#allocation295_spill] sm:$0xff] }
 0x417   :  { %v11076_v44 = vpop.permute.xlu0 %4346 }
 0x418   :  { %14422 = vst [vmem:[#allocation263_spill] sm:$0xff] %v11076_v44  ;;  %v11082_v48 = vpop.permute.xlu1 %2906  ;;  %v14429_v44 = vld [vmem:[#allocation98_spill] sm:$0xff] }
 0x419   :  { %2894 = vrot.lane.b32.xlu0 %v14426_v41, %s6819_s13  ;;  %v6541_v57 = vpack.i.bf16 %v14429_v44, %v14428_v30  ;;  %v3390_v30 = vrot.slane %v3369_v63, 3  ;;  %v14447_v44 = vld [vmem:[#allocation97_spill] sm:$0xff] }
 0x41a   :  { %6537 = vrot.lane.b32.xlu1 %v6536_v52, %s6813_s26  ;;  %v2970_v50 = vsel %vm2055_vm8, %v14221_v49, %v14447_v44  ;;  %v14458_v49 = vld [vmem:[#allocation44_spill] sm:$0xff] }
 0x41b   :  { %v11087_v12 = vpop.permute.xlu0 %6437  ;;  %v3391_v22 = vsel %vm14439_vm13, %v3388_v27, %v3390_v30  ;;  %v14446_v27 = vld [vmem:[#allocation160_spill] sm:$0xff]  ;;  %vm14474_vm13 = vmmov %vm14468_vm4 }
 0x41c   :  { %v11093_v56 = vpop.permute.xlu1 %4368 }
 0x41d   :  { %14430 = vst [vmem:[#allocation299_spill] sm:$0xff] %v11093_v56  ;;  %2918 = vrot.lane.b32.xlu0 %v9530_v2, %s6807_s0  ;;  %v14437_v56 = vld [vmem:[#allocation127_spill] sm:$0xff] }
 0x41e   :  { %6542 = vrot.lane.b32.xlu1 %v6541_v57, %s6818_s12  ;;  %v6546_v0 = vpack.i.bf16 %v14438_v10, %v14437_v56  ;;  %v14445_v10 = vld [vmem:[#allocation120_spill] sm:$0xff] }
 0x41f   :  { %v11101_v52 = vpop.permute.xlu0 %2908 }
 0x420   :  { %14431 = vst [vmem:[#allocation230_spill] sm:$0xff] %v11101_v52  ;;  %v11103_v36 = vpop.permute.xlu1 %4430 }
 0x421   :  { %14432 = vst [vmem:[#allocation75_spill] sm:$0xff] %v11103_v36  ;;  %2956 = vrot.lane.b32.xlu0 %v11106_v40, %s6821_s16  ;;  %v14441_v40 = vld [vmem:[#allocation199_spill] sm:$0xff] }
 0x422   :  { %2872 = vrot.lane.b32.xlu1 %v14435_v26, %s6809_s22  ;;  %v14442_v26 = vld [vmem:[#allocation140_spill] sm:$0xff] }
 0x423   :  { %v11112_v61 = vpop.permute.xlu0 %4428 }
 0x424   :  { %14436 = vst [vmem:[#allocation298_spill] sm:$0xff] %v11112_v61  ;;  %v11116_v57 = vpop.permute.xlu1 %6442  ;;  %v6556_v61 = vpack.i.bf16 %v14446_v27, %v14445_v10  ;;  %v11149_v10 = vsel %vm2055_vm8, %v14280_v39, %v14448_v8  ;;  %v14449_v27 = vld [vmem:[#allocation287_spill] sm:$0xff]  ;;  %v14455_v8 = vld [vmem:[#allocation114_spill] sm:$0xff] }
 0x425   :  { %3404 = vrot.lane.b32.xlu0 %v3391_v22, %s6824_s2  ;;  %v2942_v22 = vrot.slane %v14092_v33, 6  ;;  %v6344_v33 = vunpack.i.l.bf16 %v14449_v27  ;;  %v6345_v41 = vunpack.i.h.bf16 %v14449_v27 }
 0x426   :  { %6547 = vrot.lane.b32.xlu1 %v6546_v0, %s6816_s29  ;;  %v3572_v0 = vrot.slane %v13856_v4, 3 }
 0x427   :  { %v11121_v24 = vpop.permute.xlu0 %2668  ;;  %v11161_v44 = vsel %vm14453_vm7, %v2940_v9, %v2942_v22  ;;  %v6571_v9 = vpack.i.bf16 %v14344_v16, %v14458_v49  ;;  %v14459_v22 = vrot.slane %v8003_v31, 7  ;;  %v2059_v49 = vsel %vm2055_vm8, %v14264_v46, %v6344_v33  ;;  %v14466_v16 = vld [vmem:[#allocation291_spill] sm:$0xff]  ;;  %vm14475_vm7 = vmmov %vm14460_vm12 }
 0x428   :  { %14440 = vst [vmem:[#allocation290_spill] sm:$0xff] %v11121_v24  ;;  %v11123_v63 = vpop.permute.xlu1 %6447  ;;  %14454 = vst [vmem:[#allocation244_spill] sm:$0xff] %v11161_v44  ;;  %v11167_v39 = vsel %vm14420_vm1, %v3572_v0, %v14455_v8  ;;  %v14461_v24 = vld [vmem:[#allocation10_spill] sm:$0xff]  ;;  %v14462_v0 = vld [vmem:[#allocation12_spill] sm:$0xff]  ;;  %v6349_v31 = vunpack.i.l.bf16 %v14466_v16  ;;  %v2060_v13 = vsel %vm2055_vm8, %v14267_v38, %v6345_v41 }
 0x429   :  { %2896 = vrot.lane.b32.xlu0 %v14441_v40, %s6819_s13  ;;  %v14469_v8 = vld [vmem:[#allocation247_spill] sm:$0xff]  ;;  %vm14476_vm1 = vmmov %vm14475_vm7 }
 0x42a   :  { %6552 = vrot.lane.b32.xlu1 %v14442_v26, %s6811_s24  ;;  %v3542_v26 = vrot.slane %v14199_v15, 7  ;;  %v6325_v17 = vunpack.i.h.bf16 %v14469_v8 }
 0x42b   :  { %v11129_v36 = vpop.permute.xlu0 %2944 }
 0x42c   :  { %14443 = vst [vmem:[#allocation242_spill] sm:$0xff] %v11129_v36  ;;  %v11131_v56 = vpop.permute.xlu1 %2946  ;;  %v2066_v38 = vsel %vm2062_vm9, %v2059_v49, %v6325_v17 }
 0x42d   :  { %14444 = vst [vmem:[#allocation307_spill] sm:$0xff] %v11131_v56  ;;  %2920 = vrot.lane.b32.xlu0 %v9818_v25, %s6807_s0  ;;  %v14450_v25 = vld [vmem:[#allocation141_spill] sm:$0xff] }
 0x42e   :  { %6557 = vrot.lane.b32.xlu1 %v6556_v61, %s6817_s30  ;;  %v2978_v4 = vsel %vm2062_vm9, %v2970_v50, %v14450_v25  ;;  %v3818_v61 = vsel %vm2062_vm9, %v11149_v10, %v14451_v1  ;;  %v3544_v25 = vrot.slane %v14203_v28, 7  ;;  %v3546_v50 = vrot.slane %v14265_v51, 7  ;;  %v14456_v1 = vld [vmem:[#allocation26_spill] sm:$0xff]  ;;  %v14481_v51 = vld [vmem:[#allocation232_spill] sm:$0xff] }
 0x42f   :  { %v11140_v40 = vpop.permute.xlu0 %6452  ;;  %v11188_v6 = vsel %vm2069_vm10, %v2978_v4, %v14464_v7  ;;  %v6350_v4 = vunpack.i.h.bf16 %v14466_v16  ;;  %v14480_v16 = vld [vmem:[#allocation63_spill] sm:$0xff] }
 0x430   :  { %v11158_v2 = vpop.permute.xlu1 %3392  ;;  %v11210_v46 = vsel %vm14475_vm7, %v3542_v26, %v3544_v25  ;;  %v11213_v8 = vsel %vm14476_vm1, %v3544_v25, %v3546_v50  ;;  %v2073_v50 = vsel %vm2069_vm10, %v2066_v38, %v6349_v31  ;;  %v14494_v31 = vld [vmem:[#allocation229_spill] sm:$0xff]  ;;  %vm14502_vm1 = vcmask 326656  }
 0x431   :  { %14452 = vst [vmem:[#allocation292_spill] sm:$0xff] %v11158_v2  ;;  %2958 = vrot.lane.b32.xlu0 %v11161_v44, %s6821_s16  ;;  %v11180_v44 = vsel %vm14460_vm12, %v14459_v22, %v3542_v26  ;;  %v14467_v22 = vld [vmem:[#allocation182_spill] sm:$0xff]  ;;  %14477 = vst [vmem:[#allocation181_spill] sm:$0xff] %v11213_v8  ;;  %v14486_v8 = vld [vmem:[#allocation300_spill] sm:$0xff] }
 0x432   :  { %6562 = vrot.lane.b32.xlu1 %v14456_v1, %s6812_s25  ;;  %v14465_v1 = vld [vmem:[#allocation78_spill] sm:$0xff]  ;;  %v3826_v59 = vsel %vm14468_vm4, %v11188_v6, %v14467_v22  ;;  %v14478_v22 = vld [vmem:[#allocation219_spill] sm:$0xff]  ;;  %vm14479_vm12 = vmmov %vm14472_vm5  ;;  %vm14489_vm4 = vcmask 490496  }
 0x433   :  { %v11173_v27 = vpop.permute.xlu0 %3394  ;;  %v3822_v43 = vsel %vm2069_vm10, %v3818_v61, %v14465_v1  ;;  %v3832_v61 = vsel %vm14472_vm5, %v3826_v59, %v14471_v54  ;;  %v14485_v26 = vld [vmem:[#allocation178_spill] sm:$0xff]  ;;  %v14487_v2 = vld [vmem:[#allocation245_spill] sm:$0xff]  ;;  %vm14495_vm5 = vcmask 572416  }
 0x434   :  { %14457 = vst [vmem:[#allocation294_spill] sm:$0xff] %v11173_v27  ;;  %v11202_v7 = vpop.permute.xlu1 %4397  ;;  %v3827_v33 = vsel %vm14474_vm13, %v3822_v43, %v14473_v14  ;;  %v14483_v43 = vld [vmem:[#allocation17_spill] sm:$0xff]  ;;  %vm14497_vm13 = vmmov %vm14489_vm4 }
 0x435   :  { %14470 = vst [vmem:[#allocation189_spill] sm:$0xff] %v11202_v7  ;;  %3406 = vrot.lane.b32.xlu0 %v3390_v30, %s6824_s2  ;;  %v3833_v41 = vsel %vm14479_vm12, %v3827_v33, %v14478_v22  ;;  %v6581_v7 = vpack.i.bf16 %v14481_v51, %v14480_v16  ;;  %v6566_v14 = vpack.i.bf16 %v14308_v5, %v14483_v43  ;;  %v14484_v30 = vld [vmem:[#allocation289_spill] sm:$0xff]  ;;  %v6355_v33 = vunpack.i.h.bf16 %v14486_v8  ;;  %v14496_v8 = vld [vmem:[#allocation202_spill] sm:$0xff]  ;;  %vm14500_vm7 = vmmov %vm14495_vm5 }
 0x436   :  { %6572 = vrot.lane.b32.xlu1 %v6571_v9, %s6814_s27  ;;  %v2061_v25 = vsel %vm2055_vm8, %v14485_v26, %v14484_v30  ;;  %v2067_v51 = vsel %vm2062_vm9, %v2060_v13, %v14487_v2  ;;  %v14488_v16 = vld [vmem:[#allocation21_spill] sm:$0xff]  ;;  %v6384_v5 = vunpack.i.l.bf16 %v10626_v37  ;;  %v14493_v30 = vld [vmem:[#allocation186_spill] sm:$0xff]  ;;  %v3839_v13 = vsel %vm14497_vm13, %v3833_v41, %v14496_v8  ;;  %v14544_v8 = vld [vmem:[#allocation260_spill] sm:$0xff] }
 0x437   :  { %v11221_v59 = vpop.permute.xlu0 %2862  ;;  %v3838_v17 = vsel %vm14489_vm4, %v3832_v61, %v14488_v16  ;;  %v14490_v9 = vld [vmem:[#allocation241_spill] sm:$0xff]  ;;  %v6385_v2 = vunpack.i.h.bf16 %v10626_v37  ;;  %v14498_v61 = vld [vmem:[#allocation55_spill] sm:$0xff]  ;;  %v14504_v41 = vld [vmem:[#allocation166_spill] sm:$0xff] }
 0x438   :  { %14482 = vst [vmem:[#allocation237_spill] sm:$0xff] %v11221_v59  ;;  %v6330_v49 = vunpack.i.h.bf16 %v14490_v9  ;;  %v2074_v59 = vsel %vm2069_vm10, %v2067_v51, %v6350_v4  ;;  %v11237_v43 = vpop.permute.xlu1 %2886  ;;  %v14492_v27 = vld [vmem:[#allocation13_spill] sm:$0xff]  ;;  %v3844_v38 = vsel %vm14495_vm5, %v3838_v17, %v14494_v31  ;;  %v3816_v4 = vsel %vm2055_vm8, %v14347_v45, %v14498_v61  ;;  %v14499_v51 = vld [vmem:[#allocation231_spill] sm:$0xff]  ;;  %vm14508_vm4 = vmmov %vm14502_vm1 }
 0x439   :  { %14491 = vst [vmem:[#allocation273_spill] sm:$0xff] %v11237_v43  ;;  %v6576_v26 = vpack.i.bf16 %v14493_v30, %v14492_v27  ;;  %6567 = vrot.lane.b32.xlu0 %v6566_v14, %s6808_s21  ;;  %v3845_v9 = vsel %vm14500_vm7, %v3839_v13, %v14499_v51  ;;  %v14501_v43 = vld [vmem:[#allocation256_spill] sm:$0xff]  ;;  %v11260_v37 = vsel %vm2062_vm9, %v3816_v4, %v14504_v41  ;;  %v14506_v14 = vld [vmem:[#allocation297_spill] sm:$0xff]  ;;  %vm14510_vm5 = vmmov %vm14479_vm12 }
 0x43a   :  { %v2068_v27 = vsel %vm2062_vm9, %v2061_v25, %v14501_v43  ;;  %v2080_v30 = vsel %vm14502_vm1, %v2073_v50, %v6330_v49  ;;  %6582 = vrot.lane.b32.xlu1 %v6581_v7, %s6815_s28  ;;  %14505 = vst [vmem:[#allocation246_spill] sm:$0xff] %v11260_v37  ;;  %v2081_v13 = vsel %vm14508_vm4, %v2074_v59, %v9952_v32  ;;  %v14509_v25 = vld [vmem:[#allocation105_spill] sm:$0xff]  ;;  %v14511_v49 = vld [vmem:[#allocation66_spill] sm:$0xff]  ;;  %v14513_v4 = vld [vmem:[#allocation187_spill] sm:$0xff]  ;;  %vm14528_vm4 = vcmask 572416  }
 0x43b   :  { %v11256_v17 = vpop.permute.xlu0 %4413  ;;  %v11264_v36 = vsel %vm2069_vm10, %v2068_v27, %v14506_v14  ;;  %v2086_v61 = vsel %vm14479_vm12, %v2080_v30, %v6355_v33  ;;  %v2087_v50 = vsel %vm14510_vm5, %v2081_v13, %v14509_v25  ;;  %v6389_v43 = vunpack.i.l.bf16 %v14511_v49  ;;  %v14514_v27 = vld [vmem:[#allocation308_spill] sm:$0xff]  ;;  %vm14515_vm7 = vmmov %vm14497_vm13  ;;  %v14519_v13 = vld [vmem:[#allocation250_spill] sm:$0xff] }
 0x43c   :  { %14503 = vst [vmem:[#allocation234_spill] sm:$0xff] %v11256_v17  ;;  %14507 = vst [vmem:[#allocation276_spill] sm:$0xff] %v11264_v36  ;;  %v2093_v7 = vsel %vm14497_vm13, %v2086_v61, %v6384_v5  ;;  %v11273_v51 = vpop.permute.xlu1 %6457  ;;  %v11277_v41 = vsel %vm2103_vm14, %v3844_v38, %v14513_v4  ;;  %v6370_v14 = vunpack.i.h.bf16 %v14514_v27  ;;  %v2094_v33 = vsel %vm14515_vm7, %v2087_v50, %v6385_v2  ;;  %v14516_v32 = vld [vmem:[#allocation204_spill] sm:$0xff]  ;;  %v14518_v5 = vld [vmem:[#allocation249_spill] sm:$0xff] }
 0x43d   :  { %14512 = vst [vmem:[#allocation197_spill] sm:$0xff] %v11273_v51  ;;  %v6390_v30 = vunpack.i.h.bf16 %v14511_v49  ;;  %6577 = vrot.lane.b32.xlu0 %v6576_v26, %s6810_s23  ;;  %v11285_v59 = vsel %vm2103_vm14, %v3845_v9, %v14516_v32  ;;  %v6335_v61 = vunpack.i.h.bf16 %v14518_v5  ;;  %v14520_v25 = vld [vmem:[#allocation296_spill] sm:$0xff]  ;;  %v14521_v45 = vld [vmem:[#allocation253_spill] sm:$0xff]  ;;  %v2082_v2 = vsel %vm14502_vm1, %v11264_v36, %v14318_v11  ;;  %v14523_v50 = vld [vmem:[#allocation302_spill] sm:$0xff] }
 0x43e   :  { %14517 = vst [vmem:[#allocation252_spill] sm:$0xff] %v11285_v59  ;;  %v2143_v38 = vsel %vm2138_vm2, %v14521_v45, %v14520_v25  ;;  %3586 = vrot.lane.b32.xlu1 %v11167_v39, %s6819_s13  ;;  %v14524_v9 = vld [vmem:[#allocation251_spill] sm:$0xff]  ;;  %vm14526_vm12 = vmmov %vm14510_vm5  ;;  %v14527_v17 = vld [vmem:[#allocation172_spill] sm:$0xff]  ;;  %v2100_v25 = vsel %vm14528_vm4, %v2093_v7, %v6370_v14  ;;  %v6395_v39 = vunpack.i.h.bf16 %v10848_v21  ;;  %v6394_v36 = vunpack.i.l.bf16 %v10848_v21 }
 0x43f   :  { %v11297_v26 = vpop.permute.xlu0 %6462  ;;  %v2142_v49 = vsel %vm2138_vm2, %v14524_v9, %v14523_v50  ;;  %v14525_v27 = vld [vmem:[#allocation103_spill] sm:$0xff]  ;;  %v6375_v51 = vunpack.i.h.bf16 %v14527_v17  ;;  %v14529_v37 = vld [vmem:[#allocation69_spill] sm:$0xff]  ;;  %vm14530_vm5 = vmmov %vm14528_vm4  ;;  %v2107_v11 = vsel %vm2103_vm14, %v2100_v25, %v6389_v43  ;;  %v6400_v17 = vunpack.i.h.bf16 %v10880_v42 }
 0x440   :  { %14522 = vst [vmem:[#allocation127_spill] sm:$0xff] %v11297_v26  ;;  %v2088_v5 = vsel %vm14526_vm12, %v2082_v2, %v14525_v27  ;;  %v2101_v32 = vsel %vm14530_vm5, %v2094_v33, %v14529_v37  ;;  %v11311_v4 = vpop.permute.xlu1 %2910  ;;  %vm14532_vm13 = vmmov %vm14515_vm7  ;;  %v6399_v7 = vunpack.i.l.bf16 %v10880_v42  ;;  %v6339_v43 = vunpack.i.l.bf16 %v14519_v13  ;;  %v14533_v14 = vld [vmem:[#allocation293_spill] sm:$0xff]  ;;  %v14534_v25 = vld [vmem:[#allocation243_spill] sm:$0xff] }
 0x441   :  { %14531 = vst [vmem:[#allocation295_spill] sm:$0xff] %v11311_v4  ;;  %v2108_v50 = vsel %vm2103_vm14, %v2101_v32, %v6390_v30  ;;  %v2095_v2 = vsel %vm14532_vm13, %v2088_v5, %v10786_v60  ;;  %3554 = vrot.lane.b32.xlu0 %v11180_v44, %s6809_s22  ;;  %v6360_v33 = vunpack.i.h.bf16 %v14533_v14  ;;  %v2150_v21 = vsel %vm2145_vm15, %v2143_v38, %v14534_v25  ;;  %v14535_v37 = vld [vmem:[#allocation212_spill] sm:$0xff]  ;;  %v14537_v32 = vld [vmem:[#allocation117_spill] sm:$0xff]  ;;  %v14539_v14 = vld [vmem:[#allocation51_spill] sm:$0xff] }
 0x442   :  { %v6379_v27 = vunpack.i.l.bf16 %v14535_v37  ;;  %3604 = vrot.lane.b32.xlu1 %v14199_v15, %s6807_s0  ;;  %v6364_v42 = vunpack.i.l.bf16 %v14537_v32  ;;  %v14538_v60 = vld [vmem:[#allocation240_spill] sm:$0xff]  ;;  %v2114_v4 = vsel %vm2110_vm11, %v2107_v11, %v6375_v51  ;;  %vm14540_vm7 = vmmov %vm14528_vm4  ;;  %v14541_v38 = vld [vmem:[#allocation29_spill] sm:$0xff]  ;;  %v14545_v11 = vpack.i.bf16 %v14462_v0, %v14461_v24 }
 0x443   :  { %v11327_v30 = vpop.permute.xlu0 %4432  ;;  %v2149_v44 = vsel %vm2145_vm15, %v2142_v49, %v14538_v60  ;;  %v2102_v56 = vsel %vm14540_vm7, %v2095_v2, %v14539_v14  ;;  %v2969_v25 = vsel %vm2055_vm8, %v14541_v38, %v6395_v39  ;;  %v14542_v59 = vld [vmem:[#allocation22_spill] sm:$0xff]  ;;  %v6444_v49 = vunpack.i.l.bf16 %v11116_v57 }
 0x444   :  { %14536 = vst [vmem:[#allocation140_spill] sm:$0xff] %v11327_v30  ;;  %v2968_v15 = vsel %vm2055_vm8, %v14542_v59, %v6394_v36  ;;  %v11340_v26 = vpop.permute.xlu1 %6467  ;;  %v2115_v5 = vsel %vm2110_vm11, %v2108_v50, %v6379_v27  ;;  %v14543_v30 = vld [vmem:[#allocation11_spill] sm:$0xff]  ;;  %v2977_v60 = vsel %vm2062_vm9, %v2969_v25, %v6400_v17  ;;  %v6405_v36 = vunpack.i.h.bf16 %v10874_v3  ;;  %v14546_v50 = vld [vmem:[#allocation9_spill] sm:$0xff]  ;;  %v14547_v17 = vld [vmem:[#allocation62_spill] sm:$0xff] }
 0x445   :  { %v2144_v52 = vsel %vm2138_vm2, %v14544_v8, %v14543_v30  ;;  %v2976_v51 = vsel %vm2062_vm9, %v2968_v15, %v6399_v7  ;;  %6587 = vrot.lane.b32.xlu0 %v14545_v11, %s6820_s3  ;;  %v6404_v39 = vunpack.i.l.bf16 %v10874_v3  ;;  %v6429_v27 = vunpack.i.l.bf16 %v11039_v20 }
 0x446   :  { %3622 = vrot.lane.b32.xlu1 %v14546_v50, %s6821_s16  ;;  %v2121_v15 = vsel %vm2117_vm0, %v2114_v4, %v6335_v61  ;;  %v2109_v7 = vsel %vm2103_vm14, %v2102_v56, %v14547_v17  ;;  %v6410_v30 = vunpack.i.h.bf16 %v10882_v35  ;;  %v6409_v0 = vunpack.i.l.bf16 %v10882_v35  ;;  %v14548_v61 = vld [vmem:[#allocation80_spill] sm:$0xff]  ;;  %v14550_v17 = vld [vmem:[#allocation147_spill] sm:$0xff] }
 0x447   :  { %v11358_v2 = vpop.permute.xlu0 %6472  ;;  %v2122_v25 = vsel %vm2117_vm0, %v2115_v5, %v6339_v43  ;;  %v6380_v3 = vunpack.i.h.bf16 %v14535_v37  ;;  %v2984_v11 = vsel %vm2069_vm10, %v2976_v51, %v6404_v39  ;;  %v2985_v14 = vsel %vm2069_vm10, %v2977_v60, %v6405_v36  ;;  %v14552_v43 = vld [vmem:[#allocation254_spill] sm:$0xff] }
 0x448   :  { %v6414_v50 = vunpack.i.l.bf16 %v10937_v47  ;;  %v11370_v59 = vpop.permute.xlu1 %2948  ;;  %v11372_v4 = vpop.f32.mrb[0].mxu1  ;;  %vm14549_vm1 = vcmask 179200   ;;  %v2151_v37 = vsel %vm2145_vm15, %v2144_v52, %v14552_v43  ;;  %v2979_v5 = vsel %vm2062_vm9, %v11149_v10, %v6444_v49 }
 0x449   :  { %v11376_v56 = vsel %vm14549_vm1, %v2150_v21, %v14548_v61  ;;  %vm14551_vm12 = vmmov %vm14549_vm1  ;;  %v14553_v60 = vpack.i.bf16 %v14463_v18, %v14182_v53  ;;  %v4823_v51 = vpop.f32.mrb[1].mxu1  ;;  %vm14554_vm4 = vcmask 326656   ;;  %vm14555_vm5 = vcmask 900096  }
 0x44a   :  { %v11380_v35 = vsel %vm14551_vm12, %v2149_v44, %v14550_v17  ;;  %v2994_v21 = vsel %vm14554_vm4, %v11188_v6, %v6429_v27  ;;  %3862 = vrot.lane.b32.xlu1 %v11277_v41, %s6824_s2  ;;  %v2128_v36 = vsel %vm14555_vm5, %v2121_v15, %v6360_v33  ;;  %vm14556_vm13 = vmmov %vm14555_vm5  ;;  %v2116_v10 = vsel %vm2110_vm11, %v2109_v7, %v6380_v3  ;;  %v14559_v6 = vld [vmem:[#allocation180_spill] sm:$0xff] }
 0x44b   :  { %6592 = vrot.lane.b32.xlu0 %v14553_v60, %s6813_s26  ;;  %v11394_v44 = vpop.permute.xlu0 %6477  ;;  %v2129_v52 = vsel %vm14556_vm13, %v2122_v25, %v6364_v42  ;;  %vm14557_vm7 = vmmov %vm14554_vm4  ;;  %v6420_v18 = vunpack.i.h.bf16 %v10947_v29  ;;  %v6419_v39 = vunpack.i.l.bf16 %v10947_v29  ;;  %v11405_v27 = vsel %vm14551_vm12, %v2151_v37, %v14559_v6  ;;  %v14563_v25 = vld [vmem:[#allocation46_spill] sm:$0xff] }
 0x44c   :  { %v2992_v49 = vsel %vm14557_vm7, %v2984_v11, %v6409_v0  ;;  %vm14558_vm1 = vmmov %vm14554_vm4  ;;  %vm14560_vm4 = vcmask 408576   ;;  %v6424_v33 = vunpack.i.l.bf16 %v11000_v58  ;;  %v2987_v42 = vsel %vm2069_vm10, %v2979_v5, %v14465_v1  ;;  %v11411_v15 = vpop.permute.xlu1 %6482  ;;  %v11413_v17 = vpop.f32.mrb[2].mxu1  ;;  %v14562_v0 = vld [vmem:[#allocation43_spill] sm:$0xff]  ;;  %v14565_v1 = vld [vmem:[#allocation184_spill] sm:$0xff] }
 0x44d   :  { %v2993_v53 = vsel %vm14558_vm1, %v2985_v14, %v6410_v30  ;;  %v6425_v14 = vunpack.i.h.bf16 %v11000_v58  ;;  %v6434_v7 = vunpack.i.l.bf16 %v11024_v23  ;;  %v6430_v29 = vunpack.i.h.bf16 %v11039_v20  ;;  %vm14561_vm5 = vmmov %vm14560_vm4  ;;  %v4828_v11 = vpop.f32.mrb[3].mxu1 }
 0x44e   :  { %v3001_v41 = vsel %vm14560_vm4, %v2993_v53, %v6414_v50  ;;  %v3002_v30 = vsel %vm14561_vm5, %v2994_v21, %v14471_v54  ;;  %v14564_v3 = vpack.i.bf16 %v14562_v0, %v14563_v25  ;;  %vm14566_vm13 = vmmov %vm14560_vm4  ;;  %3556 = vrot.lane.b32.xlu1 %v11210_v46, %s6809_s22  ;;  %vm14567_vm7 = vcmask 982016   ;;  %v14581_v25 = vld [vmem:[#allocation230_spill] sm:$0xff] }
 0x44f   :  { %v3000_v50 = vsel %vm14566_vm13, %v2992_v49, %v14565_v1  ;;  %v11428_v58 = vpop.permute.xlu0 %6487  ;;  %v2135_v20 = vsel %vm14567_vm7, %v2128_v36, %v14524_v9  ;;  %vm14568_vm1 = vmmov %vm14567_vm7  ;;  %v14569_v61 = vunpack.i.h.bf16 %v14519_v13  ;;  %vm14570_vm12 = vcmask 490496   ;;  %v14576_v49 = vld [vmem:[#allocation143_spill] sm:$0xff] }
 0x450   :  { %6597 = vrot.lane.b32.xlu0 %v14564_v3, %s6818_s12  ;;  %v11434_v54 = vsel %vm14568_vm1, %v2129_v52, %v14521_v45  ;;  %v3008_v37 = vsel %vm14570_vm12, %v3000_v50, %v6419_v39  ;;  %vm14571_vm4 = vmmov %vm14570_vm12  ;;  %v6435_v60 = vunpack.i.h.bf16 %v11024_v23  ;;  %vm14572_vm5 = vcmask 326656   ;;  %v11448_v13 = vpop.permute.xlu1 %3396  ;;  %v11450_v36 = vpop.f32.mrb[4].mxu1  ;;  %v14582_v3 = vld [vmem:[#allocation202_spill] sm:$0xff] }
 0x451   :  { %v2123_v43 = vsel %vm2117_vm0, %v2116_v10, %v14569_v61  ;;  %v3009_v5 = vsel %vm14571_vm4, %v3001_v41, %v6420_v18  ;;  %v2995_v46 = vsel %vm14572_vm5, %v2987_v42, %v6430_v29  ;;  %vm14573_vm13 = vcmask 572416   ;;  %vm14574_vm7 = vmmov %vm14571_vm4  ;;  %v4833_v53 = vpop.f32.mrb[5].mxu1  ;;  %v14587_v61 = vld [vmem:[#allocation127_spill] sm:$0xff] }
 0x452   :  { %v3016_v51 = vsel %vm14573_vm13, %v3008_v37, %v6424_v33  ;;  %v3010_v9 = vsel %vm14574_vm7, %v3002_v30, %v14488_v16  ;;  %v6440_v45 = vunpack.i.h.bf16 %v11087_v12  ;;  %v6439_v21 = vunpack.i.l.bf16 %v11087_v12  ;;  %vm14575_vm1 = vmmov %vm14573_vm13  ;;  %3606 = vrot.lane.b32.xlu1 %v14203_v28, %s6807_s0 }
 0x453   :  { %v3017_v52 = vsel %vm14575_vm1, %v3009_v5, %v6425_v14  ;;  %v3024_v10 = vsel %vm2103_vm14, %v3016_v51, %v6434_v7  ;;  %v6449_v23 = vunpack.i.l.bf16 %v11123_v63  ;;  %v14577_v16 = vunpack.i.h.bf16 %v14537_v32  ;;  %vm14580_vm5 = vmmov %vm14575_vm1  ;;  %v2518_v14 = vpop.permute.xlu0 %2517  ;;  %v14589_v5 = vld [vmem:[#allocation252_spill] sm:$0xff] }
 0x454   :  { %6602 = vrot.lane.b32.xlu0 %v14576_v49, %s6812_s25  ;;  %vm14578_vm12 = vcmask 900096   ;;  %v6450_v12 = vunpack.i.h.bf16 %v11123_v63  ;;  %v6454_v39 = vunpack.i.l.bf16 %v11140_v40  ;;  %v6484_v6 = vunpack.i.l.bf16 %v11411_v15  ;;  %v2516_v0 = vpop.permute.xlu1 %2515  ;;  %vm14583_vm13 = vmmov %vm14574_vm7  ;;  %v14598_v49 = vld [vmem:[#allocation187_spill] sm:$0xff] }
 0x455   :  { %v11460_v18 = vsel %vm14578_vm12, %v2123_v43, %v14577_v16  ;;  %vm14579_vm4 = vcmask 408576   ;;  %v3025_v33 = vsel %vm2103_vm14, %v3017_v52, %v6435_v60  ;;  %v3064_v32 = vsel %vm2138_vm2, %v11055_v62, %v11066_v19  ;;  %vm14586_vm1 = vmmov %vm14578_vm12  ;;  %v14591_v60 = vld [vmem:[#allocation307_spill] sm:$0xff] }
 0x456   :  { %v3003_v41 = vsel %vm14579_vm4, %v2995_v46, %v14478_v22  ;;  %v6455_v42 = vunpack.i.h.bf16 %v11140_v40  ;;  %v3018_v63 = vsel %vm14580_vm5, %v3010_v9, %v14494_v31  ;;  %v3065_v7 = vsel %vm2138_vm2, %v11043_v34, %v11059_v55  ;;  %v14585_v55 = vld [vmem:[#allocation173_spill] sm:$0xff]  ;;  %vm14588_vm12 = vmmov %vm14580_vm5  ;;  %3864 = vrot.lane.b32.xlu1 %v14589_v5, %s6824_s2  ;;  %v14617_v5 = vld [vmem:[#allocation14_spill] sm:$0xff] }
 0x457   :  { %v3072_v22 = vsel %vm2145_vm15, %v3064_v32, %v11082_v48  ;;  %v3032_v29 = vsel %vm2110_vm11, %v3024_v10, %v6439_v21  ;;  %v3033_v30 = vsel %vm2110_vm11, %v3025_v33, %v6440_v45  ;;  %v3073_v19 = vsel %vm2145_vm15, %v3065_v7, %v14581_v25  ;;  %v2520_v45 = vpop.permute.xlu0 %2519  ;;  %v14594_v21 = vld [vmem:[#allocation242_spill] sm:$0xff]  ;;  %v14603_v33 = vld [vmem:[#allocation204_spill] sm:$0xff] }
 0x458   :  { %v3040_v40 = vsel %vm2117_vm0, %v3032_v29, %v6449_v23  ;;  %v3011_v31 = vsel %vm14583_vm13, %v3003_v41, %v14582_v3  ;;  %vm14584_vm7 = vcmask 261120   ;;  %3588 = vrot.lane.b32.xlu0 %v14585_v55, %s6819_s13  ;;  %v3041_v48 = vsel %vm2117_vm0, %v3033_v30, %v6450_v12  ;;  %vm14593_vm13 = vmmov %vm14586_vm1  ;;  %v14596_v10 = vld [vmem:[#allocation294_spill] sm:$0xff]  ;;  %v2865_v12 = vpop.permute.xlu1 %2864  ;;  %v14602_v41 = vld [vmem:[#allocation237_spill] sm:$0xff] }
 0x459   :  { %v2531_v11 = vsel %vm14584_vm7, %v11380_v35, %v2516_v0  ;;  %v3048_v50 = vsel %vm14586_vm1, %v3040_v40, %v6454_v39  ;;  %v6464_v43 = vunpack.i.l.bf16 %v14587_v61  ;;  %v3019_v37 = vsel %vm14588_vm12, %v3011_v31, %v6484_v6  ;;  %vm14597_vm12 = vmmov %vm14584_vm7  ;;  %v14599_v39 = vld [vmem:[#allocation292_spill] sm:$0xff]  ;;  %v14607_v30 = vld [vmem:[#allocation175_spill] sm:$0xff] }
 0x45a   :  { %vm14590_vm4 = vcmask 998400   ;;  %vm14592_vm5 = vcmask 179200   ;;  %v3049_v35 = vsel %vm14593_vm13, %v3041_v48, %v6455_v42  ;;  %v6474_v51 = vunpack.i.l.bf16 %v11358_v2  ;;  %v14604_v42 = vld [vmem:[#allocation7_spill] sm:$0xff]  ;;  %3590 = vrot.lane.b32.xlu1 %v14607_v30, %s6819_s13  ;;  %v14610_v31 = vld [vmem:[#allocation102_spill] sm:$0xff] }
 0x45b   :  { %5660 = vmatprep.mubr.msk.f32.mxu1 %vm14590_vm4, %v2531_v11  ;;  %v3081_v46 = vsel %vm14592_vm5, %v3073_v19, %v14591_v60  ;;  %v2532_v9 = vsel %vm14584_vm7, %v11376_v56, %v2518_v14  ;;  %vm14595_vm1 = vmmov %vm14592_vm5  ;;  %v3026_v53 = vsel %vm2103_vm14, %v3018_v63, %v14598_v49  ;;  %v6489_v16 = vunpack.i.l.bf16 %v11428_v58  ;;  %v14601_v56 = vld [vmem:[#allocation273_spill] sm:$0xff]  ;;  %v11537_v3 = vpop.permute.xlu0 %6492  ;;  %v14611_v11 = vld [vmem:[#allocation246_spill] sm:$0xff] }
 0x45c   :  { %4835 = vmatmul.mubr.f32.gmra.mrb[6].mxu1 %v2135_v20  ;;  %v3080_v52 = vsel %vm14595_vm1, %v3072_v22, %v14594_v21  ;;  %v3417_v23 = vsel %vm14597_vm12, %v3081_v46, %v14596_v10  ;;  %vm14600_vm5 = vmmov %vm14584_vm7  ;;  %v3066_v20 = vsel %vm2138_vm2, %v14602_v41, %v14601_v56  ;;  %v3027_v32 = vsel %vm2103_vm14, %v3019_v37, %v14603_v33  ;;  %v14606_v22 = vld [vmem:[#allocation295_spill] sm:$0xff]  ;;  %v14616_v37 = vld [vmem:[#allocation181_spill] sm:$0xff] }
 0x45d   :  { %5661 = vmatprep.mubr.msk.f32.mxu1 %vm14590_vm4, %v2532_v9  ;;  %v3416_v6 = vsel %vm14600_vm5, %v3080_v52, %v14599_v39  ;;  %3624 = vrot.lane.b32.xlu0 %v14604_v42, %s6821_s16  ;;  %vm14605_vm13 = vcmask 982016   ;;  %v6465_v14 = vunpack.i.h.bf16 %v14587_v61  ;;  %v3034_v7 = vsel %vm2110_vm11, %v3026_v53, %v6464_v43  ;;  %vm14609_vm12 = vmmov %vm14600_vm5  ;;  %v2913_v61 = vpop.permute.xlu1 %2912  ;;  %v14618_v60 = vld [vmem:[#allocation95_spill] sm:$0xff]  ;;  %v14627_v56 = vld [vmem:[#allocation224_spill] sm:$0xff] }
 0x45e   :  { %v3056_v63 = vsel %vm14605_vm13, %v3048_v50, %v11055_v62  ;;  %v3074_v29 = vsel %vm2145_vm15, %v3066_v20, %v14606_v22  ;;  %vm14608_vm7 = vmmov %vm14605_vm13  ;;  %v4572_v25 = vrot.slane %v3417_v23, 4  ;;  %v3042_v19 = vsel %vm2117_vm0, %v3034_v7, %v6474_v51  ;;  %v14621_v51 = vld [vmem:[#allocation52_spill] sm:$0xff]  ;;  %v14633_v22 = vld [vmem:[#allocation275_spill] sm:$0xff] }
 0x45f   :  { %v3057_v0 = vsel %vm14608_vm7, %v3049_v35, %v11043_v34  ;;  %v3082_v40 = vsel %vm14595_vm1, %v3074_v29, %v11370_v59  ;;  %v2533_v62 = vsel %vm14609_vm12, %v11405_v27, %v2520_v45  ;;  %v3823_v55 = vsel %vm2069_vm10, %v14611_v11, %v14610_v31  ;;  %v14614_v59 = vld [vmem:[#allocation200_spill] sm:$0xff]  ;;  %3608 = vrot.lane.b32.xlu1 %v14621_v51, %s6807_s0  ;;  %v2889_v10 = vpop.permute.xlu0 %2888 }
 0x460   :  { %4840 = vmatmul.mubr.f32.gmra.mrb[8].mxu1 %v11434_v54  ;;  %vm14612_vm4 = vcmask 900096   ;;  %v3418_v34 = vsel %vm14600_vm5, %v3082_v40, %v11448_v13  ;;  %v3035_v50 = vsel %vm2110_vm11, %v3027_v32, %v6465_v14  ;;  %vm14613_vm13 = vcmask 998400   ;;  %v14619_v35 = vld [vmem:[#allocation216_spill] sm:$0xff]  ;;  %v14636_v40 = vld [vmem:[#allocation205_spill] sm:$0xff] }
 0x461   :  { %v3050_v48 = vsel %vm14612_vm4, %v3042_v19, %v6489_v16  ;;  %5662 = vmatprep.mubr.msk.f32.mxu1 %vm14613_vm13, %v2533_v62  ;;  %vm14615_vm7 = vcmask 326656   ;;  %v4571_v43 = vrot.slane %v3416_v6, 4  ;;  %v6475_v54 = vunpack.i.h.bf16 %v11358_v2  ;;  %3558 = vrot.lane.b32.xlu0 %v14616_v37, %s6809_s22  ;;  %v2951_v39 = vpop.permute.xlu1 %2950  ;;  %vm14624_vm5 = vmmov %vm14613_vm13  ;;  %v14632_v7 = vld [vmem:[#allocation20_spill] sm:$0xff]  ;;  %v14637_v62 = vld [vmem:[#allocation119_spill] sm:$0xff] }
 0x462   :  { %v3828_v27 = vsel %vm14615_vm7, %v3823_v55, %v14614_v59  ;;  %v6606_v46 = vpack.i.bf16 %v14618_v60, %v14617_v5  ;;  %vm14620_vm1 = vcmask 408576   ;;  %vm14622_vm12 = vcmask 982016   ;;  %v14639_v59 = vld [vmem:[#allocation42_spill] sm:$0xff] }
 0x463   :  { %v3834_v13 = vsel %vm14620_vm1, %v3828_v27, %v14619_v35  ;;  %v2137_v9 = vsel %vm14622_vm12, %v11460_v18, %v14544_v8  ;;  %v4568_v45 = vrot.slane %v3056_v63, 4  ;;  %v4569_v21 = vrot.slane %v3057_v0, 4  ;;  %vm14623_vm4 = vmmov %vm14622_vm12  ;;  %v14625_v8 = vld [vmem:[#allocation203_spill] sm:$0xff]  ;;  %v11580_v63 = vpop.permute.xlu0 %6497  ;;  %v14645_v35 = vld [vmem:[#allocation265_spill] sm:$0xff] }
 0x464   :  { %v4576_v52 = vrot.slane %v3418_v34, 4  ;;  %v3043_v2 = vsel %vm2117_vm0, %v3035_v50, %v6475_v54  ;;  %4845 = vmatmul.mubr.f32.gmra.mrb[10].mxu1 %v2137_v9  ;;  %v4573_v23 = vsel %vm1571_vm6, %v4571_v43, %v4572_v25  ;;  %v3058_v49 = vsel %vm14623_vm4, %v3050_v48, %v14602_v41  ;;  %v14630_v41 = vld [vmem:[#allocation27_spill] sm:$0xff]  ;;  %vm14631_vm12 = vmmov %vm14623_vm4 }
 0x465   :  { %v6490_v53 = vunpack.i.h.bf16 %v11428_v58  ;;  %v3067_v16 = vsel %vm2138_vm2, %v2865_v12, %v2889_v10  ;;  %5663 = vmatprep.mubr.msk.f32.mxu1 %vm14624_vm5, %v4573_v23  ;;  %vm14626_vm13 = vcmask 490496   ;;  %6607 = vrot.lane.b32.xlu0 %v6606_v46, %s6820_s3  ;;  %vm14628_vm7 = vcmask 572416   ;;  %v3399_v0 = vpop.permute.xlu1 %3398  ;;  %v14642_v43 = vld [vmem:[#allocation123_spill] sm:$0xff]  ;;  %v14648_v10 = vld [vmem:[#allocation125_spill] sm:$0xff] }
 0x466   :  { %v3840_v18 = vsel %vm14626_vm13, %v3834_v13, %v14625_v8  ;;  %v3075_v6 = vsel %vm2145_vm15, %v3067_v16, %v2913_v61  ;;  %vm14629_vm1 = vcmask 900096   ;;  %3626 = vrot.lane.b32.xlu1 %v14630_v41, %s6821_s16  ;;  %v4570_v58 = vsel %vm1571_vm6, %v4568_v45, %v4569_v21  ;;  %v14638_v61 = vld [vmem:[#allocation139_spill] sm:$0xff]  ;;  %v14646_v13 = vld [vmem:[#allocation116_spill] sm:$0xff] }
 0x467   :  { %v3846_v20 = vsel %vm14628_vm7, %v3840_v18, %v14627_v56  ;;  %v3051_v33 = vsel %vm14629_vm1, %v3043_v2, %v6490_v53  ;;  %v4574_v32 = vrot.slane %v3058_v49, 4  ;;  %v4577_v14 = vsel %vm1571_vm6, %v4572_v25, %v4576_v52  ;;  %v11594_v48 = vpop.permute.xlu0 %6502  ;;  %vm14641_vm7 = vmmov %vm14624_vm5  ;;  %v14649_v49 = vld [vmem:[#allocation146_spill] sm:$0xff]  ;;  %v14651_v8 = vld [vmem:[#allocation151_spill] sm:$0xff] }
 0x468   :  { %v3059_v42 = vsel %vm14631_vm12, %v3051_v33, %v2865_v12  ;;  %4850 = vmatmul.mubr.f32.gmra.mrb[12].mxu1 %v4570_v58  ;;  %v6611_v29 = vpack.i.bf16 %v14633_v22, %v14632_v7  ;;  %vm14634_vm4 = vcmask 179200   ;;  %vm14635_vm13 = vcmask 261120   ;;  %v14650_v53 = vld [vmem:[#allocation266_spill] sm:$0xff]  ;;  %v14654_v33 = vld [vmem:[#allocation109_spill] sm:$0xff]  ;;  %v14656_v58 = vld [vmem:[#allocation88_spill] sm:$0xff] }
 0x469   :  { %v3083_v30 = vsel %vm14634_vm4, %v3075_v6, %v2951_v39  ;;  %5664 = vmatprep.mubr.msk.f32.mxu1 %vm14624_vm5, %v4577_v14  ;;  %v3852_v12 = vsel %vm2103_vm14, %v3846_v20, %v14636_v40  ;;  %v3548_v31 = vrot.slane %v14637_v62, 7  ;;  %v4578_v11 = vrot.slane %v3059_v42, 4  ;;  %v11596_v34 = vpop.permute.xlu1 %6512  ;;  %v14653_v6 = vld [vmem:[#allocation197_spill] sm:$0xff]  ;;  %v14658_v14 = vld [vmem:[#allocation214_spill] sm:$0xff] }
 0x46a   :  { %v3419_v19 = vsel %vm14635_vm13, %v3083_v30, %v3399_v0  ;;  %6612 = vrot.lane.b32.xlu0 %v6611_v29, %s6813_s26  ;;  %3866 = vrot.lane.b32.xlu1 %v3852_v12, %s6824_s2  ;;  %v4575_v25 = vsel %vm1571_vm6, %v4569_v21, %v4574_v32  ;;  %v14640_v27 = vpack.i.bf16 %v14638_v61, %v14639_v59  ;;  %v14643_v54 = vrot.slane %v14642_v43, 7  ;;  %v14647_v21 = vld [vmem:[#allocation126_spill] sm:$0xff]  ;;  %v14660_v29 = vld [vmem:[#allocation191_spill] sm:$0xff] }
 0x46b   :  { %v4580_v55 = vrot.slane %v3419_v19, 4  ;;  %vm14644_vm1 = vcmask 1040384   ;;  %v4579_v46 = vsel %vm1571_vm6, %v4574_v32, %v4578_v11  ;;  %v2974_v9 = vsel %vm2055_vm8, %v14646_v13, %v14645_v35  ;;  %v11614_v45 = vpop.permute.xlu0 %6507  ;;  %v14657_v32 = vld [vmem:[#allocation261_spill] sm:$0xff]  ;;  %v14661_v30 = vld [vmem:[#allocation162_spill] sm:$0xff] }
 0x46c   :  { %4855 = vmatmul.mubr.f32.gmra.mrb[14].mxu1 %v4575_v25  ;;  %v3549_v37 = vsel %vm14644_vm1, %v14643_v54, %v3548_v31  ;;  %v3579_v23 = vrot.slane %v14648_v10, 3  ;;  %vm14652_vm12 = vcmask 326656   ;;  %v6459_v56 = vunpack.i.l.bf16 %v14653_v6  ;;  %v14662_v12 = vld [vmem:[#allocation34_spill] sm:$0xff] }
 0x46d   :  { %v4581_v50 = vsel %vm1571_vm6, %v4576_v52, %v4580_v55  ;;  %v2982_v52 = vsel %vm2062_vm9, %v2974_v9, %v14647_v21  ;;  %v11618_v2 = vpop.permute.xlu1 %2868  ;;  %vm14655_vm4 = vcmask 1044480   ;;  %v6626_v42 = vpack.i.bf16 %v14657_v32, %v14656_v58  ;;  %v14664_v55 = vld [vmem:[#allocation122_spill] sm:$0xff]  ;;  %v14667_v9 = vld [vmem:[#allocation192_spill] sm:$0xff]  ;;  %vm14671_vm1 = vmmov %vm14652_vm12 }
 0x46e   :  { %6617 = vrot.lane.b32.xlu0 %v14640_v27, %s6818_s12  ;;  %5665 = vmatprep.mubr.msk.f32.mxu1 %vm14641_vm7, %v4581_v50  ;;  %v11627_v16 = vsel %vm2069_vm10, %v2982_v52, %v14650_v53  ;;  %v3581_v41 = vsel %vm14655_vm4, %v3579_v23, %v14654_v33  ;;  %vm14659_vm5 = vcmask 408576   ;;  %v6460_v22 = vunpack.i.h.bf16 %v14653_v6  ;;  %v14665_v27 = vld [vmem:[#allocation61_spill] sm:$0xff]  ;;  %v14668_v21 = vld [vmem:[#allocation118_spill] sm:$0xff] }
 0x46f   :  { %3560 = vrot.lane.b32.xlu1 %v3549_v37, %s6809_s22  ;;  %v11629_v39 = vpop.permute.xlu0 %2866  ;;  %v3829_v18 = vsel %vm14652_vm12, %v11627_v16, %v14651_v8  ;;  %v6631_v0 = vpack.i.bf16 %v14661_v30, %v14660_v29  ;;  %v6469_v19 = vunpack.i.l.bf16 %v11340_v26  ;;  %vm14663_vm13 = vcmask 490496   ;;  %v14670_v6 = vld [vmem:[#allocation130_spill] sm:$0xff]  ;;  %vm14672_vm12 = vmmov %vm14671_vm1 }
 0x470   :  { %4860 = vmatmul.mubr.f32.gmra.mrb[16].mxu1 %v4579_v46  ;;  %v3835_v7 = vsel %vm14659_vm5, %v3829_v18, %v14658_v14  ;;  %v2972_v25 = vsel %vm2055_vm8, %v14664_v55, %v6459_v56  ;;  %v6480_v50 = vunpack.i.h.bf16 %v11394_v44  ;;  %v6479_v61 = vunpack.i.l.bf16 %v11394_v44  ;;  %v14669_v18 = vld [vmem:[#allocation310_spill] sm:$0xff]  ;;  %vm14675_vm4 = vmmov %vm14659_vm5 }
 0x471   :  { %v11635_v20 = vpop.permute.xlu1 %2892  ;;  %v3841_v11 = vsel %vm14663_vm13, %v3835_v7, %v14662_v12  ;;  %vm14666_vm7 = vcmask 572416   ;;  %v6445_v37 = vunpack.i.h.bf16 %v11116_v57  ;;  %v6495_v46 = vunpack.i.h.bf16 %v11537_v3  ;;  %v14674_v30 = vld [vmem:[#allocation290_spill] sm:$0xff]  ;;  %vm14676_vm5 = vmmov %vm14675_vm4 }
 0x472   :  { %6622 = vrot.lane.b32.xlu0 %v14649_v49, %s6812_s25  ;;  %v3847_v54 = vsel %vm14666_vm7, %v3841_v11, %v14665_v27  ;;  %v6494_v35 = vunpack.i.l.bf16 %v11537_v3  ;;  %v2973_v52 = vsel %vm2055_vm8, %v14668_v21, %v6460_v22  ;;  %v3550_v56 = vrot.slane %v14670_v6, 7  ;;  %v14673_v22 = vld [vmem:[#allocation33_spill] sm:$0xff] }
 0x473   :  { %3610 = vrot.lane.b32.xlu1 %v14637_v62, %s6807_s0  ;;  %v2891_v40 = vpop.permute.xlu0 %2890  ;;  %v2981_v44 = vsel %vm2062_vm9, %v2973_v52, %v6469_v19  ;;  %v2980_v23 = vsel %vm2062_vm9, %v2972_v25, %v6445_v37  ;;  %v3853_v3 = vsel %vm2103_vm14, %v3847_v54, %v14669_v18  ;;  %v6500_v58 = vunpack.i.h.bf16 %v11580_v63  ;;  %v14678_v25 = vld [vmem:[#allocation178_spill] sm:$0xff] }
 0x474   :  { %v2989_v53 = vsel %vm2069_vm10, %v2981_v44, %v6480_v50  ;;  %v2988_v57 = vsel %vm2069_vm10, %v2980_v23, %v6479_v61  ;;  %v6499_v32 = vunpack.i.l.bf16 %v11580_v63  ;;  %v6504_v7 = vunpack.i.l.bf16 %v11594_v48 }
 0x475   :  { %v2915_v59 = vpop.permute.xlu1 %2914  ;;  %v2996_v33 = vsel %vm14671_vm1, %v2988_v57, %v6494_v35  ;;  %vm14677_vm13 = vcmask 1040384   ;;  %vm14680_vm7 = vcmask 490496   ;;  %v6515_v37 = vunpack.i.h.bf16 %v11596_v34 }
 0x476   :  { %3592 = vrot.lane.b32.xlu0 %v3581_v41, %s6819_s13  ;;  %v2997_v41 = vsel %vm14672_vm12, %v2989_v53, %v6495_v46  ;;  %v3551_v63 = vsel %vm14677_vm13, %v3548_v31, %v3550_v56  ;;  %vm14681_vm1 = vmmov %vm14680_vm7  ;;  %v6514_v46 = vunpack.i.l.bf16 %v11596_v34  ;;  %v6485_v35 = vunpack.i.h.bf16 %v11411_v15 }
 0x477   :  { %6627 = vrot.lane.b32.xlu1 %v6626_v42, %s6816_s29  ;;  %v6518_v49 = vpop.permute.xlu0 %6517  ;;  %v6415_v42 = vunpack.i.h.bf16 %v10937_v47  ;;  %v14679_v47 = vld [vmem:[#allocation94_spill] sm:$0xff]  ;;  %vm14682_vm12 = vcmask 572416   ;;  %v3068_v31 = vsel %vm2138_vm2, %v11629_v39, %v2891_v40  ;;  %v6509_v57 = vunpack.i.l.bf16 %v11614_v45 }
 0x478   :  { %v6641_v50 = vpack.i.bf16 %v14679_v47, %v14678_v25  ;;  %v6520_v52 = vunpack.i.h.bf16 %v6518_v49  ;;  %v6519_v44 = vunpack.i.l.bf16 %v6518_v49  ;;  %v14685_v49 = vld [vmem:[#allocation269_spill] sm:$0xff]  ;;  %v3076_v40 = vsel %vm2145_vm15, %v3068_v31, %v2915_v59  ;;  %v14693_v31 = vld [vmem:[#allocation272_spill] sm:$0xff] }
 0x479   :  { %v6523_v8 = vpop.permute.xlu1 %6522  ;;  %v3005_v19 = vsel %vm14676_vm5, %v2997_v41, %v6415_v42  ;;  %vm14689_vm5 = vcmask 179200   ;;  %vm14690_vm13 = vcmask 326656  }
 0x47a   :  { %3628 = vrot.lane.b32.xlu0 %v14667_v9, %s6821_s16  ;;  %v3013_v54 = vsel %vm14681_vm1, %v3005_v19, %v6500_v58  ;;  %v6525_v15 = vunpack.i.h.bf16 %v6523_v8  ;;  %v6524_v41 = vunpack.i.l.bf16 %v6523_v8  ;;  %v14684_v58 = vld [vmem:[#allocation48_spill] sm:$0xff]  ;;  %v14688_v19 = vld [vmem:[#allocation71_spill] sm:$0xff]  ;;  %v3069_v8 = vsel %vm2138_vm2, %v11618_v2, %v11635_v20 }
 0x47b   :  { %6632 = vrot.lane.b32.xlu1 %v6631_v0, %s6811_s24  ;;  %v2917_v29 = vpop.permute.xlu0 %2916  ;;  %v3004_v0 = vsel %vm14675_vm4, %v2996_v33, %v14674_v30  ;;  %v3021_v9 = vsel %vm14682_vm12, %v3013_v54, %v6504_v7  ;;  %vm14683_vm4 = vmmov %vm14682_vm12  ;;  %v2998_v59 = vsel %vm14690_vm13, %v11627_v16, %v6509_v57  ;;  %v14692_v20 = vld [vmem:[#allocation279_spill] sm:$0xff]  ;;  %vm14695_vm1 = vcmask 900096   ;;  %v14697_v57 = vld [vmem:[#allocation201_spill] sm:$0xff] }
 0x47c   :  { %v3012_v61 = vsel %vm14680_vm7, %v3004_v0, %v6499_v32  ;;  %v3029_v33 = vsel %vm2103_vm14, %v3021_v9, %v6515_v37  ;;  %v14686_v32 = vld [vmem:[#allocation217_spill] sm:$0xff]  ;;  %vm14694_vm7 = vcmask 261120   ;;  %vm14696_vm12 = vmmov %vm14695_vm1  ;;  %vm14699_vm13 = vcmask 982016  }
 0x47d   :  { %v2955_v11 = vpop.permute.xlu1 %2954  ;;  %v3020_v53 = vsel %vm14683_vm4, %v3012_v61, %v6485_v35  ;;  %v2975_v42 = vsel %vm2055_vm8, %v14686_v32, %v14685_v49  ;;  %v14687_v0 = vld [vmem:[#allocation49_spill] sm:$0xff]  ;;  %v3077_v61 = vsel %vm2145_vm15, %v3069_v8, %v2917_v29  ;;  %vm14698_vm4 = vcmask 408576   ;;  %vm14700_vm3 = vmmov %vm14699_vm13  ;;  %v14708_v8 = vld [vmem:[#allocation150_spill] sm:$0xff] }
 0x47e   :  { %3868 = vrot.lane.b32.xlu0 %v3853_v3, %s6824_s2  ;;  %v3028_v34 = vsel %vm2103_vm14, %v3020_v53, %v6514_v46 }
 0x47f   :  { %3594 = vrot.lane.b32.xlu1 %v14673_v22, %s6819_s13  ;;  %v2953_v23 = vpop.permute.xlu0 %2952  ;;  %v3036_v7 = vsel %vm2110_vm11, %v3028_v34, %v6519_v44  ;;  %v3037_v22 = vsel %vm2110_vm11, %v3029_v33, %v6520_v52  ;;  %v14691_v52 = vld [vmem:[#allocation259_spill] sm:$0xff]  ;;  %v3006_v34 = vsel %vm14698_vm4, %v2998_v59, %v14658_v14  ;;  %v3085_v33 = vsel %vm14689_vm5, %v3077_v61, %v2955_v11 }
 0x480   :  { %v3084_v25 = vsel %vm14689_vm5, %v3076_v40, %v2953_v23  ;;  %v3044_v35 = vsel %vm2117_vm0, %v3036_v7, %v6524_v41  ;;  %v3045_v9 = vsel %vm2117_vm0, %v3037_v22, %v6525_v15  ;;  %v6651_v44 = vpack.i.bf16 %v14692_v20, %v14691_v52  ;;  %v14704_v11 = vld [vmem:[#allocation211_spill] sm:$0xff] }
 0x481   :  { %v3401_v3 = vpop.permute.xlu1 %3400  ;;  %vm14712_vm5 = vcmask 998400  }
 0x482   :  { %3562 = vrot.lane.b32.xlu0 %v3551_v63, %s6809_s22  ;;  %v3820_v63 = vsel %vm2062_vm9, %v2975_v42, %v14688_v19  ;;  %v3420_v16 = vsel %vm14694_vm7, %v3084_v25, %v3401_v3  ;;  %v14701_v3 = vld [vmem:[#allocation41_spill] sm:$0xff]  ;;  %vm14702_vm7 = vcmask 326656  }
 0x483   :  { %6642 = vrot.lane.b32.xlu1 %v6641_v50, %s6820_s3  ;;  %v6528_v50 = vpop.permute.xlu0 %6527  ;;  %v3824_v23 = vsel %vm2069_vm10, %v3820_v63, %v14693_v31  ;;  %v4585_v19 = vrot.slane %v3420_v16, 4  ;;  %v14707_v63 = vld [vmem:[#allocation152_spill] sm:$0xff]  ;;  %v14717_v16 = vld [vmem:[#allocation15_spill] sm:$0xff] }
 0x484   :  { %v6530_v54 = vunpack.i.h.bf16 %v6528_v50  ;;  %v6529_v37 = vunpack.i.l.bf16 %v6528_v50  ;;  %v3830_v49 = vsel %vm14702_vm7, %v3824_v23, %v14701_v3  ;;  %v14709_v25 = vpack.i.bf16 %v14707_v63, %v14708_v8 }
 0x485   :  { %v2871_v46 = vpop.permute.xlu1 %2870  ;;  %v6470_v50 = vunpack.i.h.bf16 %v11340_v26 }
 0x486   :  { %6637 = vrot.lane.b32.xlu0 %v14684_v58, %s6817_s30  ;;  %v3052_v29 = vsel %vm14695_vm1, %v3044_v35, %v6529_v37  ;;  %v3053_v53 = vsel %vm14696_vm12, %v3045_v9, %v6530_v54  ;;  %vm14703_vm1 = vcmask 261120   ;;  %vm14705_vm12 = vmmov %vm14698_vm4  ;;  %v14710_v54 = vld [vmem:[#allocation311_spill] sm:$0xff]  ;;  %v14713_v9 = vld [vmem:[#allocation193_spill] sm:$0xff] }
 0x487   :  { %6647 = vrot.lane.b32.xlu1 %v14687_v0, %s6812_s25  ;;  %v3403_v15 = vpop.permute.xlu0 %3402  ;;  %v3060_v41 = vsel %vm14699_vm13, %v3052_v29, %v11629_v39  ;;  %v11744_v58 = vsel %vm14700_vm3, %v3053_v53, %v11618_v2  ;;  %v3836_v0 = vsel %vm14705_vm12, %v3830_v49, %v14704_v11  ;;  %vm14706_vm3 = vcmask 490496   ;;  %v14718_v29 = vld [vmem:[#allocation19_spill] sm:$0xff]  ;;  %v14721_v49 = vld [vmem:[#allocation128_spill] sm:$0xff] }
 0x488   :  { %v11749_v40 = vsel %vm14703_vm1, %v3085_v33, %v3403_v15  ;;  %v4582_v22 = vrot.slane %v3060_v41, 4  ;;  %v4583_v14 = vrot.slane %v11744_v58, 4  ;;  %v3014_v2 = vsel %vm14706_vm3, %v3006_v34, %v14662_v12  ;;  %vm14711_vm4 = vmmov %vm14706_vm3  ;;  %v14720_v41 = vld [vmem:[#allocation312_spill] sm:$0xff]  ;;  %v14741_v58 = vld [vmem:[#allocation101_spill] sm:$0xff] }
 0x489   :  { %v11751_v7 = vpop.permute.xlu1 %6532  ;;  %v4586_v39 = vrot.slane %v11749_v40, 4  ;;  %v3842_v37 = vsel %vm14711_vm4, %v3836_v0, %v14710_v54  ;;  %vm14714_vm13 = vcmask 572416   ;;  %v14719_v53 = vpack.i.bf16 %v14717_v16, %v14718_v29 }
 0x48a   :  { %3612 = vrot.lane.b32.xlu0 %v14670_v6, %s6807_s0  ;;  %v4584_v12 = vsel %vm1571_vm6, %v4582_v22, %v4583_v14  ;;  %v3848_v52 = vsel %vm14714_vm13, %v3842_v37, %v14713_v9  ;;  %v6534_v20 = vunpack.i.l.bf16 %v11751_v7  ;;  %vm14715_vm7 = vmmov %vm14714_vm13  ;;  %v6510_v34 = vunpack.i.h.bf16 %v11614_v45  ;;  %v14729_v9 = vld [vmem:[#allocation40_spill] sm:$0xff] }
 0x48b   :  { %3630 = vrot.lane.b32.xlu1 %v14697_v57, %s6821_s16  ;;  %v2895_v59 = vpop.permute.xlu0 %2894  ;;  %v4587_v61 = vsel %vm1571_vm6, %v4585_v19, %v4586_v39  ;;  %v3022_v26 = vsel %vm14715_vm7, %v3014_v2, %v14665_v27  ;;  %v2983_v57 = vsel %vm2062_vm9, %v2975_v42, %v6470_v50  ;;  %v3854_v3 = vsel %vm2103_vm14, %v3848_v52, %v14720_v41  ;;  %v14722_v19 = vld [vmem:[#allocation81_spill] sm:$0xff] }
 0x48c   :  { %5666 = vmatprep.mubr.msk.f32.mxu1 %vm14712_vm5, %v4587_v61  ;;  %v3030_v15 = vsel %vm2103_vm14, %v3022_v26, %v14669_v18  ;;  %v3552_v40 = vrot.slane %v14721_v49, 7  ;;  %v2991_v42 = vsel %vm2069_vm10, %v2983_v57, %v14693_v31  ;;  %vm14723_vm1 = vcmask 326656  }
 0x48d   :  { %v11768_v35 = vpop.permute.xlu1 %6537  ;;  %4865 = vmatmul.mubr.f32.gmra.mrb[18].mxu1 %v4584_v12  ;;  %v3038_v22 = vsel %vm2110_vm11, %v3030_v15, %v6534_v20  ;;  %v2999_v18 = vsel %vm14723_vm1, %v2991_v42, %v6510_v34  ;;  %vm14724_vm12 = vcmask 900096   ;;  %vm14725_vm3 = vcmask 1040384   ;;  %v14728_v12 = vld [vmem:[#allocation45_spill] sm:$0xff]  ;;  %v14736_v34 = vld [vmem:[#allocation35_spill] sm:$0xff] }
 0x48e   :  { %6652 = vrot.lane.b32.xlu0 %v6651_v44, %s6813_s26  ;;  %v14716_v44 = vld [vmem:[#allocation50_spill] sm:$0xff]  ;;  %v6539_v23 = vunpack.i.l.bf16 %v11768_v35  ;;  %v3070_v50 = vsel %vm2138_vm2, %v2871_v46, %v2895_v59  ;;  %vm14726_vm4 = vcmask 982016   ;;  %vm14727_vm5 = vcmask 408576  }
 0x48f   :  { %6662 = vrot.lane.b32.xlu1 %v14709_v25, %s6818_s12  ;;  %v2919_v33 = vpop.permute.xlu0 %2918  ;;  %v3553_v25 = vsel %vm14725_vm3, %v3550_v56, %v3552_v40  ;;  %v3007_v61 = vsel %vm14727_vm5, %v2999_v18, %v14704_v11  ;;  %v6671_v52 = vpack.i.bf16 %v14729_v9, %v14728_v12  ;;  %vm14730_vm13 = vcmask 179200   ;;  %v14747_v12 = vld [vmem:[#allocation176_spill] sm:$0xff] }
 0x490   :  { %v3046_v45 = vsel %vm2117_vm0, %v3038_v22, %v6539_v23  ;;  %v3078_v37 = vsel %vm2145_vm15, %v3070_v50, %v2919_v33  ;;  %vm14731_vm7 = vcmask 261120   ;;  %vm14734_vm1 = vcmask 490496  }
 0x491   :  { %v6543_v27 = vpop.permute.xlu1 %6542  ;;  %v3015_v16 = vsel %vm14734_vm1, %v3007_v61, %v14710_v54  ;;  %v4073_v33 = vrot.slane %v14736_v34, 7  ;;  %v6505_v15 = vunpack.i.h.bf16 %v11594_v48  ;;  %v6535_v22 = vunpack.i.h.bf16 %v11751_v7  ;;  %v14744_v61 = vld [vmem:[#allocation233_spill] sm:$0xff] }
 0x492   :  { %6657 = vrot.lane.b32.xlu0 %v14716_v44, %s6808_s21  ;;  %v6544_v0 = vunpack.i.l.bf16 %v6543_v27  ;;  %v14733_v44 = vld [vmem:[#allocation5_spill] sm:$0xff]  ;;  %vm14738_vm3 = vcmask 998400   ;;  %v6540_v42 = vunpack.i.h.bf16 %v11768_v35  ;;  %vm14746_vm5 = vcmask 326656  }
 0x493   :  { %6667 = vrot.lane.b32.xlu1 %v14719_v53, %s6814_s27  ;;  %v2957_v63 = vpop.permute.xlu0 %2956  ;;  %v14735_v53 = vld [vmem:[#allocation36_spill] sm:$0xff]  ;;  %vm14757_vm1 = vcmask 982016  }
 0x494   :  { %v3054_v2 = vsel %vm14724_vm12, %v3046_v45, %v6544_v0  ;;  %v3086_v56 = vsel %vm14730_vm13, %v3078_v37, %v2957_v63  ;;  %v4072_v57 = vrot.slane %v14735_v53, 7  ;;  %vm14737_vm12 = vcmask 572416   ;;  %v14739_v45 = vld [vmem:[#allocation53_spill] sm:$0xff]  ;;  %v14742_v63 = vld [vmem:[#allocation288_spill] sm:$0xff]  ;;  %v14745_v37 = vld [vmem:[#allocation107_spill] sm:$0xff] }
 0x495   :  { %v2873_v8 = vpop.permute.xlu1 %2872  ;;  %v11808_v31 = vsel %vm14726_vm4, %v3054_v2, %v2871_v46  ;;  %v14732_v46 = vld [vmem:[#allocation8_spill] sm:$0xff]  ;;  %v3023_v54 = vsel %vm14737_vm12, %v3015_v16, %v6505_v15  ;;  %vm14740_vm4 = vcmask 1040384   ;;  %vm14748_vm13 = vcmask 900096   ;;  %v14752_v16 = vld [vmem:[#allocation113_spill] sm:$0xff]  ;;  %vm14762_vm12 = vmmov %vm14746_vm5 }
 0x496   :  { %3870 = vrot.lane.b32.xlu0 %v3854_v3, %s6824_s2  ;;  %v6681_v23 = vpack.i.bf16 %v14733_v44, %v14732_v46  ;;  %v4588_v11 = vrot.slane %v11808_v31, 4  ;;  %v4074_v7 = vsel %vm14740_vm4, %v4072_v57, %v4073_v33  ;;  %v14751_v46 = vld [vmem:[#allocation169_spill] sm:$0xff]  ;;  %v14792_v31 = vld [vmem:[#allocation223_spill] sm:$0xff] }
 0x497   :  { %3596 = vrot.lane.b32.xlu1 %v14722_v19, %s6819_s13  ;;  %v3405_v20 = vpop.permute.xlu0 %3404  ;;  %v3031_v19 = vsel %vm2103_vm14, %v3023_v54, %v14720_v41  ;;  %v4459_v41 = vsel %vm14746_vm5, %v14745_v37, %v14744_v61  ;;  %v4441_v44 = vsel %vm2055_vm8, %v14617_v5, %v14751_v46  ;;  %v14754_v54 = vld [vmem:[#allocation148_spill] sm:$0xff]  ;;  %v14765_v61 = vld [vmem:[#allocation57_spill] sm:$0xff] }
 0x498   :  { %v11819_v59 = vsel %vm14731_vm7, %v3086_v56, %v3405_v20  ;;  %v4589_v48 = vsel %vm1571_vm6, %v4583_v14, %v4588_v11  ;;  %v4440_v14 = vsel %vm2055_vm8, %v14461_v24, %v14741_v58  ;;  %v3039_v35 = vsel %vm2110_vm11, %v3031_v19, %v6535_v22  ;;  %v14750_v56 = vld [vmem:[#allocation72_spill] sm:$0xff] }
 0x499   :  { %v11821_v26 = vpop.permute.xlu1 %6547  ;;  %v4590_v29 = vrot.slane %v11819_v59, 4  ;;  %v4446_v20 = vsel %vm2062_vm9, %v4440_v14, %v14750_v56  ;;  %vm14755_vm7 = vcmask 408576   ;;  %v14758_v5 = vld [vmem:[#allocation24_spill] sm:$0xff]  ;;  %v14771_v56 = vld [vmem:[#allocation177_spill] sm:$0xff] }
 0x49a   :  { %3564 = vrot.lane.b32.xlu0 %v3553_v25, %s6809_s22  ;;  %v14743_v25 = vld [vmem:[#allocation239_spill] sm:$0xff]  ;;  %v14759_v19 = vrot.slane %v14758_v5, 4  ;;  %v14760_v58 = vld [vmem:[#allocation56_spill] sm:$0xff]  ;;  %vm14766_vm4 = vmmov %vm14755_vm7 }
 0x49b   :  { %3614 = vrot.lane.b32.xlu1 %v14721_v49, %s6807_s0  ;;  %v2897_v3 = vpop.permute.xlu0 %2896  ;;  %v4591_v40 = vsel %vm1571_vm6, %v4586_v39, %v4590_v29  ;;  %v6545_v39 = vunpack.i.h.bf16 %v6543_v27  ;;  %v3817_v50 = vsel %vm2055_vm8, %v14743_v25, %v14742_v63  ;;  %v3047_v27 = vsel %vm2117_vm0, %v3039_v35, %v6540_v42  ;;  %v14756_v42 = vld [vmem:[#allocation278_spill] sm:$0xff]  ;;  %v14788_v59 = vld [vmem:[#allocation165_spill] sm:$0xff] }
 0x49c   :  { %5667 = vmatprep.mubr.msk.f32.mxu1 %vm14738_vm3, %v4591_v40  ;;  %v3821_v9 = vsel %vm2062_vm9, %v3817_v50, %v14747_v12  ;;  %v14753_v40 = vld [vmem:[#allocation28_spill] sm:$0xff]  ;;  %v4447_v14 = vsel %vm2062_vm9, %v4441_v44, %v14760_v58  ;;  %v14761_v35 = vld [vmem:[#allocation206_spill] sm:$0xff]  ;;  %vm14764_vm3 = vmmov %vm14746_vm5  ;;  %vm14767_vm5 = vcmask 179200  }
 0x49d   :  { %v11839_v0 = vpop.permute.xlu1 %6552  ;;  %4870 = vmatmul.mubr.f32.gmra.mrb[20].mxu1 %v4589_v48  ;;  %v3055_v24 = vsel %vm14748_vm13, %v3047_v27, %v6545_v39  ;;  %v6686_v22 = vpack.i.bf16 %v14753_v40, %v14541_v38  ;;  %v4467_v48 = vsel %vm14755_vm7, %v4459_v41, %v14754_v54  ;;  %v3071_v39 = vsel %vm2138_vm2, %v2873_v8, %v2897_v3  ;;  %v14763_v63 = vld [vmem:[#allocation198_spill] sm:$0xff]  ;;  %v14777_v40 = vld [vmem:[#allocation235_spill] sm:$0xff] }
 0x49e   :  { %6672 = vrot.lane.b32.xlu0 %v6671_v52, %s6810_s23  ;;  %v14749_v52 = vld [vmem:[#allocation76_spill] sm:$0xff]  ;;  %v14768_v41 = vld [vmem:[#allocation226_spill] sm:$0xff]  ;;  %vm14769_vm13 = vcmask 490496   ;;  %vm14770_vm7 = vcmask 261120   ;;  %v14783_v58 = vld [vmem:[#allocation131_spill] sm:$0xff] }
 0x49f   :  { %6682 = vrot.lane.b32.xlu1 %v6681_v23, %s6815_s28  ;;  %v2921_v18 = vpop.permute.xlu0 %2920  ;;  %v4475_v12 = vsel %vm14769_vm13, %v4467_v48, %v14768_v41  ;;  %v14778_v54 = vld [vmem:[#allocation142_spill] sm:$0xff]  ;;  %v4036_v41 = vrot.slane %v14758_v5, 3 }
 0x4a0   :  { %v3079_v27 = vsel %vm2145_vm15, %v3071_v39, %v2921_v18  ;;  %v14773_v18 = vld [vmem:[#allocation168_spill] sm:$0xff] }
 0x4a1   :  { %v11860_v2 = vpop.permute.xlu1 %6557  ;;  %v4453_v46 = vsel %vm2069_vm10, %v4447_v14, %v14773_v18  ;;  %v4038_v18 = vrot.slane %v14203_v28, 3 }
 0x4a2   :  { %6677 = vrot.lane.b32.xlu0 %v14739_v45, %s6812_s25  ;;  %v3825_v45 = vsel %vm2069_vm10, %v3821_v9, %v14756_v42  ;;  %v14780_v42 = vld [vmem:[#allocation188_spill] sm:$0xff]  ;;  %v6559_v5 = vunpack.i.l.bf16 %v11860_v2 }
 0x4a3   :  { %4088 = vrot.lane.b32.xlu1 %v4074_v7, %s6809_s22  ;;  %v2959_v23 = vpop.permute.xlu0 %2958  ;;  %v3063_v7 = vsel %vm14757_vm1, %v3055_v24, %v2873_v8  ;;  %v3831_v50 = vsel %vm14764_vm3, %v3825_v45, %v14763_v63  ;;  %vm14772_vm1 = vmmov %vm14766_vm4  ;;  %v14785_v63 = vld [vmem:[#allocation170_spill] sm:$0xff] }
 0x4a4   :  { %v3837_v8 = vsel %vm14766_vm4, %v3831_v50, %v14765_v61  ;;  %v3087_v3 = vsel %vm14767_vm5, %v3079_v27, %v2959_v23  ;;  %v4592_v9 = vrot.slane %v3063_v7, 4  ;;  %v14775_v23 = vld [vmem:[#allocation209_spill] sm:$0xff]  ;;  %vm14781_vm5 = vcmask 572416  }
 0x4a5   :  { %v11882_v15 = vpop.permute.xlu1 %6562  ;;  %v4483_v45 = vsel %vm14781_vm5, %v4475_v12, %v14780_v42  ;;  %v14787_v27 = vld [vmem:[#allocation185_spill] sm:$0xff]  ;;  %v14793_v12 = vld [vmem:[#allocation208_spill] sm:$0xff] }
 0x4a6   :  { %4086 = vrot.lane.b32.xlu0 %v4072_v57, %s6809_s22  ;;  %v4452_v57 = vsel %vm2069_vm10, %v4446_v20, %v14752_v16  ;;  %v14774_v16 = vld [vmem:[#allocation218_spill] sm:$0xff] }
 0x4a7   :  { %4112 = vrot.lane.b32.xlu1 %v14749_v52, %s6819_s13  ;;  %v4458_v38 = vsel %vm14762_vm12, %v4452_v57, %v14761_v35  ;;  %v3407_v37 = vpop.permute.xlu0 %3406  ;;  %vm14776_vm12 = vmmov %vm14769_vm13  ;;  %vm14784_vm13 = vcmask 998400  }
 0x4a8   :  { %v3423_v24 = vsel %vm14770_vm7, %v3087_v3, %v3407_v37  ;;  %v4466_v20 = vsel %vm14772_vm1, %v4458_v38, %v14771_v56  ;;  %vm14779_vm4 = vmmov %vm14776_vm12  ;;  %v4593_v38 = vsel %vm1571_vm6, %v4588_v11, %v4592_v9  ;;  %v4491_v11 = vsel %vm2103_vm14, %v4483_v45, %v14792_v31  ;;  %v14794_v56 = vld [vmem:[#allocation108_spill] sm:$0xff] }
 0x4a9   :  { %v11909_v52 = vpop.permute.xlu1 %6572  ;;  %v4594_v44 = vrot.slane %v3423_v24, 4  ;;  %v4474_v57 = vsel %vm14776_vm12, %v4466_v20, %v14775_v23  ;;  %v3843_v48 = vsel %vm14779_vm4, %v3837_v8, %v14778_v54  ;;  %vm14786_vm7 = vmmov %vm14781_vm5  ;;  %v14790_v8 = vld [vmem:[#allocation238_spill] sm:$0xff]  ;;  %v4507_v23 = vrot.slane %v4491_v11, 1 }
 0x4aa   :  { %4110 = vrot.lane.b32.xlu0 %v14759_v19, %s6819_s13  ;;  %v14782_v19 = vld [vmem:[#allocation179_spill] sm:$0xff]  ;;  %v4482_v50 = vsel %vm14786_vm7, %v4474_v57, %v14785_v63  ;;  %vm14789_vm12 = vmmov %vm14781_vm5  ;;  %vm14804_vm7 = vcmask 1046528  }
 0x4ab   :  { %6687 = vrot.lane.b32.xlu1 %v6686_v22, %s6820_s3  ;;  %v4460_v22 = vsel %vm14764_vm3, %v4453_v46, %v14777_v40  ;;  %v11927_v7 = vpop.permute.xlu0 %6567  ;;  %v4595_v39 = vsel %vm1571_vm6, %v4590_v29, %v4594_v44  ;;  %v6691_v14 = vpack.i.bf16 %v14783_v58, %v14782_v19  ;;  %v3849_v29 = vsel %vm14789_vm12, %v3843_v48, %v14788_v59  ;;  %vm14791_vm3 = vmmov %vm14779_vm4  ;;  %v14795_v46 = vld [vmem:[#allocation207_spill] sm:$0xff]  ;;  %v14805_v59 = vld [vmem:[#allocation37_spill] sm:$0xff] }
 0x4ac   :  { %5668 = vmatprep.mubr.msk.f32.mxu1 %vm14784_vm13, %v4595_v39  ;;  %v4468_v61 = vsel %vm14772_vm1, %v4460_v22, %v14787_v27  ;;  %v4490_v9 = vsel %vm2103_vm14, %v4482_v50, %v14793_v12  ;;  %v3855_v20 = vsel %vm2103_vm14, %v3849_v29, %v14794_v56  ;;  %vm14796_vm4 = vmmov %vm14781_vm5  ;;  %v14797_v57 = vld [vmem:[#allocation39_spill] sm:$0xff]  ;;  %v6564_v22 = vunpack.i.l.bf16 %v11882_v15  ;;  %v14801_v39 = vld [vmem:[#allocation236_spill] sm:$0xff] }
 0x4ad   :  { %v11934_v35 = vpop.permute.xlu1 %6582  ;;  %4875 = vmatmul.mubr.f32.gmra.mrb[22].mxu1 %v4593_v38  ;;  %v4476_v3 = vsel %vm14791_vm3, %v4468_v61, %v14790_v8  ;;  %v4506_v40 = vrot.slane %v4490_v9, 1  ;;  %v14798_v48 = vld [vmem:[#allocation23_spill] sm:$0xff]  ;;  %vm14800_vm5 = vcmask 1044480   ;;  %v14803_v27 = vld [vmem:[#allocation30_spill] sm:$0xff]  ;;  %v4075_v29 = vrot.slane %v14805_v59, 7 }
 0x4ae   :  { %3632 = vrot.lane.b32.xlu0 %v14774_v16, %s6821_s16  ;;  %v4484_v44 = vsel %vm14796_vm4, %v4476_v3, %v14795_v46  ;;  %v6554_v16 = vunpack.i.l.bf16 %v11839_v0  ;;  %v14799_v42 = vrot.slane %v14798_v48, 3  ;;  %vm14802_vm13 = vmmov %vm14800_vm5  ;;  %vm14806_vm1 = vcmask 326656  }
 0x4af   :  { %4136 = vrot.lane.b32.xlu1 %v14736_v34, %s6807_s0  ;;  %v11953_v37 = vpop.permute.xlu0 %6577  ;;  %v11975_v19 = vsel %vm2103_vm14, %v4484_v44, %v14801_v39  ;;  %v4039_v63 = vsel %vm14802_vm13, %v4036_v41, %v4038_v18  ;;  %v4508_v61 = vsel %vm14804_vm7, %v4506_v40, %v4507_v23  ;;  %v6565_v12 = vunpack.i.h.bf16 %v11882_v15  ;;  %v14809_v15 = vld [vmem:[#allocation31_spill] sm:$0xff]  ;;  %v14812_v40 = vld [vmem:[#allocation22_spill] sm:$0xff]  ;;  %vm14816_vm13 = vmmov %vm14806_vm1 }
 0x4b0   :  { %v4037_v45 = vsel %vm14800_vm5, %v14799_v42, %v4036_v41  ;;  %v4509_v3 = vrot.slane %v11975_v19, 1  ;;  %vm14807_vm12 = vcmask 408576   ;;  %v6574_v46 = vunpack.i.l.bf16 %v11909_v52  ;;  %vm14814_vm5 = vmmov %vm14804_vm7 }
 0x4b1   :  { %v3587_v24 = vpop.permute.xlu1 %3586  ;;  %v6696_v41 = vpack.i.bf16 %v4039_v63, %v4037_v45  ;;  %vm14808_vm3 = vcmask 1040384   ;;  %vm14813_vm4 = vcmask 490496   ;;  %v14815_v45 = vld [vmem:[#allocation210_spill] sm:$0xff]  ;;  %vm14817_vm7 = vcmask 572416  }
 0x4b2   :  { %4134 = vrot.lane.b32.xlu0 %v14735_v53, %s6807_s0  ;;  %v6549_v53 = vunpack.i.l.bf16 %v11821_v26  ;;  %v4076_v44 = vsel %vm14808_vm3, %v4073_v33, %v4075_v29  ;;  %v4510_v34 = vsel %vm14814_vm5, %v4507_v23, %v4509_v3  ;;  %v3647_v33 = vsel %vm14816_vm13, %v14815_v45, %v6565_v12  ;;  %v14821_v23 = vld [vmem:[#allocation54_spill] sm:$0xff]  ;;  %vm14826_vm5 = vmmov %vm14816_vm13 }
 0x4b3   :  { %6692 = vrot.lane.b32.xlu1 %v6691_v14, %s6813_s26  ;;  %v3555_v54 = vpop.permute.xlu0 %3554  ;;  %v6569_v14 = vunpack.i.l.bf16 %v11927_v7  ;;  %vm14820_vm3 = vcmask 998400   ;;  %vm14829_vm13 = vcmask 490496  }
 0x4b4   :  { %v3640_v58 = vsel %vm2055_vm8, %v14798_v48, %v6549_v53  ;;  %v6579_v53 = vunpack.i.l.bf16 %v11953_v37  ;;  %v3700_v56 = vsel %vm2138_vm2, %v3555_v54, %v3587_v24 }
 0x4b5   :  { %v3605_v38 = vpop.permute.xlu1 %3604  ;;  %v3642_v50 = vsel %vm2062_vm9, %v3640_v58, %v6554_v16  ;;  %v14810_v16 = vld [vmem:[#allocation64_spill] sm:$0xff] }
 0x4b6   :  { %3872 = vrot.lane.b32.xlu0 %v3855_v20, %s6824_s2  ;;  %v3644_v8 = vsel %vm2069_vm10, %v3642_v50, %v6559_v5  ;;  %v6701_v5 = vpack.i.bf16 %v14810_v16, %v14809_v15  ;;  %v3706_v48 = vsel %vm2145_vm15, %v3700_v56, %v3605_v38  ;;  %v6584_v50 = vunpack.i.l.bf16 %v11934_v35  ;;  %v14827_v16 = vld [vmem:[#allocation106_spill] sm:$0xff] }
 0x4b7   :  { %4164 = vrot.lane.b32.xlu1 %v14797_v57, %s6821_s16  ;;  %v3646_v31 = vsel %vm14806_vm1, %v3644_v8, %v6564_v22  ;;  %v11992_v11 = vpop.permute.xlu0 %6587  ;;  %v14811_v57 = vld [vmem:[#allocation171_spill] sm:$0xff]  ;;  %vm14818_vm1 = vcmask 179200   ;;  %v14822_v8 = vld [vmem:[#allocation90_spill] sm:$0xff] }
 0x4b8   :  { %v3652_v9 = vsel %vm14807_vm12, %v3646_v31, %v6569_v14  ;;  %v4442_v24 = vsel %vm2055_vm8, %v14812_v40, %v14811_v57  ;;  %v6589_v58 = vunpack.i.l.bf16 %v11992_v11  ;;  %vm14819_vm12 = vcmask 261120   ;;  %v14828_v40 = vld [vmem:[#allocation136_spill] sm:$0xff] }
 0x4b9   :  { %v3623_v20 = vpop.permute.xlu1 %3622  ;;  %v3658_v22 = vsel %vm14813_vm4, %v3652_v9, %v6574_v46  ;;  %vm14823_vm4 = vcmask 408576   ;;  %v14824_v9 = vld [vmem:[#allocation174_spill] sm:$0xff]  ;;  %v4040_v57 = vrot.slane %v14621_v51, 3  ;;  %v14836_v51 = vld [vmem:[#allocation93_spill] sm:$0xff] }
 0x4ba   :  { %4162 = vrot.lane.b32.xlu0 %v14803_v27, %s6821_s16  ;;  %v3664_v39 = vsel %vm14817_vm7, %v3658_v22, %v6579_v53  ;;  %v3712_v14 = vsel %vm14818_vm1, %v3706_v48, %v3623_v20  ;;  %v3653_v31 = vsel %vm14823_vm4, %v3647_v33, %v14822_v8  ;;  %v14830_v22 = vld [vmem:[#allocation144_spill] sm:$0xff]  ;;  %v14831_v48 = vld [vmem:[#allocation149_spill] sm:$0xff]  ;;  %vm14833_vm7 = vcmask 900096   ;;  %v14843_v8 = vld [vmem:[#allocation274_spill] sm:$0xff] }
 0x4bb   :  { %4520 = vrot.lane.b32.xlu1 %v4508_v61, %s6824_s2  ;;  %v4448_v61 = vsel %vm2062_vm9, %v4442_v24, %v14821_v23  ;;  %v3659_v24 = vsel %vm14829_vm13, %v3653_v31, %v14828_v40  ;;  %vm14834_vm1 = vcmask 982016   ;;  %v14840_v23 = vld [vmem:[#allocation220_spill] sm:$0xff] }
 0x4bc   :  { %v4454_v53 = vsel %vm2069_vm10, %v4448_v61, %v14824_v9  ;;  %v14842_v61 = vld [vmem:[#allocation154_spill] sm:$0xff] }
 0x4bd   :  { %v6593_v42 = vpop.permute.xlu0 %6592  ;;  %v3863_v63 = vpop.permute.xlu1 %3862  ;;  %v6711_v31 = vpack.i.bf16 %v14843_v8, %v14842_v61  ;;  %v14860_v8 = vld [vmem:[#allocation104_spill] sm:$0xff] }
 0x4be   :  { %6697 = vrot.lane.b32.xlu0 %v6696_v41, %s6818_s12  ;;  %v6594_v27 = vunpack.i.l.bf16 %v6593_v42  ;;  %v3880_v38 = vsel %vm14819_vm12, %v3712_v14, %v3863_v63  ;;  %v3670_v41 = vsel %vm2103_vm14, %v3664_v39, %v6584_v50  ;;  %vm14835_vm12 = vmmov %vm14823_vm4  ;;  %v6590_v50 = vunpack.i.h.bf16 %v11992_v11  ;;  %v14844_v11 = vld [vmem:[#allocation145_spill] sm:$0xff] }
 0x4bf   :  { %4090 = vrot.lane.b32.xlu1 %v4076_v44, %s6809_s22  ;;  %5669 = vmatprep.mubr.msk.f32.mxu1 %vm14820_vm3, %v3880_v38  ;;  %v3676_v56 = vsel %vm2110_vm11, %v3670_v41, %v6589_v58  ;;  %v14825_v44 = vld [vmem:[#allocation222_spill] sm:$0xff]  ;;  %vm14837_vm3 = vcmask 572416   ;;  %vm14838_vm4 = vcmask 1044480   ;;  %v6595_v38 = vunpack.i.h.bf16 %v6593_v42 }
 0x4c0   :  { %v4461_v15 = vsel %vm14826_vm5, %v4454_v53, %v14825_v44  ;;  %v3665_v63 = vsel %vm14837_vm3, %v3659_v24, %v14836_v51  ;;  %vm14841_vm5 = vmmov %vm14829_vm13  ;;  %v14847_v44 = vld [vmem:[#allocation271_spill] sm:$0xff] }
 0x4c1   :  { %v3557_v46 = vpop.permute.xlu1 %3556  ;;  %v4469_v58 = vsel %vm14835_vm12, %v4461_v15, %v14565_v1  ;;  %vm14845_vm13 = vmmov %vm14837_vm3  ;;  %vm14850_vm12 = vcmask 261120   ;;  %vm14852_vm3 = vcmask 998400  }
 0x4c2   :  { %4522 = vrot.lane.b32.xlu0 %v4510_v34, %s6824_s2  ;;  %v6598_v12 = vpop.permute.xlu0 %6597  ;;  %v14832_v34 = vpack.i.bf16 %v14830_v22, %v14831_v48  ;;  %v4477_v1 = vsel %vm14841_vm5, %v4469_v58, %v14840_v23  ;;  %v14851_v58 = vld [vmem:[#allocation153_spill] sm:$0xff]  ;;  %vm14855_vm5 = vcmask 326656  }
 0x4c3   :  { %6702 = vrot.lane.b32.xlu1 %v6701_v5, %s6820_s3  ;;  %v6599_v20 = vunpack.i.l.bf16 %v6598_v12  ;;  %v3682_v5 = vsel %vm2117_vm0, %v3676_v56, %v6594_v27  ;;  %v4041_v27 = vsel %vm14838_vm4, %v4038_v18, %v4040_v57  ;;  %v6600_v41 = vunpack.i.h.bf16 %v6598_v12  ;;  %v14846_v56 = vld [vmem:[#allocation134_spill] sm:$0xff] }
 0x4c4   :  { %v4485_v53 = vsel %vm14845_vm13, %v4477_v1, %v14844_v11  ;;  %v3671_v28 = vsel %vm2103_vm14, %v3665_v63, %v14846_v56  ;;  %vm14853_vm4 = vcmask 982016   ;;  %vm14856_vm13 = vcmask 1046528   ;;  %v14858_v1 = vld [vmem:[#allocation89_spill] sm:$0xff]  ;;  %v14862_v11 = vld [vmem:[#allocation167_spill] sm:$0xff] }
 0x4c5   :  { %v3688_v45 = vsel %vm14833_vm7, %v3682_v5, %v6599_v20  ;;  %v3607_v14 = vpop.permute.xlu1 %3606  ;;  %v6721_v20 = vpack.i.bf16 %v4040_v57, %v4041_v27  ;;  %v4493_v15 = vsel %vm2103_vm14, %v4485_v53, %v14847_v44  ;;  %v6560_v56 = vunpack.i.h.bf16 %v11860_v2 }
 0x4c6   :  { %4114 = vrot.lane.b32.xlu0 %v14827_v16, %s6819_s13  ;;  %v12047_v33 = vpop.permute.xlu0 %6602  ;;  %v3694_v39 = vsel %vm14834_vm1, %v3688_v45, %v3555_v54  ;;  %v14839_v54 = vld [vmem:[#allocation85_spill] sm:$0xff]  ;;  %v3677_v16 = vsel %vm2110_vm11, %v3671_v28, %v6590_v50  ;;  %v4511_v48 = vrot.slane %v4493_v15, 1  ;;  %vm14848_vm1 = vcmask 179200  }
 0x4c7   :  { %6707 = vrot.lane.b32.xlu1 %v14832_v34, %s6811_s24  ;;  %4880 = vmatmul.mubr.f32.gmra.mrb[24].mxu1 %v3694_v39  ;;  %v3683_v12 = vsel %vm2117_vm0, %v3677_v16, %v6595_v38  ;;  %v6604_v5 = vunpack.i.l.bf16 %v12047_v33  ;;  %v14849_v45 = vld [vmem:[#allocation65_spill] sm:$0xff] }
 0x4c8   :  { %v3689_v22 = vsel %vm14833_vm7, %v3683_v12, %v6600_v41  ;;  %v4512_v38 = vsel %vm14856_vm13, %v4509_v3, %v4511_v48  ;;  %vm14859_vm7 = vcmask 408576   ;;  %v6555_v3 = vunpack.i.h.bf16 %v11839_v0 }
 0x4c9   :  { %v3865_v42 = vpop.permute.xlu1 %3864  ;;  %v3695_v51 = vsel %vm14853_vm4, %v3689_v22, %v3557_v46  ;;  %vm14866_vm4 = vcmask 179200   ;;  %vm14870_vm13 = vcmask 998400  }
 0x4ca   :  { %4138 = vrot.lane.b32.xlu0 %v14805_v59, %s6807_s0  ;;  %v3589_v9 = vpop.permute.xlu0 %3588 }
 0x4cb   :  { %4166 = vrot.lane.b32.xlu1 %v14839_v54, %s6821_s16  ;;  %v3701_v18 = vsel %vm2138_vm2, %v3557_v46, %v3589_v9  ;;  %v14857_v54 = vld [vmem:[#allocation6_spill] sm:$0xff] }
 0x4cc   :  { %v3707_v40 = vsel %vm2145_vm15, %v3701_v18, %v3607_v14  ;;  %v14854_v14 = vld [vmem:[#allocation25_spill] sm:$0xff]  ;;  %v4077_v23 = vrot.slane %v14857_v54, 7 }
 0x4cd   :  { %v3591_v34 = vpop.permute.xlu1 %3590  ;;  %v3648_v63 = vsel %vm14855_vm5, %v14854_v14, %v6604_v5  ;;  %vm14867_vm5 = vcmask 261120   ;;  %v14869_v5 = vld [vmem:[#allocation82_spill] sm:$0xff]  ;;  %v14874_v14 = vld [vmem:[#allocation100_spill] sm:$0xff] }
 0x4ce   :  { %6712 = vrot.lane.b32.xlu0 %v6711_v31, %s6813_s26  ;;  %v3654_v61 = vsel %vm14859_vm7, %v3648_v63, %v14858_v1  ;;  %v6550_v31 = vunpack.i.h.bf16 %v11821_v26  ;;  %v6605_v26 = vunpack.i.h.bf16 %v12047_v33  ;;  %v14868_v33 = vld [vmem:[#allocation155_spill] sm:$0xff]  ;;  %vm14871_vm7 = vcmask 326656  }
 0x4cf   :  { %6722 = vrot.lane.b32.xlu1 %v6721_v20, %s6818_s12  ;;  %v3625_v24 = vpop.permute.xlu0 %3624  ;;  %v14879_v1 = vld [vmem:[#allocation163_spill] sm:$0xff] }
 0x4d0   :  { %v3713_v57 = vsel %vm14848_vm1, %v3707_v40, %v3625_v24  ;;  %vm14861_vm1 = vcmask 1040384   ;;  %v3641_v59 = vsel %vm2055_vm8, %v14642_v43, %v6550_v31  ;;  %v14872_v24 = vld [vmem:[#allocation156_spill] sm:$0xff] }
 0x4d1   :  { %v3881_v39 = vsel %vm14850_vm12, %v3713_v57, %v3865_v42  ;;  %v3609_v27 = vpop.permute.xlu1 %3608  ;;  %v4078_v19 = vsel %vm14861_vm1, %v4075_v29, %v4077_v23  ;;  %vm14863_vm12 = vcmask 490496   ;;  %v14864_v29 = vld [vmem:[#allocation91_spill] sm:$0xff]  ;;  %v3643_v2 = vsel %vm2062_vm9, %v3641_v59, %v6555_v3  ;;  %v14878_v23 = vld [vmem:[#allocation284_spill] sm:$0xff] }
 0x4d2   :  { %6717 = vrot.lane.b32.xlu0 %v14849_v45, %s6817_s30  ;;  %5670 = vmatprep.mubr.msk.f32.mxu1 %vm14852_vm3, %v3881_v39  ;;  %v3660_v53 = vsel %vm14863_vm12, %v3654_v61, %v14862_v11  ;;  %vm14865_vm3 = vcmask 572416   ;;  %v3645_v12 = vsel %vm2069_vm10, %v3643_v2, %v6560_v56  ;;  %vm14876_vm1 = vcmask 408576   ;;  %v14889_v2 = vld [vmem:[#allocation245_spill] sm:$0xff] }
 0x4d3   :  { %6727 = vrot.lane.b32.xlu1 %v14851_v58, %s6812_s25  ;;  %v3559_v50 = vpop.permute.xlu0 %3558  ;;  %4885 = vmatmul.mubr.f32.gmra.mrb[26].mxu1 %v3695_v51  ;;  %v3666_v42 = vsel %vm14865_vm3, %v3660_v53, %v14864_v29  ;;  %v3649_v40 = vsel %vm14871_vm7, %v3645_v12, %v6605_v26  ;;  %v14873_v51 = vld [vmem:[#allocation98_spill] sm:$0xff]  ;;  %vm14877_vm12 = vcmask 900096   ;;  %v6575_v61 = vunpack.i.h.bf16 %v11909_v52  ;;  %v14884_v53 = vld [vmem:[#allocation124_spill] sm:$0xff]  ;;  %v14891_v12 = vld [vmem:[#allocation277_spill] sm:$0xff] }
 0x4d4   :  { %v3702_v41 = vsel %vm2138_vm2, %v3559_v50, %v3591_v34  ;;  %v3672_v22 = vsel %vm2103_vm14, %v3666_v42, %v14872_v24  ;;  %v6570_v34 = vunpack.i.h.bf16 %v11927_v7  ;;  %v14875_v63 = vpack.i.bf16 %v14873_v51, %v14874_v14  ;;  %v14885_v52 = vld [vmem:[#allocation58_spill] sm:$0xff]  ;;  %v14895_v51 = vld [vmem:[#allocation267_spill] sm:$0xff] }
 0x4d5   :  { %v3708_v28 = vsel %vm2145_vm15, %v3702_v41, %v3609_v27  ;;  %v6741_v7 = vpack.i.bf16 %v14879_v1, %v14878_v23  ;;  %vm14880_vm3 = vcmask 982016   ;;  %v4080_v56 = vrot.slane %v14884_v53, 7 }
 0x4d6   :  { %4524 = vrot.lane.b32.xlu0 %v4512_v38, %s6824_s2  ;;  %v3655_v38 = vsel %vm14876_vm1, %v3649_v40, %v6570_v34  ;;  %v6580_v26 = vunpack.i.h.bf16 %v11953_v37  ;;  %v6585_v42 = vunpack.i.h.bf16 %v11934_v35  ;;  %v14893_v34 = vld [vmem:[#allocation70_spill] sm:$0xff]  ;;  %vm14894_vm1 = vmmov %vm14871_vm7 }
 0x4d7   :  { %4116 = vrot.lane.b32.xlu1 %v14860_v8, %s6819_s13  ;;  %v12099_v46 = vpop.permute.xlu0 %6607 }
 0x4d8   :  { %v3627_v9 = vpop.permute.xlu1 %3626  ;;  %v6609_v0 = vunpack.i.l.bf16 %v12099_v46  ;;  %v6610_v59 = vunpack.i.h.bf16 %v12099_v46  ;;  %v14890_v46 = vld [vmem:[#allocation282_spill] sm:$0xff] }
 0x4d9   :  { %v3714_v20 = vsel %vm14866_vm4, %v3708_v28, %v3627_v9  ;;  %v14881_v9 = vld [vmem:[#allocation190_spill] sm:$0xff]  ;;  %vm14883_vm4 = vcmask 490496  }
 0x4da   :  { %4092 = vrot.lane.b32.xlu0 %v4078_v19, %s6809_s22  ;;  %v3678_v45 = vsel %vm2110_vm11, %v3672_v22, %v6609_v0  ;;  %v14882_v19 = vld [vmem:[#allocation199_spill] sm:$0xff]  ;;  %v3661_v11 = vsel %vm14883_vm4, %v3655_v38, %v6575_v61  ;;  %vm14898_vm4 = vcmask 179200  }
 0x4db   :  { %4140 = vrot.lane.b32.xlu1 %v14857_v54, %s6807_s0  ;;  %v6751_v3 = vpack.i.bf16 %v14882_v19, %v14881_v9  ;;  %v14905_v19 = vld [vmem:[#allocation16_spill] sm:$0xff] }
 0x4dc   :  { %v6613_v18 = vpop.permute.xlu0 %6612  ;;  %v3867_v44 = vpop.permute.xlu1 %3866 }
 0x4dd   :  { %v6614_v15 = vunpack.i.l.bf16 %v6613_v18  ;;  %v3882_v16 = vsel %vm14867_vm5, %v3714_v20, %v3867_v44  ;;  %vm14886_vm5 = vcmask 572416   ;;  %v6615_v20 = vunpack.i.h.bf16 %v6613_v18  ;;  %v14887_v44 = vld [vmem:[#allocation157_spill] sm:$0xff] }
 0x4de   :  { %6732 = vrot.lane.b32.xlu0 %v14868_v33, %s6808_s21  ;;  %5671 = vmatprep.mubr.msk.f32.mxu1 %vm14870_vm13, %v3882_v16  ;;  %v3667_v0 = vsel %vm14886_vm5, %v3661_v11, %v6580_v26  ;;  %vm14888_vm13 = vcmask 1040384   ;;  %vm14899_vm5 = vcmask 261120   ;;  %v14907_v11 = vld [vmem:[#allocation73_spill] sm:$0xff]  ;;  %s6831_s21 = smov 112  }
 0x4df   :  { %4168 = vrot.lane.b32.xlu1 %v14869_v5, %s6821_s16  ;;  %v3684_v27 = vsel %vm2117_vm0, %v3678_v45, %v6614_v15  ;;  %v3673_v33 = vsel %vm2103_vm14, %v3667_v0, %v6585_v42  ;;  %v14892_v5 = vld [vmem:[#allocation276_spill] sm:$0xff] }
 0x4e0   :  { %v6618_v57 = vpop.permute.xlu0 %6617  ;;  %v4463_v40 = vsel %vm14871_vm7, %v14892_v5, %v14891_v12  ;;  %v3679_v24 = vsel %vm2110_vm11, %v3673_v33, %v6610_v59  ;;  %vm14903_vm7 = vcmask 998400   ;;  %v14911_v59 = vld [vmem:[#allocation132_spill] sm:$0xff] }
 0x4e1   :  { %v6619_v39 = vunpack.i.l.bf16 %v6618_v57  ;;  %v3561_v58 = vpop.permute.xlu1 %3560  ;;  %v6620_v15 = vunpack.i.h.bf16 %v6618_v57  ;;  %v3685_v57 = vsel %vm2117_vm0, %v3679_v24, %v6615_v20  ;;  %v14912_v20 = vld [vmem:[#allocation59_spill] sm:$0xff]  ;;  %v14920_v33 = vld [vmem:[#allocation228_spill] sm:$0xff] }
 0x4e2   :  { %6737 = vrot.lane.b32.xlu0 %v14875_v63, %s6814_s27  ;;  %v14896_v63 = vld [vmem:[#allocation103_spill] sm:$0xff] }
 0x4e3   :  { %4526 = vrot.lane.b32.xlu1 %v4511_v48, %s6824_s2  ;;  %v3690_v54 = vsel %vm14877_vm12, %v3684_v27, %v6619_v39  ;;  %v4079_v48 = vrot.slane %v14648_v10, 7  ;;  %v3691_v14 = vsel %vm14877_vm12, %v3685_v57, %v6620_v15  ;;  %vm14906_vm12 = vcmask 490496   ;;  %v14917_v15 = vld [vmem:[#allocation183_spill] sm:$0xff] }
 0x4e4   :  { %v12145_v8 = vpop.permute.xlu0 %6622  ;;  %v3696_v31 = vsel %vm14880_vm3, %v3690_v54, %v3559_v50  ;;  %v4443_v50 = vsel %vm2055_vm8, %v14618_v60, %v14885_v52  ;;  %vm14897_vm3 = vcmask 408576   ;;  %v6756_v52 = vpack.i.bf16 %v14646_v13, %v14668_v21  ;;  %v14919_v21 = vld [vmem:[#allocation298_spill] sm:$0xff] }
 0x4e5   :  { %v3611_v41 = vpop.permute.xlu1 %3610  ;;  %4890 = vmatmul.mubr.f32.gmra.mrb[28].mxu1 %v3696_v31  ;;  %v4081_v37 = vsel %vm14888_vm13, %v4079_v48, %v4080_v56  ;;  %v4449_v60 = vsel %vm2062_vm9, %v4443_v50, %v14889_v2  ;;  %v4471_v27 = vsel %vm14897_vm3, %v4463_v40, %v14896_v63  ;;  %vm14901_vm13 = vmmov %vm14897_vm3  ;;  %v6624_v31 = vunpack.i.l.bf16 %v12145_v8  ;;  %v14909_v50 = vld [vmem:[#allocation159_spill] sm:$0xff]  ;;  %v14915_v2 = vld [vmem:[#allocation69_spill] sm:$0xff] }
 0x4e6   :  { %6742 = vrot.lane.b32.xlu0 %v6741_v7, %s6810_s23  ;;  %v4455_v16 = vsel %vm2069_vm10, %v4449_v60, %v14890_v46  ;;  %v14900_v7 = vld [vmem:[#allocation105_spill] sm:$0xff]  ;;  %vm14908_vm3 = vmmov %vm14906_vm12  ;;  %v14923_v40 = vld [vmem:[#allocation62_spill] sm:$0xff]  ;;  %v4044_v57 = vrot.slane %v14670_v6, 3 }
 0x4e7   :  { %6752 = vrot.lane.b32.xlu1 %v6751_v3, %s6815_s28  ;;  %v4462_v45 = vsel %vm14894_vm1, %v4455_v16, %v14893_v34  ;;  %vm14904_vm1 = vcmask 982016   ;;  %v4479_v3 = vsel %vm14906_vm12, %v4471_v27, %v14905_v19  ;;  %v4042_v16 = vrot.slane %v14637_v62, 3  ;;  %v14924_v34 = vld [vmem:[#allocation60_spill] sm:$0xff]  ;;  %v14929_v63 = vld [vmem:[#allocation18_spill] sm:$0xff] }
 0x4e8   :  { %v3593_v28 = vpop.permute.xlu0 %3592  ;;  %v4470_v61 = vsel %vm14901_vm13, %v4462_v45, %v14900_v7  ;;  %v3697_v9 = vsel %vm14904_vm1, %v3691_v14, %v3561_v58  ;;  %vm14918_vm13 = vcmask 326656   ;;  %v14928_v14 = vld [vmem:[#allocation221_spill] sm:$0xff] }
 0x4e9   :  { %v12161_v29 = vpop.permute.xlu1 %6627  ;;  %v3703_v35 = vsel %vm2138_vm2, %v3561_v58, %v3593_v28  ;;  %v4444_v28 = vsel %vm2055_vm8, %v14679_v47, %v14909_v50  ;;  %v14910_v58 = vld [vmem:[#allocation281_spill] sm:$0xff]  ;;  %v3650_v13 = vsel %vm14918_vm13, %v14917_v15, %v6624_v31  ;;  %vm14925_vm1 = vmmov %vm14918_vm13  ;;  %vm14934_vm13 = vcmask 1044480  }
 0x4ea   :  { %6747 = vrot.lane.b32.xlu0 %v14887_v44, %s6812_s25  ;;  %v3709_v39 = vsel %vm2145_vm15, %v3703_v35, %v3611_v41  ;;  %v14902_v41 = vrot.slane %v14637_v62, 4  ;;  %v6761_v0 = vpack.i.bf16 %v14911_v59, %v14910_v58  ;;  %v4450_v44 = vsel %vm2062_vm9, %v4444_v28, %v14912_v20  ;;  %v14926_v62 = vld [vmem:[#allocation285_spill] sm:$0xff] }
 0x4eb   :  { %4096 = vrot.lane.b32.xlu1 %v4081_v37, %s6809_s22  ;;  %v14913_v37 = vld [vmem:[#allocation51_spill] sm:$0xff]  ;;  %v4456_v35 = vsel %vm2069_vm10, %v4450_v44, %v14920_v33  ;;  %v14939_v28 = vld [vmem:[#allocation137_spill] sm:$0xff] }
 0x4ec   :  { %v3629_v18 = vpop.permute.xlu0 %3628  ;;  %v4464_v45 = vsel %vm14925_vm1, %v4456_v35, %v14924_v34  ;;  %vm14938_vm1 = vcmask 1046528   ;;  %v4082_v58 = vrot.slane %v14939_v28, 7  ;;  %v14947_v34 = vld [vmem:[#allocation286_spill] sm:$0xff] }
 0x4ed   :  { %v12180_v22 = vpop.permute.xlu1 %6632  ;;  %v3715_v38 = vsel %vm14898_vm4, %v3709_v39, %v3629_v18  ;;  %vm14914_vm4 = vcmask 572416   ;;  %v14921_v18 = vld [vmem:[#allocation258_spill] sm:$0xff] }
 0x4ee   :  { %4094 = vrot.lane.b32.xlu0 %v4079_v48, %s6809_s22  ;;  %v4478_v48 = vsel %vm14908_vm3, %v4470_v61, %v14907_v11  ;;  %v14932_v61 = vld [vmem:[#allocation133_spill] sm:$0xff]  ;;  %v14936_v11 = vld [vmem:[#allocation75_spill] sm:$0xff] }
 0x4ef   :  { %4120 = vrot.lane.b32.xlu1 %v14895_v51, %s6819_s13 }
 0x4f0   :  { %v3869_v54 = vpop.permute.xlu0 %3868 }
 0x4f1   :  { %v3883_v23 = vsel %vm14899_vm5, %v3715_v38, %v3869_v54  ;;  %v3595_v1 = vpop.permute.xlu1 %3594  ;;  %vm14916_vm5 = vmmov %vm14914_vm4  ;;  %v14930_v38 = vld [vmem:[#allocation301_spill] sm:$0xff] }
 0x4f2   :  { %4118 = vrot.lane.b32.xlu0 %v14902_v41, %s6819_s13  ;;  %5672 = vmatprep.mubr.msk.f32.mxu1 %vm14903_vm7, %v3883_v23  ;;  %v4486_v60 = vsel %vm14916_vm5, %v4478_v48, %v14915_v2  ;;  %vm14922_vm7 = vcmask 408576  }
 0x4f3   :  { %4142 = vrot.lane.b32.xlu1 %v14648_v10, %s6807_s0  ;;  %4895 = vmatmul.mubr.f32.gmra.mrb[30].mxu1 %v3697_v9  ;;  %v4487_v10 = vsel %vm14914_vm4, %v4479_v3, %v14913_v37  ;;  %v4494_v47 = vsel %vm2103_vm14, %v4486_v60, %v14919_v21  ;;  %v3656_v12 = vsel %vm14922_vm7, %v3650_v13, %v14921_v18  ;;  %vm14927_vm12 = vmmov %vm14922_vm7  ;;  %v14933_v9 = vrot.slane %v14642_v43, 3  ;;  %v14940_v43 = vld [vmem:[#allocation262_spill] sm:$0xff]  ;;  %v14942_v60 = vld [vmem:[#allocation303_spill] sm:$0xff] }
 0x4f4   :  { %v12208_v26 = vpop.permute.xlu0 %3562  ;;  %v4495_v24 = vsel %vm2103_vm14, %v4487_v10, %v14923_v40  ;;  %v4513_v39 = vrot.slane %v4494_v47, 1  ;;  %v4472_v51 = vsel %vm14927_vm12, %v4464_v45, %v14926_v62  ;;  %vm14931_vm4 = vmmov %vm14908_vm3  ;;  %v14944_v18 = vld [vmem:[#allocation306_spill] sm:$0xff]  ;;  %v14949_v62 = vld [vmem:[#allocation263_spill] sm:$0xff] }
 0x4f5   :  { %v12217_v42 = vpop.permute.xlu1 %6642  ;;  %v4480_v27 = vsel %vm14908_vm3, %v4472_v51, %v14929_v63  ;;  %v3662_v54 = vsel %vm14931_vm4, %v3656_v12, %v14930_v38  ;;  %v4514_v7 = vrot.slane %v4495_v24, 1  ;;  %v4043_v19 = vsel %vm14934_vm13, %v14933_v9, %v4042_v16  ;;  %vm14935_vm7 = vmmov %vm14934_vm13  ;;  %v14951_v63 = vld [vmem:[#allocation244_spill] sm:$0xff]  ;;  %v14953_v38 = vld [vmem:[#allocation299_spill] sm:$0xff] }
 0x4f6   :  { %6757 = vrot.lane.b32.xlu0 %v6756_v52, %s6820_s3  ;;  %v4488_v31 = vsel %vm14916_vm5, %v4480_v27, %v14932_v61  ;;  %v4045_v3 = vsel %vm14935_vm7, %v4042_v16, %v4044_v57  ;;  %v14937_v52 = vld [vmem:[#allocation213_spill] sm:$0xff]  ;;  %v6644_v59 = vunpack.i.l.bf16 %v12217_v42  ;;  %vm14941_vm12 = vmmov %vm14916_vm5  ;;  %vm14943_vm3 = vcmask 1040384  }
 0x4f7   :  { %6762 = vrot.lane.b32.xlu1 %v6761_v0, %s6813_s26  ;;  %v12265_v48 = vsel %vm2103_vm14, %v4488_v31, %v14936_v11  ;;  %v4515_v50 = vsel %vm14938_vm1, %v4513_v39, %v4514_v7  ;;  %v3668_v0 = vsel %vm14941_vm12, %v3662_v54, %v14940_v43  ;;  %v6766_v44 = vpack.i.bf16 %v4045_v3, %v4043_v19  ;;  %vm14945_vm4 = vmmov %vm14938_vm1  ;;  %v14961_v3 = vld [vmem:[#allocation234_spill] sm:$0xff] }
 0x4f8   :  { %v12231_v46 = vpop.permute.xlu0 %6637  ;;  %v4516_v37 = vrot.slane %v12265_v48, 1  ;;  %v3674_v15 = vsel %vm2103_vm14, %v3668_v0, %v14942_v60  ;;  %v4083_v13 = vsel %vm14943_vm3, %v4080_v56, %v4082_v58  ;;  %v3704_v16 = vsel %vm2138_vm2, %v12208_v26, %v3595_v1  ;;  %v14966_v60 = vld [vmem:[#allocation79_spill] sm:$0xff] }
 0x4f9   :  { %v12238_v5 = vpop.permute.xlu1 %6647  ;;  %v3680_v21 = vsel %vm2110_vm11, %v3674_v15, %v6644_v59  ;;  %v4445_v12 = vsel %vm2055_vm8, %v14664_v55, %v14944_v18  ;;  %v6771_v24 = vpack.i.bf16 %v14743_v25, %v14686_v32  ;;  %vm14946_vm5 = vcmask 900096  }
 0x4fa   :  { %4144 = vrot.lane.b32.xlu0 %v14884_v53, %s6807_s0  ;;  %v4517_v40 = vsel %vm14945_vm4, %v4514_v7, %v4516_v37  ;;  %v4451_v45 = vsel %vm2062_vm9, %v4445_v12, %v14947_v34  ;;  %vm14948_vm13 = vcmask 179200   ;;  %vm14952_vm7 = vcmask 261120  }
 0x4fb   :  { %4172 = vrot.lane.b32.xlu1 %v14928_v14, %s6821_s16  ;;  %v4457_v51 = vsel %vm2069_vm10, %v4451_v45, %v14949_v62  ;;  %v14950_v14 = vld [vmem:[#allocation215_spill] sm:$0xff]  ;;  %vm14954_vm1 = vcmask 326656   ;;  %vm14956_vm12 = vcmask 998400   ;;  %vm14957_vm3 = vcmask 982016  }
 0x4fc   :  { %v3613_v23 = vpop.permute.xlu0 %3612  ;;  %v6776_v27 = vpack.i.bf16 %v14951_v63, %v14950_v14  ;;  %v4465_v54 = vsel %vm14954_vm1, %v4457_v51, %v14953_v38  ;;  %v4046_v61 = vrot.slane %v14721_v49, 3  ;;  %vm14958_vm4 = vcmask 408576   ;;  %v14965_v49 = vld [vmem:[#allocation138_spill] sm:$0xff] }
 0x4fd   :  { %v3631_v41 = vpop.permute.xlu1 %3630  ;;  %v3710_v53 = vsel %vm2145_vm15, %v3704_v16, %v3613_v23  ;;  %v14955_v23 = vld [vmem:[#allocation283_spill] sm:$0xff]  ;;  %v4473_v31 = vsel %vm14958_vm4, %v4465_v54, %v14674_v30  ;;  %v6635_v59 = vunpack.i.h.bf16 %v12180_v22  ;;  %vm14967_vm1 = vcmask 1040384   ;;  %v14970_v16 = vld [vmem:[#allocation248_spill] sm:$0xff]  ;;  %v14983_v54 = vld [vmem:[#allocation270_spill] sm:$0xff] }
 0x4fe   :  { %4170 = vrot.lane.b32.xlu0 %v14937_v52, %s6821_s16  ;;  %v3716_v55 = vsel %vm14948_vm13, %v3710_v53, %v3631_v41  ;;  %v14959_v41 = vld [vmem:[#allocation189_spill] sm:$0xff]  ;;  %vm14962_vm13 = vcmask 572416   ;;  %v14963_v52 = vld [vmem:[#allocation140_spill] sm:$0xff]  ;;  %v14974_v53 = vld [vmem:[#allocation158_spill] sm:$0xff]  ;;  %v6629_v14 = vunpack.i.l.bf16 %v12161_v29  ;;  %v6645_v38 = vunpack.i.h.bf16 %v12217_v42 }
 0x4ff   :  { %4528 = vrot.lane.b32.xlu1 %v4515_v50, %s6824_s2  ;;  %v4084_v50 = vrot.slane %v14965_v49, 7 }
 0x500   :  { %v12275_v20 = vpop.permute.xlu0 %6652 }
 0x501   :  { %v6654_v10 = vunpack.i.l.bf16 %v12275_v20  ;;  %v12279_v2 = vpop.permute.xlu1 %6662  ;;  %v4085_v6 = vsel %vm14967_vm1, %v4082_v58, %v4084_v50  ;;  %v6649_v50 = vunpack.i.l.bf16 %v12238_v5 }
 0x502   :  { %6767 = vrot.lane.b32.xlu0 %v6766_v44, %s6818_s12  ;;  %v6664_v47 = vunpack.i.l.bf16 %v12279_v2 }
 0x503   :  { %4098 = vrot.lane.b32.xlu1 %v4083_v13, %s6809_s22  ;;  %v3686_v35 = vsel %vm2117_vm0, %v3680_v21, %v6654_v10  ;;  %v6625_v10 = vunpack.i.h.bf16 %v12145_v8 }
 0x504   :  { %v12292_v33 = vpop.permute.xlu0 %6657  ;;  %v3692_v1 = vsel %vm14946_vm5, %v3686_v35, %v6664_v47  ;;  %vm14960_vm5 = vcmask 490496   ;;  %v14972_v35 = vld [vmem:[#allocation195_spill] sm:$0xff] }
 0x505   :  { %v12299_v56 = vpop.permute.xlu1 %6667  ;;  %v3698_v7 = vsel %vm14957_vm3, %v3692_v1, %v12208_v26  ;;  %v4481_v9 = vsel %vm14960_vm5, %v4473_v31, %v14959_v41  ;;  %vm14971_vm3 = vcmask 326656   ;;  %vm14975_vm5 = vcmask 408576   ;;  %v14985_v41 = vld [vmem:[#allocation38_spill] sm:$0xff] }
 0x506   :  { %4530 = vrot.lane.b32.xlu0 %v4517_v40, %s6824_s2  ;;  %v4489_v11 = vsel %vm14962_vm13, %v4481_v9, %v14961_v3  ;;  %v3651_v8 = vsel %vm14971_vm3, %v14970_v16, %v6625_v10  ;;  %v6670_v58 = vunpack.i.h.bf16 %v12299_v56  ;;  %vm14973_vm4 = vmmov %vm14971_vm3  ;;  %v4186_v9 = vsel %vm2055_vm8, %v14985_v41, %v6629_v14 }
 0x507   :  { %6772 = vrot.lane.b32.xlu1 %v6771_v24, %s6820_s3  ;;  %v4497_v26 = vsel %vm2103_vm14, %v4489_v11, %v14963_v52  ;;  %vm14977_vm13 = vmmov %vm14975_vm5  ;;  %v6655_v3 = vunpack.i.h.bf16 %v12275_v20  ;;  %v14986_v52 = vld [vmem:[#allocation32_spill] sm:$0xff]  ;;  %v6665_v20 = vunpack.i.h.bf16 %v12279_v2  ;;  %v6659_v10 = vunpack.i.l.bf16 %v12292_v33 }
 0x508   :  { %v3871_v39 = vpop.permute.xlu0 %3870  ;;  %v4518_v0 = vrot.slane %v4497_v26, 1  ;;  %v6669_v16 = vunpack.i.l.bf16 %v12299_v56 }
 0x509   :  { %v3884_v32 = vsel %vm14952_vm7, %v3716_v55, %v3871_v39  ;;  %v12315_v25 = vpop.permute.xlu1 %3596  ;;  %vm14964_vm7 = vcmask 1044480   ;;  %v14979_v55 = vld [vmem:[#allocation280_spill] sm:$0xff] }
 0x50a   :  { %4122 = vrot.lane.b32.xlu0 %v14955_v23, %s6819_s13  ;;  %5673 = vmatprep.mubr.msk.f32.mxu1 %vm14956_vm12, %v3884_v32  ;;  %v4047_v30 = vsel %vm14964_vm7, %v4044_v57, %v4046_v61  ;;  %vm14969_vm12 = vcmask 1046528   ;;  %vm14978_vm7 = vcmask 490496   ;;  %v14980_v39 = vld [vmem:[#allocation112_spill] sm:$0xff]  ;;  %v14982_v32 = vld [vmem:[#allocation111_spill] sm:$0xff] }
 0x50b   :  { %6777 = vrot.lane.b32.xlu1 %v6776_v27, %s6813_s26  ;;  %4900 = vmatmul.mubr.f32.gmra.mrb[32].mxu1 %v3698_v7  ;;  %v4519_v47 = vsel %vm14969_vm12, %v4516_v37, %v4518_v0  ;;  %v14976_v37 = vld [vmem:[#allocation268_spill] sm:$0xff]  ;;  %vm14981_vm1 = vmmov %vm14978_vm7  ;;  %v6634_v27 = vunpack.i.l.bf16 %v12180_v22  ;;  %vm14984_vm12 = vcmask 572416   ;;  %v6640_v7 = vunpack.i.h.bf16 %v12231_v46 }
 0x50c   :  { %v12330_v19 = vpop.permute.xlu0 %3564  ;;  %v3657_v1 = vsel %vm14977_vm13, %v3651_v8, %v14976_v37  ;;  %vm14989_vm13 = vcmask 179200  }
 0x50d   :  { %v12334_v48 = vpop.permute.xlu1 %3614  ;;  %v3663_v62 = vsel %vm14981_vm1, %v3657_v1, %v14980_v39  ;;  %v4188_v22 = vsel %vm2062_vm9, %v4186_v9, %v6634_v27  ;;  %vm14991_vm1 = vmmov %vm14975_vm5 }
 0x50e   :  { %4146 = vrot.lane.b32.xlu0 %v14939_v28, %s6807_s0  ;;  %v14968_v28 = vld [vmem:[#allocation227_spill] sm:$0xff]  ;;  %v3669_v23 = vsel %vm14984_vm12, %v3663_v62, %v14983_v54  ;;  %vm14992_vm12 = vcmask 261120  }
 0x50f   :  { %4060 = vrot.lane.b32.xlu1 %v4047_v30, %s6818_s12  ;;  %v4189_v57 = vsel %vm2062_vm9, %v14968_v28, %v6635_v59  ;;  %v3675_v26 = vsel %vm2103_vm14, %v3669_v23, %v14986_v52  ;;  %v14987_v30 = vld [vmem:[#allocation225_spill] sm:$0xff] }
 0x510   :  { %v12346_v43 = vpop.permute.xlu0 %6672  ;;  %v4194_v18 = vsel %vm2069_vm10, %v4189_v57, %v14972_v35  ;;  %v3681_v42 = vsel %vm2110_vm11, %v3675_v26, %v6645_v38 }
 0x511   :  { %v12348_v44 = vpop.permute.xlu1 %6682  ;;  %v3687_v57 = vsel %vm2117_vm0, %v3681_v42, %v6655_v3 }
 0x512   :  { %4174 = vrot.lane.b32.xlu0 %v14966_v60, %s6821_s16  ;;  %v3705_v60 = vsel %vm2138_vm2, %v12330_v19, %v12315_v25  ;;  %v6684_v1 = vunpack.i.l.bf16 %v12348_v44 }
 0x513   :  { %4100 = vrot.lane.b32.xlu1 %v4085_v6, %s6809_s22  ;;  %v6660_v6 = vunpack.i.h.bf16 %v12292_v33 }
 0x514   :  { %v12357_v15 = vpop.permute.xlu0 %6677 }
 0x515   :  { %v6680_v13 = vunpack.i.h.bf16 %v12357_v15  ;;  %v12360_v21 = vpop.permute.xlu1 %4088 }
 0x516   :  { %4532 = vrot.lane.b32.xlu0 %v4519_v47, %s6824_s2  ;;  %v3711_v47 = vsel %vm2145_vm15, %v3705_v60, %v12334_v48 }
 0x517   :  { %v4201_v12 = vsel %vm14973_vm4, %v4194_v18, %v6680_v13  ;;  %4148 = vrot.lane.b32.xlu1 %v14965_v49, %s6807_s0  ;;  %v4193_v49 = vsel %vm2069_vm10, %v14987_v30, %v6640_v7  ;;  %vm14988_vm4 = vmmov %vm14971_vm3  ;;  %v6675_v18 = vunpack.i.h.bf16 %v12346_v43 }
 0x518   :  { %v4209_v40 = vsel %vm14975_vm5, %v4201_v12, %v14974_v53  ;;  %v12374_v24 = vpop.permute.xlu0 %4086 }
 0x519   :  { %v12379_v34 = vsel %vm14978_vm7, %v4209_v40, %v6670_v58  ;;  %v12381_v45 = vpop.permute.xlu1 %4112  ;;  %vm14990_vm7 = vcmask 900096   ;;  %v6674_v58 = vunpack.i.l.bf16 %v12346_v43  ;;  %v14996_v40 = vld [vmem:[#allocation84_spill] sm:$0xff] }
 0x51a   :  { %4124 = vrot.lane.b32.xlu0 %v14979_v55, %s6819_s13  ;;  %v3693_v35 = vsel %vm14990_vm7, %v3687_v57, %v6665_v20  ;;  %vm14998_vm7 = vcmask 572416   ;;  %v4271_v30 = vsel %vm2138_vm2, %v12360_v21, %v12381_v45 }
 0x51b   :  { %4062 = vrot.lane.b32.xlu1 %v4046_v61, %s6818_s12  ;;  %v6639_v61 = vunpack.i.l.bf16 %v12231_v46  ;;  %v6650_v46 = vunpack.i.h.bf16 %v12238_v5 }
 0x51c   :  { %v4111_v51 = vpop.permute.xlu0 %4110 }
 0x51d   :  { %v12389_v63 = vpop.permute.xlu1 %6687  ;;  %v4192_v59 = vsel %vm2069_vm10, %v4188_v22, %v6639_v61  ;;  %v4199_v5 = vsel %vm14988_vm4, %v4193_v49, %v6650_v46  ;;  %vm14994_vm4 = vcmask 982016   ;;  %v6679_v61 = vunpack.i.l.bf16 %v12357_v15 }
 0x51e   :  { %4176 = vrot.lane.b32.xlu0 %v14982_v32, %s6821_s16  ;;  %v4198_v13 = vsel %vm14971_vm3, %v4192_v59, %v6649_v50  ;;  %v4207_v33 = vsel %vm14991_vm1, %v4199_v5, %v6660_v6  ;;  %vm14993_vm3 = vcmask 998400   ;;  %v3699_v48 = vsel %vm14994_vm4, %v3693_v35, %v12330_v19  ;;  %vm14999_vm1 = vmmov %vm14998_vm7  ;;  %v15010_v35 = vld [vmem:[#allocation115_spill] sm:$0xff] }
 0x51f   :  { %v4206_v2 = vsel %vm14975_vm5, %v4198_v13, %v6659_v10  ;;  %vm14995_vm5 = vcmask 490496   ;;  %v6690_v62 = vunpack.i.h.bf16 %v12389_v63  ;;  %v6689_v14 = vunpack.i.l.bf16 %v12389_v63 }
 0x520   :  { %v3633_v31 = vpop.permute.xlu0 %3632  ;;  %v4214_v56 = vsel %vm14995_vm5, %v4206_v2, %v6669_v16  ;;  %v4270_v19 = vsel %vm2138_vm2, %v12374_v24, %v4111_v51  ;;  %vm15003_vm4 = vcmask 900096  }
 0x521   :  { %v4137_v11 = vpop.permute.xlu1 %4136  ;;  %v3717_v8 = vsel %vm14989_vm13, %v3711_v47, %v3633_v31  ;;  %vm14997_vm13 = vmmov %vm14995_vm5  ;;  %v4222_v39 = vsel %vm14998_vm7, %v4214_v56, %v6674_v58  ;;  %v15000_v31 = vld [vmem:[#allocation87_spill] sm:$0xff]  ;;  %vm15006_vm7 = vcmask 982016   ;;  %v12488_v58 = vld [vmem:[%s13224_s5] ss:$0 sm:$0xff]  ;;  %s6832_s5 = smov 24  }
 0x522   :  { %4534 = vrot.lane.b32.xlu0 %v4518_v0, %s6824_s2  ;;  %v4215_v37 = vsel %vm14997_vm13, %v4207_v33, %v14996_v40  ;;  %v4230_v7 = vsel %vm2103_vm14, %v4222_v39, %v6684_v1  ;;  %v4279_v46 = vsel %vm2145_vm15, %v4271_v30, %v4137_v11  ;;  %vm15004_vm5 = vmmov %vm15003_vm4  ;;  %v15008_v11 = vld [vmem:[#allocation77_spill] sm:$0xff] }
 0x523   :  { %v4223_v43 = vsel %vm14999_vm1, %v4215_v37, %v6675_v18  ;;  %v4238_v22 = vsel %vm2110_vm11, %v4230_v7, %v6689_v14  ;;  %vm15007_vm1 = vmmov %vm15006_vm7  ;;  %v12498_v37 = vadd.f32 %v12488_v58, %v11372_v4  ;;  %v15015_v14 = vld [vmem:[#allocation121_spill] sm:$0xff] }
 0x524   :  { %v4135_v0 = vpop.permute.xlu0 %4134  ;;  %v4231_v41 = vsel %vm2103_vm14, %v4223_v43, %v15000_v31 }
 0x525   :  { %v6693_v28 = vpop.permute.xlu1 %6692  ;;  %v4278_v54 = vsel %vm2145_vm15, %v4270_v19, %v4135_v0  ;;  %v4239_v51 = vsel %vm2110_vm11, %v4231_v41, %v6690_v62 }
 0x526   :  { %v6695_v32 = vunpack.i.h.bf16 %v6693_v28  ;;  %v6694_v38 = vunpack.i.l.bf16 %v6693_v28 }
 0x528   :  { %v3873_v25 = vpop.permute.xlu0 %3872  ;;  %v4246_v15 = vsel %vm2117_vm0, %v4238_v22, %v6694_v38  ;;  %v4247_v49 = vsel %vm2117_vm0, %v4239_v51, %v6695_v32  ;;  %v12510_v38 = vadd.f32 %v12488_v58, %v11413_v17 }
 0x529   :  { %v3885_v12 = vsel %vm14992_vm12, %v3717_v8, %v3873_v25  ;;  %v4165_v53 = vpop.permute.xlu1 %4164  ;;  %vm15001_vm12 = vcmask 179200  }
 0x52a   :  { %5674 = vmatprep.mubr.msk.f32.mxu1 %vm14993_vm3, %v3885_v12  ;;  %vm15002_vm3 = vcmask 261120   ;;  %vm15005_vm13 = vmmov %vm15001_vm12 }
 0x52b   :  { %4905 = vmatmul.mubr.f32.gmra.mrb[34].mxu1 %v3699_v48  ;;  %v4287_v60 = vsel %vm15005_vm13, %v4279_v46, %v4165_v53  ;;  %v15013_v48 = vld [vmem:[#allocation83_spill] sm:$0xff]  ;;  %vm15014_vm13 = vcmask 490496  }
 0x52c   :  { %v4163_v55 = vpop.permute.xlu0 %4162 }
 0x52d   :  { %v4521_v27 = vpop.permute.xlu1 %4520  ;;  %v4286_v9 = vsel %vm15001_vm12, %v4278_v54, %v4163_v55  ;;  %vm15009_vm12 = vcmask 326656  }
 0x52e   :  { %v4544_v50 = vsel %vm15002_vm3, %v4286_v9, %v4521_v27  ;;  %v4200_v57 = vsel %vm15009_vm12, %v15008_v11, %v6679_v61  ;;  %v15017_v61 = vld [vmem:[#allocation86_spill] sm:$0xff]  ;;  %vm15019_vm12 = vcmask 982016  }
 0x52f   :  { %v12445_v23 = vpop.f32.mrb[6].mxu1  ;;  %v4621_v16 = vrot.slane %v4544_v50, 4 }
 0x530   :  { %v6698_v63 = vpop.permute.xlu0 %6697  ;;  %v4838_v3 = vpop.f32.mrb[7].mxu1 }
 0x531   :  { %v6700_v52 = vunpack.i.h.bf16 %v6698_v63  ;;  %v6699_v26 = vunpack.i.l.bf16 %v6698_v63  ;;  %v12454_v42 = vpop.permute.xlu1 %4090 }
 0x533   :  { %v4254_v59 = vsel %vm15003_vm4, %v4246_v15, %v6699_v26  ;;  %v4255_v20 = vsel %vm15004_vm5, %v4247_v49, %v6700_v52  ;;  %v12465_v10 = vpop.f32.mrb[8].mxu1  ;;  %vm15011_vm4 = vcmask 408576   ;;  %vm15012_vm5 = vcmask 998400  }
 0x534   :  { %v4523_v0 = vpop.permute.xlu0 %4522  ;;  %v4843_v6 = vpop.f32.mrb[9].mxu1  ;;  %v4262_v45 = vsel %vm15006_vm7, %v4254_v59, %v12374_v24  ;;  %v12472_v28 = vsel %vm15007_vm1, %v4255_v20, %v12360_v21  ;;  %v4208_v24 = vsel %vm15011_vm4, %v4200_v57, %v15010_v35  ;;  %vm15016_vm7 = vcmask 572416   ;;  %v15022_v57 = vld [vmem:[#allocation161_spill] sm:$0xff] }
 0x535   :  { %v4545_v13 = vsel %vm15002_vm3, %v4287_v60, %v4523_v0  ;;  %v12477_v5 = vpop.permute.xlu1 %6702  ;;  %v4618_v47 = vrot.slane %v4262_v45, 4  ;;  %v4619_v2 = vrot.slane %v12472_v28, 4  ;;  %v4216_v56 = vsel %vm15014_vm13, %v4208_v24, %v15013_v48 }
 0x536   :  { %v4622_v8 = vrot.slane %v4545_v13, 4  ;;  %v6704_v62 = vunpack.i.l.bf16 %v12477_v5  ;;  %v4224_v27 = vsel %vm15016_vm7, %v4216_v56, %v15015_v14  ;;  %v12523_v52 = vadd.f32 %v12488_v58, %v11450_v36 }
 0x537   :  { %v12480_v25 = vpop.f32.mrb[10].mxu1  ;;  %v4620_v53 = vsel %vm1571_vm6, %v4618_v47, %v4619_v2  ;;  %v4232_v31 = vsel %vm2103_vm14, %v4224_v27, %v15017_v61  ;;  %vm15018_vm1 = vcmask 900096   ;;  %vm15020_vm3 = vcmask 179200  }
 0x538   :  { %v4115_v33 = vpop.permute.xlu0 %4114  ;;  %v4848_v21 = vpop.f32.mrb[11].mxu1  ;;  %v4623_v18 = vsel %vm1571_vm6, %v4621_v16, %v4622_v8  ;;  %v4240_v63 = vsel %vm2110_vm11, %v4232_v31, %v6704_v62  ;;  %vm15021_vm4 = vcmask 261120   ;;  %v6705_v11 = vunpack.i.h.bf16 %v12477_v5 }
 0x539   :  { %v12490_v12 = vpop.permute.xlu1 %6707  ;;  %5675 = vmatprep.mubr.msk.f32.mxu1 %vm15012_vm5, %v4623_v18  ;;  %v4272_v26 = vsel %vm2138_vm2, %v12454_v42, %v4115_v33  ;;  %vm15023_vm5 = vmmov %vm15016_vm7  ;;  %v6685_v16 = vunpack.i.h.bf16 %v12348_v44  ;;  %vm15024_vm13 = vcmask 998400  }
 0x53a   :  { %4910 = vmatmul.mubr.f32.gmra.mrb[36].mxu1 %v4620_v53  ;;  %v4225_v13 = vsel %vm15023_vm5, %v12379_v34, %v15022_v57  ;;  %vm15025_vm7 = vmmov %vm15018_vm1  ;;  %vm15032_vm5 = vcmask 326656  }
 0x53b   :  { %v4851_v40 = vpop.f32.mrb[12].mxu1  ;;  %v4233_v33 = vsel %vm2103_vm14, %v4225_v13, %v6685_v16 }
 0x53c   :  { %v12501_v1 = vadd.f32 %v12488_v58, %v4851_v40  ;;  %v4139_v55 = vpop.permute.xlu0 %4138  ;;  %v4853_v39 = vpop.f32.mrb[13].mxu1  ;;  %v4241_v5 = vsel %vm2110_vm11, %v4233_v33, %v6705_v11 }
 0x53d   :  { %v4167_v43 = vpop.permute.xlu1 %4166  ;;  %v4280_v50 = vsel %vm2145_vm15, %v4272_v26, %v4139_v55 }
 0x53e   :  { %v4940_v19 = vmax.f32 %v12498_v37, %v12501_v1  ;;  %v4288_v60 = vsel %vm15020_vm3, %v4280_v50, %v4167_v43  ;;  %v5110_v37 = vld [vmem:[%s13225_s6 + $0xd8] sm:$0xff] }
 0x53f   :  { %v4856_v32 = vpop.f32.mrb[14].mxu1 }
 0x540   :  { %v12513_v4 = vadd.f32 %v12488_v58, %v4856_v32  ;;  %v6713_v54 = vpop.permute.xlu0 %6712  ;;  %v4858_v7 = vpop.f32.mrb[15].mxu1 }
 0x541   :  { %v6714_v41 = vunpack.i.l.bf16 %v6713_v54  ;;  %v6723_v9 = vpop.permute.xlu1 %6722  ;;  %v6715_v35 = vunpack.i.h.bf16 %v6713_v54 }
 0x542   :  { %v4941_v3 = vmax.f32 %v12510_v38, %v12513_v4  ;;  %v6724_v22 = vunpack.i.l.bf16 %v6723_v9  ;;  %v6725_v53 = vunpack.i.h.bf16 %v6723_v9  ;;  %v5124_v38 = vld [vmem:[%s13225_s6 + $0x148] sm:$0xff]  ;;  %v5126_v4 = vld [vmem:[%s13225_s6 + $0x158] sm:$0xff] }
 0x543   :  { %v4248_v51 = vsel %vm2117_vm0, %v4240_v63, %v6714_v41  ;;  %v4861_v17 = vpop.f32.mrb[16].mxu1  ;;  %v4249_v34 = vsel %vm2117_vm0, %v4241_v5, %v6715_v35 }
 0x544   :  { %v4256_v30 = vsel %vm15018_vm1, %v4248_v51, %v6724_v22  ;;  %v12529_v15 = vadd.f32 %v12488_v58, %v4861_v17  ;;  %v12531_v49 = vpop.permute.xlu0 %6717  ;;  %v4863_v46 = vpop.f32.mrb[17].mxu1  ;;  %v4257_v40 = vsel %vm15025_vm7, %v4249_v34, %v6725_v53  ;;  %vm15026_vm1 = vmmov %vm15019_vm12  ;;  %v6630_v22 = vunpack.i.h.bf16 %v12161_v29  ;;  %v15030_v29 = vld [vmem:[#allocation135_spill] sm:$0xff] }
 0x545   :  { %v12534_v59 = vpop.permute.xlu1 %6727  ;;  %v4264_v36 = vsel %vm15019_vm12, %v4256_v30, %v12454_v42  ;;  %vm15027_vm12 = vmmov %vm15020_vm3  ;;  %v6720_v51 = vunpack.i.h.bf16 %v12531_v49  ;;  %v6709_v17 = vunpack.i.l.bf16 %v12490_v12  ;;  %v6719_v30 = vunpack.i.l.bf16 %v12531_v49 }
 0x546   :  { %v4942_v20 = vmax.f32 %v12523_v52, %v12529_v15  ;;  %v4624_v28 = vrot.slane %v4264_v36, 4  ;;  %vm15028_vm3 = vmmov %vm15021_vm4  ;;  %v12578_v36 = vadd.f32 %v12488_v58, %v12445_v23  ;;  %v6729_v13 = vunpack.i.l.bf16 %v12534_v59 }
 0x548   :  { %v4525_v0 = vpop.permute.xlu0 %4524  ;;  %v4625_v18 = vsel %vm1571_vm6, %v4619_v2, %v4624_v28 }
 0x549   :  { %v4546_v6 = vsel %vm15021_vm4, %v4288_v60, %v4525_v0  ;;  %v4117_v45 = vpop.permute.xlu1 %4116  ;;  %vm15029_vm4 = vmmov %vm15024_vm13  ;;  %v6730_v60 = vunpack.i.h.bf16 %v12534_v59 }
 0x54a   :  { %v4626_v47 = vrot.slane %v4546_v6, 4 }
 0x54c   :  { %v4093_v24 = vpop.permute.xlu0 %4092  ;;  %v4627_v42 = vsel %vm1571_vm6, %v4622_v8, %v4626_v47 }
 0x54d   :  { %v4141_v21 = vpop.permute.xlu1 %4140  ;;  %5676 = vmatprep.mubr.msk.f32.mxu1 %vm15024_vm13, %v4627_v42  ;;  %v4273_v44 = vsel %vm2138_vm2, %v4093_v24, %v4117_v45  ;;  %v4265_v8 = vsel %vm15026_vm1, %v4257_v40, %v4093_v24  ;;  %v4187_v45 = vsel %vm2055_vm8, %v15030_v29, %v6630_v22  ;;  %vm15033_vm8 = vcmask 408576   ;;  %vm15034_vm13 = vmmov %vm15032_vm5 }
 0x54e   :  { %4915 = vmatmul.mubr.f32.gmra.mrb[38].mxu1 %v4625_v18  ;;  %v4281_v55 = vsel %vm2145_vm15, %v4273_v44, %v4141_v21  ;;  %v4628_v62 = vrot.slane %v4265_v8, 4  ;;  %v4190_v49 = vsel %vm2062_vm9, %v4187_v45, %v6709_v17  ;;  %vm15035_vm7 = vmmov %vm15033_vm8  ;;  %vm15036_vm1 = vcmask 490496   ;;  %v15042_v17 = vld [vmem:[#allocation257_spill] sm:$0xff] }
 0x54f   :  { %v4195_v16 = vsel %vm2069_vm10, %v4190_v49, %v6719_v30 }
 0x550   :  { %v6733_v48 = vpop.permute.xlu0 %6732  ;;  %v4629_v61 = vsel %vm1571_vm6, %v4624_v28, %v4628_v62  ;;  %v15031_v28 = vld [vmem:[#allocation68_spill] sm:$0xff]  ;;  %v4202_v53 = vsel %vm15034_vm13, %v4195_v16, %v6729_v13  ;;  %vm15045_vm13 = vcmask 179200   ;;  %v12622_v13 = vadd.f32 %v12488_v58, %v12465_v10 }
 0x551   :  { %v4169_v56 = vpop.permute.xlu1 %4168  ;;  %v4196_v11 = vsel %vm2069_vm10, %v15031_v28, %v6720_v51  ;;  %v6735_v57 = vunpack.i.h.bf16 %v6733_v48  ;;  %v6734_v35 = vunpack.i.l.bf16 %v6733_v48  ;;  %v15037_v48 = vld [vmem:[#allocation255_spill] sm:$0xff]  ;;  %v15043_v28 = vld [vmem:[#allocation304_spill] sm:$0xff] }
 0x552   :  { %v4289_v2 = vsel %vm15027_vm12, %v4281_v55, %v4169_v56  ;;  %v4203_v42 = vsel %vm15032_vm5, %v4196_v11, %v6730_v60  ;;  %vm15038_vm12 = vmmov %vm15036_vm1 }
 0x553   :  { %v4211_v21 = vsel %vm15033_vm8, %v4203_v42, %v6735_v57  ;;  %v4210_v59 = vsel %vm15035_vm7, %v4202_v53, %v6734_v35  ;;  %vm15044_vm8 = vmmov %vm15035_vm7  ;;  %v6710_v42 = vunpack.i.h.bf16 %v12490_v12 }
 0x554   :  { %v12557_v39 = vpop.permute.xlu0 %6737  ;;  %v4219_v8 = vsel %vm15038_vm12, %v4211_v21, %v15037_v48  ;;  %vm15047_vm7 = vmmov %vm15036_vm1  ;;  %vm15049_vm12 = vcmask 900096  }
 0x555   :  { %v4527_v43 = vpop.permute.xlu1 %4526  ;;  %v6739_v33 = vunpack.i.l.bf16 %v12557_v39 }
 0x556   :  { %v4547_v14 = vsel %vm15028_vm3, %v4289_v2, %v4527_v43  ;;  %vm15039_vm3 = vcmask 572416  }
 0x557   :  { %v4630_v27 = vrot.slane %v4547_v14, 4  ;;  %v4218_v40 = vsel %vm15036_vm1, %v4210_v59, %v6739_v33  ;;  %vm15048_vm1 = vcmask 261120  }
 0x558   :  { %v6743_v32 = vpop.permute.xlu0 %6742 }
 0x559   :  { %v12561_v54 = vpop.permute.xlu1 %6752  ;;  %v4631_v7 = vsel %vm1571_vm6, %v4626_v47, %v4630_v27  ;;  %v6745_v18 = vunpack.i.h.bf16 %v6743_v32  ;;  %v6744_v5 = vunpack.i.l.bf16 %v6743_v32 }
 0x55a   :  { %5677 = vmatprep.mubr.msk.f32.mxu1 %vm15029_vm4, %v4631_v7  ;;  %v6754_v55 = vunpack.i.l.bf16 %v12561_v54  ;;  %vm15040_vm4 = vmmov %vm15039_vm3  ;;  %v15041_v7 = vld [vmem:[#allocation96_spill] sm:$0xff] }
 0x55b   :  { %4920 = vmatmul.mubr.f32.gmra.mrb[40].mxu1 %v4629_v61  ;;  %v4226_v2 = vsel %vm15039_vm3, %v4218_v40, %v6744_v5  ;;  %v4227_v43 = vsel %vm15040_vm4, %v4219_v8, %v6745_v18  ;;  %v15046_v5 = vld [vmem:[#allocation264_spill] sm:$0xff]  ;;  %vm15050_vm3 = vmmov %vm15049_vm12 }
 0x55c   :  { %v12566_v31 = vpop.permute.xlu0 %6747  ;;  %v4234_v51 = vsel %vm2103_vm14, %v4226_v2, %v6754_v55  ;;  %v4235_v30 = vsel %vm2103_vm14, %v4227_v43, %v15042_v17  ;;  %vm15051_vm4 = vmmov %vm15045_vm13 }
 0x55d   :  { %v12568_v41 = vpop.permute.xlu1 %4096  ;;  %v6749_v44 = vunpack.i.l.bf16 %v12566_v31 }
 0x55f   :  { %v4204_v61 = vsel %vm15032_vm5, %v15041_v7, %v6749_v44  ;;  %vm15052_vm5 = vcmask 982016   ;;  %v15055_v7 = vld [vmem:[#allocation67_spill] sm:$0xff] }
 0x560   :  { %v12570_v9 = vpop.permute.xlu0 %4094  ;;  %v4866_v50 = vpop.f32.mrb[18].mxu1 }
 0x561   :  { %v4121_v63 = vpop.permute.xlu1 %4120  ;;  %v12582_v0 = vadd.f32 %v12488_v58, %v4866_v50  ;;  %v4868_v6 = vpop.f32.mrb[19].mxu1 }
 0x562   :  { %v4275_v11 = vsel %vm2138_vm2, %v12568_v41, %v4121_v63 }
 0x563   :  { %v4943_v23 = vmax.f32 %v12578_v36, %v12582_v0  ;;  %v5131_v36 = vld [vmem:[%s13225_s6 + $0x180] sm:$0xff]  ;;  %v5133_v0 = vld [vmem:[%s13225_s6 + $0x190] sm:$0xff] }
 0x564   :  { %v4119_v26 = vpop.permute.xlu0 %4118 }
 0x565   :  { %v4143_v46 = vpop.permute.xlu1 %4142  ;;  %v4274_v27 = vsel %vm2138_vm2, %v12570_v9, %v4119_v26  ;;  %v4212_v26 = vsel %vm15044_vm8, %v4204_v61, %v15043_v28  ;;  %vm15053_vm8 = vmmov %vm15052_vm5  ;;  %v15057_v61 = vld [vmem:[#allocation110_spill] sm:$0xff] }
 0x566   :  { %v4282_v6 = vsel %vm2145_vm15, %v4274_v27, %v4143_v46  ;;  %v4220_v10 = vsel %vm15047_vm7, %v4212_v26, %v15046_v5  ;;  %vm15056_vm7 = vcmask 572416  }
 0x568   :  { %v6758_v47 = vpop.permute.xlu0 %6757 }
 0x569   :  { %v6763_v24 = vpop.permute.xlu1 %6762  ;;  %v6760_v62 = vunpack.i.h.bf16 %v6758_v47  ;;  %v6759_v14 = vunpack.i.l.bf16 %v6758_v47 }
 0x56a   :  { %v6765_v50 = vunpack.i.h.bf16 %v6763_v24  ;;  %v6764_v60 = vunpack.i.l.bf16 %v6763_v24 }
 0x56b   :  { %v4242_v29 = vsel %vm2110_vm11, %v4234_v51, %v6759_v14  ;;  %v4243_v45 = vsel %vm2110_vm11, %v4235_v30, %v6760_v62  ;;  %v6750_v51 = vunpack.i.h.bf16 %v12566_v31 }
 0x56c   :  { %v4145_v34 = vpop.permute.xlu0 %4144  ;;  %v4250_v33 = vsel %vm2117_vm0, %v4242_v29, %v6764_v60  ;;  %v4251_v21 = vsel %vm2117_vm0, %v4243_v45, %v6765_v50  ;;  %v15059_v60 = vld [vmem:[#allocation129_spill] sm:$0xff] }
 0x56d   :  { %v4173_v56 = vpop.permute.xlu1 %4172  ;;  %v4283_v47 = vsel %vm2145_vm15, %v4275_v11, %v4145_v34  ;;  %v15060_v29 = vld [vmem:[#allocation309_spill] sm:$0xff] }
 0x56e   :  { %v4291_v44 = vsel %vm15051_vm4, %v4283_v47, %v4173_v56  ;;  %v4228_v56 = vsel %vm15056_vm7, %v4220_v10, %v15055_v7  ;;  %vm15064_vm4 = vcmask 900096  }
 0x570   :  { %v4171_v32 = vpop.permute.xlu0 %4170  ;;  %v4871_v24 = vpop.f32.mrb[20].mxu1 }
 0x571   :  { %v4529_v22 = vpop.permute.xlu1 %4528  ;;  %v4290_v57 = vsel %vm15045_vm13, %v4282_v6, %v4171_v32  ;;  %v12629_v63 = vadd.f32 %v12488_v58, %v4871_v24  ;;  %v4873_v18 = vpop.f32.mrb[21].mxu1  ;;  %vm15054_vm13 = vmmov %vm15048_vm1  ;;  %v4236_v6 = vsel %vm2103_vm14, %v4228_v56, %v15059_v60 }
 0x572   :  { %v4548_v53 = vsel %vm15048_vm1, %v4290_v57, %v4529_v22  ;;  %v4191_v22 = vsel %vm2062_vm9, %v15057_v61, %v6710_v42  ;;  %vm15058_vm1 = vcmask 998400   ;;  %v12665_v42 = vadd.f32 %v12488_v58, %v12480_v25 }
 0x573   :  { %v4944_v12 = vmax.f32 %v12622_v13, %v12629_v63  ;;  %v4635_v14 = vrot.slane %v4548_v53, 4  ;;  %v4197_v45 = vsel %vm2069_vm10, %v4191_v22, %v15060_v29  ;;  %vm15065_vm10 = vcmask 490496   ;;  %v5139_v13 = vld [vmem:[%s13225_s6 + $0x1c0] sm:$0xff]  ;;  %v5141_v63 = vld [vmem:[%s13225_s6 + $0x1d0] sm:$0xff] }
 0x574   :  { %v6768_v49 = vpop.permute.xlu0 %6767 }
 0x575   :  { %v6770_v46 = vunpack.i.h.bf16 %v6768_v49  ;;  %v6769_v16 = vunpack.i.l.bf16 %v6768_v49  ;;  %v4099_v35 = vpop.permute.xlu1 %4098  ;;  %v15062_v49 = vld [vmem:[#allocation305_spill] sm:$0xff] }
 0x577   :  { %v4258_v34 = vsel %vm15049_vm12, %v4250_v33, %v6769_v16  ;;  %v4259_v59 = vsel %vm15050_vm3, %v4251_v21, %v6770_v46  ;;  %vm15061_vm12 = vcmask 326656   ;;  %vm15063_vm3 = vcmask 408576  }
 0x578   :  { %v4531_v40 = vpop.permute.xlu0 %4530  ;;  %v4266_v48 = vsel %vm15052_vm5, %v4258_v34, %v12570_v9  ;;  %v4267_v8 = vsel %vm15053_vm8, %v4259_v59, %v12568_v41  ;;  %v4205_v31 = vsel %vm15061_vm12, %v4197_v45, %v6750_v51  ;;  %v6740_v16 = vunpack.i.h.bf16 %v12557_v39  ;;  %vm15068_vm12 = vmmov %vm15064_vm4 }
 0x579   :  { %v4549_v55 = vsel %vm15054_vm13, %v4291_v44, %v4531_v40  ;;  %v6773_v2 = vpop.permute.xlu1 %6772  ;;  %v4632_v43 = vrot.slane %v4266_v48, 4  ;;  %v4633_v62 = vrot.slane %v4267_v8, 4  ;;  %v4213_v47 = vsel %vm15063_vm3, %v4205_v31, %v15062_v49  ;;  %vm15069_vm3 = vmmov %vm15052_vm5 }
 0x57a   :  { %v4636_v27 = vrot.slane %v4549_v55, 4  ;;  %v6774_v32 = vunpack.i.l.bf16 %v6773_v2  ;;  %v4221_v18 = vsel %vm15065_vm10, %v4213_v47, %v6740_v16  ;;  %vm15066_vm8 = vcmask 179200   ;;  %vm15072_vm10 = vmmov %vm15058_vm1 }
 0x57b   :  { %v4634_v30 = vsel %vm1571_vm6, %v4632_v43, %v4633_v62  ;;  %v6775_v40 = vunpack.i.h.bf16 %v6773_v2  ;;  %v15067_v43 = vld [vmem:[#allocation74_spill] sm:$0xff] }
 0x57c   :  { %v4123_v9 = vpop.permute.xlu0 %4122  ;;  %v4637_v17 = vsel %vm1571_vm6, %v4635_v14, %v4636_v27  ;;  %v4244_v28 = vsel %vm2110_vm11, %v4236_v6, %v6774_v32  ;;  %v6755_v14 = vunpack.i.h.bf16 %v12561_v54 }
 0x57d   :  { %v6778_v41 = vpop.permute.xlu1 %6777  ;;  %5678 = vmatprep.mubr.msk.f32.mxu1 %vm15058_vm1, %v4637_v17  ;;  %v4276_v5 = vsel %vm2138_vm2, %v4099_v35, %v4123_v9 }
 0x57e   :  { %v6779_v50 = vunpack.i.l.bf16 %v6778_v41  ;;  %4925 = vmatmul.mubr.f32.gmra.mrb[42].mxu1 %v4634_v30  ;;  %v6780_v32 = vunpack.i.h.bf16 %v6778_v41 }
 0x580   :  { %v4147_v26 = vpop.permute.xlu0 %4146  ;;  %v4252_v11 = vsel %vm2117_vm0, %v4244_v28, %v6779_v50  ;;  %v4876_v21 = vpop.f32.mrb[22].mxu1 }
 0x581   :  { %v4061_v57 = vpop.permute.xlu1 %4060  ;;  %v12671_v53 = vadd.f32 %v12488_v58, %v4876_v21  ;;  %v4878_v34 = vpop.f32.mrb[23].mxu1  ;;  %v4284_v59 = vsel %vm2145_vm15, %v4276_v5, %v4147_v26 }
 0x582   :  { %v4260_v46 = vsel %vm15064_vm4, %v4252_v11, %v4061_v57  ;;  %vm15070_vm4 = vmmov %vm15066_vm8  ;;  %v5086_v34 = vld [vmem:[%s13225_s6 + $0x18] sm:$0xff] }
 0x583   :  { %v4268_v10 = vsel %vm15052_vm5, %v4260_v46, %v4099_v35  ;;  %v4945_v25 = vmax.f32 %v12665_v42, %v12671_v53  ;;  %v4229_v35 = vsel %vm15056_vm7, %v4221_v18, %v15067_v43  ;;  %v5087_v43 = vld [vmem:[%s13225_s6 + $0x20] sm:$0xff]  ;;  %vm15073_vm5 = vcmask 326656  }
 0x584   :  { %v4175_v24 = vpop.permute.xlu0 %4174  ;;  %v4638_v48 = vrot.slane %v4268_v10, 4  ;;  %v4237_v61 = vsel %vm2103_vm14, %v4229_v35, %v6755_v14  ;;  %v5084_v10 = vld [vmem:[%s13225_s6 + $0x8] sm:$0xff]  ;;  %v5089_v35 = vld [vmem:[%s13225_s6 + $0x30] sm:$0xff] }
 0x585   :  { %v4101_v33 = vpop.permute.xlu1 %4100  ;;  %v4292_v39 = vsel %vm15066_vm8, %v4284_v59, %v4175_v24  ;;  %v4245_v9 = vsel %vm2110_vm11, %v4237_v61, %v6775_v40  ;;  %vm15071_vm11 = vmmov %vm15054_vm13  ;;  %v5083_v59 = vld [vmem:[%s13225_s6] sm:$0xff]  ;;  %v5088_v40 = vld [vmem:[%s13225_s6 + $0x28] sm:$0xff]  ;;  %vm5071_vm8 = vcmask 588800  }
 0x586   :  { %v4639_v2 = vsel %vm1571_vm6, %v4633_v62, %v4638_v48  ;;  %v4253_v17 = vsel %vm2117_vm0, %v4245_v9, %v6780_v32  ;;  %v5092_v14 = vld [vmem:[%s13225_s6 + $0x48] sm:$0xff]  ;;  %v5094_v32 = vld [vmem:[%s13225_s6 + $0x58] sm:$0xff]  ;;  %v5091_v61 = vld [vmem:[%s13225_s6 + $0x40] sm:$0xff] }
 0x587   :  { %v5098_v9 = vld [vmem:[%s13225_s6 + $0x78] sm:$0xff]  ;;  %vm15075_vm7 = vmmov %vm15071_vm11 }
 0x588   :  { %v4533_v44 = vpop.permute.xlu0 %4532 }
 0x589   :  { %v4550_v8 = vsel %vm15054_vm13, %v4292_v39, %v4533_v44  ;;  %v4149_v55 = vpop.permute.xlu1 %4148  ;;  %v6125_v39 = vpack.c.bf16 %v5086_v34, %v5084_v10  ;;  %v5085_v44 = vld [vmem:[%s13225_s6 + $0x10] sm:$0xff]  ;;  %v5108_v34 = vld [vmem:[%s13225_s6 + $0xc8] sm:$0xff]  ;;  %vm15074_vm13 = vcmask 490496  }
 0x58a   :  { %v4640_v7 = vrot.slane %v4550_v8, 4  ;;  %v6127_v8 = vpack.c.bf16 %v5085_v44, %v5083_v59  ;;  %v5105_v10 = vld [vmem:[%s13225_s6 + $0xb0] sm:$0xff]  ;;  %v5107_v59 = vld [vmem:[%s13225_s6 + $0xc0] sm:$0xff]  ;;  %v5112_v44 = vld [vmem:[%s13225_s6 + $0xe8] sm:$0xff] }
 0x58b   :  { %6126 = vmatprep.subr.bf16.mxu1 %v6125_v39  ;;  %v5109_v39 = vld [vmem:[%s13225_s6 + $0xd0] sm:$0xff] }
 0x58c   :  { %v4125_v56 = vpop.permute.xlu0 %4124  ;;  %v4641_v22 = vsel %vm1571_vm6, %v4636_v27, %v4640_v7  ;;  %6128 = vmatpush1.bf16.msra.mxu1 %v6127_v8 }
 0x58d   :  { %v4063_v51 = vpop.permute.xlu1 %4062  ;;  %5679 = vmatprep.mubr.msk.f32.mxu1 %vm15058_vm1, %v4641_v22  ;;  %v4277_v54 = vsel %vm2138_vm2, %v4101_v33, %v4125_v56  ;;  %v6133_v56 = vpack.c.bf16 %v5094_v32, %v5092_v14  ;;  %v5093_v22 = vld [vmem:[%s13225_s6 + $0x50] sm:$0xff]  ;;  %v5118_v14 = vld [vmem:[%s13225_s6 + $0x118] sm:$0xff]  ;;  %vm5069_vm2 = vcmask 424960   ;;  %vm5073_vm1 = vcmask 752640  }
 0x58e   :  { %4930 = vmatmul.mubr.f32.gmra.mrb[44].mxu1 %v4639_v2  ;;  %v4261_v30 = vsel %vm15068_vm12, %v4253_v17, %v4063_v51  ;;  %v4285_v60 = vsel %vm2145_vm15, %v4277_v54, %v4149_v55  ;;  %v5096_v51 = vld [vmem:[%s13225_s6 + $0x68] sm:$0xff]  ;;  %v6135_v2 = vpack.c.bf16 %v5093_v22, %v5091_v61  ;;  %v5097_v54 = vld [vmem:[%s13225_s6 + $0x70] sm:$0xff]  ;;  %vm5081_vm12 = vcmask 359424  }
 0x58f   :  { %v4269_v50 = vsel %vm15069_vm3, %v4261_v30, %v4101_v33  ;;  %v6137_v17 = vpack.c.bf16 %v5098_v9, %v5096_v51  ;;  %v5095_v30 = vld [vmem:[%s13225_s6 + $0x60] sm:$0xff]  ;;  %v5117_v61 = vld [vmem:[%s13225_s6 + $0x110] sm:$0xff]  ;;  %v5120_v51 = vld [vmem:[%s13225_s6 + $0x128] sm:$0xff] }
 0x590   :  { %v4177_v41 = vpop.permute.xlu0 %4176  ;;  %v4642_v29 = vrot.slane %v4269_v50, 4  ;;  %v5100_v50 = vld [vmem:[%s13225_s6 + $0x88] sm:$0xff]  ;;  %v5122_v9 = vld [vmem:[%s13225_s6 + $0x138] sm:$0xff] }
 0x591   :  { %v4293_v27 = vsel %vm15070_vm4, %v4285_v60, %v4177_v41  ;;  %v5102_v60 = vld [vmem:[%s13225_s6 + $0x98] sm:$0xff]  ;;  %vm5492_vm4 = vcmask 551938  }
 0x592   :  { %v4643_v31 = vsel %vm1571_vm6, %v4638_v48, %v4642_v29  ;;  %v5090_v48 = vld [vmem:[%s13225_s6 + $0x38] sm:$0xff] }
 0x593   :  { %v6129_v55 = vpack.c.bf16 %v5090_v48, %v5088_v40  ;;  %v5114_v40 = vld [vmem:[%s13225_s6 + $0xf8] sm:$0xff]  ;;  %v6151_v48 = vpack.c.bf16 %v5109_v39, %v5107_v59  ;;  %v5132_v59 = vld [vmem:[%s13225_s6 + $0x188] sm:$0xff] }
 0x594   :  { %v4535_v6 = vpop.permute.xlu0 %4534  ;;  %v6153_v8 = vpack.c.bf16 %v5114_v40, %v5112_v44  ;;  %v5134_v39 = vld [vmem:[%s13225_s6 + $0x198] sm:$0xff] }
 0x595   :  { %v4551_v45 = vsel %vm15071_vm11, %v4293_v27, %v4535_v6  ;;  %6130 = vmatprep.subr.bf16.mxu1 %v6129_v55  ;;  %v5111_v55 = vld [vmem:[%s13225_s6 + $0xe0] sm:$0xff]  ;;  %v6173_v40 = vpack.c.bf16 %v5134_v39, %v5132_v59  ;;  %vm15078_vm11 = vcmask 1041408  }
 0x596   :  { %v4644_v28 = vrot.slane %v4551_v45, 4  ;;  %v6139_v45 = vpack.c.bf16 %v5097_v54, %v5095_v30 }
 0x598   :  { %v4645_v62 = vsel %vm1571_vm6, %v4640_v7, %v4644_v28  ;;  %v6131_v7 = vpack.c.bf16 %v5089_v35, %v5087_v43  ;;  %v5113_v43 = vld [vmem:[%s13225_s6 + $0xf0] sm:$0xff]  ;;  %v5116_v35 = vld [vmem:[%s13225_s6 + $0x108] sm:$0xff]  ;;  %vm4967_vm6 = vcmask 1041409  }
 0x599   :  { %5680 = vmatprep.mubr.msk.f32.mxu1 %vm15072_vm10, %v4645_v62  ;;  %v6141_v62 = vpack.c.bf16 %v5102_v60, %v5100_v50  ;;  %v6155_v32 = vpack.c.bf16 %v5113_v43, %v5111_v55  ;;  %v6161_v50 = vpack.c.bf16 %v5122_v9, %v5120_v51  ;;  %v5119_v60 = vld [vmem:[%s13225_s6 + $0x120] sm:$0xff]  ;;  %vm5493_vm10 = vmor %vm5492_vm4, %vm15078_vm11 }
 0x59a   :  { %4935 = vmatmul.mubr.f32.gmra.mrb[46].mxu1 %v4643_v31  ;;  %v4881_v26 = vpop.f32.mrb[24].mxu1  ;;  %v5099_v31 = vld [vmem:[%s13225_s6 + $0x80] sm:$0xff] }
 0x59b   :  { %v4883_v11 = vpop.f32.mrb[25].mxu1  ;;  %6132 = vmatpush1.bf16.msra.mxu1 %v6131_v7  ;;  %v4882_v27 = vadd.f32 %v12488_v58, %v4881_v26  ;;  %v5104_v26 = vld [vmem:[%s13225_s6 + $0xa8] sm:$0xff]  ;;  %v6157_v7 = vpack.c.bf16 %v5118_v14, %v5116_v35 }
 0x59c   :  { %6134 = vmatprep.subr.bf16.mxu1 %v6133_v56  ;;  %v5101_v11 = vld [vmem:[%s13225_s6 + $0x90] sm:$0xff]  ;;  %v5115_v56 = vld [vmem:[%s13225_s6 + $0x100] sm:$0xff] }
 0x59d   :  { %v6159_v54 = vpack.c.bf16 %v5117_v61, %v5115_v56  ;;  %v5136_v61 = vld [vmem:[%s13225_s6 + $0x1a8] sm:$0xff] }
 0x59f   :  { %6136 = vmatpush1.bf16.msra.mxu1 %v6135_v2 }
 0x5a0   :  { %6138 = vmatprep.subr.bf16.mxu1 %v6137_v17 }
 0x5a3   :  { %6140 = vmatpush1.bf16.msra.mxu1 %v6139_v45 }
 0x5a4   :  { %6142 = vmatprep.subr.bf16.mxu1 %v6141_v62 }
 0x5a6   :  { %v12696_v57 = vpop.f32.mrb[26].mxu1 }
 0x5a7   :  { %v4888_v49 = vpop.f32.mrb[27].mxu1  ;;  %v4887_v2 = vadd.f32 %v12488_v58, %v12696_v57 }
 0x5a8   :  { %v5106_v49 = vld [vmem:[%s13225_s6 + $0xb8] sm:$0xff] }
 0x5b8   :  { %v12698_v47 = vpop.f32.mrb[28].mxu1 }
 0x5b9   :  { %v4893_v46 = vpop.f32.mrb[29].mxu1  ;;  %v4892_v45 = vadd.f32 %v12488_v58, %v12698_v47  ;;  %v6165_v47 = vpack.c.bf16 %v5126_v4, %v5124_v38 }
 0x5c6   :  { %v12700_v16 = vpop.f32.mrb[30].mxu1 }
 0x5c7   :  { %v4898_v24 = vpop.f32.mrb[31].mxu1 }
 0x5c8   :  { %v6143_v24 = vpack.c.bf16 %v5101_v11, %v5099_v31 }
 0x5ca   :  { %6144 = vmatpush1.bf16.msra.mxu1 %v6143_v24 }
 0x5de   :  { %v12702_v33 = vpop.f32.mrb[32].mxu1 }
 0x5df   :  { %v4903_v21 = vpop.f32.mrb[33].mxu1 }
 0x5e0   :  { %v6145_v21 = vpack.c.bf16 %v5106_v49, %v5104_v26  ;;  %v5125_v26 = vld [vmem:[%s13225_s6 + $0x150] sm:$0xff] }
 0x5e2   :  { %6146 = vmatprep.subr.bf16.mxu1 %v6145_v21  ;;  %v5128_v21 = vld [vmem:[%s13225_s6 + $0x168] sm:$0xff] }
 0x5fe   :  { %v12704_v18 = vpop.f32.mrb[34].mxu1 }
 0x5ff   :  { %v4908_v5 = vpop.f32.mrb[35].mxu1  ;;  %v4907_v39 = vadd.f32 %v12488_v58, %v12704_v18 }
 0x600   :  { %v5103_v5 = vld [vmem:[%s13225_s6 + $0xa0] sm:$0xff] }
 0x601   :  { %v6147_v1 = vpack.c.bf16 %v5105_v10, %v5103_v5  ;;  %v5130_v5 = vld [vmem:[%s13225_s6 + $0x178] sm:$0xff] }
 0x602   :  { %v6169_v10 = vpack.c.bf16 %v5130_v5, %v5128_v21  ;;  %v5144_v21 = vld [vmem:[%s13225_s6 + $0x1e8] sm:$0xff]  ;;  %v5146_v5 = vld [vmem:[%s13225_s6 + $0x1f8] sm:$0xff] }
 0x603   :  { %6148 = vmatpush1.bf16.msra.mxu1 %v6147_v1  ;;  %v5127_v1 = vld [vmem:[%s13225_s6 + $0x160] sm:$0xff] }
 0x60d   :  { %v4911_v41 = vpop.f32.mrb[36].mxu1 }
 0x60e   :  { %v4912_v6 = vadd.f32 %v12488_v58, %v4911_v41  ;;  %v4913_v29 = vpop.f32.mrb[37].mxu1 }
 0x610   :  { %v4946_v28 = vmax.f32 %v4882_v27, %v4912_v6  ;;  %v5121_v27 = vld [vmem:[%s13225_s6 + $0x130] sm:$0xff] }
 0x611   :  { %v6163_v6 = vpack.c.bf16 %v5121_v27, %v5119_v60 }
 0x612   :  { %v12777_v46 = vmax.f32 %v4940_v19, %v4946_v28  ;;  %v6149_v19 = vpack.c.bf16 %v5110_v37, %v5108_v34 }
 0x614   :  { %6150 = vmatprep.subr.bf16.mxu1 %v6149_v19  ;;  %v12871_v34 = vmax.f32 %v12777_v46, 0.0  ;;  %v5129_v19 = vld [vmem:[%s13225_s6 + $0x170] sm:$0xff] }
 0x615   :  { %6152 = vmatpush1.bf16.msra.mxu1 %v6151_v48  ;;  %v6171_v46 = vpack.c.bf16 %v5129_v19, %v5127_v1  ;;  %v6175_v48 = vpack.c.bf16 %v5133_v0, %v5131_v36  ;;  %v6185_v1 = vpack.c.bf16 %v5146_v5, %v5144_v21 }
 0x616   :  { %6154 = vmatprep.subr.bf16.mxu1 %v6153_v8  ;;  %v4970_v44 = vrot.slane %v12871_v34, 1  ;;  %v4975_v35 = vrot.slane %v12871_v34, 2  ;;  %v4981_v56 = vrot.slane %v12871_v34, 3 }
 0x619   :  { %6156 = vmatpush1.bf16.msra.mxu1 %v6155_v32 }
 0x61a   :  { %6158 = vmatprep.subr.bf16.mxu1 %v6157_v7 }
 0x61d   :  { %6160 = vmatpush1.bf16.msra.mxu1 %v6159_v54 }
 0x61e   :  { %6162 = vmatprep.subr.bf16.mxu1 %v6161_v50  ;;  %v5137_v50 = vld [vmem:[%s13225_s6 + $0x1b0] sm:$0xff] }
 0x621   :  { %v4916_v22 = vpop.f32.mrb[38].mxu1  ;;  %6164 = vmatpush1.bf16.msra.mxu1 %v6163_v6 }
 0x622   :  { %v4917_v17 = vadd.f32 %v12488_v58, %v4916_v22  ;;  %v4918_v30 = vpop.f32.mrb[39].mxu1  ;;  %6166 = vmatprep.subr.bf16.mxu1 %v6165_v47  ;;  %v5138_v22 = vld [vmem:[%s13225_s6 + $0x1b8] sm:$0xff] }
 0x623   :  { %v6177_v9 = vpack.c.bf16 %v5138_v22, %v5136_v61 }
 0x624   :  { %v4947_v41 = vmax.f32 %v4887_v2, %v4917_v17  ;;  %v4902_v2 = vadd.f32 %v12488_v58, %v12702_v33 }
 0x626   :  { %v12839_v57 = vmax.f32 %v4941_v3, %v4947_v41  ;;  %v5123_v3 = vld [vmem:[%s13225_s6 + $0x140] sm:$0xff] }
 0x627   :  { %v6167_v52 = vpack.c.bf16 %v5125_v26, %v5123_v3  ;;  %v5135_v41 = vld [vmem:[%s13225_s6 + $0x1a0] sm:$0xff] }
 0x628   :  { %v6179_v60 = vpack.c.bf16 %v5137_v50, %v5135_v41  ;;  %v4959_v27 = vmax.f32 %v12839_v57, 0.0  ;;  %v5163_v50 = vld [vmem:[%s13220_s1] sm:$0x3] }
 0x629   :  { %6168 = vmatpush1.bf16.msra.mxu1 %v6167_v52 }
 0x62a   :  { %6170 = vmatprep.subr.bf16.mxu1 %v6169_v10  ;;  %v5011_v38 = vrot.slane %v4959_v27, 4  ;;  %v5017_v4 = vrot.slane %v4959_v27, 5  ;;  %v5023_v57 = vrot.slane %v4959_v27, 6  ;;  %v5029_v3 = vrot.slane %v4959_v27, 7 }
 0x62d   :  { %6172 = vmatpush1.bf16.msra.mxu1 %v6171_v46 }
 0x62e   :  { %v4921_v29 = vpop.f32.mrb[40].mxu1  ;;  %6174 = vmatprep.subr.bf16.mxu1 %v6173_v40  ;;  %v5143_v40 = vld [vmem:[%s13225_s6 + $0x1e0] sm:$0xff] }
 0x62f   :  { %v4922_v28 = vadd.f32 %v12488_v58, %v4921_v29  ;;  %v4923_v62 = vpop.f32.mrb[41].mxu1  ;;  %v5140_v29 = vld [vmem:[%s13225_s6 + $0x1c8] sm:$0xff] }
 0x631   :  { %v4948_v31 = vmax.f32 %v4892_v45, %v4922_v28  ;;  %6176 = vmatpush1.bf16.msra.mxu1 %v6175_v48  ;;  %v5142_v45 = vld [vmem:[%s13225_s6 + $0x1d8] sm:$0xff]  ;;  %v5145_v48 = vld [vmem:[%s13225_s6 + $0x1f0] sm:$0xff] }
 0x632   :  { %6178 = vmatprep.subr.bf16.mxu1 %v6177_v9  ;;  %v6181_v28 = vpack.c.bf16 %v5142_v45, %v5140_v29 }
 0x633   :  { %v12847_v11 = vmax.f32 %v4942_v20, %v4948_v31  ;;  %v4897_v20 = vadd.f32 %v12488_v58, %v12700_v16  ;;  %v5006_v31 = vrot.slane %v4959_v27, 1 }
 0x635   :  { %6180 = vmatpush1.bf16.msra.mxu1 %v6179_v60  ;;  %v6833_v60 = vmov 0  }
 0x636   :  { %6182 = vmatprep.subr.bf16.mxu1 %v6181_v28  ;;  %6781 = vset.pattern.permute.xlu0 %v6833_v60  ;;  %v5354_v60 = vld [vmem:[%s13228_s9 + $0x48] sm:$0xff] }
 0x651   :  { %v4926_v15 = vpop.f32.mrb[42].mxu1 }
 0x652   :  { %v4927_v49 = vadd.f32 %v12488_v58, %v4926_v15  ;;  %v4928_v24 = vpop.f32.mrb[43].mxu1 }
 0x653   :  { %v6183_v24 = vpack.c.bf16 %v5141_v63, %v5139_v13 }
 0x654   :  { %v4949_v37 = vmax.f32 %v4897_v20, %v4927_v49 }
 0x655   :  { %6184 = vmatpush1.bf16.msra.mxu1 %v6183_v24 }
 0x656   :  { %v4955_v16 = vmax.f32 %v4943_v23, %v4949_v37  ;;  %6186 = vmatprep.subr.bf16.mxu1 %v6185_v1 }
 0x658   :  { %v12894_v23 = vmax.f32 %v4955_v16, 0.0 }
 0x65a   :  { %v4971_v8 = vsel %vm4967_vm6, %v12894_v23, %v4970_v44  ;;  %v4976_v55 = vrot.slane %v12894_v23, 1  ;;  %v4966_v43 = vrot.slane %v12894_v23, 7  ;;  %v4982_v7 = vrot.slane %v12894_v23, 2 }
 0x65b   :  { %4972 = vrot.lane.b32.xlu1 %v4971_v8, %s6811_s24  ;;  %v4988_v15 = vrot.slane %v12894_v23, 5  ;;  %v4987_v44 = vrot.slane %v12871_v34, 6  ;;  %v6187_v8 = vpack.c.bf16 %v5145_v48, %v5143_v40  ;;  %v5155_v48 = vld [vmem:[%s13225_s6 + $0x240] sm:$0xff] }
 0x65c   :  { %v12905_v14 = vsel %vm4967_vm6, %v4966_v43, %v12871_v34  ;;  %v4977_v32 = vsel %vm4967_vm6, %v4976_v55, %v4975_v35  ;;  %v4983_v54 = vsel %vm4967_vm6, %v4982_v7, %v4981_v56  ;;  %v4960_v43 = vmax.f32 %v12847_v11, 0.0  ;;  %v5148_v7 = vld [vmem:[%s13225_s6 + $0x208] sm:$0xff] }
 0x65d   :  { %v4989_v18 = vsel %vm4967_vm6, %v4988_v15, %v4987_v44  ;;  %6188 = vmatpush1.bf16.msra.mxu1 %v6187_v8  ;;  %v15077_v44 = vmov 0.0   ;;  %v5157_v8 = vld [vmem:[%s13225_s6 + $0x250] sm:$0xff] }
 0x65e   :  { %v5043_v42 = vrot.slane %v4960_v43, 3  ;;  %v5055_v53 = vrot.slane %v4960_v43, 5 }
 0x65f   :  { %4978 = vrot.lane.b32.xlu1 %v4977_v32, %s6812_s25  ;;  %v4993_v32 = vrot.slane %v12871_v34, 7  ;;  %v5049_v34 = vrot.slane %v4960_v43, 4 }
 0x661   :  { %v4931_v51 = vpop.f32.mrb[44].mxu1 }
 0x662   :  { %v4932_v17 = vadd.f32 %v12488_v58, %v4931_v51  ;;  %v4933_v30 = vpop.f32.mrb[45].mxu1 }
 0x663   :  { %4984 = vrot.lane.b32.xlu1 %v4983_v54, %s6814_s27 }
 0x664   :  { %v4950_v33 = vmax.f32 %v4902_v2, %v4932_v17 }
 0x666   :  { %v4956_v6 = vmax.f32 %v4944_v12, %v4950_v33 }
 0x668   :  { %v4962_v62 = vmax.f32 %v4956_v6, 0.0 }
 0x66a   :  { %v5007_v12 = vsel %vm4967_vm6, %v4962_v62, %v5006_v31  ;;  %v5001_v47 = vrot.slane %v4962_v62, 7  ;;  %v5012_v26 = vrot.slane %v4962_v62, 3  ;;  %v5018_v52 = vrot.slane %v4962_v62, 4 }
 0x66b   :  { %5008 = vrot.lane.b32.xlu0 %v5007_v12, %s6807_s0  ;;  %v5024_v20 = vrot.slane %v4962_v62, 5  ;;  %v5030_v49 = vrot.slane %v4962_v62, 6 }
 0x66c   :  { %v5002_v10 = vsel %vm4967_vm6, %v5001_v47, %v4959_v27  ;;  %v5013_v37 = vsel %vm4967_vm6, %v5012_v26, %v5011_v38  ;;  %v5019_v16 = vsel %vm4967_vm6, %v5018_v52, %v5017_v4  ;;  %v5147_v26 = vld [vmem:[%s13225_s6 + $0x200] sm:$0xff]  ;;  %v5149_v52 = vld [vmem:[%s13225_s6 + $0x210] sm:$0xff] }
 0x66d   :  { %v4936_v19 = vpop.f32.mrb[46].mxu1  ;;  %5003 = vrot.lane.b32.xlu1 %v5002_v10, %s6809_s22  ;;  %v5025_v59 = vsel %vm4967_vm6, %v5024_v20, %v5023_v57  ;;  %v5031_v46 = vsel %vm4967_vm6, %v5030_v49, %v5029_v3  ;;  %v5152_v20 = vld [vmem:[%s13225_s6 + $0x228] sm:$0xff]  ;;  %v5154_v49 = vld [vmem:[%s13225_s6 + $0x238] sm:$0xff] }
 0x66e   :  { %v4937_v36 = vadd.f32 %v12488_v58, %v4936_v19  ;;  %v4938_v0 = vpop.f32.mrb[47].mxu1  ;;  %v4994_v58 = vrot.slane %v12894_v23, 6  ;;  %v5150_v23 = vld [vmem:[%s13225_s6 + $0x218] sm:$0xff]  ;;  %v6193_v1 = vpack.c.bf16 %v5154_v49, %v5152_v20  ;;  %v5151_v19 = vld [vmem:[%s13225_s6 + $0x220] sm:$0xff] }
 0x66f   :  { %5014 = vrot.lane.b32.xlu0 %v5013_v37, %s6824_s2  ;;  %v6189_v61 = vpack.c.bf16 %v5150_v23, %v5148_v7  ;;  %v6191_v37 = vpack.c.bf16 %v5149_v52, %v5147_v26  ;;  %v5346_v7 = vld [vmem:[%s13228_s9 + $0x8] sm:$0xff]  ;;  %v5348_v23 = vld [vmem:[%s13228_s9 + $0x18] sm:$0xff]  ;;  %v5363_v26 = vld [vmem:[%s13228_s9 + $0x90] sm:$0xff] }
 0x670   :  { %v4951_v55 = vmax.f32 %v4907_v39, %v4937_v36  ;;  %v4995_v56 = vsel %vm4967_vm6, %v4994_v58, %v4993_v32  ;;  %v5156_v39 = vld [vmem:[%s13225_s6 + $0x248] sm:$0xff]  ;;  %v5158_v36 = vld [vmem:[%s13225_s6 + $0x258] sm:$0xff]  ;;  %v6199_v58 = vpack.c.bf16 %v5157_v8, %v5155_v48  ;;  %v5161_v32 = vld [vmem:[%s13225_s6 + $0x270] sm:$0xff] }
 0x671   :  { %4990 = vrot.lane.b32.xlu1 %v4989_v18, %s6815_s28  ;;  %6190 = vmatprep.subr.bf16.mxu1 %v6189_v61  ;;  %s6827_s28 = smov 72   ;;  %v6197_v40 = vpack.c.bf16 %v5158_v36, %v5156_v39  ;;  %v5162_v18 = vld [vmem:[%s13225_s6 + $0x278] sm:$0xff]  ;;  %v5366_v52 = vld [vmem:[%s13228_s9 + $0xa8] sm:$0xff]  ;;  %v5365_v49 = vld [vmem:[%s13228_s9 + $0xa0] sm:$0xff] }
 0x672   :  { %v4957_v35 = vmax.f32 %v4945_v25, %v4951_v55  ;;  %v5037_v25 = vrot.slane %v4960_v43, 2  ;;  %v5160_v55 = vld [vmem:[%s13225_s6 + $0x268] sm:$0xff]  ;;  %v5373_v36 = vld [vmem:[%s13228_s9 + $0xe0] sm:$0xff] }
 0x673   :  { %5020 = vrot.lane.b32.xlu0 %v5019_v16, %s6826_s17  ;;  %v6201_v43 = vpack.c.bf16 %v5162_v18, %v5160_v55  ;;  %v5377_v55 = vld [vmem:[%s13228_s9 + $0x100] sm:$0xff]  ;;  %v5379_v18 = vld [vmem:[%s13228_s9 + $0x110] sm:$0xff] }
 0x674   :  { %v4963_v11 = vmax.f32 %v4957_v35, 0.0  ;;  %v5159_v35 = vld [vmem:[%s13225_s6 + $0x260] sm:$0xff] }
 0x675   :  { %4996 = vrot.lane.b32.xlu1 %v4995_v56, %s6813_s26  ;;  %s6828_s26 = smov 4   ;;  %v6203_v61 = vpack.c.bf16 %v5161_v32, %v5159_v35  ;;  %v6239_v35 = vpack.c.bf16 %v5379_v18, %v5377_v55 }
 0x676   :  { %v5044_v22 = vrot.slane %v4963_v11, 2  ;;  %v5056_v51 = vrot.slane %v4963_v11, 4  ;;  %v5038_v9 = vrot.slane %v4963_v11, 1  ;;  %v5050_v2 = vrot.slane %v4963_v11, 3 }
 0x677   :  { %5026 = vrot.lane.b32.xlu0 %v5025_v59, %s6827_s28  ;;  %v5153_v59 = vld [vmem:[%s13225_s6 + $0x230] sm:$0xff] }
 0x678   :  { %v5045_v17 = vsel %vm4967_vm6, %v5044_v22, %v5043_v42  ;;  %v5057_v30 = vsel %vm4967_vm6, %v5056_v51, %v5055_v53  ;;  %v5039_v54 = vsel %vm4967_vm6, %v5038_v9, %v5037_v25  ;;  %v5051_v41 = vsel %vm4967_vm6, %v5050_v2, %v5049_v34  ;;  %v5345_v53 = vld [vmem:[%s13228_s9] sm:$0xff]  ;;  %v5347_v25 = vld [vmem:[%s13228_s9 + $0x10] sm:$0xff]  ;;  %v5350_v22 = vld [vmem:[%s13228_s9 + $0x28] sm:$0xff] }
 0x679   :  { %5046 = vrot.lane.b32.xlu1 %v5045_v17, %s6828_s26  ;;  %v6195_v0 = vpack.c.bf16 %v5153_v59, %v5151_v19  ;;  %v6205_v42 = vpack.c.bf16 %v5348_v23, %v5346_v7  ;;  %v5352_v51 = vld [vmem:[%s13228_s9 + $0x38] sm:$0xff]  ;;  %v6207_v2 = vpack.c.bf16 %v5347_v25, %v5345_v53  ;;  %v5374_v19 = vld [vmem:[%s13228_s9 + $0xe8] sm:$0xff]  ;;  %v5381_v7 = vld [vmem:[%s13228_s9 + $0x120] sm:$0xff] }
 0x67a   :  { %v5376_v59 = vld [vmem:[%s13228_s9 + $0xf8] sm:$0xff]  ;;  %v5383_v23 = vld [vmem:[%s13228_s9 + $0x130] sm:$0xff]  ;;  %v5385_v53 = vld [vmem:[%s13228_s9 + $0x140] sm:$0xff] }
 0x67b   :  { %5032 = vrot.lane.b32.xlu0 %v5031_v46, %s6829_s20  ;;  %v6233_v39 = vpack.c.bf16 %v5376_v59, %v5374_v19  ;;  %v5387_v25 = vld [vmem:[%s13228_s9 + $0x150] sm:$0xff] }
 0x67d   :  { %5058 = vrot.lane.b32.xlu1 %v5057_v30, %s6830_s4  ;;  %v6209_v30 = vpack.c.bf16 %v5352_v51, %v5350_v22  ;;  %v5390_v22 = vld [vmem:[%s13228_s9 + $0x168] sm:$0xff]  ;;  %v5392_v51 = vld [vmem:[%s13228_s9 + $0x178] sm:$0xff] }
 0x67f   :  { %5040 = vrot.lane.b32.xlu0 %v5039_v54, %s6831_s21  ;;  %v5349_v54 = vld [vmem:[%s13228_s9 + $0x20] sm:$0xff] }
 0x683   :  { %5052 = vrot.lane.b32.xlu0 %v5051_v41, %s6832_s5  ;;  %v5351_v41 = vld [vmem:[%s13228_s9 + $0x30] sm:$0xff] }
 0x687   :  { %5167 = vperm.xlu0 %6781, %v5163_v50  }
 0x6cd   :  { %v4973_v27 = vpop.permute.xlu1 %4972 }
 0x6ce   :  { %v5061_v57 = vsel %vm2062_vm9, %v12905_v14, %v4973_v27  ;;  %vm5075_vm9 = vcmask 916480   ;;  %v5356_v27 = vld [vmem:[%s13228_s9 + $0x58] sm:$0xff] }
 0x6d1   :  { %v4979_v33 = vpop.permute.xlu1 %4978 }
 0x6d2   :  { %v5062_v3 = vsel %vm15073_vm5, %v5061_v57, %v4979_v33  ;;  %v6211_v33 = vpack.c.bf16 %v5351_v41, %v5349_v54  ;;  %v5359_v57 = vld [vmem:[%s13228_s9 + $0x70] sm:$0xff]  ;;  %v5394_v54 = vld [vmem:[%s13228_s9 + $0x188] sm:$0xff]  ;;  %v5393_v41 = vld [vmem:[%s13228_s9 + $0x180] sm:$0xff] }
 0x6d5   :  { %v4985_v6 = vpop.permute.xlu1 %4984 }
 0x6d6   :  { %v5063_v12 = vsel %vm15074_vm13, %v5062_v3, %v4985_v6  ;;  %v6213_v6 = vpack.c.bf16 %v5356_v27, %v5354_v60  ;;  %v5362_v3 = vld [vmem:[%s13228_s9 + $0x88] sm:$0xff] }
 0x6dd   :  { %v5009_v29 = vpop.permute.xlu0 %5008 }
 0x6df   :  { %v5004_v45 = vpop.permute.xlu1 %5003 }
 0x6e0   :  { %v5067_v4 = vsel %vm2145_vm15, %v5004_v45, %v5009_v29  ;;  %vm5079_vm15 = vcmask 195584   ;;  %v5353_v29 = vld [vmem:[%s13228_s9 + $0x40] sm:$0xff] }
 0x6e1   :  { %v5015_v28 = vpop.permute.xlu0 %5014 }
 0x6e2   :  { %v5068_v47 = vsel %vm15075_vm7, %v5067_v4, %v5015_v28  ;;  %v5358_v28 = vld [vmem:[%s13228_s9 + $0x68] sm:$0xff]  ;;  %v5357_v4 = vld [vmem:[%s13228_s9 + $0x60] sm:$0xff] }
 0x6e3   :  { %v4991_v31 = vpop.permute.xlu1 %4990 }
 0x6e4   :  { %v5064_v14 = vsel %vm2103_vm14, %v5063_v12, %v4991_v31  ;;  %vm15076_vm14 = vmmov %vm15069_vm3  ;;  %vm5183_vm3 = vcmask 523264  }
 0x6e5   :  { %v5021_v62 = vpop.permute.xlu0 %5020 }
 0x6e6   :  { %v5070_v15 = vsel %vm5069_vm2, %v5068_v47, %v5021_v62  ;;  %v5360_v62 = vld [vmem:[%s13228_s9 + $0x78] sm:$0xff]  ;;  %v5361_v47 = vld [vmem:[%s13228_s9 + $0x80] sm:$0xff] }
 0x6e7   :  { %v4997_v13 = vpop.permute.xlu1 %4996 }
 0x6e8   :  { %v5065_v24 = vsel %vm2117_vm0, %v5064_v14, %v4997_v13  ;;  %vm5077_vm0 = vcmask 31744   ;;  %v5364_v13 = vld [vmem:[%s13228_s9 + $0x98] sm:$0xff] }
 0x6e9   :  { %v5027_v38 = vpop.permute.xlu0 %5026  ;;  %v5066_v46 = vsel %vm15076_vm14, %v5065_v24, %v5004_v45  ;;  %v5355_v45 = vld [vmem:[%s13228_s9 + $0x50] sm:$0xff]  ;;  %v6221_v12 = vpack.c.bf16 %v5364_v13, %v5362_v3  ;;  %v5368_v14 = vld [vmem:[%s13228_s9 + $0xb8] sm:$0xff] }
 0x6ea   :  { %v5072_v21 = vsel %vm5071_vm8, %v5070_v15, %v5027_v38  ;;  %v6215_v31 = vpack.c.bf16 %v5355_v45, %v5353_v29  ;;  %v6217_v38 = vpack.c.bf16 %v5360_v62, %v5358_v28  ;;  %v6223_v15 = vpack.c.bf16 %v5363_v26, %v5361_v47  ;;  %v5367_v24 = vld [vmem:[%s13228_s9 + $0xb0] sm:$0xff]  ;;  %v5329_v62 = vld [vmem:[%s13227_s8] sm:$0x3]  ;;  %s6835_s8 = smov [#allocation2]  }
 0x6eb   :  { %v5047_v11 = vpop.permute.xlu1 %5046  ;;  %v6225_v20 = vpack.c.bf16 %v5368_v14, %v5366_v52  ;;  %s5501_s12 = sshll.u32 %s6835_s8, 4  ;;  %s5502_s12 = int_to_ptr.vmem [resolvable:$true] %s5501_s12 }
 0x6ec   :  { %p6788_p1 = scmp.lt.s32.totalorder %s5502_s12, %s5502_s12 }
 0x6ed   :  { %v5033_v63 = vpop.permute.xlu0 %5032 }
 0x6ee   :  { %v5074_v5 = vsel %vm5073_vm1, %v5072_v21, %v5033_v63  ;;  %v6219_v63 = vpack.c.bf16 %v5359_v57, %v5357_v4  ;;  %v5370_v21 = vld [vmem:[%s13228_s9 + $0xc8] sm:$0xff] }
 0x6ef   :  { %v5059_v17 = vpop.permute.xlu1 %5058 }
 0x6f1   :  { %v5041_v10 = vpop.permute.xlu0 %5040 }
 0x6f2   :  { %v5076_v16 = vsel %vm5075_vm9, %v5074_v5, %v5041_v10  ;;  %v5078_v34 = vsel %vm5077_vm0, %v5041_v10, %v5047_v11  ;;  %v5372_v5 = vld [vmem:[%s13228_s9 + $0xd8] sm:$0xff]  ;;  %v6227_v10 = vpack.c.bf16 %v5367_v24, %v5365_v49  ;;  %v5386_v11 = vld [vmem:[%s13228_s9 + $0x148] sm:$0xff] }
 0x6f3   :  { %5251 = vmatprep.mubr.f32.mxu1 %v5076_v16  ;;  %v5369_v16 = vld [vmem:[%s13228_s9 + $0xc0] sm:$0xff] }
 0x6f4   :  { %5252 = vmatmul.mubr.f32.vlgmr.msra.gmra.mrb[48].mxu1 %v5066_v46 }
 0x6f5   :  { %6192 = vmatpush1.bf16.msra.mxu1 %v6191_v37  ;;  %5322 = vmatprep.mubr.f32.mxu1 %v15077_v44  ;;  %v5053_v56 = vpop.permute.xlu0 %5052  ;;  %v6229_v37 = vpack.c.bf16 %v5372_v5, %v5370_v21  ;;  %v5378_v44 = vld [vmem:[%s13228_s9 + $0x108] sm:$0xff] }
 0x6f6   :  { %6194 = vmatprep.subr.bf16.mxu1 %v6193_v1  ;;  %v5080_v9 = vsel %vm5079_vm15, %v5078_v34, %v5053_v56  ;;  %v5371_v1 = vld [vmem:[%s13228_s9 + $0xd0] sm:$0xff]  ;;  %v5388_v56 = vld [vmem:[%s13228_s9 + $0x158] sm:$0xff]  ;;  %v6247_v34 = vpack.c.bf16 %v5387_v25, %v5385_v53 }
 0x6f7   :  { %v5082_v50 = vsel %vm5081_vm12, %v5080_v9, %v5059_v17  ;;  %v6231_v46 = vpack.c.bf16 %v5371_v1, %v5369_v16  ;;  %v5389_v9 = vld [vmem:[%s13228_s9 + $0x160] sm:$0xff]  ;;  %v5391_v17 = vld [vmem:[%s13228_s9 + $0x170] sm:$0xff] }
 0x6f9   :  { %6196 = vmatpush1.bf16.msra.mxu1 %v6195_v0  ;;  %v5375_v0 = vld [vmem:[%s13228_s9 + $0xf0] sm:$0xff] }
 0x6fa   :  { %6198 = vmatprep.subr.bf16.mxu1 %v6197_v40  ;;  %v5380_v40 = vld [vmem:[%s13228_s9 + $0x118] sm:$0xff]  ;;  %v6235_v48 = vpack.c.bf16 %v5375_v0, %v5373_v36 }
 0x6fb   :  { %v6237_v8 = vpack.c.bf16 %v5380_v40, %v5378_v44 }
 0x6fd   :  { %6200 = vmatpush1.bf16.msra.mxu1 %v6199_v58  ;;  %v5382_v58 = vld [vmem:[%s13228_s9 + $0x128] sm:$0xff] }
 0x6fe   :  { %6202 = vmatprep.subr.bf16.mxu1 %v6201_v43  ;;  %v5384_v43 = vld [vmem:[%s13228_s9 + $0x138] sm:$0xff] }
 0x6ff   :  { %v6241_v32 = vpack.c.bf16 %v5384_v43, %v5382_v58 }
 0x701   :  { %6204 = vmatpush1.bf16.msra.mxu1 %v6203_v61  ;;  %v6243_v61 = vpack.c.bf16 %v5383_v23, %v5381_v7 }
 0x702   :  { %6206 = vmatprep.subr.bf16.mxu1 %v6205_v42  ;;  %v6245_v42 = vpack.c.bf16 %v5388_v56, %v5386_v11 }
 0x704   :  { %5681 = vmatmul.mubr.msk.f32.vlgmr.msra.gmra.mrb[48].mxu1 %vm5183_vm3, %v5082_v50  ;;  %v5171_v50 = vlaneseq }
 0x705   :  { %6208 = vmatpush1.bf16.msra.mxu1 %v6207_v2  ;;  %v6249_v2 = vpack.c.bf16 %v5392_v51, %v5390_v22 }
 0x706   :  { %6210 = vmatprep.subr.bf16.mxu1 %v6209_v30  ;;  %v6251_v30 = vpack.c.bf16 %v5391_v17, %v5389_v9  ;;  %v5172_v60 = vshrl.u32 %v5171_v50, 7  ;;  %v5168_v28 = vpop.permute.xlu0 %5167 }
 0x708   :  { %v5173_v27 = vsub.s32 0, %v5172_v60 }
 0x709   :  { %6212 = vmatpush1.bf16.msra.mxu1 %v6211_v33  ;;  %v5164_v33 = vld [vmem:[%s13226_s7] sm:$0x3] }
 0x70a   :  { %6214 = vmatprep.subr.bf16.mxu1 %v6213_v6  ;;  %v5177_v6 = vsub.s32 1, %v5172_v60  ;;  %v5174_v29 = vrot.slane %v5164_v33, %v5173_v27  ;;  %v5334_v4 = vrot.slane %v5329_v62, %v5173_v27 }
 0x70c   :  { %v5178_v45 = vrot.slane %v5164_v33, %v5177_v6  ;;  %v5338_v3 = vrot.slane %v5329_v62, %v5177_v6 }
 0x70d   :  { %6216 = vmatpush1.bf16.msra.mxu1 %v6215_v31  ;;  %v5181_v31 = vmul.f32 %v5174_v29, %v5168_v28 }
 0x70e   :  { %6218 = vmatprep.subr.bf16.mxu1 %v6217_v38  ;;  %v5182_v38 = vmul.f32 %v5178_v45, %v5168_v28 }
 0x711   :  { %6220 = vmatpush1.bf16.msra.mxu1 %v6219_v63 }
 0x712   :  { %6222 = vmatprep.subr.bf16.mxu1 %v6221_v12 }
 0x715   :  { %6224 = vmatpush1.bf16.msra.mxu1 %v6223_v15  ;;  %v5395_v15 = vld [vmem:[%s13229_s10] sm:$0x3]  ;;  %s6783_s10 = scalar_lea.vmem %s5502_s12, 64 }
 0x716   :  { %6226 = vmatprep.subr.bf16.mxu1 %v6225_v20  ;;  %v6834_v20 = vmov 1983009808   ;;  %v5400_v24 = vrot.slane %v5395_v15, %v5173_v27  ;;  %v5404_v21 = vrot.slane %v5395_v15, %v5177_v6  ;;  %p6784_p0 = scmp.ne.s32.totalorder %s5502_s12, %s6783_s10  ;;  %p6789_p2 = scmp.lt.s32.totalorder %s6783_s10, %s6783_s10 }
 0x717   :  { %v5485_v49 = vunpack.c.l.s4 %v6834_v20 }
 0x718   :  { %p6790_p3 = por %p6789_p2, %p6788_p1 }
 0x719   :  { %6228 = vmatpush1.bf16.msra.mxu1 %v6227_v10  ;;  %v5486_v5 = vunpack.c.0.s8 %v5485_v49 }
 0x71a   :  { %6230 = vmatprep.subr.bf16.mxu1 %v6229_v37  ;;  %p6791_p4 = pnand %p6790_p3, %p6784_p0 }
 0x71b   :  { %v5489_v19 = vsub.s32 %v5486_v5, %v5172_v60 }
 0x71d   :  { %6232 = vmatpush1.bf16.msra.mxu1 %v6231_v46 }
 0x71e   :  { %6234 = vmatprep.subr.bf16.mxu1 %v6233_v39 }
 0x721   :  { %6236 = vmatpush1.bf16.msra.mxu1 %v6235_v48 }
 0x722   :  { %6238 = vmatprep.subr.bf16.mxu1 %v6237_v8 }
 0x725   :  { %6240 = vmatpush1.bf16.msra.mxu1 %v6239_v35 }
 0x726   :  { %6242 = vmatprep.subr.bf16.mxu1 %v6241_v32 }
 0x729   :  { %6244 = vmatpush1.bf16.msra.mxu1 %v6243_v61 }
 0x72a   :  { %6246 = vmatprep.subr.bf16.mxu1 %v6245_v42 }
 0x72d   :  { %6248 = vmatpush1.bf16.msra.mxu1 %v6247_v34 }
 0x72e   :  { %6250 = vmatprep.subr.bf16.mxu1 %v6249_v2 }
 0x731   :  { %6252 = vmatpush1.bf16.msra.mxu1 %v6251_v30 }
 0x732   :  { %5458 = vmatprep.subr.mxu1 %v5394_v54 }
 0x735   :  { %5459 = vmatpush1.msra.mxu1 %v5393_v41 }
 0x7d7   :  { %v5324_v57 = vpop.f32.mrb[48].mxu1 }
 0x7d8   :  { %v6253_v13 = vadd.f32 %v5324_v57, %v5181_v31  ;;  %v5326_v63 = vpop.f32.mrb[49].mxu1 }
 0x7d9   :  { %v6254_v12 = vadd.f32 %v5326_v63, %v5182_v38 }
 0x7da   :  { %v5341_v47 = vadd.f32 %v6253_v13, %v5334_v4 }
 0x7db   :  { %v5342_v26 = vadd.f32 %v6254_v12, %v5338_v3 }
 0x7dc   :  { %v5343_v14 = vmax.f32 %v5341_v47, 0.0 }
 0x7dd   :  { %v5344_v52 = vmax.f32 %v5342_v26, 0.0 }
 0x7df   :  { %5682 = vmatprep.mubr.msk.f32.mxu1 %vm5071_vm8, %v5344_v52 }
 0x7e0   :  { %5475 = vmatmul.mubr.f32.vlgmr.msra.gmra.mrb[50].mxu1 %v5343_v14 }
 0x8b3   :  { %v5476_v10 = vpop.f32.mrb[50].mxu1 }
 0x8b4   :  { %v5477_v37 = vadd.f32 %v5476_v10, %v5400_v24  ;;  %v5478_v16 = vpop.f32.mrb[51].mxu1 }
 0x8b5   :  { %v5479_v1 = vadd.f32 %v5478_v16, %v5404_v21 }
 0x8b7   :  { %v5483_v59 = vcombine.low %v5477_v37, %v5479_v1 }
 0x8b9   :  { %v5490_v46 = vrot.slane %v5483_v59, %v5489_v19 }
 0x8bb   :  { %5494 = vst.msk [vmem:[#allocation2] sm:$0xf] %vm5493_vm10, %v5490_v46 }
 0x8bc   :  { %6794 = shalt.err (!%p6791_p4)
}
 0x8bd   :  { %s6795_s16 = scalar_lea.hbm %s13230_s11, 64 }
 0x8be   :  { %p6796_p5 = scmp.ne.s32.totalorder %s13230_s11, %s6795_s16  ;;  %p6799_p6 = scmp.lt.u32.totalorder %s6795_s16, %s13230_s11 }
 0x8c0   :  { %p6801_p7 = pnand %p6799_p6, %p6796_p5 }
 0x8c2   :  { %6804 = shalt.err (!%p6801_p7)
}
 0x8c3   :  { %5504 = dma.vmem_to_hbm [thread:$0]  %s5502_s12, 64, %s13230_s11, [#allocation3]  }
 0x8c4   :  { %6805 = dma.done.wait [#allocation3], 64  }
 0x8c5   :  { %6806 = vsyncadd [#allocation3], 4294967232 }
 0x8c6   :  { %5508 = vsyncpa [#allocation3], 1 }

</bundles_post_ra>
